<compile_context>
chip_gen: v7x
topology: tpu7x:2x2x1
jax: 0.10.0
libtpu: 0.0.40
codegen_flags: <defaults>
</compile_context>

<pallas_src>
import functools
import math

import jax
import jax.numpy as jnp
from jax.experimental import pallas as pl
from jax.experimental.pallas import tpu as pltpu


def silu(x):
    # Explicit x * sigmoid(x) so it lowers cleanly both in-kernel and in XLA.
    return x * (1.0 / (1.0 + jnp.exp(-x)))


def _embedding_block_kernel(
    x_ref, idx_ref,
    logit_tab_ref, be_ref,
    w1_ref, b1_ref, w2_ref, b2_ref, w3_ref, b3_ref, expand_ref,
    out_ref, *, num_basis, mid, max_elem, act):
    f32 = jnp.float32
    bf16 = jnp.bfloat16
    tn = x_ref.shape[0]

    # ---- embedding path (folded): softmax(one_hot @ (tab @ We) + be) --------
    src = idx_ref[:, 0:1]
    tgt = idx_ref[:, 1:2]
    lane_ids = jax.lax.broadcasted_iota(jnp.int32, (tn, 2 * max_elem), 1)
    sel = jnp.where(lane_ids < max_elem, src, tgt + max_elem)
    one_hot = (lane_ids == sel).astype(f32)                          # (tn, 2*max_elem)
    logits = (jnp.dot(one_hot, logit_tab_ref[...], preferred_element_type=f32)
              + be_ref[...])                                         # (tn, nb)
    logits = logits - jnp.max(logits, axis=-1, keepdims=True)
    p = jnp.exp(logits)
    basis_w = p * pl.reciprocal(jnp.sum(p, axis=-1, keepdims=True), approx=True)

    # ---- main MLP path: bf16 MXU operands, f32 accumulate / elementwise -----
    h1 = act(jnp.dot(x_ref[...], w1_ref[...], preferred_element_type=f32)
             + b1_ref[...])                                          # (tn, mid)   f32
    h2 = act(jnp.dot(h1.astype(bf16), w2_ref[...], preferred_element_type=f32)
             + b2_ref[...])                                          # (tn, nb*mid) f32

    # basis_w (tn, nb) -> (tn, nb*mid) via one block-diagonal MXU matmul,
    # then elementwise multiply + pairwise-add tree over the nb lane slices.
    bw_exp = jnp.dot(basis_w.astype(bf16), expand_ref[...],
                     preferred_element_type=f32)                     # (tn, nb*mid)
    weighted = h2 * bw_exp
    parts = [weighted[:, b * mid:(b + 1) * mid] for b in range(num_basis)]
    while len(parts) > 1:
        nxt = [parts[i] + parts[i + 1] for i in range(0, len(parts) - 1, 2)]
        if len(parts) % 2:
            nxt.append(parts[-1])
        parts = nxt
    acc = parts[0]                                                   # (tn, mid)

    out_ref[...] = (jnp.dot(acc.astype(bf16), w3_ref[...],
                            preferred_element_type=f32)
                    + b3_ref[...]).astype(out_ref.dtype)


def embedding_block_forward(x, source_element, target_element, params, *,
                            num_embedding_basis, act=silu, tile_n=256):
    """Pallas equivalent of EmbeddingBlock.forward.

    x:               (N, in_hidden_channels) float
    source_element:  (N,) int  atomic numbers
    target_element:  (N,) int
    returns:         (N, out_hidden_channels) float32
    """
    n, in_ch = x.shape
    mid = params["w1"].shape[1]
    out_ch = params["w3"].shape[1]
    emb = params["src_tab"].shape[1]
    max_elem = params["src_tab"].shape[0]
    nb = num_embedding_basis

    # --- wrapper-side constant folding (cheap, done once per call) -----------
    # embed_fc1(cat(src_emb, tgt_emb)) == one_hot @ [src_tab@We_s ; tgt_tab@We_t] + be
    we = params["we"].astype(jnp.float32)
    logit_tab = jnp.concatenate(
        [params["src_tab"].astype(jnp.float32) @ we[:emb],
         params["tgt_tab"].astype(jnp.float32) @ we[emb:]], axis=0)   # (2*max_elem, nb)

    # Block-diagonal 0/1 matrix: row b has ones in lanes [b*mid, (b+1)*mid).
    expand = (jnp.arange(nb)[:, None]
              == (jnp.arange(nb * mid)[None, :] // mid)).astype(jnp.bfloat16)

    # bf16 MXU operands (f32 accumulation in-kernel).
    x_bf = x.astype(jnp.bfloat16)
    w1 = params["w1"].astype(jnp.bfloat16)
    w2 = params["w2"].astype(jnp.bfloat16)
    w3 = params["w3"].astype(jnp.bfloat16)
    b1 = params["b1"].astype(jnp.float32)
    b2 = params["b2"].astype(jnp.float32)
    b3 = params["b3"].astype(jnp.float32)
    be = params["be"].astype(jnp.float32)

    # Indices packed into one (N, 2) int32 array -> one DMA per tile.
    idx = jnp.stack([source_element.astype(jnp.int32),
                     target_element.astype(jnp.int32)], axis=1)       # (N, 2)

    n_pad = pl.cdiv(n, tile_n) * tile_n
    if n_pad != n:
        # Padded rows produce finite garbage that is sliced off below.
        x_bf = jnp.pad(x_bf, ((0, n_pad - n), (0, 0)))
        idx = jnp.pad(idx, ((0, n_pad - n), (0, 0)))

    kernel = functools.partial(_embedding_block_kernel,
                               num_basis=nb, mid=mid, max_elem=max_elem, act=act)

    grid = (n_pad // tile_n,)
    out = pl.pallas_call(
        kernel,
        out_shape=jax.ShapeDtypeStruct((n_pad, out_ch), jnp.float32),
        grid_spec=pltpu.PrefetchScalarGridSpec(
            num_scalar_prefetch=0,
            grid=grid,
            in_specs=[
                pl.BlockSpec((tile_n, in_ch), lambda i: (i, 0)),        # x (bf16)
                pl.BlockSpec((tile_n, 2), lambda i: (i, 0)),            # packed idx
                pl.BlockSpec((2 * max_elem, nb), lambda i: (0, 0)),     # logit_tab
                pl.BlockSpec((1, nb), lambda i: (0, 0)),                # be
                pl.BlockSpec((in_ch, mid), lambda i: (0, 0)),           # w1 (bf16)
                pl.BlockSpec((1, mid), lambda i: (0, 0)),               # b1
                pl.BlockSpec((mid, nb * mid), lambda i: (0, 0)),        # w2 (bf16)
                pl.BlockSpec((1, nb * mid), lambda i: (0, 0)),          # b2
                pl.BlockSpec((mid, out_ch), lambda i: (0, 0)),          # w3 (bf16)
                pl.BlockSpec((1, out_ch), lambda i: (0, 0)),            # b3
                pl.BlockSpec((nb, nb * mid), lambda i: (0, 0)),         # expand (bf16)
            ],
            out_specs=pl.BlockSpec((tile_n, out_ch), lambda i: (i, 0)),
        ),
        compiler_params=pltpu.CompilerParams(
            dimension_semantics=("parallel",)),
    )(x_bf, idx, logit_tab, be, w1, b1, w2, b2, w3, b3, expand)

    if n_pad != n:
        out = out[:n]
    return out


def init_params(key, *, in_ch, mid, out_ch, emb, num_basis, max_elem):
    ks = jax.random.split(key, 10)

    def uniform(k, shape, scale):
        return jax.random.uniform(k, shape, jnp.float32, -scale, scale)

    def linear(kw, kb, fan_in, fan_out):
        bound = 1.0 / math.sqrt(fan_in)            # PyTorch nn.Linear default init
        return uniform(kw, (fan_in, fan_out), bound), uniform(kb, (1, fan_out), bound)

    w1, b1 = linear(ks[0], ks[1], in_ch, mid)
    w2, b2 = linear(ks[2], ks[3], mid, num_basis * mid)
    w3, b3 = linear(ks[4], ks[5], mid, out_ch)
    we, be = linear(ks[6], ks[7], 2 * emb, num_basis)
    src_tab = uniform(ks[8], (max_elem, emb), 1e-4)  # nn.init.uniform_(-1e-4, 1e-4)
    tgt_tab = uniform(ks[9], (max_elem, emb), 1e-4)
    return dict(w1=w1, b1=b1, w2=w2, b2=b2, w3=w3, b3=b3,
                we=we, be=be, src_tab=src_tab, tgt_tab=tgt_tab)


def embedding_block_reference(x, src, tgt, params, *, num_embedding_basis, act=silu):
    """Pure-JAX reference mirroring the PyTorch forward literally (f32)."""
    src_emb = params["src_tab"][src]
    tgt_emb = params["tgt_tab"][tgt]
    embedding = jnp.concatenate([src_emb, tgt_emb], axis=1)
    embedding = embedding @ params["we"] + params["be"]
    embedding = jax.nn.softmax(embedding, axis=1)
    h = act(x @ params["w1"] + params["b1"])
    h = act(h @ params["w2"] + params["b2"])
    mid = params["w1"].shape[1]
    h = h.reshape(-1, num_embedding_basis, mid) * embedding[:, :, None]
    h = jnp.sum(h, axis=1)
    return h @ params["w3"] + params["b3"]


if __name__ == "__main__":
    key = jax.random.PRNGKey(0)
    # Small shapes consistent with the module (spinconv-style, TPU-friendly dims).
    N = 512                      # number of edges
    in_hidden_channels = 64
    mid_hidden_channels = 128
    out_hidden_channels = 128
    embedding_size = 32
    num_embedding_basis = 8
    max_num_elements = 16

    k_x, k_s, k_t, k_p = jax.random.split(key, 4)
    x = jax.random.normal(k_x, (N, in_hidden_channels), jnp.float32)
    source_element = jax.random.randint(k_s, (N,), 0, max_num_elements, jnp.int32)
    target_element = jax.random.randint(k_t, (N,), 0, max_num_elements, jnp.int32)
    params = init_params(k_p, in_ch=in_hidden_channels, mid=mid_hidden_channels,
                         out_ch=out_hidden_channels, emb=embedding_size,
                         num_basis=num_embedding_basis, max_elem=max_num_elements)

    out = embedding_block_forward(x, source_element, target_element, params,
                                  num_embedding_basis=num_embedding_basis)
    out = jax.block_until_ready(out)

    ref = embedding_block_reference(x, source_element, target_element, params,
                                    num_embedding_basis=num_embedding_basis)

    assert out.shape == (N, out_hidden_channels), out.shape
    assert bool(jnp.all(jnp.isfinite(out)))
    # Tolerance absorbs bf16-input / f32-accumulate MXU vs f32 XLA matmul and
    # the approx reciprocal in the softmax denominator.
    assert jnp.allclose(out, ref, atol=2e-2, rtol=2e-2), float(jnp.max(jnp.abs(out - ref)))
    print("KERNEL_OK")
</pallas_src>

<mosaic_0001>
module attributes {stable_mosaic.version = 11 : i64} {
  func.func @_embedding_block_kernel(%arg0: i32, %arg1: memref<256x64xbf16, #tpu.memory_space<vmem>>, %arg2: memref<256x2xi32, #tpu.memory_space<vmem>>, %arg3: memref<32x8xf32, #tpu.memory_space<vmem>>, %arg4: memref<1x8xf32, #tpu.memory_space<vmem>>, %arg5: memref<64x128xbf16, #tpu.memory_space<vmem>>, %arg6: memref<1x128xf32, #tpu.memory_space<vmem>>, %arg7: memref<128x1024xbf16, #tpu.memory_space<vmem>>, %arg8: memref<1x1024xf32, #tpu.memory_space<vmem>>, %arg9: memref<128x128xbf16, #tpu.memory_space<vmem>>, %arg10: memref<1x128xf32, #tpu.memory_space<vmem>>, %arg11: memref<8x1024xbf16, #tpu.memory_space<vmem>>, %arg12: memref<256x128xf32, #tpu.memory_space<vmem>>) attributes {dimension_semantics = [#tpu.dimension_semantics<parallel>], iteration_bounds = array<i64: 2>, scalar_prefetch = 0 : i64, scratch_operands = 0 : i64, tpu.core_type = #tpu.core_type<tc>, window_params = [{transform_indices = @transform_0, window_bounds = array<i64: 256, 64>}, {transform_indices = @transform_1, window_bounds = array<i64: 256, 2>}, {pipeline_mode = #tpu.pipeline_mode<synchronous>, transform_indices = @transform_2, window_bounds = array<i64: 32, 8>}, {pipeline_mode = #tpu.pipeline_mode<synchronous>, transform_indices = @transform_3, window_bounds = array<i64: 1, 8>}, {pipeline_mode = #tpu.pipeline_mode<synchronous>, transform_indices = @transform_4, window_bounds = array<i64: 64, 128>}, {pipeline_mode = #tpu.pipeline_mode<synchronous>, transform_indices = @transform_5, window_bounds = array<i64: 1, 128>}, {pipeline_mode = #tpu.pipeline_mode<synchronous>, transform_indices = @transform_6, window_bounds = array<i64: 128, 1024>}, {pipeline_mode = #tpu.pipeline_mode<synchronous>, transform_indices = @transform_7, window_bounds = array<i64: 1, 1024>}, {pipeline_mode = #tpu.pipeline_mode<synchronous>, transform_indices = @transform_8, window_bounds = array<i64: 128, 128>}, {pipeline_mode = #tpu.pipeline_mode<synchronous>, transform_indices = @transform_9, window_bounds = array<i64: 1, 128>}, {pipeline_mode = #tpu.pipeline_mode<synchronous>, transform_indices = @transform_10, window_bounds = array<i64: 8, 1024>}, {transform_indices = @transform_11, window_bounds = array<i64: 256, 128>}]} {
    %c0 = arith.constant 0 : index
    %c0_0 = arith.constant 0 : index
    %0 = vector.load %arg2[%c0, %c0_0] : memref<256x2xi32, #tpu.memory_space<vmem>>, vector<256x1xi32>
    %c0_1 = arith.constant 0 : index
    %c1 = arith.constant 1 : index
    %1 = vector.load %arg2[%c0_1, %c1] : memref<256x2xi32, #tpu.memory_space<vmem>>, vector<256x1xi32>
    %2 = tpu.iota {dimensions = array<i32: 1>} : vector<256x32xi32>
    %c16_i32 = arith.constant 16 : i32
    %3 = vector.broadcast %c16_i32 : i32 to vector<256x32xi32>
    %4 = arith.cmpi slt, %2, %3 : vector<256x32xi32>
    %c16_i32_2 = arith.constant 16 : i32
    %5 = vector.broadcast %c16_i32_2 : i32 to vector<256x1xi32>
    %6 = arith.addi %1, %5 : vector<256x1xi32>
    %7 = vector.shape_cast %0 : vector<256x1xi32> to vector<256x1xi32>
    %8 = vector.broadcast %7 : vector<256x1xi32> to vector<256x32xi32>
    %9 = vector.shape_cast %6 : vector<256x1xi32> to vector<256x1xi32>
    %10 = vector.broadcast %9 : vector<256x1xi32> to vector<256x32xi32>
    %11 = arith.select %4, %8, %10 : vector<256x32xi1>, vector<256x32xi32>
    %12 = arith.cmpi eq, %2, %11 : vector<256x32xi32>
    %13 = arith.extui %12 : vector<256x32xi1> to vector<256x32xi32>
    %14 = arith.sitofp %13 : vector<256x32xi32> to vector<256x32xf32>
    %c0_3 = arith.constant 0 : index
    %c0_4 = arith.constant 0 : index
    %15 = vector.load %arg3[%c0_3, %c0_4] : memref<32x8xf32, #tpu.memory_space<vmem>>, vector<32x8xf32>
    %cst = arith.constant dense<0.000000e+00> : vector<256x8xf32>
    %16 = tpu.matmul %14, %15, %cst {dimension_numbers = #tpu.dot_dimension_numbers<[1], [0], [0], [1], [0, 0, 1, 1], [], []>} : vector<256x32xf32>, vector<32x8xf32>, vector<256x8xf32> -> vector<256x8xf32>
    %c0_5 = arith.constant 0 : index
    %c0_6 = arith.constant 0 : index
    %17 = vector.load %arg4[%c0_5, %c0_6] : memref<1x8xf32, #tpu.memory_space<vmem>>, vector<1x8xf32>
    %18 = vector.broadcast %17 : vector<1x8xf32> to vector<256x8xf32>
    %19 = arith.addf %16, %18 : vector<256x8xf32>
    %cst_7 = arith.constant dense<0xFF800000> : vector<256xf32>
    %20 = vector.multi_reduction <maximumf>, %19, %cst_7 [1] : vector<256x8xf32> to vector<256xf32>
    %21 = vector.shape_cast %20 : vector<256xf32> to vector<256x1xf32>
    %22 = vector.broadcast %21 : vector<256x1xf32> to vector<256x8xf32>
    %23 = arith.subf %19, %22 : vector<256x8xf32>
    %24 = math.exp %23 : vector<256x8xf32>
    %cst_8 = arith.constant dense<0.000000e+00> : vector<256xf32>
    %25 = vector.multi_reduction <add>, %24, %cst_8 [1] : vector<256x8xf32> to vector<256xf32>
    %26 = vector.shape_cast %25 : vector<256xf32> to vector<256x1xf32>
    %27 = tpu.reciprocal %26 {approx = true} : vector<256x1xf32> -> vector<256x1xf32>
    %28 = vector.broadcast %27 : vector<256x1xf32> to vector<256x8xf32>
    %29 = arith.mulf %24, %28 : vector<256x8xf32>
    %c0_9 = arith.constant 0 : index
    %c0_10 = arith.constant 0 : index
    %30 = vector.load %arg1[%c0_9, %c0_10] : memref<256x64xbf16, #tpu.memory_space<vmem>>, vector<256x64xbf16>
    %c0_11 = arith.constant 0 : index
    %c0_12 = arith.constant 0 : index
    %31 = vector.load %arg5[%c0_11, %c0_12] : memref<64x128xbf16, #tpu.memory_space<vmem>>, vector<64x128xbf16>
    %cst_13 = arith.constant dense<0.000000e+00> : vector<256x128xf32>
    %32 = tpu.matmul %30, %31, %cst_13 {dimension_numbers = #tpu.dot_dimension_numbers<[1], [0], [0], [1], [0, 0, 1, 1], [], []>} : vector<256x64xbf16>, vector<64x128xbf16>, vector<256x128xf32> -> vector<256x128xf32>
    %c0_14 = arith.constant 0 : index
    %c0_15 = arith.constant 0 : index
    %33 = vector.load %arg6[%c0_14, %c0_15] : memref<1x128xf32, #tpu.memory_space<vmem>>, vector<1x128xf32>
    %34 = vector.broadcast %33 : vector<1x128xf32> to vector<256x128xf32>
    %35 = arith.addf %32, %34 : vector<256x128xf32>
    %cst_16 = arith.constant 0.000000e+00 : f32
    %36 = vector.broadcast %cst_16 : f32 to vector<256x128xf32>
    %37 = arith.subf %36, %35 : vector<256x128xf32>
    %38 = math.exp %37 : vector<256x128xf32>
    %cst_17 = arith.constant 1.000000e+00 : f32
    %39 = vector.broadcast %cst_17 : f32 to vector<256x128xf32>
    %40 = arith.addf %39, %38 : vector<256x128xf32>
    %cst_18 = arith.constant 1.000000e+00 : f32
    %41 = vector.broadcast %cst_18 : f32 to vector<256x128xf32>
    %42 = arith.divf %41, %40 : vector<256x128xf32>
    %43 = arith.mulf %35, %42 : vector<256x128xf32>
    %44 = arith.truncf %43 : vector<256x128xf32> to vector<256x128xbf16>
    %c0_19 = arith.constant 0 : index
    %c0_20 = arith.constant 0 : index
    %45 = vector.load %arg7[%c0_19, %c0_20] : memref<128x1024xbf16, #tpu.memory_space<vmem>>, vector<128x1024xbf16>
    %cst_21 = arith.constant dense<0.000000e+00> : vector<256x1024xf32>
    %46 = tpu.matmul %44, %45, %cst_21 {dimension_numbers = #tpu.dot_dimension_numbers<[1], [0], [0], [1], [0, 0, 1, 1], [], []>} : vector<256x128xbf16>, vector<128x1024xbf16>, vector<256x1024xf32> -> vector<256x1024xf32>
    %c0_22 = arith.constant 0 : index
    %c0_23 = arith.constant 0 : index
    %47 = vector.load %arg8[%c0_22, %c0_23] : memref<1x1024xf32, #tpu.memory_space<vmem>>, vector<1x1024xf32>
    %48 = vector.broadcast %47 : vector<1x1024xf32> to vector<256x1024xf32>
    %49 = arith.addf %46, %48 : vector<256x1024xf32>
    %cst_24 = arith.constant 0.000000e+00 : f32
    %50 = vector.broadcast %cst_24 : f32 to vector<256x1024xf32>
    %51 = arith.subf %50, %49 : vector<256x1024xf32>
    %52 = math.exp %51 : vector<256x1024xf32>
    %cst_25 = arith.constant 1.000000e+00 : f32
    %53 = vector.broadcast %cst_25 : f32 to vector<256x1024xf32>
    %54 = arith.addf %53, %52 : vector<256x1024xf32>
    %cst_26 = arith.constant 1.000000e+00 : f32
    %55 = vector.broadcast %cst_26 : f32 to vector<256x1024xf32>
    %56 = arith.divf %55, %54 : vector<256x1024xf32>
    %57 = arith.mulf %49, %56 : vector<256x1024xf32>
    %58 = arith.truncf %29 : vector<256x8xf32> to vector<256x8xbf16>
    %c0_27 = arith.constant 0 : index
    %c0_28 = arith.constant 0 : index
    %59 = vector.load %arg11[%c0_27, %c0_28] : memref<8x1024xbf16, #tpu.memory_space<vmem>>, vector<8x1024xbf16>
    %cst_29 = arith.constant dense<0.000000e+00> : vector<256x1024xf32>
    %60 = tpu.matmul %58, %59, %cst_29 {dimension_numbers = #tpu.dot_dimension_numbers<[1], [0], [0], [1], [0, 0, 1, 1], [], []>} : vector<256x8xbf16>, vector<8x1024xbf16>, vector<256x1024xf32> -> vector<256x1024xf32>
    %61 = arith.mulf %57, %60 : vector<256x1024xf32>
    %62 = vector.extract_strided_slice %61 {offsets = [0, 0], sizes = [256, 128], strides = [1, 1]} : vector<256x1024xf32> to vector<256x128xf32>
    %63 = vector.extract_strided_slice %61 {offsets = [0, 128], sizes = [256, 128], strides = [1, 1]} : vector<256x1024xf32> to vector<256x128xf32>
    %64 = vector.extract_strided_slice %61 {offsets = [0, 256], sizes = [256, 128], strides = [1, 1]} : vector<256x1024xf32> to vector<256x128xf32>
    %65 = vector.extract_strided_slice %61 {offsets = [0, 384], sizes = [256, 128], strides = [1, 1]} : vector<256x1024xf32> to vector<256x128xf32>
    %66 = vector.extract_strided_slice %61 {offsets = [0, 512], sizes = [256, 128], strides = [1, 1]} : vector<256x1024xf32> to vector<256x128xf32>
    %67 = vector.extract_strided_slice %61 {offsets = [0, 640], sizes = [256, 128], strides = [1, 1]} : vector<256x1024xf32> to vector<256x128xf32>
    %68 = vector.extract_strided_slice %61 {offsets = [0, 768], sizes = [256, 128], strides = [1, 1]} : vector<256x1024xf32> to vector<256x128xf32>
    %69 = vector.extract_strided_slice %61 {offsets = [0, 896], sizes = [256, 128], strides = [1, 1]} : vector<256x1024xf32> to vector<256x128xf32>
    %70 = arith.addf %62, %63 : vector<256x128xf32>
    %71 = arith.addf %64, %65 : vector<256x128xf32>
    %72 = arith.addf %66, %67 : vector<256x128xf32>
    %73 = arith.addf %68, %69 : vector<256x128xf32>
    %74 = arith.addf %70, %71 : vector<256x128xf32>
    %75 = arith.addf %72, %73 : vector<256x128xf32>
    %76 = arith.addf %74, %75 : vector<256x128xf32>
    %77 = arith.truncf %76 : vector<256x128xf32> to vector<256x128xbf16>
    %c0_30 = arith.constant 0 : index
    %c0_31 = arith.constant 0 : index
    %78 = vector.load %arg9[%c0_30, %c0_31] : memref<128x128xbf16, #tpu.memory_space<vmem>>, vector<128x128xbf16>
    %cst_32 = arith.constant dense<0.000000e+00> : vector<256x128xf32>
    %79 = tpu.matmul %77, %78, %cst_32 {dimension_numbers = #tpu.dot_dimension_numbers<[1], [0], [0], [1], [0, 0, 1, 1], [], []>} : vector<256x128xbf16>, vector<128x128xbf16>, vector<256x128xf32> -> vector<256x128xf32>
    %c0_33 = arith.constant 0 : index
    %c0_34 = arith.constant 0 : index
    %80 = vector.load %arg10[%c0_33, %c0_34] : memref<1x128xf32, #tpu.memory_space<vmem>>, vector<1x128xf32>
    %81 = vector.broadcast %80 : vector<1x128xf32> to vector<256x128xf32>
    %82 = arith.addf %79, %81 : vector<256x128xf32>
    %c0_35 = arith.constant 0 : index
    %c0_36 = arith.constant 0 : index
    %83 = vector.load %arg12[%c0_35, %c0_36] : memref<256x128xf32, #tpu.memory_space<vmem>>, vector<256x128xf32>
    tpu.vector_store %arg12[%c0_35, %c0_36], %82 {strides = array<i32>} : memref<256x128xf32, #tpu.memory_space<vmem>>, vector<256x128xf32>,
    return
  }
  func.func @transform_0(%arg0: i32) -> (i32, i32) {
    %c0_i32 = arith.constant 0 : i32
    %c0_i32_0 = arith.constant 0 : i32
    return %arg0, %c0_i32 : i32, i32
  }
  func.func @transform_1(%arg0: i32) -> (i32, i32) {
    %c0_i32 = arith.constant 0 : i32
    %c0_i32_0 = arith.constant 0 : i32
    return %arg0, %c0_i32 : i32, i32
  }
  func.func @transform_2(%arg0: i32) -> (i32, i32) {
    %c0_i32 = arith.constant 0 : i32
    %c0_i32_0 = arith.constant 0 : i32
    %c0_i32_1 = arith.constant 0 : i32
    return %c0_i32, %c0_i32_0 : i32, i32
  }
  func.func @transform_3(%arg0: i32) -> (i32, i32) {
    %c0_i32 = arith.constant 0 : i32
    %c0_i32_0 = arith.constant 0 : i32
    %c0_i32_1 = arith.constant 0 : i32
    return %c0_i32, %c0_i32_0 : i32, i32
  }
  func.func @transform_4(%arg0: i32) -> (i32, i32) {
    %c0_i32 = arith.constant 0 : i32
    %c0_i32_0 = arith.constant 0 : i32
    %c0_i32_1 = arith.constant 0 : i32
    return %c0_i32, %c0_i32_0 : i32, i32
  }
  func.func @transform_5(%arg0: i32) -> (i32, i32) {
    %c0_i32 = arith.constant 0 : i32
    %c0_i32_0 = arith.constant 0 : i32
    %c0_i32_1 = arith.constant 0 : i32
    return %c0_i32, %c0_i32_0 : i32, i32
  }
  func.func @transform_6(%arg0: i32) -> (i32, i32) {
    %c0_i32 = arith.constant 0 : i32
    %c0_i32_0 = arith.constant 0 : i32
    %c0_i32_1 = arith.constant 0 : i32
    return %c0_i32, %c0_i32_0 : i32, i32
  }
  func.func @transform_7(%arg0: i32) -> (i32, i32) {
    %c0_i32 = arith.constant 0 : i32
    %c0_i32_0 = arith.constant 0 : i32
    %c0_i32_1 = arith.constant 0 : i32
    return %c0_i32, %c0_i32_0 : i32, i32
  }
  func.func @transform_8(%arg0: i32) -> (i32, i32) {
    %c0_i32 = arith.constant 0 : i32
    %c0_i32_0 = arith.constant 0 : i32
    %c0_i32_1 = arith.constant 0 : i32
    return %c0_i32, %c0_i32_0 : i32, i32
  }
  func.func @transform_9(%arg0: i32) -> (i32, i32) {
    %c0_i32 = arith.constant 0 : i32
    %c0_i32_0 = arith.constant 0 : i32
    %c0_i32_1 = arith.constant 0 : i32
    return %c0_i32, %c0_i32_0 : i32, i32
  }
  func.func @transform_10(%arg0: i32) -> (i32, i32) {
    %c0_i32 = arith.constant 0 : i32
    %c0_i32_0 = arith.constant 0 : i32
    %c0_i32_1 = arith.constant 0 : i32
    return %c0_i32, %c0_i32_0 : i32, i32
  }
  func.func @transform_11(%arg0: i32) -> (i32, i32) {
    %c0_i32 = arith.constant 0 : i32
    %c0_i32_0 = arith.constant 0 : i32
    return %arg0, %c0_i32 : i32, i32
  }
}

</mosaic_0001>

<bundles_post_ra>
// kernel: tpu_custom_call.1
= control target key start
LH: loop header
LB: loop body
LE: loop exit
PB: predicated region body
PF: predicated region fallthrough
CT: control target
= control target key end

     0   :  { %s14434_s0 = inlined_call_operand.vmem [shape: bf16[512,64], index: 0, kind: input, shape index: {}]   ;;  %s14435_s1 = inlined_call_operand.vmem [shape: s32[512,2], index: 1, kind: input, shape index: {}]   ;;  %s14436_s2 = inlined_call_operand.vmem [shape: f32[32,8], index: 2, kind: input, shape index: {}]   ;;  %s14437_s3 = inlined_call_operand.vmem [shape: f32[1,8], index: 3, kind: input, shape index: {}]   ;;  %s14438_s4 = inlined_call_operand.vmem [shape: bf16[64,128], index: 4, kind: input, shape index: {}]   ;;  %s14439_s5 = inlined_call_operand.vmem [shape: f32[1,128], index: 5, kind: input, shape index: {}]   ;;  %s14440_s6 = inlined_call_operand.vmem [shape: bf16[128,1024], index: 6, kind: input, shape index: {}]   ;;  %s14441_s7 = inlined_call_operand.vmem [shape: f32[1,1024], index: 7, kind: input, shape index: {}]   ;;  %s14442_s8 = inlined_call_operand.vmem [shape: bf16[128,128], index: 8, kind: input, shape index: {}]   ;;  %s14443_s9 = inlined_call_operand.vmem [shape: f32[1,128], index: 9, kind: input, shape index: {}]   ;;  %s14444_s10 = inlined_call_operand.vmem [shape: bf16[8,1024], index: 10, kind: input, shape index: {}]   ;;  %s14445_s11 = inlined_call_operand.hbm [shape: f32[512,128], index: 11, kind: output, shape index: {}]  }
   0x1   :  { %14747 = sst [smem:[#allocation332_spill]] %s14435_s1 }
   0x2   :  { %16 = vsyncpa [#allocation3], 0 }
   0x3   :  { %18 = vsyncpa [#allocation3 + $0x1], 0  ;;  %s8807_s17 = smov 0   ;;  %s8809_s18 = smov 0  }
   0x4   :  { %s8811_s19 = smov 0   ;;  %s8813_s20 = smov 0  }
   0x5 LB: > { %14748 = sst [smem:[#allocation5_spill]] %s8735_s19  ;;  %s8828_s21 = sadd.s32 4294967295, %s8739_s20   ;;  %s8739_s20 = sphi %s8813_s20, %s16400_s20   ;;  %s8735_s19 = sphi %s8811_s19, %s16397_s19   ;;  %s8731_s18 = sphi %s8809_s18, %s16399_s18   ;;  %s8727_s17 = sphi %s8807_s17, %s16398_s17  }
   0x6   : > { %s6808_s22 = sadd.s32 4294967294, %s8739_s20   ;;  %s8832_s23 = sadd.s32 1, %s8739_s20  }
   0x7   : > { %s272_s24 = sadd.s32 1, %s8735_s19  ;;  %s269_s25 = ssub.s32 %s8739_s20, %s8832_s23 }
   0x8   : > { %p282_p0 = scmp.ne.s32.totalorder %s8735_s19, %s8731_s18  ;;  %p270_p1 = scmp.eq.s32.totalorder %s269_s25, 0 }
   0x9   : > { %p283_p2 = scmp.eq.s32.totalorder %s8828_s21, 1  ;;  %p288_p3 = scmp.ne.s32.totalorder %s8731_s18, %s8727_s17 }
   0xa   : > { %p289_p4 = scmp.eq.s32.totalorder %s6808_s22, 1  ;;  %p6811_p7 = scmp.ge.s32.totalorder %s8739_s20, 1 }
   0xb   : > { %s8843_s26 = scalar_select %p270_p1, %s8735_s19, %s272_s24  }
   0xc   : > { %p8845_p5 = por %p283_p2, %p282_p0  ;;  %p8849_p6 = por %p289_p4, %p288_p3 }
   0xd   : > { %14749 = sst [smem:[#allocation6_spill]] %s8843_s26  ;;  %p352_p8 = scmp.lt.s32.totalorder %s8739_s20, 3 }
   0xf   : > { %p353_p9 = pnand %p6811_p7, %p352_p8 }
  0x11   : > { %356 = sbr.rel (%p353_p9) target bundleno = 1751 (0x6d7), region = 64 }
  0x18   : > { %s6813_s29 = sshll.u32 %s8828_s21, 5  ;;  %v14448_v0 = vmov 0   ;;  %s14752_s1 = sld [smem:[#allocation332_spill]]  ;;  %v8742_v5 = vmov 1   ;;  %v798_v13 = vld [vmem:[%s14436_s2] sm:$0xff]  ;;  %v799_v14 = vld [vmem:[%s14436_s2 + $0x8] sm:$0xff] }
  0x19   : > { %7355 = vset.pattern.permute.xlu1 %v14448_v0  ;;  %7354 = vset.pattern.permute.xlu0 %v14448_v0  ;;  %p398_p10 = scmp.lt.s32.totalorder %s6813_s29, 63  ;;  %v800_v15 = vld [vmem:[%s14436_s2 + $0x10] sm:$0xff]  ;;  %v801_v16 = vld [vmem:[%s14436_s2 + $0x18] sm:$0xff]  ;;  %v7298_v18 = vpack.c.bf16 %v799_v14, %v798_v13  ;;  %v8899_v37 = vld [vmem:[%s14438_s4] sm:$0xff]   ;;  %vm809_vm1 = vcmask 261120   ;;  %s394_s19 = sand.u32 1, %s8731_s18  }
  0x1a   : > { %v7302_v21 = vpack.c.bf16 %v801_v16, %v800_v15  ;;  %s6812_s26 = sshll.u32 %s394_s19, 8  ;;  %s7073_s22 = sshll.u32 %s8828_s21, 12 }
  0x1b   : > { %s16402_s29 = smov (!%p398_p10, %s6813_s29), 63  ;;  %7306 = vmatprep.subr.bf16.mxu1 %v7298_v18  ;;  %7299 = vmatprep.subr.bf16.mxu0 %v7298_v18  ;;  %s14318_s16 = scalar_lea.vmem [#allocation2], %s6812_s26 }
  0x1c   : > { %s6816_s30 = sshll.u32 %s16402_s29, 3  ;;  %s6814_s15 = sshll.u32 %s16402_s29, 2  ;;  %7308 = vmatpush3.bf16.msra.mxu1 %v7298_v18  ;;  %7301 = vmatpush3.bf16.msra.mxu0 %v7298_v18 }
  0x1d   : > { %7307 = vmatprep.subr.bf16.mxu1 %v7302_v21  ;;  %7303 = vmatprep.subr.bf16.mxu0 %v7302_v21  ;;  %s6734_s24 = sshll.u32 %s14318_s16, 4  ;;  %s14383_s12 = scalar_lea.hbm %s14445_s11, %s7073_s22  ;;  %s14385_s24 = int_to_ptr.vmem [resolvable:$true] %s6734_s24 }
  0x1e   : > { %s8861_s14 = scalar_lea.vmem %s14752_s1, %s6816_s30  ;;  %s8876_s30 = scalar_lea.vmem %s14434_s0, %s6814_s15 }
  0x1f   : > { %v428_v1 = vld [vmem:[%s8861_s14 + $0x88] sm:$0xff]  ;;  %v427_v2 = vld [vmem:[%s8861_s14 + $0x80] sm:$0xff]  ;;  %v429_v4 = vld [vmem:[%s8861_s14 + $0x90] sm:$0xff]  ;;  %s14393_s21 = scalar_lea.sflag [#allocation3], %s394_s19  ;;  %s8677_s13 = scalar_lea.vmem %s14385_s24, 4096 }
  0x20   : > { %530 = vperm.xlu1 %7355, %v428_v1   ;;  %527 = vperm.xlu0 %7354, %v427_v2   ;;  %v462_v3 = vadd.s32 16, %v427_v2  ;;  %v463_v6 = vadd.s32 16, %v428_v1  ;;  %v464_v7 = vadd.s32 16, %v429_v4  ;;  %v430_v8 = vld [vmem:[%s8861_s14 + $0x98] sm:$0xff]  ;;  %v431_v9 = vld [vmem:[%s8861_s14 + $0xa0] sm:$0xff]  ;;  %v432_v11 = vld [vmem:[%s8861_s14 + $0xa8] sm:$0xff]  ;;  %p8678_p11 = scmp.ne.s32.totalorder %s14385_s24, %s8677_s13 }
  0x21   : > { %v465_v10 = vadd.s32 16, %v430_v8  ;;  %v433_v12 = vld [vmem:[%s8861_s14 + $0xb0] sm:$0xff]  ;;  %v466_v17 = vadd.s32 16, %v431_v9  ;;  %v467_v19 = vadd.s32 16, %v432_v11  ;;  %7309 = vmatpush3.bf16.msra.mxu1 %v7302_v21  ;;  %v434_v22 = vld [vmem:[%s8861_s14 + $0xb8] sm:$0xff]  ;;  %7305 = vmatpush3.bf16.msra.mxu0 %v7302_v21  ;;  %v435_v24 = vld [vmem:[%s8861_s14 + $0xc0] sm:$0xff] }
  0x22   : > { %v468_v20 = vadd.s32 16, %v433_v12  ;;  %v469_v23 = vadd.s32 16, %v434_v22  ;;  %v470_v25 = vadd.s32 16, %v435_v24  ;;  %v436_v26 = vld [vmem:[%s8861_s14 + $0xc8] sm:$0xff]  ;;  %v437_v28 = vld [vmem:[%s8861_s14 + $0xd0] sm:$0xff]  ;;  %v438_v30 = vld [vmem:[%s8861_s14 + $0xd8] sm:$0xff]  ;;  %7210 = vmatprep.subr.bf16.mxu1 %v8899_v37  ;;  %p8679_p12 = pnand %p8678_p11, %p8845_p5 }
  0x23   : > { %v471_v27 = vadd.s32 16, %v436_v26  ;;  %v472_v29 = vadd.s32 16, %v437_v28  ;;  %v473_v31 = vadd.s32 16, %v438_v30  ;;  %v439_v32 = vld [vmem:[%s8861_s14 + $0xe0] sm:$0xff]  ;;  %v440_v34 = vld [vmem:[%s8861_s14 + $0xe8] sm:$0xff]  ;;  %v441_v36 = vld [vmem:[%s8861_s14 + $0xf0] sm:$0xff] }
  0x24   : > { %533 = vperm.xlu1 %7355, %v429_v4   ;;  %7356 = vset.pattern.permute.xlu0 %v8742_v5  ;;  %v474_v33 = vadd.s32 16, %v439_v32  ;;  %v475_v35 = vadd.s32 16, %v440_v34  ;;  %v476_v38 = vadd.s32 16, %v441_v36  ;;  %v442_v39 = vld [vmem:[%s8861_s14 + $0xf8] sm:$0xff]  ;;  %v411_v41 = vld [vmem:[%s8861_s14] sm:$0xff]  ;;  %v412_v43 = vld [vmem:[%s8861_s14 + $0x8] sm:$0xff]  ;;  %p8680_p13 = pneg %p8679_p12 }
  0x25   : > { %623 = vperm.xlu0 %7356, %v462_v3   ;;  %v477_v40 = vadd.s32 16, %v442_v39  ;;  %v446_v42 = vadd.s32 16, %v411_v41  ;;  %v447_v44 = vadd.s32 16, %v412_v43  ;;  %v413_v45 = vld [vmem:[%s8861_s14 + $0x10] sm:$0xff]  ;;  %v414_v47 = vld [vmem:[%s8861_s14 + $0x18] sm:$0xff]  ;;  %v415_v49 = vld [vmem:[%s8861_s14 + $0x20] sm:$0xff] }
  0x26   : > { %v448_v46 = vadd.s32 16, %v413_v45  ;;  %v449_v48 = vadd.s32 16, %v414_v47  ;;  %v450_v50 = vadd.s32 16, %v415_v49  ;;  %v416_v51 = vld [vmem:[%s8861_s14 + $0x28] sm:$0xff]  ;;  %v417_v53 = vld [vmem:[%s8861_s14 + $0x30] sm:$0xff]  ;;  %v418_v55 = vld [vmem:[%s8861_s14 + $0x38] sm:$0xff] }
  0x27   : > { %v451_v52 = vadd.s32 16, %v416_v51  ;;  %v452_v54 = vadd.s32 16, %v417_v53  ;;  %v453_v56 = vadd.s32 16, %v418_v55  ;;  %v419_v57 = vld [vmem:[%s8861_s14 + $0x40] sm:$0xff]  ;;  %v420_v59 = vld [vmem:[%s8861_s14 + $0x48] sm:$0xff]  ;;  %v421_v61 = vld [vmem:[%s8861_s14 + $0x50] sm:$0xff] }
  0x28   : > { %7357 = vset.pattern.permute.xlu1 %v8742_v5  ;;  %v454_v58 = vadd.s32 16, %v419_v57  ;;  %v455_v60 = vadd.s32 16, %v420_v59  ;;  %v456_v62 = vadd.s32 16, %v421_v61  ;;  %v422_v63 = vld [vmem:[%s8861_s14 + $0x58] sm:$0xff]  ;;  %v423_v2 = vld [vmem:[%s8861_s14 + $0x60] sm:$0xff]  ;;  %v424_v4 = vld [vmem:[%s8861_s14 + $0x68] sm:$0xff] }
  0x29   : > { %626 = vperm.xlu1 %7357, %v463_v6   ;;  %629 = vperm.xlu0 %7356, %v464_v7   ;;  %v457_v1 = vadd.s32 16, %v422_v63  ;;  %v458_v3 = vadd.s32 16, %v423_v2  ;;  %v459_v5 = vadd.s32 16, %v424_v4  ;;  %v425_v6 = vld [vmem:[%s8861_s14 + $0x70] sm:$0xff]  ;;  %s8744_s29 = smov [#allocation2]  }
  0x2a   : > { %v460_v7 = vadd.s32 16, %v425_v6  ;;  %s8681_s1 = sshll.u32 %s8744_s29, 4  ;;  %s8682_s1 = int_to_ptr.vmem [resolvable:$false] %s8681_s1 }
  0x2b   : > { %s8683_s26 = scalar_lea.vmem %s8682_s1, 8192  ;;  %p8684_p0 = scmp.lt.s32.totalorder %s14385_s24, %s8682_s1 }
  0x2c   : > { %p8685_p1 = scmp.lt.s32.totalorder %s8683_s26, %s8677_s13 }
  0x2d   : > { %7358 = vset.pattern.permute.xlu1 %v14448_v0  ;;  %632 = vperm.xlu0 %7356, %v465_v10   ;;  %v14447_v10 = vlaneseq }
  0x2e   : > { %536 = vperm.xlu1 %7358, %v430_v8   ;;  %v426_v8 = vld [vmem:[%s8861_s14 + $0x78] sm:$0xff]  ;;  %p8686_p2 = por %p8685_p1, %p8684_p0 }
  0x30   : > { %p8687_p3 = pnand %p8686_p2, %p8680_p13 }
  0x31   : > { %635 = vperm.xlu0 %7356, %v466_v17   ;;  %v8743_v17 = vmov 0.0  }
  0x32   : > { %539 = vperm.xlu1 %7358, %v431_v9   ;;  %v461_v9 = vadd.s32 16, %v426_v8 }
  0x35   : > { %638 = vperm.xlu0 %7356, %v467_v19  }
  0x36   : > { %542 = vperm.xlu1 %7358, %v432_v11   ;;  %v8920_v11 = vand.u32 127, %v14447_v10  ;;  %v9427_v10 = vld [vmem:[%s14440_s6 + $0xf8] sm:$0xff] }
  0x38   : > { %vm445_vm0 = vcmp.lt.s32.totalorder %v8920_v11, 16 }
  0x39   : > { %641 = vperm.xlu0 %7356, %v468_v20  }
  0x3a   : > { %545 = vperm.xlu1 %7358, %v433_v12  }
  0x3d   : > { %644 = vperm.xlu0 %7356, %v469_v23   ;;  %v7360_v23 = vld [vmem:[%s14438_s4 + $0x8] sm:$0xff]  }
  0x3e   : > { %548 = vperm.xlu1 %7358, %v434_v22  }
  0x41   : > { %647 = vperm.xlu0 %7356, %v470_v25  }
  0x42   : > { %551 = vperm.xlu1 %7358, %v435_v24  }
  0x45   : > { %650 = vperm.xlu0 %7356, %v471_v27  }
  0x46   : > { %554 = vperm.xlu1 %7358, %v436_v26  }
  0x49   : > { %653 = vperm.xlu0 %7356, %v472_v29   ;;  %v7361_v29 = vld [vmem:[%s14438_s4 + $0x10] sm:$0xff]  }
  0x4a   : > { %557 = vperm.xlu1 %7358, %v437_v28  }
  0x4d   : > { %656 = vperm.xlu0 %7356, %v473_v31  }
  0x4e   : > { %560 = vperm.xlu1 %7358, %v438_v30  }
  0x51   : > { %659 = vperm.xlu0 %7356, %v474_v33  }
  0x52   : > { %563 = vperm.xlu1 %7358, %v439_v32  }
  0x55   : > { %662 = vperm.xlu0 %7356, %v475_v35  }
  0x56   : > { %566 = vperm.xlu1 %7358, %v440_v34   ;;  %v7362_v34 = vld [vmem:[%s14438_s4 + $0x18] sm:$0xff]  }
  0x59   : > { %665 = vperm.xlu0 %7356, %v476_v38  }
  0x5a   : > { %569 = vperm.xlu1 %7358, %v441_v36  }
  0x5d   : > { %668 = vperm.xlu0 %7356, %v477_v40  }
  0x5e   : > { %572 = vperm.xlu1 %7358, %v442_v39  }
  0x61   : > { %575 = vperm.xlu0 %7356, %v446_v42  }
  0x62   : > { %479 = vperm.xlu1 %7358, %v411_v41  }
  0x65   : > { %578 = vperm.xlu0 %7356, %v447_v44  }
  0x66   : > { %482 = vperm.xlu1 %7358, %v412_v43  }
  0x69   : > { %581 = vperm.xlu0 %7356, %v448_v46  }
  0x6a   : > { %485 = vperm.xlu1 %7358, %v413_v45  }
  0x6d   : > { %584 = vperm.xlu0 %7356, %v449_v48  }
  0x6e   : > { %488 = vperm.xlu1 %7358, %v414_v47  }
  0x71   : > { %587 = vperm.xlu0 %7356, %v450_v50  }
  0x72   : > { %491 = vperm.xlu1 %7358, %v415_v49  }
  0x75   : > { %590 = vperm.xlu0 %7356, %v451_v52  }
  0x76   : > { %494 = vperm.xlu1 %7358, %v416_v51  }
  0x79   : > { %593 = vperm.xlu0 %7356, %v452_v54  }
  0x7a   : > { %497 = vperm.xlu1 %7358, %v417_v53  }
  0x7d   : > { %596 = vperm.xlu0 %7356, %v453_v56  }
  0x7e   : > { %500 = vperm.xlu1 %7358, %v418_v55  }
  0x81   : > { %599 = vperm.xlu0 %7356, %v454_v58  }
  0x82   : > { %503 = vperm.xlu1 %7358, %v419_v57  }
  0x85   : > { %602 = vperm.xlu0 %7356, %v455_v60  }
  0x86   : > { %506 = vperm.xlu1 %7358, %v420_v59  }
  0x89   : > { %605 = vperm.xlu0 %7356, %v456_v62  }
  0x8a   : > { %509 = vperm.xlu1 %7358, %v421_v61  }
  0x8d   : > { %608 = vperm.xlu0 %7356, %v457_v1  }
  0x8e   : > { %512 = vperm.xlu1 %7358, %v422_v63  }
  0x91   : > { %611 = vperm.xlu0 %7356, %v458_v3  }
  0x92   : > { %515 = vperm.xlu1 %7358, %v423_v2  }
  0x95   : > { %614 = vperm.xlu0 %7356, %v459_v5  }
  0x96   : > { %518 = vperm.xlu1 %7358, %v424_v4  }
  0x99   : > { %617 = vperm.xlu0 %7356, %v460_v7  }
  0x9a   : > { %521 = vperm.xlu1 %7358, %v425_v6  }
  0x9d   : > { %620 = vperm.xlu0 %7356, %v461_v9  }
  0x9e   : > { %524 = vperm.xlu1 %7358, %v426_v8  }
  0x9f   : > { %v531_v12 = vpop.permute.xlu1 %530  ;;  %v528_v13 = vpop.permute.xlu0 %527 }
  0xa3   : > { %v534_v14 = vpop.permute.xlu1 %533 }
  0xa4   : > { %v624_v15 = vpop.permute.xlu0 %623 }
  0xa5   : > { %v686_v16 = vsel %vm445_vm0, %v528_v13, %v624_v15 }
  0xa6   : > { %vm718_vm2 = vcmp.eq.s32.totalorder %v8920_v11, %v686_v16 }
  0xa7   : > { %v6833_v18 = vsel %vm718_vm2, 1.0, %v8743_v17 }
  0xa8   : > { %v627_v19 = vpop.permute.xlu1 %626  ;;  %7186 = vmatprep.mubr.msk.f32.mxu1 %vm809_vm1, %v6833_v18  ;;  %v630_v20 = vpop.permute.xlu0 %629 }
  0xa9   : > { %v687_v21 = vsel %vm445_vm0, %v531_v12, %v627_v19  ;;  %v688_v22 = vsel %vm445_vm0, %v534_v14, %v630_v20  ;;  %v7363_v19 = vld [vmem:[%s8876_s30] sm:$0xff]  }
  0xaa   : > { %vm719_vm3 = vcmp.eq.s32.totalorder %v8920_v11, %v687_v21  ;;  %vm720_vm4 = vcmp.eq.s32.totalorder %v8920_v11, %v688_v22 }
  0xab   : > { %v6834_v24 = vsel %vm719_vm3, 1.0, %v8743_v17  ;;  %v6835_v25 = vsel %vm720_vm4, 1.0, %v8743_v17  ;;  %vm1635_vm4 = vcmask 523264  }
  0xac   : > { %7187 = vmatmul.mubr.msk.f32.vlgmr.msra.gmra.mrb[0].mxu1 %vm809_vm1, %v6834_v24  ;;  %v633_v26 = vpop.permute.xlu0 %632 }
  0xad   : > { %v537_v27 = vpop.permute.xlu1 %536  ;;  %7189 = vmatprep.mubr.msk.f32.mxu1 %vm809_vm1, %v6835_v25  ;;  %7211 = vmatpush3.bf16.msra.mxu1 %v8899_v37  ;;  %v7365_v25 = vld [vmem:[%s8876_s30 + $0x10] sm:$0xff]  }
  0xae   : > { %v689_v28 = vsel %vm445_vm0, %v537_v27, %v633_v26  ;;  %7212 = vmatprep.subr.bf16.mxu1 %v7360_v23 }
  0xaf   : > { %vm721_vm5 = vcmp.eq.s32.totalorder %v8920_v11, %v689_v28 }
  0xb0   : > { %v636_v30 = vpop.permute.xlu0 %635  ;;  %v6836_v31 = vsel %vm721_vm5, 1.0, %v8743_v17 }
  0xb1   : > { %v540_v32 = vpop.permute.xlu1 %539  ;;  %7190 = vmatmul.mubr.msk.f32.gmra.mrb[2].mxu1 %vm809_vm1, %v6836_v31 }
  0xb2   : > { %v690_v33 = vsel %vm445_vm0, %v540_v32, %v636_v30  ;;  %7213 = vmatpush3.bf16.msra.mxu1 %v7360_v23  ;;  %v7364_v23 = vld [vmem:[%s8876_s30 + $0x8] sm:$0xff]  }
  0xb3   : > { %vm722_vm6 = vcmp.eq.s32.totalorder %v8920_v11, %v690_v33  ;;  %7214 = vmatprep.subr.bf16.mxu1 %v7361_v29  ;;  %v7366_v33 = vld [vmem:[%s8876_s30 + $0x18] sm:$0xff]  }
  0xb4   : > { %v639_v35 = vpop.permute.xlu0 %638  ;;  %v6837_v36 = vsel %vm722_vm6, 1.0, %v8743_v17 }
  0xb5   : > { %v543_v37 = vpop.permute.xlu1 %542  ;;  %7192 = vmatprep.mubr.msk.f32.mxu1 %vm809_vm1, %v6837_v36 }
  0xb6   : > { %v691_v38 = vsel %vm445_vm0, %v543_v37, %v639_v35  ;;  %7215 = vmatpush3.bf16.msra.mxu1 %v7361_v29  ;;  %v7367_v35 = vld [vmem:[%s8876_s30 + $0x20] sm:$0xff]  }
  0xb7   : > { %vm723_vm7 = vcmp.eq.s32.totalorder %v8920_v11, %v691_v38  ;;  %7216 = vmatprep.subr.bf16.mxu1 %v7362_v34 }
  0xb8   : > { %v642_v39 = vpop.permute.xlu0 %641  ;;  %v6838_v40 = vsel %vm723_vm7, 1.0, %v8743_v17 }
  0xb9   : > { %v546_v41 = vpop.permute.xlu1 %545  ;;  %7193 = vmatmul.mubr.msk.f32.gmra.mrb[4].mxu1 %vm809_vm1, %v6838_v40 }
  0xba   : > { %v692_v42 = vsel %vm445_vm0, %v546_v41, %v642_v39  ;;  %7217 = vmatpush3.bf16.msra.mxu1 %v7362_v34 }
  0xbb   : > { %vm724_vm8 = vcmp.eq.s32.totalorder %v8920_v11, %v692_v42 }
  0xbc   : > { %v645_v43 = vpop.permute.xlu0 %644  ;;  %v6839_v44 = vsel %vm724_vm8, 1.0, %v8743_v17 }
  0xbd   : > { %v549_v45 = vpop.permute.xlu1 %548  ;;  %7195 = vmatprep.mubr.msk.f32.mxu1 %vm809_vm1, %v6839_v44 }
  0xbe   : > { %v693_v46 = vsel %vm445_vm0, %v549_v45, %v645_v43  ;;  %v7368_v43 = vld [vmem:[%s8876_s30 + $0x28] sm:$0xff]   ;;  %v7369_v45 = vld [vmem:[%s8876_s30 + $0x30] sm:$0xff]  }
  0xbf   : > { %vm725_vm9 = vcmp.eq.s32.totalorder %v8920_v11, %v693_v46 }
  0xc0   : > { %v648_v47 = vpop.permute.xlu0 %647  ;;  %v6840_v48 = vsel %vm725_vm9, 1.0, %v8743_v17 }
  0xc1   : > { %v552_v49 = vpop.permute.xlu1 %551  ;;  %7196 = vmatmul.mubr.msk.f32.gmra.mrb[6].mxu1 %vm809_vm1, %v6840_v48 }
  0xc2   : > { %v694_v50 = vsel %vm445_vm0, %v552_v49, %v648_v47 }
  0xc3   : > { %vm726_vm10 = vcmp.eq.s32.totalorder %v8920_v11, %v694_v50 }
  0xc4   : > { %v651_v51 = vpop.permute.xlu0 %650  ;;  %v6841_v52 = vsel %vm726_vm10, 1.0, %v8743_v17 }
  0xc5   : > { %v555_v53 = vpop.permute.xlu1 %554  ;;  %7198 = vmatprep.mubr.msk.f32.mxu1 %vm809_vm1, %v6841_v52 }
  0xc6   : > { %v695_v54 = vsel %vm445_vm0, %v555_v53, %v651_v51  ;;  %v7370_v53 = vld [vmem:[%s8876_s30 + $0x38] sm:$0xff]  }
  0xc7   : > { %vm727_vm11 = vcmp.eq.s32.totalorder %v8920_v11, %v695_v54 }
  0xc8   : > { %v654_v55 = vpop.permute.xlu0 %653  ;;  %v6842_v56 = vsel %vm727_vm11, 1.0, %v8743_v17 }
  0xc9   : > { %v558_v57 = vpop.permute.xlu1 %557  ;;  %7199 = vmatmul.mubr.msk.f32.gmra.mrb[8].mxu1 %vm809_vm1, %v6842_v56 }
  0xca   : > { %v696_v58 = vsel %vm445_vm0, %v558_v57, %v654_v55  ;;  %v7371_v55 = vld [vmem:[%s8876_s30 + $0x40] sm:$0xff]  }
  0xcb   : > { %vm728_vm12 = vcmp.eq.s32.totalorder %v8920_v11, %v696_v58 }
  0xcc   : > { %v657_v59 = vpop.permute.xlu0 %656  ;;  %v6843_v60 = vsel %vm728_vm12, 1.0, %v8743_v17 }
  0xcd   : > { %v561_v61 = vpop.permute.xlu1 %560  ;;  %7201 = vmatprep.mubr.msk.f32.mxu1 %vm809_vm1, %v6843_v60 }
  0xce   : > { %v697_v62 = vsel %vm445_vm0, %v561_v61, %v657_v59 }
  0xcf   : > { %vm729_vm13 = vcmp.eq.s32.totalorder %v8920_v11, %v697_v62 }
  0xd0   : > { %v660_v63 = vpop.permute.xlu0 %659  ;;  %v6844_v1 = vsel %vm729_vm13, 1.0, %v8743_v17 }
  0xd1   : > { %v564_v2 = vpop.permute.xlu1 %563  ;;  %7202 = vmatmul.mubr.msk.f32.gmra.mrb[10].mxu1 %vm809_vm1, %v6844_v1 }
  0xd2   : > { %v698_v3 = vsel %vm445_vm0, %v564_v2, %v660_v63  ;;  %v7372_v63 = vld [vmem:[%s8876_s30 + $0x48] sm:$0xff]   ;;  %v7373_v2 = vld [vmem:[%s8876_s30 + $0x50] sm:$0xff]  }
  0xd3   : > { %vm730_vm14 = vcmp.eq.s32.totalorder %v8920_v11, %v698_v3 }
  0xd4   : > { %v663_v4 = vpop.permute.xlu0 %662  ;;  %v6845_v5 = vsel %vm730_vm14, 1.0, %v8743_v17 }
  0xd5   : > { %v567_v6 = vpop.permute.xlu1 %566  ;;  %7204 = vmatprep.mubr.msk.f32.mxu1 %vm809_vm1, %v6845_v5 }
  0xd6   : > { %v699_v7 = vsel %vm445_vm0, %v567_v6, %v663_v4 }
  0xd7   : > { %vm731_vm15 = vcmp.eq.s32.totalorder %v8920_v11, %v699_v7 }
  0xd8   : > { %v666_v8 = vpop.permute.xlu0 %665  ;;  %v6846_v9 = vsel %vm731_vm15, 1.0, %v8743_v17 }
  0xd9   : > { %v570_v12 = vpop.permute.xlu1 %569  ;;  %7205 = vmatmul.mubr.msk.f32.gmra.mrb[12].mxu1 %vm809_vm1, %v6846_v9 }
  0xda   : > { %v700_v13 = vsel %vm445_vm0, %v570_v12, %v666_v8  ;;  %v7374_v12 = vld [vmem:[%s8876_s30 + $0x58] sm:$0xff]  }
  0xdb   : > { %vm732_vm2 = vcmp.eq.s32.totalorder %v8920_v11, %v700_v13 }
  0xdc   : > { %v669_v14 = vpop.permute.xlu0 %668  ;;  %v6847_v15 = vsel %vm732_vm2, 1.0, %v8743_v17 }
  0xdd   : > { %v573_v16 = vpop.permute.xlu1 %572  ;;  %7207 = vmatprep.mubr.msk.f32.mxu1 %vm809_vm1, %v6847_v15 }
  0xde   : > { %v701_v18 = vsel %vm445_vm0, %v573_v16, %v669_v14  ;;  %v7375_v14 = vld [vmem:[%s8876_s30 + $0x60] sm:$0xff]  }
  0xdf   : > { %vm733_vm3 = vcmp.eq.s32.totalorder %v8920_v11, %v701_v18 }
  0xe0   : > { %v576_v20 = vpop.permute.xlu0 %575  ;;  %v6848_v21 = vsel %vm733_vm3, 1.0, %v8743_v17 }
  0xe1   : > { %7208 = vmatmul.mubr.msk.f32.gmra.mrb[14].mxu1 %vm809_vm1, %v6848_v21  ;;  %v480_v22 = vpop.permute.xlu1 %479 }
  0xe2   : > { %v670_v24 = vsel %vm445_vm0, %v480_v22, %v576_v20  ;;  %7218 = vmatprep.mubr.msk.bf16.mxu1 %vm1635_vm4, %v7363_v19 }
  0xe3   : > { %vm702_vm5 = vcmp.eq.s32.totalorder %v8920_v11, %v670_v24 }
  0xe4   : > { %v579_v26 = vpop.permute.xlu0 %578  ;;  %v6817_v27 = vsel %vm702_vm5, 1.0, %v8743_v17 }
  0xe5   : > { %v483_v28 = vpop.permute.xlu1 %482  ;;  %7162 = vmatprep.mubr.msk.f32.mxu0 %vm809_vm1, %v6817_v27  ;;  %7219 = vmatmul.mubr.msk.bf16.vlgmr.msra.gmra.mrb[16].mxu1 %vm1635_vm4, %v7364_v23  ;;  %v7376_v23 = vld [vmem:[%s8876_s30 + $0x68] sm:$0xff]  }
  0xe6   : > { %v671_v29 = vsel %vm445_vm0, %v483_v28, %v579_v26  ;;  %7222 = vmatprep.mubr.msk.bf16.mxu1 %vm1635_vm4, %v7365_v25  ;;  %v7377_v25 = vld [vmem:[%s8876_s30 + $0x70] sm:$0xff]  }
  0xe7   : > { %vm703_vm6 = vcmp.eq.s32.totalorder %v8920_v11, %v671_v29 }
  0xe8   : > { %v582_v30 = vpop.permute.xlu0 %581  ;;  %v6818_v31 = vsel %vm703_vm6, 1.0, %v8743_v17 }
  0xe9   : > { %v486_v32 = vpop.permute.xlu1 %485  ;;  %7163 = vmatmul.mubr.msk.f32.vlgmr.msra.gmra.mrb[0].mxu0 %vm809_vm1, %v6818_v31 }
  0xea   : > { %v672_v34 = vsel %vm445_vm0, %v486_v32, %v582_v30 }
  0xeb   : > { %vm704_vm7 = vcmp.eq.s32.totalorder %v8920_v11, %v672_v34 }
  0xec   : > { %v585_v36 = vpop.permute.xlu0 %584  ;;  %v6819_v37 = vsel %vm704_vm7, 1.0, %v8743_v17 }
  0xed   : > { %v489_v38 = vpop.permute.xlu1 %488  ;;  %7165 = vmatprep.mubr.msk.f32.mxu0 %vm809_vm1, %v6819_v37  ;;  %7223 = vmatmul.mubr.msk.bf16.gmra.mrb[20].mxu1 %vm1635_vm4, %v7366_v33  ;;  %v7378_v33 = vld [vmem:[%s8876_s30 + $0x78] sm:$0xff]  }
  0xee   : > { %v673_v39 = vsel %vm445_vm0, %v489_v38, %v585_v36  ;;  %7226 = vmatprep.mubr.msk.bf16.mxu1 %vm1635_vm4, %v7367_v35 }
  0xef   : > { %vm705_vm8 = vcmp.eq.s32.totalorder %v8920_v11, %v673_v39 }
  0xf0   : > { %v588_v40 = vpop.permute.xlu0 %587  ;;  %v6820_v41 = vsel %vm705_vm8, 1.0, %v8743_v17 }
  0xf1   : > { %v492_v42 = vpop.permute.xlu1 %491  ;;  %7166 = vmatmul.mubr.msk.f32.gmra.mrb[2].mxu0 %vm809_vm1, %v6820_v41  ;;  %v2089_v41 = vld [vmem:[%s14440_s6 + $0x20] sm:$0xff] }
  0xf2   : > { %v674_v44 = vsel %vm445_vm0, %v492_v42, %v588_v40  ;;  %v2085_v40 = vld [vmem:[%s14440_s6] sm:$0xff]  ;;  %v2086_v42 = vld [vmem:[%s14440_s6 + $0x8] sm:$0xff] }
  0xf3   : > { %vm706_vm9 = vcmp.eq.s32.totalorder %v8920_v11, %v674_v44 }
  0xf4   : > { %v591_v46 = vpop.permute.xlu0 %590  ;;  %v6821_v47 = vsel %vm706_vm9, 1.0, %v8743_v17 }
  0xf5   : > { %v495_v48 = vpop.permute.xlu1 %494  ;;  %7168 = vmatprep.mubr.msk.f32.mxu0 %vm809_vm1, %v6821_v47  ;;  %7227 = vmatmul.mubr.msk.bf16.gmra.mrb[24].mxu1 %vm1635_vm4, %v7368_v43  ;;  %v6920_v43 = vcombine.high %v2085_v40, %v2089_v41  ;;  %v2097_v47 = vld [vmem:[%s14440_s6 + $0x60] sm:$0xff] }
  0xf6   : > { %v675_v49 = vsel %vm445_vm0, %v495_v48, %v591_v46  ;;  %7230 = vmatprep.mubr.msk.bf16.mxu1 %vm1635_vm4, %v7369_v45  ;;  %v2093_v46 = vld [vmem:[%s14440_s6 + $0x40] sm:$0xff]  ;;  %v2094_v48 = vld [vmem:[%s14440_s6 + $0x48] sm:$0xff] }
  0xf7   : > { %vm707_vm10 = vcmp.eq.s32.totalorder %v8920_v11, %v675_v49  ;;  %2511 = vmatprep.subr.bf16.mxu0 %v6920_v43  ;;  %v6928_v49 = vcombine.high %v2093_v46, %v2097_v47 }
  0xf8   : > { %v594_v50 = vpop.permute.xlu0 %593  ;;  %v6822_v51 = vsel %vm707_vm10, 1.0, %v8743_v17 }
  0xf9   : > { %v498_v52 = vpop.permute.xlu1 %497  ;;  %7169 = vmatmul.mubr.msk.f32.gmra.mrb[4].mxu0 %vm809_vm1, %v6822_v51  ;;  %v6927_v51 = vcombine.low %v2093_v46, %v2097_v47 }
  0xfa   : > { %v676_v54 = vsel %vm445_vm0, %v498_v52, %v594_v50  ;;  %v2098_v50 = vld [vmem:[%s14440_s6 + $0x68] sm:$0xff] }
  0xfb   : > { %vm708_vm11 = vcmp.eq.s32.totalorder %v8920_v11, %v676_v54  ;;  %v6929_v52 = vcombine.low %v2094_v48, %v2098_v50  ;;  %v2101_v54 = vld [vmem:[%s14440_s6 + $0x80] sm:$0xff] }
  0xfc   : > { %v597_v56 = vpop.permute.xlu0 %596  ;;  %v6823_v57 = vsel %vm708_vm11, 1.0, %v8743_v17 }
  0xfd   : > { %v501_v58 = vpop.permute.xlu1 %500  ;;  %7171 = vmatprep.mubr.msk.f32.mxu0 %vm809_vm1, %v6823_v57  ;;  %7231 = vmatmul.mubr.msk.bf16.gmra.mrb[28].mxu1 %vm1635_vm4, %v7370_v53  ;;  %v6930_v53 = vcombine.high %v2094_v48, %v2098_v50 }
  0xfe   : > { %v677_v59 = vsel %vm445_vm0, %v501_v58, %v597_v56  ;;  %7234 = vmatprep.mubr.msk.bf16.mxu1 %vm1635_vm4, %v7371_v55  ;;  %v2105_v55 = vld [vmem:[%s14440_s6 + $0xa0] sm:$0xff]  ;;  %v2102_v56 = vld [vmem:[%s14440_s6 + $0x88] sm:$0xff] }
  0xff   : > { %vm709_vm12 = vcmp.eq.s32.totalorder %v8920_v11, %v677_v59  ;;  %v6936_v57 = vcombine.high %v2101_v54, %v2105_v55  ;;  %v2106_v58 = vld [vmem:[%s14440_s6 + $0xa8] sm:$0xff]  ;;  %v6935_v59 = vcombine.low %v2101_v54, %v2105_v55 }
 0x100   : > { %v600_v60 = vpop.permute.xlu0 %599  ;;  %v6824_v61 = vsel %vm709_vm12, 1.0, %v8743_v17 }
 0x101   : > { %v504_v62 = vpop.permute.xlu1 %503  ;;  %7172 = vmatmul.mubr.msk.f32.gmra.mrb[6].mxu0 %vm809_vm1, %v6824_v61  ;;  %v6938_v61 = vcombine.high %v2102_v56, %v2106_v58 }
 0x102   : > { %v678_v1 = vsel %vm445_vm0, %v504_v62, %v600_v60  ;;  %v6937_v60 = vcombine.low %v2102_v56, %v2106_v58  ;;  %v2109_v62 = vld [vmem:[%s14440_s6 + $0xc0] sm:$0xff]  ;;  %v9260_v58 = vld [vmem:[%s14440_s6 + $0x10] sm:$0xff] }
 0x103   : > { %vm710_vm13 = vcmp.eq.s32.totalorder %v8920_v11, %v678_v1  ;;  %v2110_v1 = vld [vmem:[%s14440_s6 + $0xc8] sm:$0xff]  ;;  %v9250_v56 = vld [vmem:[%s14437_s3] ss:$0 sm:$0xff] }
 0x104   : > { %v603_v3 = vpop.permute.xlu0 %602  ;;  %v6825_v4 = vsel %vm710_vm13, 1.0, %v8743_v17 }
 0x105   : > { %v507_v5 = vpop.permute.xlu1 %506  ;;  %7174 = vmatprep.mubr.msk.f32.mxu0 %vm809_vm1, %v6825_v4  ;;  %7235 = vmatmul.mubr.msk.bf16.gmra.mrb[32].mxu1 %vm1635_vm4, %v7372_v63  ;;  %v2113_v63 = vld [vmem:[%s14440_s6 + $0xe0] sm:$0xff] }
 0x106   : > { %v679_v6 = vsel %vm445_vm0, %v507_v5, %v603_v3  ;;  %7238 = vmatprep.mubr.msk.bf16.mxu1 %vm1635_vm4, %v7373_v2  ;;  %v6944_v2 = vcombine.high %v2109_v62, %v2113_v63  ;;  %v2114_v3 = vld [vmem:[%s14440_s6 + $0xe8] sm:$0xff]  ;;  %v6943_v4 = vcombine.low %v2109_v62, %v2113_v63  ;;  %v9277_v63 = vld [vmem:[%s14440_s6 + $0x38] sm:$0xff] }
 0x107   : > { %vm711_vm14 = vcmp.eq.s32.totalorder %v8920_v11, %v679_v6  ;;  %v6945_v5 = vcombine.low %v2110_v1, %v2114_v3  ;;  %v6946_v6 = vcombine.high %v2110_v1, %v2114_v3 }
 0x108   : > { %v606_v7 = vpop.permute.xlu0 %605  ;;  %v6826_v8 = vsel %vm711_vm14, 1.0, %v8743_v17 }
 0x109   : > { %v510_v9 = vpop.permute.xlu1 %509  ;;  %7175 = vmatmul.mubr.msk.f32.gmra.mrb[8].mxu0 %vm809_vm1, %v6826_v8  ;;  %v2121_v8 = vld [vmem:[%s14440_s6 + $0x120] sm:$0xff] }
 0x10a   : > { %v680_v13 = vsel %vm445_vm0, %v510_v9, %v606_v7  ;;  %v2117_v7 = vld [vmem:[%s14440_s6 + $0x100] sm:$0xff]  ;;  %v2118_v9 = vld [vmem:[%s14440_s6 + $0x108] sm:$0xff] }
 0x10b   : > { %vm712_vm15 = vcmp.eq.s32.totalorder %v8920_v11, %v680_v13  ;;  %v2122_v13 = vld [vmem:[%s14440_s6 + $0x128] sm:$0xff] }
 0x10c   : > { %v609_v15 = vpop.permute.xlu0 %608  ;;  %v6827_v16 = vsel %vm712_vm15, 1.0, %v8743_v17 }
 0x10d   : > { %v513_v18 = vpop.permute.xlu1 %512  ;;  %7177 = vmatprep.mubr.msk.f32.mxu0 %vm809_vm1, %v6827_v16  ;;  %7239 = vmatmul.mubr.msk.bf16.gmra.mrb[36].mxu1 %vm1635_vm4, %v7374_v12  ;;  %v6952_v12 = vcombine.high %v2117_v7, %v2121_v8  ;;  %v6954_v16 = vcombine.high %v2118_v9, %v2122_v13 }
 0x10e   : > { %v681_v19 = vsel %vm445_vm0, %v513_v18, %v609_v15  ;;  %7242 = vmatprep.mubr.msk.bf16.mxu1 %vm1635_vm4, %v7375_v14  ;;  %v6951_v14 = vcombine.low %v2117_v7, %v2121_v8  ;;  %v6953_v15 = vcombine.low %v2118_v9, %v2122_v13  ;;  %v2125_v18 = vld [vmem:[%s14440_s6 + $0x140] sm:$0xff] }
 0x10f   : > { %vm713_vm2 = vcmp.eq.s32.totalorder %v8920_v11, %v681_v19  ;;  %v2129_v19 = vld [vmem:[%s14440_s6 + $0x160] sm:$0xff] }
 0x110   : > { %v612_v20 = vpop.permute.xlu0 %611  ;;  %v6828_v21 = vsel %vm713_vm2, 1.0, %v8743_v17 }
 0x111   : > { %v516_v22 = vpop.permute.xlu1 %515  ;;  %7178 = vmatmul.mubr.msk.f32.gmra.mrb[10].mxu0 %vm809_vm1, %v6828_v21  ;;  %v6960_v21 = vcombine.high %v2125_v18, %v2129_v19 }
 0x112   : > { %v682_v24 = vsel %vm445_vm0, %v516_v22, %v612_v20  ;;  %v2126_v20 = vld [vmem:[%s14440_s6 + $0x148] sm:$0xff] }
 0x113   : > { %vm714_vm3 = vcmp.eq.s32.totalorder %v8920_v11, %v682_v24  ;;  %v2130_v22 = vld [vmem:[%s14440_s6 + $0x168] sm:$0xff] }
 0x114   : > { %v615_v26 = vpop.permute.xlu0 %614  ;;  %v6829_v27 = vsel %vm714_vm3, 1.0, %v8743_v17  ;;  %v6961_v24 = vcombine.low %v2126_v20, %v2130_v22 }
 0x115   : > { %v519_v28 = vpop.permute.xlu1 %518  ;;  %7180 = vmatprep.mubr.msk.f32.mxu0 %vm809_vm1, %v6829_v27  ;;  %7243 = vmatmul.mubr.msk.bf16.gmra.mrb[40].mxu1 %vm1635_vm4, %v7376_v23  ;;  %v6959_v23 = vcombine.low %v2125_v18, %v2129_v19  ;;  %v2137_v27 = vld [vmem:[%s14440_s6 + $0x1a0] sm:$0xff] }
 0x116   : > { %v683_v29 = vsel %vm445_vm0, %v519_v28, %v615_v26  ;;  %7246 = vmatprep.mubr.msk.bf16.mxu1 %vm1635_vm4, %v7377_v25  ;;  %v6962_v25 = vcombine.high %v2126_v20, %v2130_v22  ;;  %v2133_v26 = vld [vmem:[%s14440_s6 + $0x180] sm:$0xff]  ;;  %v2134_v28 = vld [vmem:[%s14440_s6 + $0x188] sm:$0xff] }
 0x117   : > { %vm715_vm5 = vcmp.eq.s32.totalorder %v8920_v11, %v683_v29  ;;  %v6968_v29 = vcombine.high %v2133_v26, %v2137_v27 }
 0x118   : > { %v618_v30 = vpop.permute.xlu0 %617  ;;  %v6830_v31 = vsel %vm715_vm5, 1.0, %v8743_v17 }
 0x119   : > { %v522_v32 = vpop.permute.xlu1 %521  ;;  %7181 = vmatmul.mubr.msk.f32.gmra.mrb[12].mxu0 %vm809_vm1, %v6830_v31  ;;  %v6967_v31 = vcombine.low %v2133_v26, %v2137_v27 }
 0x11a   : > { %v684_v34 = vsel %vm445_vm0, %v522_v32, %v618_v30  ;;  %v2138_v30 = vld [vmem:[%s14440_s6 + $0x1a8] sm:$0xff] }
 0x11b   : > { %vm716_vm6 = vcmp.eq.s32.totalorder %v8920_v11, %v684_v34  ;;  %v6969_v32 = vcombine.low %v2134_v28, %v2138_v30  ;;  %v2141_v34 = vld [vmem:[%s14440_s6 + $0x1c0] sm:$0xff] }
 0x11c   : > { %v621_v35 = vpop.permute.xlu0 %620  ;;  %v6831_v36 = vsel %vm716_vm6, 1.0, %v8743_v17 }
 0x11d   : > { %v525_v37 = vpop.permute.xlu1 %524  ;;  %7183 = vmatprep.mubr.msk.f32.mxu0 %vm809_vm1, %v6831_v36  ;;  %7247 = vmatmul.mubr.msk.bf16.gmra.mrb[44].mxu1 %vm1635_vm4, %v7378_v33  ;;  %v6970_v33 = vcombine.high %v2134_v28, %v2138_v30  ;;  %v2142_v36 = vld [vmem:[%s14440_s6 + $0x1c8] sm:$0xff] }
 0x11e   : > { %v685_v38 = vsel %vm445_vm0, %v525_v37, %v621_v35  ;;  %2736 = vmatprep.mubr.bf16.mxu1 %v14448_v0  ;;  %v2145_v35 = vld [vmem:[%s14440_s6 + $0x1e0] sm:$0xff]  ;;  %vm1131_vm0 = vcmask 64512  }
 0x11f   : > { %vm717_vm7 = vcmp.eq.s32.totalorder %v8920_v11, %v685_v38  ;;  %v2090_v11 = vld [vmem:[%s14440_s6 + $0x28] sm:$0xff]  ;;  %v6976_v37 = vcombine.high %v2141_v34, %v2145_v35 }
 0x120   : > { %v6832_v39 = vsel %vm717_vm7, 1.0, %v8743_v17  ;;  %v6919_v17 = vcombine.low %v2085_v40, %v2089_v41  ;;  %v6921_v44 = vcombine.low %v2086_v42, %v2090_v11  ;;  %v6922_v45 = vcombine.high %v2086_v42, %v2090_v11  ;;  %v2146_v38 = vld [vmem:[%s14440_s6 + $0x1e8] sm:$0xff] }
 0x121   : > { %7184 = vmatmul.mubr.msk.f32.gmra.mrb[14].mxu0 %vm809_vm1, %v6832_v39  ;;  %v6975_v39 = vcombine.low %v2141_v34, %v2145_v35  ;;  %v6977_v40 = vcombine.low %v2142_v36, %v2146_v38  ;;  %v6978_v41 = vcombine.high %v2142_v36, %v2146_v38  ;;  %v9348_v38 = vld [vmem:[%s14440_s6 + $0x78] sm:$0xff]  ;;  %vm5163_vm1 = vcmask 1043456  }
 0x122   : > { %2543 = vmatprep.mubr.bf16.mxu0 %v14448_v0  ;;  %2704 = vmatprep.subr.bf16.mxu1 %v6922_v45 }
 0x123   : > { %2512 = vmatpush1.bf16.msra.mxu0 %v6919_v17  ;;  %2705 = vmatpush1.bf16.msra.mxu1 %v6921_v44 }
 0x124   : > { %2513 = vmatprep.subr.bf16.mxu0 %v6928_v49  ;;  %2706 = vmatprep.subr.bf16.mxu1 %v6930_v53 }
 0x127   : > { %2514 = vmatpush1.bf16.msra.mxu0 %v6927_v51  ;;  %2707 = vmatpush1.bf16.msra.mxu1 %v6929_v52 }
 0x128   : > { %2515 = vmatprep.subr.bf16.mxu0 %v6936_v57  ;;  %2708 = vmatprep.subr.bf16.mxu1 %v6938_v61  ;;  %v9255_v57 = vld [vmem:[%s14439_s5] ss:$0 sm:$0xff] }
 0x12b   : > { %2516 = vmatpush1.bf16.msra.mxu0 %v6935_v59  ;;  %2709 = vmatpush1.bf16.msra.mxu1 %v6937_v60  ;;  %v9265_v59 = vld [vmem:[%s14440_s6 + $0x30] sm:$0xff]  ;;  %v9270_v60 = vld [vmem:[%s14440_s6 + $0x18] sm:$0xff] }
 0x12c   : > { %2517 = vmatprep.subr.bf16.mxu0 %v6944_v2  ;;  %2710 = vmatprep.subr.bf16.mxu1 %v6946_v6  ;;  %v6924_v62 = vcombine.high %v9260_v58, %v9265_v59  ;;  %v6926_v3 = vcombine.high %v9270_v60, %v9277_v63 }
 0x12f   : > { %2518 = vmatpush1.bf16.msra.mxu0 %v6943_v4  ;;  %2711 = vmatpush1.bf16.msra.mxu1 %v6945_v5 }
 0x130   : > { %2519 = vmatprep.subr.bf16.mxu0 %v6952_v12  ;;  %2712 = vmatprep.subr.bf16.mxu1 %v6954_v16 }
 0x133   : > { %2520 = vmatpush1.bf16.msra.mxu0 %v6951_v14  ;;  %2713 = vmatpush1.bf16.msra.mxu1 %v6953_v15 }
 0x134   : > { %2521 = vmatprep.subr.bf16.mxu0 %v6960_v21  ;;  %2714 = vmatprep.subr.bf16.mxu1 %v6962_v25 }
 0x137   : > { %2522 = vmatpush1.bf16.msra.mxu0 %v6959_v23  ;;  %2715 = vmatpush1.bf16.msra.mxu1 %v6961_v24 }
 0x138   : > { %2523 = vmatprep.subr.bf16.mxu0 %v6968_v29  ;;  %2716 = vmatprep.subr.bf16.mxu1 %v6970_v33 }
 0x13b   : > { %2524 = vmatpush1.bf16.msra.mxu0 %v6967_v31  ;;  %2717 = vmatpush1.bf16.msra.mxu1 %v6969_v32  ;;  %v9324_v31 = vld [vmem:[%s14440_s6 + $0x50] sm:$0xff] }
 0x13c   : > { %2525 = vmatprep.subr.bf16.mxu0 %v6976_v37  ;;  %2718 = vmatprep.subr.bf16.mxu1 %v6978_v41  ;;  %v9329_v32 = vld [vmem:[%s14440_s6 + $0x70] sm:$0xff]  ;;  %v9343_v37 = vld [vmem:[%s14440_s6 + $0x58] sm:$0xff] }
 0x13f   : > { %2526 = vmatpush1.bf16.msra.mxu0 %v6975_v39  ;;  %2719 = vmatpush1.bf16.msra.mxu1 %v6977_v40 }
 0x140   : > { %2897 = vmatprep.subr.bf16.mxu0 %v6924_v62  ;;  %3090 = vmatprep.subr.bf16.mxu1 %v6926_v3  ;;  %v9373_v3 = vld [vmem:[%s14440_s6 + $0xb0] sm:$0xff] }
 0x17f   : > { %v7188_v42 = vpop.f32.mrb[0].mxu1 }
 0x180   : > { %v1052_v43 = vpop.f32.mrb[1].mxu1  ;;  %v9288_v6 = vadd.f32 %v7188_v42, %v9250_v56 }
 0x181   : > { %v9295_v12 = vadd.f32 %v9250_v56, %v1052_v43 }
 0x182   : > { %14764 = vst [vmem:[#allocation18_spill] sm:$0xff] %v9288_v6  ;;  %v9311_v24 = vsel %vm1131_vm0, %v9288_v6, -inf }
 0x183   : > { %14765 = vst [vmem:[#allocation19_spill] sm:$0xff] %v9295_v12  ;;  %v9317_v27 = vsel %vm1131_vm0, %v9295_v12, -inf }
 0x184   : > { %v7191_v11 = vpop.f32.mrb[2].mxu1 }
 0x185   : > { %v1062_v17 = vpop.f32.mrb[3].mxu1  ;;  %v9335_v35 = vadd.f32 %v7191_v11, %v9250_v56 }
 0x186   : > { %v9338_v36 = vadd.f32 %v9250_v56, %v1062_v17 }
 0x18c   : > { %v9223_v44 = vpop.f32.mrb[4].mxu1 }
 0x18d   : > { %v9225_v45 = vpop.f32.mrb[5].mxu1 }
 0x18e   : > { %14753 = vst [vmem:[#allocation7_spill] sm:$0xff] %v9225_v45 }
 0x194   : > { %v9227_v46 = vpop.f32.mrb[6].mxu1 }
 0x195   : > { %14754 = vst [vmem:[#allocation8_spill] sm:$0xff] %v9227_v46  ;;  %v9229_v47 = vpop.f32.mrb[7].mxu1 }
 0x196   : > { %14755 = vst [vmem:[#allocation9_spill] sm:$0xff] %v9229_v47 }
 0x19c   : > { %v9231_v48 = vpop.f32.mrb[8].mxu1 }
 0x19d   : > { %14756 = vst [vmem:[#allocation10_spill] sm:$0xff] %v9231_v48  ;;  %v9233_v49 = vpop.f32.mrb[9].mxu1 }
 0x19e   : > { %14757 = vst [vmem:[#allocation11_spill] sm:$0xff] %v9233_v49 }
 0x1a4   : > { %v9235_v50 = vpop.f32.mrb[10].mxu1 }
 0x1a5   : > { %14758 = vst [vmem:[#allocation12_spill] sm:$0xff] %v9235_v50  ;;  %v9237_v51 = vpop.f32.mrb[11].mxu1 }
 0x1a6   : > { %14759 = vst [vmem:[#allocation13_spill] sm:$0xff] %v9237_v51 }
 0x1ac   : > { %v9239_v52 = vpop.f32.mrb[12].mxu1 }
 0x1ad   : > { %14760 = vst [vmem:[#allocation14_spill] sm:$0xff] %v9239_v52  ;;  %v9241_v53 = vpop.f32.mrb[13].mxu1 }
 0x1ae   : > { %14761 = vst [vmem:[#allocation15_spill] sm:$0xff] %v9241_v53 }
 0x1b4   : > { %v9243_v54 = vpop.f32.mrb[14].mxu1 }
 0x1b5   : > { %14762 = vst [vmem:[#allocation16_spill] sm:$0xff] %v9243_v54  ;;  %v9245_v55 = vpop.f32.mrb[15].mxu1  ;;  %v9475_v54 = vld [vmem:[%s14440_s6 + $0x118] sm:$0xff] }
 0x1b6   : > { %14763 = vst [vmem:[#allocation17_spill] sm:$0xff] %v9245_v55 }
 0x1b8   : > { %v7220_v61 = vpop.f32.mrb[16].mxu1 }
 0x1b9   : > { %v9280_v1 = vadd.f32 %v7220_v61, %v9255_v57  ;;  %v1718_v2 = vpop.f32.mrb[17].mxu1 }
 0x1ba   : > { %v9285_v4 = vadd.f32 %v9255_v57, %v1718_v2  ;;  %v7221_v5 = vpop.f32.mrb[18].mxu1  ;;  %v9368_v2 = vld [vmem:[%s14440_s6 + $0x90] sm:$0xff] }
 0x1bb   : > { %v1847_v7 = vsub.f32 0.0, %v9280_v1  ;;  %v9292_v8 = vadd.f32 %v7221_v5, %v9255_v57  ;;  %v1721_v9 = vpop.f32.mrb[19].mxu1 }
 0x1bc   : > { %v1845_v13 = vsub.f32 0.0, %v9285_v4  ;;  %v9299_v14 = vadd.f32 %v9255_v57, %v1721_v9  ;;  %v7164_v15 = vpop.f32.mrb[0].mxu0 }
 0x1bd   : > { %v1881_v16 = vmul.f32 1.442695, %v1847_v7  ;;  %v1848_v18 = vsub.f32 0.0, %v9292_v8  ;;  %v972_v19 = vpop.f32.mrb[1].mxu0  ;;  %v9303_v20 = vadd.f32 %v7164_v15, %v9250_v56 }
 0x1be   : > { %v1877_v21 = vmul.f32 1.442695, %v1845_v13  ;;  %v1846_v22 = vsub.f32 0.0, %v9299_v14  ;;  %v9307_v23 = vadd.f32 %v9250_v56, %v972_v19 }
 0x1bf   : > { %14766 = vst [vmem:[#allocation20_spill] sm:$0xff] %v9303_v20  ;;  %7395 = vpow2.f32 %v1881_v16  ;;  %v1883_v25 = vmul.f32 1.442695, %v1848_v18  ;;  %v1135_v26 = vsel %vm1131_vm0, %v9303_v20, -inf  ;;  %v9386_v16 = vld [vmem:[%s14440_s6 + $0x98] sm:$0xff] }
 0x1c0   : > { %14767 = vst [vmem:[#allocation21_spill] sm:$0xff] %v9307_v23  ;;  %7397 = vpow2.f32 %v1877_v21  ;;  %v1879_v28 = vmul.f32 1.442695, %v1846_v22  ;;  %1136 = vmax.xlane.f32.xlu0 %v1135_v26  ;;  %v1132_v29 = vsel %vm1131_vm0, %v9307_v23, -inf  ;;  %v7224_v30 = vpop.f32.mrb[20].mxu1  ;;  %v9391_v18 = vld [vmem:[%s14440_s6 + $0xb8] sm:$0xff] }
 0x1c1   : > { %7399 = vpow2.f32 %v1883_v25  ;;  %1133 = vmax.xlane.f32.xlu1 %v1132_v29  ;;  %v9332_v33 = vadd.f32 %v7224_v30, %v9255_v57  ;;  %v1734_v34 = vpop.f32.mrb[21].mxu1 }
 0x1c2   : > { %7401 = vpow2.f32 %v1879_v28  ;;  %v9351_v39 = vadd.f32 %v9255_v57, %v1734_v34  ;;  %v7225_v40 = vpop.f32.mrb[22].mxu1 }
 0x1c3   : > { %v1851_v43 = vsub.f32 0.0, %v9332_v33  ;;  %v9359_v11 = vadd.f32 %v7225_v40, %v9255_v57  ;;  %v1737_v17 = vpop.f32.mrb[23].mxu1  ;;  %v9408_v40 = vld [vmem:[%s14440_s6 + $0xd0] sm:$0xff] }
 0x1c4   : > { %v7167_v5 = vpop.f32.mrb[2].mxu0  ;;  %v1849_v7 = vsub.f32 0.0, %v9351_v39  ;;  %v9377_v9 = vadd.f32 %v9255_v57, %v1737_v17 }
 0x1c5   : > { %v982_v19 = vpop.f32.mrb[3].mxu0  ;;  %v9394_v21 = vadd.f32 %v7167_v5, %v9250_v56  ;;  %v1889_v22 = vmul.f32 1.442695, %v1851_v43  ;;  %v1852_v25 = vsub.f32 0.0, %v9359_v11  ;;  %v9413_v43 = vld [vmem:[%s14440_s6 + $0xf0] sm:$0xff] }
 0x1c6   : > { %v9400_v28 = vadd.f32 %v9250_v56, %v982_v19  ;;  %v1885_v29 = vmul.f32 1.442695, %v1849_v7  ;;  %v1850_v30 = vsub.f32 0.0, %v9377_v9  ;;  %v9422_v19 = vld [vmem:[%s14440_s6 + $0xd8] sm:$0xff] }
 0x1c7   : > { %14768 = vst [vmem:[#allocation22_spill] sm:$0xff] %v9394_v21  ;;  %v1141_v17 = vsel %vm1131_vm0, %v9394_v21, -inf  ;;  %7403 = vpow2.f32 %v1889_v22  ;;  %v1891_v5 = vmul.f32 1.442695, %v1852_v25 }
 0x1c8   : > { %14769 = vst [vmem:[#allocation23_spill] sm:$0xff] %v9400_v28  ;;  %1142 = vmax.xlane.f32.xlu1 %v1141_v17  ;;  %v1138_v34 = vsel %vm1131_vm0, %v9400_v28, -inf  ;;  %7405 = vpow2.f32 %v1885_v29  ;;  %v1887_v22 = vmul.f32 1.442695, %v1850_v30  ;;  %v7228_v25 = vpop.f32.mrb[24].mxu1 }
 0x1c9   : > { %v7396_v26 = vpop.eup %7395  ;;  %1139 = vmax.xlane.f32.xlu0 %v1138_v34  ;;  %7407 = vpow2.f32 %v1891_v5  ;;  %v9434_v13 = vadd.f32 %v7228_v25, %v9255_v57  ;;  %v1750_v61 = vpop.f32.mrb[25].mxu1 }
 0x1ca   : > { %v7398_v62 = vpop.eup %7397  ;;  %v1943_v29 = vadd.f32 1.0, %v7396_v26  ;;  %7409 = vpow2.f32 %v1887_v22  ;;  %v9441_v30 = vadd.f32 %v9255_v57, %v1750_v61  ;;  %v7229_v7 = vpop.f32.mrb[26].mxu1 }
 0x1cb   : > { %v7400_v5 = vpop.eup %7399  ;;  %v1941_v25 = vadd.f32 1.0, %v7398_v62  ;;  %v1855_v42 = vsub.f32 0.0, %v9434_v13  ;;  %v9447_v41 = vadd.f32 %v7229_v7, %v9255_v57  ;;  %v1753_v15 = vpop.f32.mrb[27].mxu1  ;;  %v9458_v62 = vld [vmem:[%s14440_s6 + $0x110] sm:$0xff] }
 0x1cc   : > { %v7402_v26 = vpop.eup %7401  ;;  %7411 = vrcp.f32 %v1943_v29  ;;  %v1944_v22 = vadd.f32 1.0, %v7400_v5  ;;  %v7170_v61 = vpop.f32.mrb[4].mxu0  ;;  %v1853_v0 = vsub.f32 0.0, %v9441_v30  ;;  %v9453_v12 = vadd.f32 %v9255_v57, %v1753_v15  ;;  %v9463_v7 = vld [vmem:[%s14440_s6 + $0x130] sm:$0xff] }
 0x1cd   : > { %7413 = vrcp.f32 %v1941_v25  ;;  %v1942_v34 = vadd.f32 1.0, %v7402_v26  ;;  %v992_v29 = vpop.f32.mrb[5].mxu0  ;;  %v9466_v5 = vadd.f32 %v7170_v61, %v9250_v56  ;;  %v1897_v17 = vmul.f32 1.442695, %v1855_v42  ;;  %v9480_v25 = vld [vmem:[%s14440_s6 + $0x138] sm:$0xff] }
 0x1ce   : > { %7415 = vrcp.f32 %v1944_v22  ;;  %v9469_v15 = vadd.f32 %v9250_v56, %v992_v29  ;;  %v1893_v6 = vmul.f32 1.442695, %v1853_v0  ;;  %v1856_v55 = vsub.f32 0.0, %v9447_v41 }
 0x1cf   : > { %14770 = vst [vmem:[#allocation24_spill] sm:$0xff] %v9466_v5  ;;  %7417 = vrcp.f32 %v1942_v34  ;;  %v1147_v42 = vsel %vm1131_vm0, %v9466_v5, -inf  ;;  %v1854_v26 = vsub.f32 0.0, %v9453_v12 }
 0x1d0   : > { %14771 = vst [vmem:[#allocation25_spill] sm:$0xff] %v9469_v15  ;;  %1148 = vmax.xlane.f32.xlu1 %v1147_v42  ;;  %v1144_v22 = vsel %vm1131_vm0, %v9469_v15, -inf  ;;  %7419 = vpow2.f32 %v1897_v17  ;;  %v1899_v61 = vmul.f32 1.442695, %v1856_v55  ;;  %v7232_v29 = vpop.f32.mrb[28].mxu1 }
 0x1d1   : > { %v7404_v52 = vpop.eup %7403  ;;  %1145 = vmax.xlane.f32.xlu0 %v1144_v22  ;;  %7421 = vpow2.f32 %v1893_v6  ;;  %v1895_v34 = vmul.f32 1.442695, %v1854_v26  ;;  %v9492_v51 = vadd.f32 %v7232_v29, %v9255_v57  ;;  %v1766_v50 = vpop.f32.mrb[29].mxu1 }
 0x1d2   : > { %v7406_v0 = vpop.eup %7405  ;;  %v1947_v5 = vadd.f32 1.0, %v7404_v52  ;;  %7423 = vpow2.f32 %v1899_v61  ;;  %v9497_v55 = vadd.f32 %v9255_v57, %v1766_v50  ;;  %v7233_v17 = vpop.f32.mrb[30].mxu1 }
 0x1d3   : > { %v7408_v22 = vpop.eup %7407  ;;  %v1945_v6 = vadd.f32 1.0, %v7406_v0  ;;  %7425 = vpow2.f32 %v1895_v34  ;;  %v1859_v26 = vsub.f32 0.0, %v9492_v51  ;;  %v9503_v29 = vadd.f32 %v7233_v17, %v9255_v57  ;;  %v1769_v15 = vpop.f32.mrb[31].mxu1 }
 0x1d4   : > { %v7410_v42 = vpop.eup %7409  ;;  %7427 = vrcp.f32 %v1947_v5  ;;  %v1948_v52 = vadd.f32 1.0, %v7408_v22  ;;  %v7173_v61 = vpop.f32.mrb[6].mxu0  ;;  %v1857_v50 = vsub.f32 0.0, %v9497_v55  ;;  %v9507_v49 = vadd.f32 %v9255_v57, %v1769_v15 }
 0x1d5   : > { %7429 = vrcp.f32 %v1945_v6  ;;  %v1946_v53 = vadd.f32 1.0, %v7410_v42  ;;  %v1002_v48 = vpop.f32.mrb[7].mxu0  ;;  %v9510_v0 = vadd.f32 %v7173_v61, %v9250_v56  ;;  %v1905_v34 = vmul.f32 1.442695, %v1859_v26  ;;  %v9523_v6 = vld [vmem:[%s14440_s6 + $0x150] sm:$0xff] }
 0x1d6   : > { %v7412_v28 = vpop.eup %7411  ;;  %7431 = vrcp.f32 %v1948_v52  ;;  %v9513_v17 = vadd.f32 %v9250_v56, %v1002_v48  ;;  %v1901_v5 = vmul.f32 1.442695, %v1857_v50  ;;  %v1860_v22 = vsub.f32 0.0, %v9503_v29  ;;  %v9528_v48 = vld [vmem:[%s14440_s6 + $0x170] sm:$0xff] }
 0x1d7   : > { %14772 = vst [vmem:[#allocation26_spill] sm:$0xff] %v9510_v0  ;;  %v7414_v21 = vpop.eup %7413  ;;  %v2039_v23 = vmul.f32 %v7412_v28, %v9280_v1  ;;  %7433 = vrcp.f32 %v1946_v53  ;;  %v1153_v15 = vsel %vm1131_vm0, %v9510_v0, -inf  ;;  %v1858_v42 = vsub.f32 0.0, %v9507_v49 }
 0x1d8   : > { %14773 = vst [vmem:[#allocation27_spill] sm:$0xff] %v9513_v17  ;;  %v7416_v26 = vpop.eup %7415  ;;  %v2037_v52 = vmul.f32 %v7414_v21, %v9285_v4  ;;  %1154 = vmax.xlane.f32.xlu1 %v1153_v15  ;;  %v1150_v53 = vsel %vm1131_vm0, %v9513_v17, -inf  ;;  %7435 = vpow2.f32 %v1905_v34  ;;  %v1907_v1 = vmul.f32 1.442695, %v1860_v22  ;;  %v7236_v28 = vpop.f32.mrb[32].mxu1 }
 0x1d9   : > { %v7418_v61 = vpop.eup %7417  ;;  %v2040_v50 = vmul.f32 %v7416_v26, %v9292_v8  ;;  %1151 = vmax.xlane.f32.xlu0 %v1150_v53  ;;  %7437 = vpow2.f32 %v1901_v5  ;;  %v1903_v0 = vmul.f32 1.442695, %v1858_v42  ;;  %v9535_v20 = vadd.f32 %v7236_v28, %v9255_v57  ;;  %v1782_v47 = vpop.f32.mrb[33].mxu1 }
 0x1da   : > { %v7420_v46 = vpop.eup %7419  ;;  %v2038_v4 = vmul.f32 %v7418_v61, %v9299_v14  ;;  %7439 = vpow2.f32 %v1907_v1  ;;  %v9539_v21 = vadd.f32 %v9255_v57, %v1782_v47  ;;  %v7237_v34 = vpop.f32.mrb[34].mxu1 }
 0x1db   : > { %v7422_v15 = vpop.eup %7421  ;;  %v1951_v8 = vadd.f32 1.0, %v7420_v46  ;;  %v9543_v26 = vpack.c.bf16 %v2040_v50, %v2039_v23  ;;  %7441 = vpow2.f32 %v1903_v0  ;;  %v1863_v5 = vsub.f32 0.0, %v9535_v20  ;;  %v1785_v42 = vpop.f32.mrb[35].mxu1 }
 0x1dc   : > { %v7424_v53 = vpop.eup %7423  ;;  %v9546_v28 = vpack.c.bf16 %v2038_v4, %v2037_v52  ;;  %v1949_v14 = vadd.f32 1.0, %v7422_v15  ;;  %v7176_v1 = vpop.f32.mrb[8].mxu0  ;;  %v1861_v47 = vsub.f32 0.0, %v9539_v21  ;;  %v9550_v61 = vadd.f32 %v7237_v34, %v9255_v57 }
 0x1dd   : > { %v7426_v17 = vpop.eup %7425  ;;  %7443 = vrcp.f32 %v1951_v8  ;;  %v1952_v22 = vadd.f32 1.0, %v7424_v53  ;;  %v1012_v46 = vpop.f32.mrb[9].mxu0  ;;  %v9553_v23 = vadd.f32 %v7176_v1, %v9250_v56  ;;  %v1913_v0 = vmul.f32 1.442695, %v1863_v5 }
 0x1de   : > { %v7428_v50 = vpop.eup %7427  ;;  %7445 = vrcp.f32 %v1949_v14  ;;  %v1950_v45 = vadd.f32 1.0, %v7426_v17  ;;  %2544 = vmatmul.mubr.bf16.vlgmr.msra.gmra.mrb[16].mxu0 %v9546_v28  ;;  %2737 = vmatmul.mubr.bf16.vlgmr.msra.gmra.mrb[48].mxu1 %v9546_v28  ;;  %v9558_v52 = vadd.f32 %v9250_v56, %v1012_v46  ;;  %v1909_v4 = vmul.f32 1.442695, %v1861_v47 }
 0x1df   : > { %14774 = vst [vmem:[#allocation28_spill] sm:$0xff] %v9553_v23  ;;  %v7430_v34 = vpop.eup %7429  ;;  %v2043_v15 = vmul.f32 %v7428_v50, %v9332_v33  ;;  %7447 = vrcp.f32 %v1952_v22  ;;  %v1159_v8 = vsel %vm1131_vm0, %v9553_v23, -inf  ;;  %v14775_v53 = vmov 0  }
 0x1e0   : > { %2553 = vmatprep.mubr.bf16.mxu0 %v14775_v53  ;;  %2746 = vmatprep.mubr.bf16.mxu1 %v14775_v53  ;;  %v1864_v17 = vsub.f32 0.0, %v9550_v61  ;;  %v7432_v5 = vpop.eup %7431  ;;  %v2041_v14 = vmul.f32 %v7430_v34, %v9351_v39  ;;  %7449 = vrcp.f32 %v1950_v45  ;;  %v1156_v1 = vsel %vm1131_vm0, %v9558_v52, -inf  ;;  %v7240_v22 = vpop.f32.mrb[36].mxu1 }
 0x1e1   : > { %1160 = vmax.xlane.f32.xlu1 %v1159_v8  ;;  %v9570_v33 = vadd.f32 %v9255_v57, %v1785_v42  ;;  %v14776_v47 = vcombine.low %v9260_v58, %v9265_v59  ;;  %v7434_v46 = vpop.eup %7433  ;;  %v2044_v50 = vmul.f32 %v7432_v5, %v9359_v11  ;;  %1157 = vmax.xlane.f32.xlu0 %v1156_v1  ;;  %7451 = vpow2.f32 %v1913_v0  ;;  %v1798_v39 = vpop.f32.mrb[37].mxu1 }
 0x1e2   : > { %v1915_v23 = vmul.f32 1.442695, %v1864_v17  ;;  %v9577_v45 = vadd.f32 %v7240_v22, %v9255_v57  ;;  %v14777_v34 = vcombine.low %v9270_v60, %v9277_v63  ;;  %v7436_v42 = vpop.eup %7435  ;;  %v2042_v8 = vmul.f32 %v7434_v46, %v9377_v9  ;;  %v7241_v11 = vpop.f32.mrb[38].mxu1 }
 0x1e3   : > { %2898 = vmatpush1.bf16.msra.mxu0 %v14776_v47  ;;  %7453 = vpow2.f32 %v1909_v4  ;;  %v1862_v58 = vsub.f32 0.0, %v9570_v33  ;;  %v9585_v59 = vadd.f32 %v9255_v57, %v1798_v39  ;;  %v14778_v0 = vcombine.high %v9324_v31, %v9329_v32  ;;  %v7438_v60 = vpop.eup %7437  ;;  %v1801_v4 = vpop.f32.mrb[39].mxu1 }
 0x1e4   : > { %3091 = vmatpush1.bf16.msra.mxu1 %v14777_v34  ;;  %v14779_v17 = vcombine.high %v9343_v37, %v9348_v38  ;;  %v1955_v63 = vadd.f32 1.0, %v7436_v42  ;;  %v9593_v5 = vpack.c.bf16 %v2044_v50, %v2043_v15  ;;  %7455 = vpow2.f32 %v1915_v23  ;;  %v7440_v1 = vpop.eup %7439  ;;  %v7179_v22 = vpop.f32.mrb[10].mxu0 }
 0x1e5   : > { %2899 = vmatprep.subr.bf16.mxu0 %v14778_v0  ;;  %v1867_v9 = vsub.f32 0.0, %v9577_v45  ;;  %v1953_v47 = vadd.f32 1.0, %v7438_v60  ;;  %v9596_v46 = vpack.c.bf16 %v2042_v8, %v2041_v14  ;;  %v1911_v39 = vmul.f32 1.442695, %v1862_v58  ;;  %v1022_v42 = vpop.f32.mrb[11].mxu0 }
 0x1e6   : > { %3092 = vmatprep.subr.bf16.mxu1 %v14779_v17  ;;  %v1865_v34 = vsub.f32 0.0, %v9585_v59  ;;  %v14780_v0 = vcombine.low %v9324_v31, %v9329_v32  ;;  %v7442_v17 = vpop.eup %7441  ;;  %v9603_v15 = vadd.f32 %v7179_v22, %v9250_v56  ;;  %7457 = vrcp.f32 %v1955_v63  ;;  %2554 = vmatmul.mubr.bf16.gmra.mrb[20].mxu0 %v9543_v26 }
 0x1e7   : > { %v1956_v23 = vadd.f32 1.0, %v7440_v1  ;;  %v1921_v50 = vmul.f32 1.442695, %v1867_v9  ;;  %v14781_v60 = vcombine.low %v9343_v37, %v9348_v38  ;;  %v14782_v14 = vcombine.high %v9368_v2, %v9373_v3  ;;  %2747 = vmatmul.mubr.bf16.gmra.mrb[52].mxu1 %v9543_v26  ;;  %v7444_v58 = vpop.eup %7443  ;;  %2563 = vmatprep.mubr.bf16.mxu0 %v14775_v53 }
 0x1e8   : > { %2900 = vmatpush1.bf16.msra.mxu0 %v14780_v0  ;;  %v9614_v31 = vadd.f32 %v9250_v56, %v1022_v42  ;;  %7459 = vrcp.f32 %v1953_v47  ;;  %v1954_v32 = vadd.f32 1.0, %v7442_v17  ;;  %v1917_v8 = vmul.f32 1.442695, %v1865_v34  ;;  %2756 = vmatprep.mubr.bf16.mxu1 %v14775_v53  ;;  %v7446_v9 = vpop.eup %7445  ;;  %v7244_v47 = vpop.f32.mrb[40].mxu1 }
 0x1e9   : > { %3093 = vmatpush1.bf16.msra.mxu1 %v14781_v60  ;;  %2901 = vmatprep.subr.bf16.mxu0 %v14782_v14  ;;  %v1165_v63 = vsel %vm1131_vm0, %v9603_v15, -inf  ;;  %7461 = vrcp.f32 %v1956_v23  ;;  %v9621_v37 = vadd.f32 %v7241_v11, %v9255_v57  ;;  %v9624_v38 = vadd.f32 %v9255_v57, %v1801_v4  ;;  %v7448_v0 = vpop.eup %7447  ;;  %v1814_v42 = vpop.f32.mrb[41].mxu1 }
 0x1ea   : > { %v2047_v1 = vmul.f32 %v7444_v58, %v9434_v13  ;;  %1166 = vmax.xlane.f32.xlu1 %v1165_v63  ;;  %v1162_v22 = vsel %vm1131_vm0, %v9614_v31, -inf  ;;  %7463 = vrcp.f32 %v1954_v32  ;;  %v14783_v34 = vcombine.high %v9386_v16, %v9391_v18  ;;  %v7450_v60 = vpop.eup %7449 }
 0x1eb   : > { %v6964_v11 = vcombine.high %v9523_v6, %v9528_v48  ;;  %v2045_v4 = vmul.f32 %v7446_v9, %v9441_v30  ;;  %1163 = vmax.xlane.f32.xlu0 %v1162_v22  ;;  %7465 = vpow2.f32 %v1911_v39  ;;  %v1868_v13 = vsub.f32 0.0, %v9621_v37  ;;  %v7245_v39 = vpop.f32.mrb[42].mxu1 }
 0x1ec   : > { %3094 = vmatprep.subr.bf16.mxu1 %v14783_v34  ;;  %v1866_v17 = vsub.f32 0.0, %v9624_v38  ;;  %v14784_v23 = vcombine.low %v9368_v2, %v9373_v3  ;;  %v2048_v14 = vmul.f32 %v7448_v0, %v9447_v41  ;;  %7467 = vpow2.f32 %v1921_v50  ;;  %v7452_v2 = vpop.eup %7451  ;;  %v1817_v9 = vpop.f32.mrb[43].mxu1 }
 0x1ed   : > { %v9642_v32 = vadd.f32 %v7244_v47, %v9255_v57  ;;  %v9645_v30 = vadd.f32 %v9255_v57, %v1814_v42  ;;  %v14785_v58 = vcombine.low %v9386_v16, %v9391_v18  ;;  %v14786_v63 = vcombine.high %v9408_v40, %v9413_v43  ;;  %v7454_v47 = vpop.eup %7453  ;;  %v7182_v34 = vpop.f32.mrb[12].mxu0 }
 0x1ee   : > { %2902 = vmatpush1.bf16.msra.mxu0 %v14784_v23  ;;  %v2046_v3 = vmul.f32 %v7450_v60, %v9453_v12  ;;  %7469 = vpow2.f32 %v1917_v8  ;;  %v1923_v41 = vmul.f32 1.442695, %v1868_v13  ;;  %v1919_v50 = vmul.f32 1.442695, %v1866_v17  ;;  %v7456_v23 = vpop.eup %7455 }
 0x1ef   : > { %3095 = vmatpush1.bf16.msra.mxu1 %v14785_v58  ;;  %2903 = vmatprep.subr.bf16.mxu0 %v14786_v63  ;;  %v14787_v22 = vcombine.high %v9422_v19, %v9427_v10  ;;  %v1959_v0 = vadd.f32 1.0, %v7452_v2  ;;  %v9657_v16 = vpack.c.bf16 %v2048_v14, %v2047_v1  ;;  %v1871_v18 = vsub.f32 0.0, %v9642_v32  ;;  %v1032_v58 = vpop.f32.mrb[13].mxu0 }
 0x1f0   : > { %v1869_v42 = vsub.f32 0.0, %v9645_v30  ;;  %v9662_v12 = vadd.f32 %v7182_v34, %v9250_v56  ;;  %v1957_v8 = vadd.f32 1.0, %v7454_v47  ;;  %v9664_v13 = vpack.c.bf16 %v2046_v3, %v2045_v4  ;;  %2564 = vmatmul.mubr.bf16.gmra.mrb[24].mxu0 %v9596_v46  ;;  %2757 = vmatmul.mubr.bf16.gmra.mrb[56].mxu1 %v9596_v46  ;;  %v7458_v63 = vpop.eup %7457  ;;  %v7248_v47 = vpop.f32.mrb[44].mxu1 }
 0x1f1   : > { %3096 = vmatprep.subr.bf16.mxu1 %v14787_v22  ;;  %7471 = vpow2.f32 %v1923_v41  ;;  %v14788_v17 = vcombine.low %v9408_v40, %v9413_v43  ;;  %v9672_v1 = vadd.f32 %v9250_v56, %v1032_v58  ;;  %v1960_v60 = vadd.f32 1.0, %v7456_v23  ;;  %2573 = vmatprep.mubr.bf16.mxu0 %v14775_v53 }
 0x1f2   : > { %7473 = vrcp.f32 %v1959_v0  ;;  %v1929_v14 = vmul.f32 1.442695, %v1871_v18  ;;  %v1171_v4 = vsel %vm1131_vm0, %v9662_v12, -inf  ;;  %2766 = vmatprep.mubr.bf16.mxu1 %v14775_v53  ;;  %v1925_v40 = vmul.f32 1.442695, %v1869_v42  ;;  %v7460_v2 = vpop.eup %7459  ;;  %v1830_v42 = vpop.f32.mrb[45].mxu1 }
 0x1f3   : > { %2904 = vmatpush1.bf16.msra.mxu0 %v14788_v17  ;;  %7475 = vrcp.f32 %v1957_v8  ;;  %v9679_v43 = vadd.f32 %v7245_v39, %v9255_v57  ;;  %v2051_v3 = vmul.f32 %v7458_v63, %v9492_v51  ;;  %1172 = vmax.xlane.f32.xlu1 %v1171_v4  ;;  %v1168_v41 = vsel %vm1131_vm0, %v9672_v1, -inf  ;;  %v7462_v0 = vpop.eup %7461 }
 0x1f4   : > { %7477 = vrcp.f32 %v1960_v60  ;;  %v9685_v22 = vadd.f32 %v9255_v57, %v1817_v9  ;;  %v14789_v34 = vcombine.low %v9422_v19, %v9427_v10  ;;  %v2049_v39 = vmul.f32 %v7460_v2, %v9497_v55  ;;  %1169 = vmax.xlane.f32.xlu0 %v1168_v41  ;;  %v7464_v23 = vpop.eup %7463  ;;  %v7249_v55 = vpop.f32.mrb[46].mxu1 }
 0x1f5   : > { %7479 = vpow2.f32 %v1919_v50  ;;  %v1872_v51 = vsub.f32 0.0, %v9679_v43  ;;  %v9693_v18 = vadd.f32 %v7248_v47, %v9255_v57  ;;  %v14790_v9 = vcombine.high %v9458_v62, %v9463_v7  ;;  %v7466_v17 = vpop.eup %7465  ;;  %v1833_v63 = vpop.f32.mrb[47].mxu1 }
 0x1f6   : > { %3097 = vmatpush1.bf16.msra.mxu1 %v14789_v34  ;;  %v2052_v58 = vmul.f32 %v7462_v0, %v9503_v29  ;;  %7481 = vpow2.f32 %v1929_v14  ;;  %v1870_v10 = vsub.f32 0.0, %v9685_v22  ;;  %v9701_v19 = vadd.f32 %v9255_v57, %v1830_v42  ;;  %v7468_v4 = vpop.eup %7467  ;;  %v7185_v2 = vpop.f32.mrb[14].mxu0 }
 0x1f7   : > { %2905 = vmatprep.subr.bf16.mxu0 %v14790_v9  ;;  %v14791_v50 = vcombine.high %v9475_v54, %v9480_v25  ;;  %v14792_v8 = vcombine.low %v9458_v62, %v9463_v7  ;;  %v2050_v60 = vmul.f32 %v7464_v23, %v9507_v49  ;;  %7483 = vpow2.f32 %v1925_v40  ;;  %v1042_v40 = vpop.f32.mrb[15].mxu0 }
 0x1f8   : > { %v1931_v29 = vmul.f32 1.442695, %v1872_v51  ;;  %v1875_v14 = vsub.f32 0.0, %v9693_v18  ;;  %v1958_v41 = vadd.f32 1.0, %v7466_v17  ;;  %v9714_v47 = vpack.c.bf16 %v2052_v58, %v2051_v3  ;;  %v7470_v7 = vpop.eup %7469  ;;  %2574 = vmatmul.mubr.bf16.gmra.mrb[28].mxu0 %v9593_v5  ;;  %2767 = vmatmul.mubr.bf16.gmra.mrb[60].mxu1 %v9593_v5 }
 0x1f9   : > { %3098 = vmatprep.subr.bf16.mxu1 %v14791_v50  ;;  %2906 = vmatpush1.bf16.msra.mxu0 %v14792_v8  ;;  %v1927_v34 = vmul.f32 1.442695, %v1870_v10  ;;  %v1873_v62 = vsub.f32 0.0, %v9701_v19  ;;  %v14793_v49 = vcombine.low %v9475_v54, %v9480_v25  ;;  %v9721_v0 = vadd.f32 %v7185_v2, %v9250_v56  ;;  %v2128_v25 = vld [vmem:[%s14440_s6 + $0x158] sm:$0xff] }
 0x1fa   : > { %2907 = vmatprep.subr.bf16.mxu0 %v6964_v11  ;;  %v1963_v51 = vadd.f32 1.0, %v7468_v4  ;;  %v9723_v42 = vpack.c.bf16 %v2050_v60, %v2049_v39  ;;  %7485 = vpow2.f32 %v1931_v29  ;;  %v9728_v11 = vadd.f32 %v9250_v56, %v1042_v40  ;;  %v2132_v39 = vld [vmem:[%s14440_s6 + $0x178] sm:$0xff]  ;;  %2583 = vmatprep.mubr.bf16.mxu0 %v14775_v53 }
 0x1fb   : > { %3099 = vmatpush1.bf16.msra.mxu1 %v14793_v49  ;;  %7487 = vrcp.f32 %v1958_v41  ;;  %v1961_v3 = vadd.f32 1.0, %v7470_v7  ;;  %v1937_v54 = vmul.f32 1.442695, %v1875_v14  ;;  %v7472_v9 = vpop.eup %7471  ;;  %v1177_v23 = vsel %vm1131_vm0, %v9721_v0, -inf  ;;  %2776 = vmatprep.mubr.bf16.mxu1 %v14775_v53  ;;  %v2135_v41 = vld [vmem:[%s14440_s6 + $0x190] sm:$0xff]  ;;  %v2136_v40 = vld [vmem:[%s14440_s6 + $0x198] sm:$0xff] }
 0x1fc   : > { %7489 = vrcp.f32 %v1963_v51  ;;  %v1933_v58 = vmul.f32 1.442695, %v1873_v62  ;;  %v9741_v10 = vadd.f32 %v7249_v55, %v9255_v57  ;;  %v7474_v50 = vpop.eup %7473  ;;  %1178 = vmax.xlane.f32.xlu1 %v1177_v23  ;;  %v1174_v8 = vsel %vm1131_vm0, %v9728_v11, -inf  ;;  %v2140_v51 = vld [vmem:[%s14440_s6 + $0x1b8] sm:$0xff] }
 0x1fd   : > { %7491 = vrcp.f32 %v1961_v3  ;;  %v1964_v17 = vadd.f32 1.0, %v7472_v9  ;;  %v9746_v60 = vadd.f32 %v9255_v57, %v1833_v63  ;;  %v14794_v29 = vcombine.low %v9523_v6, %v9528_v48  ;;  %v7476_v14 = vpop.eup %7475  ;;  %1175 = vmax.xlane.f32.xlu0 %v1174_v8  ;;  %v2139_v57 = vld [vmem:[%s14440_s6 + $0x1b0] sm:$0xff]  ;;  %v9787_v9 = vld [vmem:[%s14440_s6 + $0x1d8] sm:$0xff] }
 0x1fe   : > { %v2055_v4 = vmul.f32 %v7474_v50, %v9535_v20  ;;  %7493 = vpow2.f32 %v1927_v34  ;;  %v1876_v55 = vsub.f32 0.0, %v9741_v10  ;;  %v6965_v2 = vcombine.low %v2128_v25, %v2132_v39  ;;  %v7478_v63 = vpop.eup %7477  ;;  %v9776_v3 = vld [vmem:[%s14440_s6 + $0x1d0] sm:$0xff]  ;;  %v9792_v23 = vld [vmem:[%s14440_s6 + $0x1f8] sm:$0xff] }
 0x1ff   : > { %2908 = vmatpush1.bf16.msra.mxu0 %v14794_v29  ;;  %v1189_v6 = vsel %vm1131_vm0, %v9335_v35, -inf  ;;  %7495 = vrcp.f32 %v1964_v17  ;;  %v1874_v20 = vsub.f32 0.0, %v9746_v60  ;;  %v6966_v48 = vcombine.high %v2128_v25, %v2132_v39  ;;  %v7480_v34 = vpop.eup %7479  ;;  %v9782_v39 = vld [vmem:[%s14440_s6 + $0x1f0] sm:$0xff] }
 0x200   : > { %v2056_v62 = vmul.f32 %v7478_v63, %v9550_v61  ;;  %v9765_v49 = vadd.f32 %v9223_v44, %v9250_v56  ;;  %7497 = vpow2.f32 %v1937_v54  ;;  %v1939_v7 = vmul.f32 1.442695, %v1876_v55  ;;  %v7482_v61 = vpop.eup %7481  ;;  %1184 = vmax.xlane.f32.xlu1 %v9311_v24  ;;  %2584 = vmatmul.mubr.bf16.gmra.mrb[32].mxu0 %v9664_v13 }
 0x201   : > { %v1962_v44 = vadd.f32 1.0, %v7480_v34  ;;  %7499 = vpow2.f32 %v1933_v58  ;;  %3100 = vmatprep.subr.bf16.mxu1 %v6966_v48  ;;  %v6971_v54 = vcombine.low %v2135_v41, %v2139_v57  ;;  %v6972_v25 = vcombine.high %v2135_v41, %v2139_v57  ;;  %v7484_v24 = vpop.eup %7483  ;;  %1181 = vmax.xlane.f32.xlu0 %v9317_v27 }
 0x202   : > { %v1967_v58 = vadd.f32 1.0, %v7482_v61  ;;  %v9795_v50 = vpack.c.bf16 %v2056_v62, %v2055_v4  ;;  %7501 = vpow2.f32 %v1939_v7  ;;  %v1935_v8 = vmul.f32 1.442695, %v1874_v20  ;;  %3101 = vmatpush1.bf16.msra.mxu1 %v6965_v2  ;;  %2593 = vmatprep.mubr.bf16.mxu0 %v14775_v53  ;;  %v14795_v20 = vld [vmem:[#allocation7_spill] sm:$0xff] }
 0x203   : > { %2777 = vmatmul.mubr.bf16.gmra.mrb[64].mxu1 %v9664_v13  ;;  %7503 = vrcp.f32 %v1962_v44  ;;  %v1965_v17 = vadd.f32 1.0, %v7484_v24  ;;  %v6973_v29 = vcombine.low %v2136_v40, %v2140_v51  ;;  %v6974_v55 = vcombine.high %v2136_v40, %v2140_v51  ;;  %2909 = vmatprep.subr.bf16.mxu0 %v6972_v25  ;;  %v14796_v40 = vld [vmem:[#allocation8_spill] sm:$0xff]  ;;  %v14797_v25 = vld [vmem:[#allocation9_spill] sm:$0xff] }
 0x204   : > { %v7486_v41 = vpop.eup %7485  ;;  %v2053_v57 = vmul.f32 %v7476_v14, %v9539_v21  ;;  %2786 = vmatprep.mubr.bf16.mxu1 %v14775_v53  ;;  %7505 = vrcp.f32 %v1967_v58  ;;  %v6980_v27 = vcombine.high %v9776_v3, %v9782_v39  ;;  %v6982_v4 = vcombine.high %v9787_v9, %v9792_v23  ;;  %1190 = vmax.xlane.f32.xlu1 %v1189_v6 }
 0x205   : > { %v7488_v2 = vpop.eup %7487  ;;  %v1186_v63 = vsel %vm1131_vm0, %v9338_v36, -inf  ;;  %v9810_v48 = vadd.f32 %v9250_v56, %v14795_v20  ;;  %7507 = vrcp.f32 %v1965_v17  ;;  %v1968_v21 = vadd.f32 1.0, %v7486_v41  ;;  %3102 = vmatprep.subr.bf16.mxu1 %v6974_v55  ;;  %2910 = vmatpush1.bf16.msra.mxu0 %v6971_v54 }
 0x206   : > { %v7490_v14 = vpop.eup %7489  ;;  %v2054_v34 = vmul.f32 %v7488_v2, %v9570_v33  ;;  %1187 = vmax.xlane.f32.xlu0 %v1186_v63  ;;  %7509 = vpow2.f32 %v1935_v8  ;;  %3103 = vmatpush1.bf16.msra.mxu1 %v6973_v29  ;;  %v1195_v7 = vsel %vm1131_vm0, %v9765_v49, -inf  ;;  %v9817_v51 = vadd.f32 %v14796_v40, %v9250_v56 }
 0x207   : > { %v7492_v62 = vpop.eup %7491  ;;  %7511 = vrcp.f32 %v1968_v21  ;;  %v2059_v61 = vmul.f32 %v7490_v14, %v9577_v45  ;;  %2911 = vmatprep.subr.bf16.mxu0 %v6980_v27  ;;  %3104 = vmatprep.subr.bf16.mxu1 %v6982_v4  ;;  %v1192_v54 = vsel %vm1131_vm0, %v9810_v48, -inf  ;;  %v9826_v24 = vadd.f32 %v9250_v56, %v14797_v25 }
 0x208   : > { %v7494_v6 = vpop.eup %7493  ;;  %v9820_v44 = vpack.c.bf16 %v2054_v34, %v2053_v57  ;;  %1196 = vmax.xlane.f32.xlu1 %v1195_v7  ;;  %v6979_v8 = vcombine.low %v9776_v3, %v9782_v39  ;;  %v6981_v29 = vcombine.low %v9787_v9, %v9792_v23  ;;  %2594 = vmatmul.mubr.bf16.gmra.mrb[36].mxu0 %v9657_v16  ;;  %v1201_v57 = vsel %vm1131_vm0, %v9817_v51, -inf }
 0x209   : > { %v7496_v33 = vpop.eup %7495  ;;  %v1966_v58 = vadd.f32 1.0, %v7494_v6  ;;  %v2057_v3 = vmul.f32 %v7492_v62, %v9585_v59  ;;  %2603 = vmatprep.mubr.bf16.mxu0 %v14775_v53  ;;  %v1198_v23 = vsel %vm1131_vm0, %v9826_v24, -inf }
 0x20a   : > { %v7498_v17 = vpop.eup %7497  ;;  %1193 = vmax.xlane.f32.xlu0 %v1192_v54  ;;  %v2060_v45 = vmul.f32 %v7496_v33, %v9621_v37  ;;  %2912 = vmatpush1.bf16.msra.mxu0 %v6979_v8 }
 0x20b   : > { %v7500_v55 = vpop.eup %7499  ;;  %2787 = vmatmul.mubr.bf16.gmra.mrb[68].mxu1 %v9657_v16  ;;  %7513 = vrcp.f32 %v1966_v58  ;;  %v1971_v41 = vadd.f32 1.0, %v7498_v17 }
 0x20c   : > { %v7502_v56 = vpop.eup %7501  ;;  %2796 = vmatprep.mubr.bf16.mxu1 %v14775_v53  ;;  %v1969_v37 = vadd.f32 1.0, %v7500_v55  ;;  %v9840_v39 = vpack.c.bf16 %v2060_v45, %v2059_v61  ;;  %1202 = vmax.xlane.f32.xlu1 %v1201_v57 }
 0x20d   : > { %v7504_v9 = vpop.eup %7503  ;;  %7515 = vrcp.f32 %v1971_v41  ;;  %v1972_v27 = vadd.f32 1.0, %v7502_v56  ;;  %3105 = vmatpush1.bf16.msra.mxu1 %v6981_v29  ;;  %v14798_v29 = vld [vmem:[#allocation20_spill] sm:$0xff]  ;;  %v14799_v56 = vld [vmem:[#allocation21_spill] sm:$0xff] }
 0x20e   : > { %v7506_v4 = vpop.eup %7505  ;;  %1199 = vmax.xlane.f32.xlu0 %v1198_v23  ;;  %v2058_v2 = vmul.f32 %v7504_v9, %v9624_v38  ;;  %7517 = vrcp.f32 %v1969_v37  ;;  %v14800_v23 = vld [vmem:[#allocation22_spill] sm:$0xff] }
 0x20f   : > { %v7508_v59 = vpop.eup %7507  ;;  %7519 = vrcp.f32 %v1972_v27  ;;  %v2063_v20 = vmul.f32 %v7506_v4, %v9642_v32 }
 0x210   : > { %v7510_v63 = vpop.eup %7509  ;;  %v9846_v21 = vpack.c.bf16 %v2058_v2, %v2057_v3  ;;  %2604 = vmatmul.mubr.bf16.gmra.mrb[40].mxu0 %v9723_v42  ;;  %v2061_v38 = vmul.f32 %v7508_v59, %v9645_v30  ;;  %v14801_v2 = vld [vmem:[#allocation23_spill] sm:$0xff] }
 0x211   : > { %v7512_v14 = vpop.eup %7511  ;;  %v1970_v34 = vadd.f32 1.0, %v7510_v63  ;;  %2613 = vmatprep.mubr.bf16.mxu0 %v14775_v53 }
 0x212   : > { %v2064_v62 = vmul.f32 %v7512_v14, %v9679_v43 }
 0x213   : > { %2797 = vmatmul.mubr.bf16.gmra.mrb[72].mxu1 %v9723_v42  ;;  %7521 = vrcp.f32 %v1970_v34 }
 0x214   : > { %2806 = vmatprep.mubr.bf16.mxu1 %v14775_v53  ;;  %v9854_v6 = vpack.c.bf16 %v2064_v62, %v2063_v20 }
 0x215   : > { %v7514_v32 = vpop.eup %7513 }
 0x216   : > { %v2062_v7 = vmul.f32 %v7514_v32, %v9685_v22 }
 0x217   : > { %v7516_v40 = vpop.eup %7515 }
 0x218   : > { %v7518_v61 = vpop.eup %7517  ;;  %v2067_v43 = vmul.f32 %v7516_v40, %v9693_v18  ;;  %v9858_v33 = vpack.c.bf16 %v2062_v7, %v2061_v38  ;;  %2614 = vmatmul.mubr.bf16.gmra.mrb[44].mxu0 %v9714_v47  ;;  %v9924_v40 = vld [vmem:[%s14437_s3] ss:$0 sm:$0xff] }
 0x219   : > { %v7520_v54 = vpop.eup %7519  ;;  %2623 = vmatprep.mubr.bf16.mxu0 %v14775_v53  ;;  %v2065_v30 = vmul.f32 %v7518_v61, %v9701_v19  ;;  %v5091_v19 = vld [vmem:[%s14444_s10] sm:$0xff]  ;;  %v14802_v61 = vld [vmem:[#allocation10_spill] sm:$0xff] }
 0x21a   : > { %v2068_v25 = vmul.f32 %v7520_v54, %v9741_v10  ;;  %v5092_v10 = vld [vmem:[%s14444_s10 + $0x8] sm:$0xff]  ;;  %v6983_v14 = vcombine.low %v5091_v19, %v5091_v19  ;;  %v14803_v54 = vld [vmem:[#allocation11_spill] sm:$0xff] }
 0x21b   : > { %2807 = vmatmul.mubr.bf16.gmra.mrb[76].mxu1 %v9714_v47  ;;  %v6986_v17 = vcombine.high %v5092_v10, %v5092_v10  ;;  %v6985_v34 = vcombine.low %v5092_v10, %v5092_v10 }
 0x21c   : > { %2816 = vmatprep.mubr.bf16.mxu1 %v14775_v53  ;;  %v9866_v22 = vpack.c.bf16 %v2068_v25, %v2067_v43  ;;  %v9928_v43 = vadd.f32 %v9924_v40, %v14802_v61  ;;  %v9932_v25 = vadd.f32 %v9924_v40, %v14803_v54  ;;  %v5165_v10 = vsel %vm5163_vm1, %v6983_v14, 0  ;;  %v14809_v14 = vld [vmem:[#allocation27_spill] sm:$0xff] }
 0x21d   : > { %v7522_v58 = vpop.eup %7521  ;;  %7008 = vmatprep.subr.msk.bf16.mxu1 %vm5163_vm1, %v6986_v17  ;;  %v14805_v17 = vld [vmem:[#allocation25_spill] sm:$0xff] }
 0x21e   : > { %v2066_v18 = vmul.f32 %v7522_v58, %v9746_v60  ;;  %v6984_v60 = vcombine.high %v5091_v19, %v5091_v19 }
 0x220   : > { %v9869_v8 = vpack.c.bf16 %v2066_v18, %v2065_v30  ;;  %2624 = vmatmul.mubr.bf16.gmra.mrb[48].mxu0 %v9820_v44  ;;  %6991 = vmatprep.subr.msk.bf16.mxu0 %vm5163_vm1, %v6984_v60  ;;  %v14804_v30 = vld [vmem:[#allocation24_spill] sm:$0xff]  ;;  %v5171_v60 = vsel %vm5163_vm1, %v6985_v34, 0 }
 0x221   : > { %2633 = vmatprep.mubr.bf16.mxu0 %v14775_v53 }
 0x223   : > { %2817 = vmatmul.mubr.bf16.gmra.mrb[80].mxu1 %v9820_v44 }
 0x224   : > { %2826 = vmatprep.mubr.bf16.mxu1 %v14775_v53 }
 0x228   : > { %2634 = vmatmul.mubr.bf16.gmra.mrb[52].mxu0 %v9795_v50 }
 0x229   : > { %2643 = vmatprep.mubr.bf16.mxu0 %v14775_v53 }
 0x22b   : > { %2827 = vmatmul.mubr.bf16.gmra.mrb[84].mxu1 %v9795_v50 }
 0x22c   : > { %2836 = vmatprep.mubr.bf16.mxu1 %v14775_v53 }
 0x230   : > { %2644 = vmatmul.mubr.bf16.gmra.mrb[56].mxu0 %v9846_v21 }
 0x231   : > { %2653 = vmatprep.mubr.bf16.mxu0 %v14775_v53 }
 0x233   : > { %2837 = vmatmul.mubr.bf16.gmra.mrb[88].mxu1 %v9846_v21 }
 0x234   : > { %2846 = vmatprep.mubr.bf16.mxu1 %v14775_v53 }
 0x238   : > { %2654 = vmatmul.mubr.bf16.gmra.mrb[60].mxu0 %v9840_v39 }
 0x239   : > { %2663 = vmatprep.mubr.bf16.mxu0 %v14775_v53 }
 0x23b   : > { %2847 = vmatmul.mubr.bf16.gmra.mrb[92].mxu1 %v9840_v39 }
 0x23c   : > { %2856 = vmatprep.mubr.bf16.mxu1 %v14775_v53 }
 0x240   : > { %2664 = vmatmul.mubr.bf16.gmra.mrb[64].mxu0 %v9858_v33 }
 0x241   : > { %2673 = vmatprep.mubr.bf16.mxu0 %v14775_v53 }
 0x243   : > { %2857 = vmatmul.mubr.bf16.gmra.mrb[96].mxu1 %v9858_v33 }
 0x244   : > { %2866 = vmatprep.mubr.bf16.mxu1 %v14775_v53 }
 0x248   : > { %2674 = vmatmul.mubr.bf16.gmra.mrb[68].mxu0 %v9854_v6 }
 0x249   : > { %2683 = vmatprep.mubr.bf16.mxu0 %v14775_v53 }
 0x24b   : > { %2867 = vmatmul.mubr.bf16.gmra.mrb[100].mxu1 %v9854_v6 }
 0x24c   : > { %2876 = vmatprep.mubr.bf16.mxu1 %v14775_v53 }
 0x24d   : > { %v1137_v45 = vpop.xlane.xlu0 %1136 }
 0x24e   : > { %v1229_v55 = vsub.f32 %v14798_v29, %v1137_v45  ;;  %v1134_v41 = vpop.xlane.xlu1 %1133 }
 0x24f   : > { %v1228_v57 = vsub.f32 %v14799_v56, %v1134_v41  ;;  %v1207_v41 = vsel %vm1131_vm0, %v9928_v43, -inf  ;;  %v1204_v56 = vsel %vm1131_vm0, %v9932_v25, -inf }
 0x250   : > { %2684 = vmatmul.mubr.bf16.gmra.mrb[72].mxu0 %v9869_v8  ;;  %v1262_v3 = vmul.f32 1.442695, %v1229_v55 }
 0x251   : > { %2693 = vmatprep.mubr.bf16.mxu0 %v14775_v53  ;;  %v1260_v37 = vmul.f32 1.442695, %v1228_v57 }
 0x252   : > { %7523 = vpow2.f32 %v1262_v3 }
 0x253   : > { %2877 = vmatmul.mubr.bf16.gmra.mrb[104].mxu1 %v9869_v8  ;;  %7525 = vpow2.f32 %v1260_v37 }
 0x254   : > { %2886 = vmatprep.mubr.bf16.mxu1 %v14775_v53 }
 0x255   : > { %v1143_v9 = vpop.xlane.xlu1 %1142 }
 0x256   : > { %v1231_v27 = vsub.f32 %v14800_v23, %v1143_v9  ;;  %v1140_v4 = vpop.xlane.xlu0 %1139  ;;  %v14806_v9 = vld [vmem:[#allocation12_spill] sm:$0xff] }
 0x257   : > { %v1230_v59 = vsub.f32 %v14801_v2, %v1140_v4  ;;  %v9956_v23 = vadd.f32 %v9924_v40, %v14806_v9 }
 0x258   : > { %2694 = vmatmul.mubr.bf16.gmra.mrb[76].mxu0 %v9866_v22  ;;  %v1266_v63 = vmul.f32 1.442695, %v1231_v27  ;;  %v14807_v27 = vld [vmem:[#allocation26_spill] sm:$0xff] }
 0x259   : > { %2929 = vmatprep.mubr.bf16.mxu0 %v14775_v53  ;;  %v1264_v20 = vmul.f32 1.442695, %v1230_v59  ;;  %v1213_v61 = vsel %vm1131_vm0, %v9956_v23, -inf }
 0x25a   : > { %7527 = vpow2.f32 %v1266_v63  ;;  %v14808_v63 = vld [vmem:[#allocation13_spill] sm:$0xff] }
 0x25b   : > { %2887 = vmatmul.mubr.bf16.gmra.mrb[108].mxu1 %v9866_v22  ;;  %7529 = vpow2.f32 %v1264_v20  ;;  %v9964_v20 = vadd.f32 %v9924_v40, %v14808_v63 }
 0x25c   : > { %3122 = vmatprep.mubr.bf16.mxu1 %v14775_v53  ;;  %v9915_v62 = vpop.eup %7523 }
 0x25d   : > { %v9917_v38 = vpop.eup %7525  ;;  %v1149_v32 = vpop.xlane.xlu1 %1148  ;;  %v1327_v7 = vsel %vm1131_vm0, %v9915_v62, 0.0  ;;  %v1210_v54 = vsel %vm1131_vm0, %v9964_v20, -inf }
 0x25e   : > { %v1233_v58 = vsub.f32 %v14804_v30, %v1149_v32  ;;  %1328 = vadd.xlane.f32.xlu1 %v1327_v7  ;;  %v1146_v18 = vpop.xlane.xlu0 %1145  ;;  %v1324_v19 = vsel %vm1131_vm0, %v9917_v38, 0.0 }
 0x25f   : > { %v1232_v45 = vsub.f32 %v14805_v17, %v1146_v18  ;;  %1325 = vadd.xlane.f32.xlu0 %v1324_v19 }
 0x260   : > { %2930 = vmatmul.mubr.bf16.vlgmr.msra.gmra.mrb[80].mxu0 %v9546_v28  ;;  %v1270_v29 = vmul.f32 1.442695, %v1233_v58  ;;  %v14810_v58 = vld [vmem:[#allocation14_spill] sm:$0xff] }
 0x261   : > { %2939 = vmatprep.mubr.bf16.mxu0 %v14775_v53  ;;  %v1268_v55 = vmul.f32 1.442695, %v1232_v45  ;;  %5189 = vmatpush1.bf16.msra.mxu0 %v5165_v10  ;;  %v9980_v18 = vadd.f32 %v9924_v40, %v14810_v58  ;;  %v14812_v45 = vld [vmem:[#allocation28_spill] sm:$0xff] }
 0x262   : > { %7531 = vpow2.f32 %v1270_v29  ;;  %1208 = vmax.xlane.f32.xlu1 %v1207_v41 }
 0x263   : > { %3123 = vmatmul.mubr.bf16.vlgmr.msra.gmra.mrb[112].mxu1 %v9546_v28  ;;  %7533 = vpow2.f32 %v1268_v55  ;;  %1205 = vmax.xlane.f32.xlu0 %v1204_v56  ;;  %v1219_v9 = vsel %vm1131_vm0, %v9980_v18, -inf }
 0x264   : > { %3132 = vmatprep.mubr.bf16.mxu1 %v14775_v53  ;;  %5382 = vmatpush1.bf16.msra.mxu1 %v5171_v60  ;;  %v9948_v28 = vpop.eup %7527  ;;  %v14811_v60 = vld [vmem:[#allocation15_spill] sm:$0xff] }
 0x265   : > { %v9950_v57 = vpop.eup %7529  ;;  %v1155_v3 = vpop.xlane.xlu1 %1154  ;;  %v1333_v37 = vsel %vm1131_vm0, %v9948_v28, 0.0  ;;  %v9986_v17 = vadd.f32 %v9924_v40, %v14811_v60 }
 0x266   : > { %v1235_v4 = vsub.f32 %v14807_v27, %v1155_v3  ;;  %1334 = vadd.xlane.f32.xlu1 %v1333_v37  ;;  %v1152_v2 = vpop.xlane.xlu0 %1151  ;;  %v1330_v59 = vsel %vm1131_vm0, %v9950_v57, 0.0 }
 0x267   : > { %v1234_v34 = vsub.f32 %v14809_v14, %v1152_v2  ;;  %1331 = vadd.xlane.f32.xlu0 %v1330_v59  ;;  %v1216_v27 = vsel %vm1131_vm0, %v9986_v17, -inf  ;;  %v14814_v14 = vld [vmem:[#allocation17_spill] sm:$0xff] }
 0x268   : > { %2940 = vmatmul.mubr.bf16.gmra.mrb[84].mxu0 %v9543_v26  ;;  %v1274_v32 = vmul.f32 1.442695, %v1235_v4  ;;  %v14813_v4 = vld [vmem:[#allocation16_spill] sm:$0xff] }
 0x269   : > { %2949 = vmatprep.mubr.bf16.mxu0 %v14775_v53  ;;  %v1272_v7 = vmul.f32 1.442695, %v1234_v34  ;;  %v10006_v2 = vadd.f32 %v9924_v40, %v14813_v4  ;;  %v10012_v34 = vadd.f32 %v9924_v40, %v14814_v14 }
 0x26a   : > { %7535 = vpow2.f32 %v1274_v32  ;;  %1214 = vmax.xlane.f32.xlu1 %v1213_v61 }
 0x26b   : > { %3133 = vmatmul.mubr.bf16.gmra.mrb[116].mxu1 %v9543_v26  ;;  %7537 = vpow2.f32 %v1272_v7  ;;  %1211 = vmax.xlane.f32.xlu0 %v1210_v54 }
 0x26c   : > { %3142 = vmatprep.mubr.bf16.mxu1 %v14775_v53  ;;  %v9974_v30 = vpop.eup %7531 }
 0x26d   : > { %v9976_v26 = vpop.eup %7533  ;;  %v1339_v10 = vsel %vm1131_vm0, %v9974_v30, 0.0 }
 0x26e   : > { %v1161_v19 = vpop.xlane.xlu1 %1160  ;;  %1340 = vadd.xlane.f32.xlu1 %v1339_v10  ;;  %v1158_v55 = vpop.xlane.xlu0 %1157  ;;  %v1336_v41 = vsel %vm1131_vm0, %v9976_v26, 0.0 }
 0x26f   : > { %v1237_v29 = vsub.f32 %v14812_v45, %v1161_v19  ;;  %v1236_v56 = vsub.f32 %v9558_v52, %v1158_v55  ;;  %1337 = vadd.xlane.f32.xlu0 %v1336_v41  ;;  %v1222_v19 = vsel %vm1131_vm0, %v10012_v34, -inf }
 0x270   : > { %2950 = vmatmul.mubr.bf16.gmra.mrb[88].mxu0 %v9596_v46 }
 0x271   : > { %v1278_v3 = vmul.f32 1.442695, %v1237_v29  ;;  %2959 = vmatprep.mubr.bf16.mxu0 %v14775_v53  ;;  %v1276_v37 = vmul.f32 1.442695, %v1236_v56 }
 0x272   : > { %1220 = vmax.xlane.f32.xlu1 %v1219_v9 }
 0x273   : > { %3143 = vmatmul.mubr.bf16.gmra.mrb[120].mxu1 %v9596_v46  ;;  %7539 = vpow2.f32 %v1278_v3  ;;  %1217 = vmax.xlane.f32.xlu0 %v1216_v27 }
 0x274   : > { %3152 = vmatprep.mubr.bf16.mxu1 %v14775_v53  ;;  %7541 = vpow2.f32 %v1276_v37  ;;  %v10000_v52 = vpop.eup %7535 }
 0x275   : > { %v10002_v46 = vpop.eup %7537  ;;  %v1345_v63 = vsel %vm1131_vm0, %v10000_v52, 0.0 }
 0x276   : > { %1346 = vadd.xlane.f32.xlu1 %v1345_v63  ;;  %v1342_v61 = vsel %vm1131_vm0, %v10002_v46, 0.0 }
 0x277   : > { %v1167_v59 = vpop.xlane.xlu1 %1166  ;;  %1343 = vadd.xlane.f32.xlu0 %v1342_v61 }
 0x278   : > { %v1239_v32 = vsub.f32 %v9603_v15, %v1167_v59  ;;  %v1164_v7 = vpop.xlane.xlu0 %1163  ;;  %2960 = vmatmul.mubr.bf16.gmra.mrb[92].mxu0 %v9593_v5  ;;  %v1225_v15 = vsel %vm1131_vm0, %v10006_v2, -inf }
 0x279   : > { %v1238_v54 = vsub.f32 %v9614_v31, %v1164_v7  ;;  %2969 = vmatprep.mubr.bf16.mxu0 %v14775_v53 }
 0x27a   : > { %v1282_v58 = vmul.f32 1.442695, %v1239_v32  ;;  %1226 = vmax.xlane.f32.xlu1 %v1225_v15 }
 0x27b   : > { %3153 = vmatmul.mubr.bf16.gmra.mrb[124].mxu1 %v9593_v5  ;;  %v1280_v40 = vmul.f32 1.442695, %v1238_v54  ;;  %1223 = vmax.xlane.f32.xlu0 %v1222_v19  ;;  %v14816_v54 = vld [vmem:[#allocation19_spill] sm:$0xff] }
 0x27c   : > { %3162 = vmatprep.mubr.bf16.mxu1 %v14775_v53  ;;  %7543 = vpow2.f32 %v1282_v58 }
 0x27d   : > { %7545 = vpow2.f32 %v1280_v40  ;;  %v10026_v31 = vpop.eup %7539 }
 0x27e   : > { %v10028_v5 = vpop.eup %7541  ;;  %v1351_v60 = vsel %vm1131_vm0, %v10026_v31, 0.0 }
 0x27f   : > { %1352 = vadd.xlane.f32.xlu1 %v1351_v60  ;;  %v1348_v55 = vsel %vm1131_vm0, %v10028_v5, 0.0 }
 0x280   : > { %v1173_v10 = vpop.xlane.xlu1 %1172  ;;  %2970 = vmatmul.mubr.bf16.gmra.mrb[96].mxu0 %v9664_v13  ;;  %1349 = vadd.xlane.f32.xlu0 %v1348_v55 }
 0x281   : > { %v1241_v45 = vsub.f32 %v9662_v12, %v1173_v10  ;;  %v1170_v29 = vpop.xlane.xlu0 %1169  ;;  %2979 = vmatprep.mubr.bf16.mxu0 %v14775_v53 }
 0x282   : > { %v1240_v41 = vsub.f32 %v9672_v1, %v1170_v29 }
 0x283   : > { %3163 = vmatmul.mubr.bf16.gmra.mrb[128].mxu1 %v9664_v13  ;;  %v1286_v56 = vmul.f32 1.442695, %v1241_v45 }
 0x284   : > { %3172 = vmatprep.mubr.bf16.mxu1 %v14775_v53  ;;  %v1284_v3 = vmul.f32 1.442695, %v1240_v41 }
 0x285   : > { %7547 = vpow2.f32 %v1286_v56 }
 0x286   : > { %7549 = vpow2.f32 %v1284_v3  ;;  %v10040_v12 = vpop.eup %7543 }
 0x287   : > { %v10042_v37 = vpop.eup %7545  ;;  %v1357_v27 = vsel %vm1131_vm0, %v10040_v12, 0.0 }
 0x288   : > { %1358 = vadd.xlane.f32.xlu1 %v1357_v27  ;;  %2980 = vmatmul.mubr.bf16.gmra.mrb[100].mxu0 %v9657_v16  ;;  %v1354_v4 = vsel %vm1131_vm0, %v10042_v37, 0.0 }
 0x289   : > { %v1179_v9 = vpop.xlane.xlu1 %1178  ;;  %1355 = vadd.xlane.f32.xlu0 %v1354_v4  ;;  %2989 = vmatprep.mubr.bf16.mxu0 %v14775_v53 }
 0x28a   : > { %v1243_v1 = vsub.f32 %v9721_v0, %v1179_v9  ;;  %v1176_v13 = vpop.xlane.xlu0 %1175  ;;  %v14815_v0 = vld [vmem:[#allocation18_spill] sm:$0xff] }
 0x28b   : > { %v1242_v59 = vsub.f32 %v9728_v11, %v1176_v13  ;;  %3173 = vmatmul.mubr.bf16.gmra.mrb[132].mxu1 %v9657_v16 }
 0x28c   : > { %v1290_v63 = vmul.f32 1.442695, %v1243_v1  ;;  %3182 = vmatprep.mubr.bf16.mxu1 %v14775_v53 }
 0x28d   : > { %v1288_v14 = vmul.f32 1.442695, %v1242_v59  ;;  %v1185_v32 = vpop.xlane.xlu1 %1184 }
 0x28e   : > { %7551 = vpow2.f32 %v1290_v63  ;;  %v1245_v7 = vsub.f32 %v14815_v0, %v1185_v32  ;;  %v1182_v61 = vpop.xlane.xlu0 %1181 }
 0x28f   : > { %7553 = vpow2.f32 %v1288_v14  ;;  %v1244_v58 = vsub.f32 %v14816_v54, %v1182_v61  ;;  %v10056_v40 = vpop.eup %7547 }
 0x290   : > { %v1294_v11 = vmul.f32 1.442695, %v1245_v7  ;;  %v10058_v15 = vpop.eup %7549  ;;  %v1363_v10 = vsel %vm1131_vm0, %v10056_v40, 0.0  ;;  %2990 = vmatmul.mubr.bf16.gmra.mrb[104].mxu0 %v9723_v42 }
 0x291   : > { %v1292_v16 = vmul.f32 1.442695, %v1244_v58  ;;  %v1191_v19 = vpop.xlane.xlu1 %1190  ;;  %1364 = vadd.xlane.f32.xlu1 %v1363_v10  ;;  %v1360_v29 = vsel %vm1131_vm0, %v10058_v15, 0.0  ;;  %2999 = vmatprep.mubr.bf16.mxu0 %v14775_v53 }
 0x292   : > { %7555 = vpow2.f32 %v1294_v11  ;;  %v1247_v60 = vsub.f32 %v9335_v35, %v1191_v19  ;;  %1361 = vadd.xlane.f32.xlu0 %v1360_v29 }
 0x293   : > { %v1188_v45 = vpop.xlane.xlu0 %1187  ;;  %7557 = vpow2.f32 %v1292_v16  ;;  %3183 = vmatmul.mubr.bf16.gmra.mrb[136].mxu1 %v9723_v42 }
 0x294   : > { %v1246_v55 = vsub.f32 %v9338_v36, %v1188_v45  ;;  %v1298_v41 = vmul.f32 1.442695, %v1247_v60  ;;  %3192 = vmatprep.mubr.bf16.mxu1 %v14775_v53 }
 0x295   : > { %v1197_v35 = vpop.xlane.xlu1 %1196 }
 0x296   : > { %v1296_v56 = vmul.f32 1.442695, %v1246_v55  ;;  %7559 = vpow2.f32 %v1298_v41  ;;  %v1249_v3 = vsub.f32 %v9765_v49, %v1197_v35 }
 0x297   : > { %v1194_v9 = vpop.xlane.xlu0 %1193 }
 0x298   : > { %7561 = vpow2.f32 %v1296_v56  ;;  %v1248_v27 = vsub.f32 %v9810_v48, %v1194_v9  ;;  %v10072_v1 = vpop.eup %7551  ;;  %v1302_v36 = vmul.f32 1.442695, %v1249_v3  ;;  %3000 = vmatmul.mubr.bf16.gmra.mrb[108].mxu0 %v9714_v47 }
 0x299   : > { %v10074_v13 = vpop.eup %7553  ;;  %v1203_v4 = vpop.xlane.xlu1 %1202  ;;  %v1369_v59 = vsel %vm1131_vm0, %v10072_v1, 0.0  ;;  %3009 = vmatprep.mubr.bf16.mxu0 %v14775_v53 }
 0x29a   : > { %v1300_v42 = vmul.f32 1.442695, %v1248_v27  ;;  %7563 = vpow2.f32 %v1302_v36  ;;  %v1251_v63 = vsub.f32 %v9817_v51, %v1203_v4  ;;  %1370 = vadd.xlane.f32.xlu1 %v1369_v59  ;;  %v1366_v49 = vsel %vm1131_vm0, %v10074_v13, 0.0 }
 0x29b   : > { %v1200_v14 = vpop.xlane.xlu0 %1199  ;;  %3193 = vmatmul.mubr.bf16.gmra.mrb[140].mxu1 %v9714_v47  ;;  %1367 = vadd.xlane.f32.xlu0 %v1366_v49 }
 0x29c   : > { %7565 = vpow2.f32 %v1300_v42  ;;  %v1250_v48 = vsub.f32 %v9826_v24, %v1200_v14  ;;  %v10084_v32 = vpop.eup %7555  ;;  %v1306_v0 = vmul.f32 1.442695, %v1251_v63  ;;  %3202 = vmatprep.mubr.bf16.mxu1 %v14775_v53 }
 0x29d   : > { %v10088_v51 = vpop.eup %7557  ;;  %v1375_v61 = vsel %vm1131_vm0, %v10084_v32, 0.0 }
 0x29e   : > { %v1304_v7 = vmul.f32 1.442695, %v1250_v48  ;;  %7567 = vpow2.f32 %v1306_v0  ;;  %1376 = vadd.xlane.f32.xlu1 %v1375_v61  ;;  %v1372_v24 = vsel %vm1131_vm0, %v10088_v51, 0.0 }
 0x29f   : > { %1373 = vadd.xlane.f32.xlu0 %v1372_v24 }
 0x2a0   : > { %7569 = vpow2.f32 %v1304_v7  ;;  %v10094_v47 = vpop.eup %7559  ;;  %3010 = vmatmul.mubr.bf16.gmra.mrb[112].mxu0 %v9820_v44 }
 0x2a1   : > { %v1381_v58 = vsel %vm1131_vm0, %v10094_v47, 0.0  ;;  %3019 = vmatprep.mubr.bf16.mxu0 %v14775_v53 }
 0x2a2   : > { %v10096_v54 = vpop.eup %7561  ;;  %1382 = vadd.xlane.f32.xlu1 %v1381_v58 }
 0x2a3   : > { %v1378_v11 = vsel %vm1131_vm0, %v10096_v54, 0.0  ;;  %3203 = vmatmul.mubr.bf16.gmra.mrb[144].mxu1 %v9820_v44 }
 0x2a4   : > { %1379 = vadd.xlane.f32.xlu0 %v1378_v11  ;;  %v10104_v16 = vpop.eup %7563  ;;  %3212 = vmatprep.mubr.bf16.mxu1 %v14775_v53 }
 0x2a5   : > { %v1387_v10 = vsel %vm1131_vm0, %v10104_v16, 0.0 }
 0x2a6   : > { %v10108_v19 = vpop.eup %7565  ;;  %1388 = vadd.xlane.f32.xlu1 %v1387_v10 }
 0x2a7   : > { %v1384_v60 = vsel %vm1131_vm0, %v10108_v19, 0.0 }
 0x2a8   : > { %1385 = vadd.xlane.f32.xlu0 %v1384_v60  ;;  %v10114_v45 = vpop.eup %7567  ;;  %3020 = vmatmul.mubr.bf16.gmra.mrb[116].mxu0 %v9795_v50 }
 0x2a9   : > { %14817 = vst [vmem:[#allocation7_spill] sm:$0xff] %v10114_v45  ;;  %v1393_v29 = vsel %vm1131_vm0, %v10114_v45, 0.0  ;;  %3029 = vmatprep.mubr.bf16.mxu0 %v14775_v53 }
 0x2aa   : > { %v10116_v44 = vpop.eup %7569  ;;  %1394 = vadd.xlane.f32.xlu1 %v1393_v29 }
 0x2ab   : > { %14818 = vst [vmem:[#allocation8_spill] sm:$0xff] %v10116_v44  ;;  %v1390_v55 = vsel %vm1131_vm0, %v10116_v44, 0.0  ;;  %3213 = vmatmul.mubr.bf16.gmra.mrb[148].mxu1 %v9795_v50 }
 0x2ac   : > { %1391 = vadd.xlane.f32.xlu0 %v1390_v55  ;;  %3222 = vmatprep.mubr.bf16.mxu1 %v14775_v53 }
 0x2b0   : > { %3030 = vmatmul.mubr.bf16.gmra.mrb[120].mxu0 %v9846_v21 }
 0x2b1   : > { %3039 = vmatprep.mubr.bf16.mxu0 %v14775_v53  ;;  %v10130_v41 = vpop.f32.mrb[16].mxu0  ;;  %v10132_v56 = vpop.f32.mrb[48].mxu1 }
 0x2b2   : > { %v10134_v35 = vpop.f32.mrb[17].mxu0  ;;  %v10136_v50 = vpop.f32.mrb[49].mxu1 }
 0x2b3   : > { %3223 = vmatmul.mubr.bf16.gmra.mrb[152].mxu1 %v9846_v21  ;;  %v10138_v3 = vpop.f32.mrb[18].mxu0  ;;  %v10140_v9 = vpop.f32.mrb[50].mxu1 }
 0x2b4   : > { %3232 = vmatprep.mubr.bf16.mxu1 %v14775_v53  ;;  %v10142_v27 = vpop.f32.mrb[19].mxu0  ;;  %v10144_v36 = vpop.f32.mrb[51].mxu1 }
 0x2b8   : > { %3040 = vmatmul.mubr.bf16.gmra.mrb[124].mxu0 %v9840_v39 }
 0x2b9   : > { %3049 = vmatprep.mubr.bf16.mxu0 %v14775_v53  ;;  %v10150_v21 = vpop.f32.mrb[20].mxu0 }
 0x2ba   : > { %v10152_v42 = vpop.f32.mrb[52].mxu1  ;;  %v10154_v4 = vpop.f32.mrb[21].mxu0 }
 0x2bb   : > { %3233 = vmatmul.mubr.bf16.gmra.mrb[156].mxu1 %v9840_v39  ;;  %v10156_v59 = vpop.f32.mrb[53].mxu1  ;;  %v10158_v63 = vpop.f32.mrb[22].mxu0 }
 0x2bc   : > { %3242 = vmatprep.mubr.bf16.mxu1 %v14775_v53  ;;  %v10160_v14 = vpop.f32.mrb[54].mxu1  ;;  %v10162_v49 = vpop.f32.mrb[23].mxu0 }
 0x2bd   : > { %v10164_v48 = vpop.f32.mrb[55].mxu1 }
 0x2c0   : > { %3050 = vmatmul.mubr.bf16.gmra.mrb[128].mxu0 %v9858_v33 }
 0x2c1   : > { %3059 = vmatprep.mubr.bf16.mxu0 %v14775_v53 }
 0x2c3   : > { %3243 = vmatmul.mubr.bf16.gmra.mrb[160].mxu1 %v9858_v33  ;;  %v10170_v39 = vpop.f32.mrb[24].mxu0  ;;  %v10172_v0 = vpop.f32.mrb[56].mxu1 }
 0x2c4   : > { %3252 = vmatprep.mubr.bf16.mxu1 %v14775_v53  ;;  %v10174_v7 = vpop.f32.mrb[25].mxu0  ;;  %v10176_v61 = vpop.f32.mrb[57].mxu1 }
 0x2c5   : > { %14819 = vst [vmem:[#allocation9_spill] sm:$0xff] %v10176_v61  ;;  %v10178_v24 = vpop.f32.mrb[26].mxu0  ;;  %v10180_v58 = vpop.f32.mrb[58].mxu1 }
 0x2c6   : > { %14820 = vst [vmem:[#allocation20_spill] sm:$0xff] %v10178_v24  ;;  %14821 = vst [vmem:[#allocation21_spill] sm:$0xff] %v10180_v58  ;;  %v10182_v11 = vpop.f32.mrb[27].mxu0  ;;  %v10184_v10 = vpop.f32.mrb[59].mxu1 }
 0x2c7   : > { %14822 = vst [vmem:[#allocation22_spill] sm:$0xff] %v10182_v11  ;;  %14823 = vst [vmem:[#allocation23_spill] sm:$0xff] %v10184_v10 }
 0x2c8   : > { %3060 = vmatmul.mubr.bf16.gmra.mrb[132].mxu0 %v9854_v6 }
 0x2c9   : > { %3069 = vmatprep.mubr.bf16.mxu0 %v14775_v53 }
 0x2cb   : > { %3253 = vmatmul.mubr.bf16.gmra.mrb[164].mxu1 %v9854_v6  ;;  %v10190_v33 = vpop.f32.mrb[28].mxu0  ;;  %v10192_v60 = vpop.f32.mrb[60].mxu1 }
 0x2cc   : > { %3262 = vmatprep.mubr.bf16.mxu1 %v14775_v53  ;;  %14824 = vst [vmem:[#allocation10_spill] sm:$0xff] %v10190_v33  ;;  %14825 = vst [vmem:[#allocation11_spill] sm:$0xff] %v10192_v60  ;;  %v10194_v29 = vpop.f32.mrb[29].mxu0  ;;  %v10196_v55 = vpop.f32.mrb[61].mxu1 }
 0x2cd   : > { %14826 = vst [vmem:[#allocation24_spill] sm:$0xff] %v10194_v29  ;;  %14827 = vst [vmem:[#allocation25_spill] sm:$0xff] %v10196_v55  ;;  %v10198_v58 = vpop.f32.mrb[30].mxu0  ;;  %v10200_v11 = vpop.f32.mrb[62].mxu1 }
 0x2ce   : > { %14828 = vst [vmem:[#allocation12_spill] sm:$0xff] %v10198_v58  ;;  %14829 = vst [vmem:[#allocation26_spill] sm:$0xff] %v10200_v11  ;;  %v10202_v10 = vpop.f32.mrb[31].mxu0  ;;  %v10204_v24 = vpop.f32.mrb[63].mxu1 }
 0x2cf   : > { %14830 = vst [vmem:[#allocation13_spill] sm:$0xff] %v10202_v10  ;;  %14831 = vst [vmem:[#allocation27_spill] sm:$0xff] %v10204_v24 }
 0x2d0   : > { %3070 = vmatmul.mubr.bf16.gmra.mrb[136].mxu0 %v9869_v8 }
 0x2d1   : > { %3079 = vmatprep.mubr.bf16.mxu0 %v14775_v53 }
 0x2d3   : > { %3263 = vmatmul.mubr.bf16.gmra.mrb[168].mxu1 %v9869_v8  ;;  %v10210_v6 = vpop.f32.mrb[32].mxu0 }
 0x2d4   : > { %3272 = vmatprep.mubr.bf16.mxu1 %v14775_v53  ;;  %14832 = vst [vmem:[#allocation14_spill] sm:$0xff] %v10210_v6  ;;  %v10214_v55 = vpop.f32.mrb[33].mxu0 }
 0x2d5   : > { %14834 = vst [vmem:[#allocation28_spill] sm:$0xff] %v10214_v55  ;;  %v10218_v11 = vpop.f32.mrb[34].mxu0 }
 0x2d6   : > { %v10212_v29 = vpop.f32.mrb[64].mxu1  ;;  %14836 = vst [vmem:[#allocation17_spill] sm:$0xff] %v10218_v11  ;;  %v10222_v24 = vpop.f32.mrb[35].mxu0 }
 0x2d7   : > { %14833 = vst [vmem:[#allocation15_spill] sm:$0xff] %v10212_v29  ;;  %v10216_v58 = vpop.f32.mrb[65].mxu1  ;;  %14838 = vst [vmem:[#allocation19_spill] sm:$0xff] %v10222_v24 }
 0x2d8   : > { %14835 = vst [vmem:[#allocation16_spill] sm:$0xff] %v10216_v58  ;;  %v10220_v10 = vpop.f32.mrb[66].mxu1  ;;  %3080 = vmatmul.mubr.bf16.gmra.mrb[140].mxu0 %v9866_v22 }
 0x2d9   : > { %14837 = vst [vmem:[#allocation18_spill] sm:$0xff] %v10220_v10  ;;  %v10224_v60 = vpop.f32.mrb[67].mxu1  ;;  %5220 = vmatprep.mubr.bf16.mxu0 %v14775_v53 }
 0x2da   : > { %14839 = vst [vmem:[#allocation29_spill] sm:$0xff] %v10224_v60 }
 0x2db   : > { %3273 = vmatmul.mubr.bf16.gmra.mrb[172].mxu1 %v9866_v22  ;;  %v10230_v8 = vpop.f32.mrb[36].mxu0 }
 0x2dc   : > { %5413 = vmatprep.mubr.bf16.mxu1 %v14775_v53  ;;  %14840 = vst [vmem:[#allocation30_spill] sm:$0xff] %v10230_v8  ;;  %v10234_v58 = vpop.f32.mrb[37].mxu0 }
 0x2dd   : > { %14842 = vst [vmem:[#allocation32_spill] sm:$0xff] %v10234_v58  ;;  %v10238_v10 = vpop.f32.mrb[38].mxu0 }
 0x2de   : > { %v10232_v55 = vpop.f32.mrb[68].mxu1  ;;  %14844 = vst [vmem:[#allocation34_spill] sm:$0xff] %v10238_v10  ;;  %v10242_v60 = vpop.f32.mrb[39].mxu0 }
 0x2df   : > { %14841 = vst [vmem:[#allocation31_spill] sm:$0xff] %v10232_v55  ;;  %v10236_v11 = vpop.f32.mrb[69].mxu1  ;;  %14846 = vst [vmem:[#allocation36_spill] sm:$0xff] %v10242_v60 }
 0x2e0   : > { %14843 = vst [vmem:[#allocation33_spill] sm:$0xff] %v10236_v11  ;;  %v10240_v24 = vpop.f32.mrb[70].mxu1 }
 0x2e1   : > { %14845 = vst [vmem:[#allocation35_spill] sm:$0xff] %v10240_v24  ;;  %v10244_v29 = vpop.f32.mrb[71].mxu1 }
 0x2e2   : > { %14847 = vst [vmem:[#allocation37_spill] sm:$0xff] %v10244_v29 }
 0x2e3   : > { %v10246_v22 = vpop.f32.mrb[40].mxu0 }
 0x2e4   : > { %14848 = vst [vmem:[#allocation38_spill] sm:$0xff] %v10246_v22  ;;  %v10250_v33 = vpop.f32.mrb[41].mxu0 }
 0x2e5   : > { %14850 = vst [vmem:[#allocation40_spill] sm:$0xff] %v10250_v33  ;;  %v10254_v55 = vpop.f32.mrb[42].mxu0 }
 0x2e6   : > { %v10248_v6 = vpop.f32.mrb[72].mxu1  ;;  %14852 = vst [vmem:[#allocation42_spill] sm:$0xff] %v10254_v55  ;;  %v10258_v11 = vpop.f32.mrb[43].mxu0 }
 0x2e7   : > { %14849 = vst [vmem:[#allocation39_spill] sm:$0xff] %v10248_v6  ;;  %v10252_v8 = vpop.f32.mrb[73].mxu1  ;;  %14854 = vst [vmem:[#allocation44_spill] sm:$0xff] %v10258_v11 }
 0x2e8   : > { %14851 = vst [vmem:[#allocation41_spill] sm:$0xff] %v10252_v8  ;;  %v10256_v58 = vpop.f32.mrb[74].mxu1 }
 0x2e9   : > { %14853 = vst [vmem:[#allocation43_spill] sm:$0xff] %v10256_v58  ;;  %v10260_v10 = vpop.f32.mrb[75].mxu1 }
 0x2ea   : > { %14855 = vst [vmem:[#allocation45_spill] sm:$0xff] %v10260_v10 }
 0x2eb   : > { %v10262_v24 = vpop.f32.mrb[44].mxu0  ;;  %v1329_v6 = vpop.xlane.xlu1 %1328 }
 0x2ec   : > { %14856 = vst [vmem:[#allocation46_spill] sm:$0xff] %v10262_v24  ;;  %v10266_v29 = vpop.f32.mrb[45].mxu0  ;;  %v1326_v8 = vpop.xlane.xlu0 %1325  ;;  %7571 = vrcp.f32 %v1329_v6 }
 0x2ed   : > { %14858 = vst [vmem:[#allocation48_spill] sm:$0xff] %v10266_v29  ;;  %v10270_v33 = vpop.f32.mrb[46].mxu0  ;;  %7573 = vrcp.f32 %v1326_v8 }
 0x2ee   : > { %v10264_v60 = vpop.f32.mrb[76].mxu1  ;;  %14860 = vst [vmem:[#allocation50_spill] sm:$0xff] %v10270_v33  ;;  %v10274_v55 = vpop.f32.mrb[47].mxu0 }
 0x2ef   : > { %14857 = vst [vmem:[#allocation47_spill] sm:$0xff] %v10264_v60  ;;  %v10268_v22 = vpop.f32.mrb[77].mxu1  ;;  %14862 = vst [vmem:[#allocation52_spill] sm:$0xff] %v10274_v55  ;;  %v1209_v11 = vpop.xlane.xlu1 %1208 }
 0x2f0   : > { %14859 = vst [vmem:[#allocation49_spill] sm:$0xff] %v10268_v22  ;;  %v10272_v44 = vpop.f32.mrb[78].mxu1  ;;  %v1253_v10 = vsub.f32 %v9928_v43, %v1209_v11  ;;  %v1206_v24 = vpop.xlane.xlu0 %1205 }
 0x2f1   : > { %14861 = vst [vmem:[#allocation51_spill] sm:$0xff] %v10272_v44  ;;  %v10276_v58 = vpop.f32.mrb[79].mxu1  ;;  %v1252_v60 = vsub.f32 %v9932_v25, %v1206_v24 }
 0x2f2   : > { %14863 = vst [vmem:[#allocation53_spill] sm:$0xff] %v10276_v58  ;;  %v1310_v22 = vmul.f32 1.442695, %v1253_v10 }
 0x2f3   : > { %v10280_v61 = vpop.f32.mrb[48].mxu0  ;;  %v1308_v33 = vmul.f32 1.442695, %v1252_v60 }
 0x2f4   : > { %v10284_v45 = vpop.f32.mrb[49].mxu0  ;;  %7575 = vpow2.f32 %v1310_v22 }
 0x2f5   : > { %14865 = vst [vmem:[#allocation55_spill] sm:$0xff] %v10284_v45  ;;  %v10288_v58 = vpop.f32.mrb[50].mxu0  ;;  %7577 = vpow2.f32 %v1308_v33 }
 0x2f6   : > { %v10282_v29 = vpop.f32.mrb[80].mxu1  ;;  %14867 = vst [vmem:[#allocation57_spill] sm:$0xff] %v10288_v58  ;;  %v10292_v43 = vpop.f32.mrb[51].mxu0 }
 0x2f7   : > { %14864 = vst [vmem:[#allocation54_spill] sm:$0xff] %v10282_v29  ;;  %v10286_v55 = vpop.f32.mrb[81].mxu1  ;;  %14869 = vst [vmem:[#allocation59_spill] sm:$0xff] %v10292_v43  ;;  %v7572_v6 = vpop.eup %7571 }
 0x2f8   : > { %14866 = vst [vmem:[#allocation56_spill] sm:$0xff] %v10286_v55  ;;  %v10290_v44 = vpop.f32.mrb[82].mxu1  ;;  %v7574_v22 = vpop.eup %7573  ;;  %v1453_v58 = vmul.f32 %v7572_v6, %v9915_v62 }
 0x2f9   : > { %14868 = vst [vmem:[#allocation58_spill] sm:$0xff] %v10290_v44  ;;  %v10294_v25 = vpop.f32.mrb[83].mxu1  ;;  %v1452_v33 = vmul.f32 %v7574_v22, %v9917_v38  ;;  %v1335_v6 = vpop.xlane.xlu1 %1334 }
 0x2fa   : > { %14870 = vst [vmem:[#allocation60_spill] sm:$0xff] %v10294_v25  ;;  %7579 = vrcp.f32 %v1335_v6 }
 0x2fb   : > { %v10296_v24 = vpop.f32.mrb[52].mxu0 }
 0x2fc   : > { %14871 = vst [vmem:[#allocation61_spill] sm:$0xff] %v10296_v24  ;;  %v10300_v10 = vpop.f32.mrb[53].mxu0 }
 0x2fd   : > { %14873 = vst [vmem:[#allocation63_spill] sm:$0xff] %v10300_v10  ;;  %v10304_v8 = vpop.f32.mrb[54].mxu0 }
 0x2fe   : > { %v10298_v11 = vpop.f32.mrb[84].mxu1  ;;  %14875 = vst [vmem:[#allocation65_spill] sm:$0xff] %v10304_v8  ;;  %v10309_v43 = vpop.f32.mrb[55].mxu0 }
 0x2ff   : > { %14872 = vst [vmem:[#allocation62_spill] sm:$0xff] %v10298_v11  ;;  %v10302_v60 = vpop.f32.mrb[85].mxu1  ;;  %14877 = vst [vmem:[#allocation67_spill] sm:$0xff] %v10309_v43  ;;  %v10311_v25 = vpop.eup %7575 }
 0x300   : > { %14874 = vst [vmem:[#allocation64_spill] sm:$0xff] %v10302_v60  ;;  %v10307_v44 = vpop.f32.mrb[86].mxu1  ;;  %14878 = vst [vmem:[#allocation68_spill] sm:$0xff] %v10311_v25  ;;  %v1399_v10 = vsel %vm1131_vm0, %v10311_v25, 0.0  ;;  %v10318_v60 = vpack.c.bf16 %v1453_v58, %v1452_v33  ;;  %v10320_v8 = vpop.eup %7577 }
 0x301   : > { %14876 = vst [vmem:[#allocation66_spill] sm:$0xff] %v10307_v44  ;;  %v10314_v24 = vpop.f32.mrb[87].mxu1  ;;  %1400 = vadd.xlane.f32.xlu1 %v1399_v10  ;;  %14881 = vst [vmem:[#allocation71_spill] sm:$0xff] %v10320_v8  ;;  %v1396_v38 = vsel %vm1131_vm0, %v10320_v8, 0.0  ;;  %v1332_v10 = vpop.xlane.xlu0 %1331 }
 0x302   : > { %14879 = vst [vmem:[#allocation69_spill] sm:$0xff] %v10314_v24  ;;  %14880 = vst [vmem:[#allocation70_spill] sm:$0xff] %v10318_v60  ;;  %6992 = vmatmul.mubr.msk.bf16.vlgmr.msra.gmra.mrb[144].mxu0 %vm1131_vm0, %v10318_v60  ;;  %7009 = vmatmul.mubr.msk.bf16.vlgmr.msra.gmra.mrb[176].mxu1 %vm1131_vm0, %v10318_v60  ;;  %v1215_v8 = vpop.xlane.xlu1 %1214  ;;  %7581 = vrcp.f32 %v1332_v10 }
 0x303   : > { %v10322_v11 = vpop.f32.mrb[56].mxu0  ;;  %1397 = vadd.xlane.f32.xlu0 %v1396_v38  ;;  %5230 = vmatprep.mubr.bf16.mxu0 %v14775_v53 }
 0x304   : > { %14882 = vst [vmem:[#allocation72_spill] sm:$0xff] %v10322_v11  ;;  %v10332_v22 = vpop.f32.mrb[57].mxu0  ;;  %5423 = vmatprep.mubr.bf16.mxu1 %v14775_v53  ;;  %v7580_v44 = vpop.eup %7579 }
 0x305   : > { %14884 = vst [vmem:[#allocation74_spill] sm:$0xff] %v10332_v22  ;;  %v10338_v33 = vpop.f32.mrb[58].mxu0  ;;  %v1212_v22 = vpop.xlane.xlu0 %1211 }
 0x306   : > { %v10324_v62 = vpop.f32.mrb[88].mxu1  ;;  %14886 = vst [vmem:[#allocation76_spill] sm:$0xff] %v10338_v33 }
 0x307   : > { %14883 = vst [vmem:[#allocation73_spill] sm:$0xff] %v10324_v62  ;;  %v10335_v58 = vpop.f32.mrb[89].mxu1  ;;  %v10342_v62 = vpop.f32.mrb[59].mxu0 }
 0x308   : > { %14885 = vst [vmem:[#allocation75_spill] sm:$0xff] %v10335_v58  ;;  %v10340_v25 = vpop.f32.mrb[90].mxu1  ;;  %14888 = vst [vmem:[#allocation78_spill] sm:$0xff] %v10342_v62  ;;  %v1341_v62 = vpop.xlane.xlu1 %1340 }
 0x309   : > { %14887 = vst [vmem:[#allocation77_spill] sm:$0xff] %v10340_v25  ;;  %v10344_v60 = vpop.f32.mrb[91].mxu1  ;;  %v1338_v6 = vpop.xlane.xlu0 %1337 }
 0x30a   : > { %14889 = vst [vmem:[#allocation79_spill] sm:$0xff] %v10344_v60 }
 0x30b   : > { %v10346_v11 = vpop.f32.mrb[60].mxu0 }
 0x30c   : > { %14890 = vst [vmem:[#allocation80_spill] sm:$0xff] %v10346_v11  ;;  %v10350_v58 = vpop.f32.mrb[61].mxu0  ;;  %v1255_v11 = vsub.f32 %v9956_v23, %v1215_v8  ;;  %v7582_v55 = vpop.eup %7581 }
 0x30d   : > { %14892 = vst [vmem:[#allocation82_spill] sm:$0xff] %v10350_v58  ;;  %v10354_v43 = vpop.f32.mrb[62].mxu0  ;;  %v1254_v58 = vsub.f32 %v9964_v20, %v1212_v22  ;;  %v1454_v23 = vmul.f32 %v7582_v55, %v9950_v57 }
 0x30e   : > { %v10348_v38 = vpop.f32.mrb[92].mxu1  ;;  %14894 = vst [vmem:[#allocation84_spill] sm:$0xff] %v10354_v43  ;;  %v10358_v25 = vpop.f32.mrb[63].mxu0  ;;  %v1314_v29 = vmul.f32 1.442695, %v1255_v11 }
 0x30f   : > { %14891 = vst [vmem:[#allocation81_spill] sm:$0xff] %v10348_v38  ;;  %v10352_v24 = vpop.f32.mrb[93].mxu1  ;;  %14896 = vst [vmem:[#allocation86_spill] sm:$0xff] %v10358_v25  ;;  %v1312_v20 = vmul.f32 1.442695, %v1254_v58 }
 0x310   : > { %14893 = vst [vmem:[#allocation83_spill] sm:$0xff] %v10352_v24  ;;  %v10356_v33 = vpop.f32.mrb[94].mxu1  ;;  %7583 = vpow2.f32 %v1314_v29 }
 0x311   : > { %14895 = vst [vmem:[#allocation85_spill] sm:$0xff] %v10356_v33  ;;  %v10360_v60 = vpop.f32.mrb[95].mxu1  ;;  %v1455_v33 = vmul.f32 %v7580_v44, %v9948_v28  ;;  %7585 = vpow2.f32 %v1312_v20 }
 0x312   : > { %14897 = vst [vmem:[#allocation87_spill] sm:$0xff] %v10360_v60  ;;  %v1221_v60 = vpop.xlane.xlu1 %1220  ;;  %7587 = vrcp.f32 %v1341_v62 }
 0x313   : > { %v10363_v38 = vpop.f32.mrb[64].mxu0  ;;  %v10382_v22 = vpack.c.bf16 %v1455_v33, %v1454_v23  ;;  %7589 = vrcp.f32 %v1338_v6 }
 0x314   : > { %v10368_v24 = vpop.f32.mrb[65].mxu0 }
 0x315   : > { %14899 = vst [vmem:[#allocation89_spill] sm:$0xff] %v10368_v24  ;;  %v10373_v25 = vpop.f32.mrb[66].mxu0  ;;  %14902 = vst [vmem:[#allocation92_spill] sm:$0xff] %v10382_v22  ;;  %v1218_v24 = vpop.xlane.xlu0 %1217  ;;  %6993 = vmatmul.mubr.msk.bf16.gmra.mrb[148].mxu0 %vm1131_vm0, %v10382_v22  ;;  %7010 = vmatmul.mubr.msk.bf16.gmra.mrb[180].mxu1 %vm1131_vm0, %v10382_v22 }
 0x316   : > { %v10365_v10 = vpop.f32.mrb[96].mxu1  ;;  %v10378_v8 = vpop.f32.mrb[67].mxu0  ;;  %5240 = vmatprep.mubr.bf16.mxu0 %v14775_v53  ;;  %5433 = vmatprep.mubr.bf16.mxu1 %v14775_v53  ;;  %v1256_v55 = vsub.f32 %v9986_v17, %v1218_v24 }
 0x317   : > { %14898 = vst [vmem:[#allocation88_spill] sm:$0xff] %v10365_v10  ;;  %v10370_v43 = vpop.f32.mrb[97].mxu1 }
 0x318   : > { %14900 = vst [vmem:[#allocation90_spill] sm:$0xff] %v10370_v43  ;;  %v10375_v45 = vpop.f32.mrb[98].mxu1  ;;  %v1257_v43 = vsub.f32 %v9980_v18, %v1221_v60  ;;  %v1316_v58 = vmul.f32 1.442695, %v1256_v55 }
 0x319   : > { %v10380_v10 = vpop.f32.mrb[99].mxu1 }
 0x31a   : > { %14901 = vst [vmem:[#allocation91_spill] sm:$0xff] %v10380_v10  ;;  %v1318_v29 = vmul.f32 1.442695, %v1257_v43  ;;  %v10404_v33 = vpop.eup %7583 }
 0x31b   : > { %v10389_v28 = vpop.f32.mrb[68].mxu0  ;;  %14909 = vst [vmem:[#allocation99_spill] sm:$0xff] %v10404_v33  ;;  %v10406_v23 = vpop.eup %7585  ;;  %v1405_v20 = vsel %vm1131_vm0, %v10404_v33, 0.0 }
 0x31c   : > { %14903 = vst [vmem:[#allocation93_spill] sm:$0xff] %v10389_v28  ;;  %v10395_v44 = vpop.f32.mrb[69].mxu0  ;;  %7591 = vpow2.f32 %v1318_v29  ;;  %14910 = vst [vmem:[#allocation100_spill] sm:$0xff] %v10406_v23  ;;  %v7588_v62 = vpop.eup %7587  ;;  %1406 = vadd.xlane.f32.xlu1 %v1405_v20  ;;  %v1402_v17 = vsel %vm1131_vm0, %v10406_v23, 0.0 }
 0x31d   : > { %14905 = vst [vmem:[#allocation95_spill] sm:$0xff] %v10395_v44  ;;  %v10400_v11 = vpop.f32.mrb[70].mxu0  ;;  %7593 = vpow2.f32 %v1316_v58  ;;  %1403 = vadd.xlane.f32.xlu0 %v1402_v17  ;;  %v1457_v55 = vmul.f32 %v7588_v62, %v9974_v30  ;;  %v1347_v33 = vpop.xlane.xlu1 %1346 }
 0x31e   : > { %v10391_v57 = vpop.f32.mrb[100].mxu1  ;;  %14907 = vst [vmem:[#allocation97_spill] sm:$0xff] %v10400_v11  ;;  %v10410_v22 = vpop.f32.mrb[71].mxu0  ;;  %7595 = vrcp.f32 %v1347_v33 }
 0x31f   : > { %14904 = vst [vmem:[#allocation94_spill] sm:$0xff] %v10391_v57  ;;  %v10397_v18 = vpop.f32.mrb[101].mxu1  ;;  %14911 = vst [vmem:[#allocation101_spill] sm:$0xff] %v10410_v22  ;;  %v7590_v22 = vpop.eup %7589 }
 0x320   : > { %14906 = vst [vmem:[#allocation96_spill] sm:$0xff] %v10397_v18  ;;  %v10402_v60 = vpop.f32.mrb[102].mxu1  ;;  %v1456_v58 = vmul.f32 %v7590_v22, %v9976_v26  ;;  %v1344_v30 = vpop.xlane.xlu0 %1343 }
 0x321   : > { %14908 = vst [vmem:[#allocation98_spill] sm:$0xff] %v10402_v60  ;;  %v10414_v43 = vpop.f32.mrb[103].mxu1  ;;  %7597 = vrcp.f32 %v1344_v30  ;;  %v1227_v17 = vpop.xlane.xlu1 %1226 }
 0x322   : > { %14912 = vst [vmem:[#allocation102_spill] sm:$0xff] %v10414_v43  ;;  %v10428_v23 = vpack.c.bf16 %v1457_v55, %v1456_v58  ;;  %v1259_v30 = vsub.f32 %v10006_v2, %v1227_v17 }
 0x323   : > { %v10416_v24 = vpop.f32.mrb[72].mxu0 }
 0x324   : > { %14913 = vst [vmem:[#allocation103_spill] sm:$0xff] %v10416_v24  ;;  %v10420_v29 = vpop.f32.mrb[73].mxu0  ;;  %14918 = vst [vmem:[#allocation108_spill] sm:$0xff] %v10428_v23  ;;  %6994 = vmatmul.mubr.msk.bf16.gmra.mrb[152].mxu0 %vm1131_vm0, %v10428_v23  ;;  %7011 = vmatmul.mubr.msk.bf16.gmra.mrb[184].mxu1 %vm1131_vm0, %v10428_v23 }
 0x325   : > { %14915 = vst [vmem:[#allocation105_spill] sm:$0xff] %v10420_v29  ;;  %5250 = vmatprep.mubr.bf16.mxu0 %v14775_v53  ;;  %5443 = vmatprep.mubr.bf16.mxu1 %v14775_v53  ;;  %v10442_v62 = vpop.f32.mrb[74].mxu0 }
 0x326   : > { %v10418_v6 = vpop.f32.mrb[104].mxu1  ;;  %v10426_v20 = vpop.eup %7591  ;;  %14920 = vst [vmem:[#allocation110_spill] sm:$0xff] %v10442_v62 }
 0x327   : > { %14914 = vst [vmem:[#allocation104_spill] sm:$0xff] %v10418_v6  ;;  %v10423_v60 = vpop.f32.mrb[105].mxu1  ;;  %14917 = vst [vmem:[#allocation107_spill] sm:$0xff] %v10426_v20  ;;  %v1411_v24 = vsel %vm1131_vm0, %v10426_v20, 0.0  ;;  %v10438_v26 = vpop.eup %7593  ;;  %v1322_v20 = vmul.f32 1.442695, %v1259_v30 }
 0x328   : > { %14916 = vst [vmem:[#allocation106_spill] sm:$0xff] %v10423_v60  ;;  %1412 = vadd.xlane.f32.xlu1 %v1411_v24  ;;  %14919 = vst [vmem:[#allocation109_spill] sm:$0xff] %v10438_v26  ;;  %v1408_v22 = vsel %vm1131_vm0, %v10438_v26, 0.0  ;;  %v10444_v33 = vpop.f32.mrb[106].mxu1  ;;  %v1224_v24 = vpop.xlane.xlu0 %1223 }
 0x329   : > { %1409 = vadd.xlane.f32.xlu0 %v1408_v22  ;;  %14921 = vst [vmem:[#allocation111_spill] sm:$0xff] %v10444_v33  ;;  %v10446_v55 = vpop.f32.mrb[75].mxu0  ;;  %v10448_v58 = vpop.f32.mrb[107].mxu1  ;;  %v1258_v22 = vsub.f32 %v10012_v34, %v1224_v24  ;;  %7599 = vpow2.f32 %v1322_v20 }
 0x32a   : > { %14922 = vst [vmem:[#allocation112_spill] sm:$0xff] %v10446_v55  ;;  %14923 = vst [vmem:[#allocation113_spill] sm:$0xff] %v10448_v58  ;;  %v7596_v23 = vpop.eup %7595 }
 0x32b   : > { %v10450_v60 = vpop.f32.mrb[76].mxu0  ;;  %v1459_v33 = vmul.f32 %v7596_v23, %v10000_v52  ;;  %v7598_v62 = vpop.eup %7597  ;;  %v1320_v58 = vmul.f32 1.442695, %v1258_v22 }
 0x32c   : > { %14924 = vst [vmem:[#allocation114_spill] sm:$0xff] %v10450_v60  ;;  %v10454_v6 = vpop.f32.mrb[77].mxu0  ;;  %v1458_v55 = vmul.f32 %v7598_v62, %v10002_v46  ;;  %v1353_v60 = vpop.xlane.xlu1 %1352 }
 0x32d   : > { %14926 = vst [vmem:[#allocation116_spill] sm:$0xff] %v10454_v6  ;;  %v1350_v2 = vpop.xlane.xlu0 %1349  ;;  %7601 = vpow2.f32 %v1320_v58  ;;  %v10470_v52 = vpop.f32.mrb[78].mxu0  ;;  %v15050_v6 = vld [vmem:[#allocation10_spill] sm:$0xff] }
 0x32e   : > { %v10452_v29 = vpop.f32.mrb[108].mxu1  ;;  %v10462_v43 = vpack.c.bf16 %v1459_v33, %v1458_v55  ;;  %7603 = vrcp.f32 %v1353_v60  ;;  %14929 = vst [vmem:[#allocation119_spill] sm:$0xff] %v10470_v52  ;;  %v10476_v23 = vpop.f32.mrb[79].mxu0 }
 0x32f   : > { %14925 = vst [vmem:[#allocation115_spill] sm:$0xff] %v10452_v29  ;;  %v10456_v26 = vpop.f32.mrb[109].mxu1  ;;  %7605 = vrcp.f32 %v1350_v2  ;;  %14932 = vst [vmem:[#allocation122_spill] sm:$0xff] %v10476_v23 }
 0x330   : > { %14927 = vst [vmem:[#allocation117_spill] sm:$0xff] %v10456_v26  ;;  %14928 = vst [vmem:[#allocation118_spill] sm:$0xff] %v10462_v43  ;;  %6995 = vmatmul.mubr.msk.bf16.gmra.mrb[156].mxu0 %vm1131_vm0, %v10462_v43  ;;  %7012 = vmatmul.mubr.msk.bf16.gmra.mrb[188].mxu1 %vm1131_vm0, %v10462_v43  ;;  %v10472_v46 = vpop.f32.mrb[110].mxu1 }
 0x331   : > { %5260 = vmatprep.mubr.bf16.mxu0 %v14775_v53  ;;  %5453 = vmatprep.mubr.bf16.mxu1 %v14775_v53  ;;  %14930 = vst [vmem:[#allocation120_spill] sm:$0xff] %v10472_v46  ;;  %v10478_v62 = vpop.f32.mrb[111].mxu1 }
 0x332   : > { %14933 = vst [vmem:[#allocation123_spill] sm:$0xff] %v10478_v62  ;;  %v1359_v62 = vpop.xlane.xlu1 %1358 }
 0x333   : > { %v10474_v34 = vpop.eup %7599  ;;  %v10484_v17 = vpop.f32.mrb[80].mxu0  ;;  %7607 = vrcp.f32 %v1359_v62 }
 0x334   : > { %14931 = vst [vmem:[#allocation121_spill] sm:$0xff] %v10474_v34  ;;  %v1417_v20 = vsel %vm1131_vm0, %v10474_v34, 0.0  ;;  %14935 = vst [vmem:[#allocation125_spill] sm:$0xff] %v10484_v17  ;;  %v10490_v58 = vpop.f32.mrb[81].mxu0 }
 0x335   : > { %1418 = vadd.xlane.f32.xlu1 %v1417_v20  ;;  %14937 = vst [vmem:[#allocation127_spill] sm:$0xff] %v10490_v58  ;;  %v1356_v20 = vpop.xlane.xlu0 %1355 }
 0x336   : > { %v10486_v24 = vpop.f32.mrb[112].mxu1  ;;  %7609 = vrcp.f32 %v1356_v20 }
 0x337   : > { %v10480_v33 = vpop.eup %7601  ;;  %14936 = vst [vmem:[#allocation126_spill] sm:$0xff] %v10486_v24  ;;  %v10492_v30 = vpop.f32.mrb[113].mxu1 }
 0x338   : > { %14934 = vst [vmem:[#allocation124_spill] sm:$0xff] %v10480_v33  ;;  %v7604_v60 = vpop.eup %7603  ;;  %v1414_v55 = vsel %vm1131_vm0, %v10480_v33, 0.0  ;;  %14938 = vst [vmem:[#allocation128_spill] sm:$0xff] %v10492_v30 }
 0x339   : > { %v7606_v22 = vpop.eup %7605  ;;  %1415 = vadd.xlane.f32.xlu0 %v1414_v55  ;;  %v1461_v2 = vmul.f32 %v7604_v60, %v10026_v31  ;;  %v10504_v55 = vpop.f32.mrb[82].mxu0 }
 0x33a   : > { %v1460_v43 = vmul.f32 %v7606_v22, %v10028_v5  ;;  %14940 = vst [vmem:[#allocation130_spill] sm:$0xff] %v10504_v55  ;;  %v10506_v31 = vpop.f32.mrb[114].mxu1  ;;  %v10508_v5 = vpop.f32.mrb[83].mxu0 }
 0x33b   : > { %14941 = vst [vmem:[#allocation131_spill] sm:$0xff] %v10506_v31  ;;  %14942 = vst [vmem:[#allocation132_spill] sm:$0xff] %v10508_v5 }
 0x33c   : > { %v10496_v23 = vpack.c.bf16 %v1461_v2, %v1460_v43  ;;  %v10510_v43 = vpop.f32.mrb[115].mxu1 }
 0x33d   : > { %14943 = vst [vmem:[#allocation133_spill] sm:$0xff] %v10510_v43  ;;  %v7608_v60 = vpop.eup %7607 }
 0x33e   : > { %14939 = vst [vmem:[#allocation129_spill] sm:$0xff] %v10496_v23  ;;  %6996 = vmatmul.mubr.msk.bf16.gmra.mrb[160].mxu0 %vm1131_vm0, %v10496_v23  ;;  %7013 = vmatmul.mubr.msk.bf16.gmra.mrb[192].mxu1 %vm1131_vm0, %v10496_v23  ;;  %v1463_v22 = vmul.f32 %v7608_v60, %v10040_v12  ;;  %v10513_v23 = vpop.f32.mrb[84].mxu0  ;;  %v10515_v62 = vpop.f32.mrb[116].mxu1 }
 0x33f   : > { %5270 = vmatprep.mubr.bf16.mxu0 %v14775_v53  ;;  %5463 = vmatprep.mubr.bf16.mxu1 %v14775_v53  ;;  %14944 = vst [vmem:[#allocation134_spill] sm:$0xff] %v10513_v23  ;;  %14945 = vst [vmem:[#allocation135_spill] sm:$0xff] %v10515_v62  ;;  %v10518_v58 = vpop.f32.mrb[85].mxu0  ;;  %v10520_v55 = vpop.f32.mrb[117].mxu1 }
 0x340   : > { %v7610_v2 = vpop.eup %7609  ;;  %14946 = vst [vmem:[#allocation136_spill] sm:$0xff] %v10518_v58  ;;  %14947 = vst [vmem:[#allocation137_spill] sm:$0xff] %v10520_v55  ;;  %v10522_v31 = vpop.f32.mrb[86].mxu0 }
 0x341   : > { %v1462_v30 = vmul.f32 %v7610_v2, %v10042_v37  ;;  %14948 = vst [vmem:[#allocation138_spill] sm:$0xff] %v10522_v31  ;;  %v10524_v20 = vpop.f32.mrb[118].mxu1  ;;  %v10528_v43 = vpop.f32.mrb[87].mxu0 }
 0x342   : > { %14949 = vst [vmem:[#allocation139_spill] sm:$0xff] %v10524_v20  ;;  %14951 = vst [vmem:[#allocation141_spill] sm:$0xff] %v10528_v43  ;;  %v10530_v12 = vpop.f32.mrb[119].mxu1 }
 0x343   : > { %v10526_v5 = vpack.c.bf16 %v1463_v22, %v1462_v30  ;;  %14952 = vst [vmem:[#allocation142_spill] sm:$0xff] %v10530_v12  ;;  %v10538_v37 = vpop.f32.mrb[88].mxu0  ;;  %v1365_v30 = vpop.xlane.xlu1 %1364 }
 0x344   : > { %14953 = vst [vmem:[#allocation143_spill] sm:$0xff] %v10538_v37  ;;  %v10542_v22 = vpop.f32.mrb[89].mxu0  ;;  %7611 = vrcp.f32 %v1365_v30  ;;  %v1362_v12 = vpop.xlane.xlu0 %1361 }
 0x345   : > { %14950 = vst [vmem:[#allocation140_spill] sm:$0xff] %v10526_v5  ;;  %14955 = vst [vmem:[#allocation145_spill] sm:$0xff] %v10542_v22  ;;  %7613 = vrcp.f32 %v1362_v12  ;;  %v10546_v43 = vpop.f32.mrb[90].mxu0 }
 0x346   : > { %6997 = vmatmul.mubr.msk.bf16.gmra.mrb[164].mxu0 %vm1131_vm0, %v10526_v5  ;;  %7014 = vmatmul.mubr.msk.bf16.gmra.mrb[196].mxu1 %vm1131_vm0, %v10526_v5  ;;  %v10540_v60 = vpop.f32.mrb[120].mxu1  ;;  %14957 = vst [vmem:[#allocation147_spill] sm:$0xff] %v10546_v43  ;;  %v10550_v5 = vpop.f32.mrb[91].mxu0 }
 0x347   : > { %5280 = vmatprep.mubr.bf16.mxu0 %v14775_v53  ;;  %5473 = vmatprep.mubr.bf16.mxu1 %v14775_v53  ;;  %14954 = vst [vmem:[#allocation144_spill] sm:$0xff] %v10540_v60  ;;  %v10544_v2 = vpop.f32.mrb[121].mxu1  ;;  %14959 = vst [vmem:[#allocation149_spill] sm:$0xff] %v10550_v5  ;;  %v5093_v60 = vld [vmem:[%s14444_s10 + $0x10] sm:$0xff] }
 0x348   : > { %14956 = vst [vmem:[#allocation146_spill] sm:$0xff] %v10544_v2  ;;  %v10548_v20 = vpop.f32.mrb[122].mxu1  ;;  %v5094_v2 = vld [vmem:[%s14444_s10 + $0x18] sm:$0xff]  ;;  %v6988_v30 = vcombine.high %v5093_v60, %v5093_v60  ;;  %v6987_v43 = vcombine.low %v5093_v60, %v5093_v60 }
 0x349   : > { %14958 = vst [vmem:[#allocation148_spill] sm:$0xff] %v10548_v20  ;;  %v10552_v31 = vpop.f32.mrb[123].mxu1  ;;  %v6990_v22 = vcombine.high %v5094_v2, %v5094_v2  ;;  %v6989_v37 = vcombine.low %v5094_v2, %v5094_v2 }
 0x34a   : > { %14960 = vst [vmem:[#allocation150_spill] sm:$0xff] %v10552_v31  ;;  %7025 = vmatprep.subr.msk.bf16.mxu0 %vm5163_vm1, %v6988_v30  ;;  %v5177_v5 = vsel %vm5163_vm1, %v6987_v43, 0  ;;  %v1371_v43 = vpop.xlane.xlu1 %1370  ;;  %v1368_v30 = vpop.xlane.xlu0 %1367 }
 0x34b   : > { %7042 = vmatprep.subr.msk.bf16.mxu1 %vm5163_vm1, %v6990_v22  ;;  %v5183_v58 = vsel %vm5163_vm1, %v6989_v37, 0  ;;  %v10566_v62 = vpop.f32.mrb[92].mxu0  ;;  %5575 = vmatpush1.bf16.msra.mxu0 %v5177_v5  ;;  %7615 = vrcp.f32 %v1371_v43 }
 0x34c   : > { %14961 = vst [vmem:[#allocation151_spill] sm:$0xff] %v10566_v62  ;;  %5768 = vmatpush1.bf16.msra.mxu1 %v5183_v58  ;;  %7617 = vrcp.f32 %v1368_v30 }
 0x34e   : > { %v7612_v55 = vpop.eup %7611  ;;  %v10568_v23 = vpop.f32.mrb[124].mxu1 }
 0x34f   : > { %v1465_v12 = vmul.f32 %v7612_v55, %v10056_v40  ;;  %v7614_v20 = vpop.eup %7613  ;;  %14962 = vst [vmem:[#allocation152_spill] sm:$0xff] %v10568_v23  ;;  %v10570_v40 = vpop.f32.mrb[93].mxu0 }
 0x350   : > { %v1464_v31 = vmul.f32 %v7614_v20, %v10058_v15  ;;  %14963 = vst [vmem:[#allocation153_spill] sm:$0xff] %v10570_v40  ;;  %v10572_v55 = vpop.f32.mrb[125].mxu1  ;;  %v10576_v2 = vpop.f32.mrb[94].mxu0 }
 0x351   : > { %14964 = vst [vmem:[#allocation154_spill] sm:$0xff] %v10572_v55  ;;  %14966 = vst [vmem:[#allocation156_spill] sm:$0xff] %v10576_v2  ;;  %v10578_v22 = vpop.f32.mrb[126].mxu1  ;;  %v10586_v15 = vpop.f32.mrb[95].mxu0 }
 0x352   : > { %v10574_v60 = vpack.c.bf16 %v1465_v12, %v1464_v31  ;;  %14967 = vst [vmem:[#allocation157_spill] sm:$0xff] %v10578_v22  ;;  %14968 = vst [vmem:[#allocation158_spill] sm:$0xff] %v10586_v15  ;;  %v10588_v58 = vpop.f32.mrb[127].mxu1 }
 0x353   : > { %14969 = vst [vmem:[#allocation159_spill] sm:$0xff] %v10588_v58  ;;  %v10590_v31 = vpop.f32.mrb[96].mxu0  ;;  %v1377_v58 = vpop.xlane.xlu1 %1376 }
 0x354   : > { %14965 = vst [vmem:[#allocation155_spill] sm:$0xff] %v10574_v60  ;;  %6998 = vmatmul.mubr.msk.bf16.gmra.mrb[168].mxu0 %vm1131_vm0, %v10574_v60  ;;  %7015 = vmatmul.mubr.msk.bf16.gmra.mrb[200].mxu1 %vm1131_vm0, %v10574_v60  ;;  %14970 = vst [vmem:[#allocation160_spill] sm:$0xff] %v10590_v31  ;;  %v10594_v20 = vpop.f32.mrb[97].mxu0  ;;  %7619 = vrcp.f32 %v1377_v58 }
 0x355   : > { %5290 = vmatprep.mubr.bf16.mxu0 %v14775_v53  ;;  %5483 = vmatprep.mubr.bf16.mxu1 %v14775_v53  ;;  %14972 = vst [vmem:[#allocation162_spill] sm:$0xff] %v10594_v20  ;;  %v10598_v12 = vpop.f32.mrb[98].mxu0  ;;  %v7616_v31 = vpop.eup %7615 }
 0x356   : > { %v10592_v5 = vpop.f32.mrb[128].mxu1  ;;  %14974 = vst [vmem:[#allocation164_spill] sm:$0xff] %v10598_v12  ;;  %v10602_v22 = vpop.f32.mrb[99].mxu0  ;;  %v1467_v43 = vmul.f32 %v7616_v31, %v10072_v1 }
 0x357   : > { %14971 = vst [vmem:[#allocation161_spill] sm:$0xff] %v10592_v5  ;;  %v10596_v37 = vpop.f32.mrb[129].mxu1  ;;  %14976 = vst [vmem:[#allocation166_spill] sm:$0xff] %v10602_v22  ;;  %v7618_v12 = vpop.eup %7617 }
 0x358   : > { %14973 = vst [vmem:[#allocation163_spill] sm:$0xff] %v10596_v37  ;;  %v10600_v60 = vpop.f32.mrb[130].mxu1  ;;  %v1466_v30 = vmul.f32 %v7618_v12, %v10074_v13  ;;  %v1374_v22 = vpop.xlane.xlu0 %1373 }
 0x359   : > { %14975 = vst [vmem:[#allocation165_spill] sm:$0xff] %v10600_v60  ;;  %v10604_v15 = vpop.f32.mrb[131].mxu1  ;;  %7621 = vrcp.f32 %v1374_v22 }
 0x35a   : > { %14977 = vst [vmem:[#allocation167_spill] sm:$0xff] %v10604_v15  ;;  %v10620_v55 = vpack.c.bf16 %v1467_v43, %v1466_v30 }
 0x35b   : > { %v10606_v2 = vpop.f32.mrb[100].mxu0 }
 0x35c   : > { %14978 = vst [vmem:[#allocation168_spill] sm:$0xff] %v10606_v2  ;;  %v10610_v20 = vpop.f32.mrb[101].mxu0  ;;  %14984 = vst [vmem:[#allocation174_spill] sm:$0xff] %v10620_v55  ;;  %6999 = vmatmul.mubr.msk.bf16.gmra.mrb[172].mxu0 %vm1131_vm0, %v10620_v55  ;;  %7016 = vmatmul.mubr.msk.bf16.gmra.mrb[204].mxu1 %vm1131_vm0, %v10620_v55 }
 0x35d   : > { %14980 = vst [vmem:[#allocation170_spill] sm:$0xff] %v10610_v20  ;;  %v10616_v60 = vpop.f32.mrb[102].mxu0  ;;  %5300 = vmatprep.mubr.bf16.mxu0 %v14775_v53  ;;  %5493 = vmatprep.mubr.bf16.mxu1 %v14775_v53 }
 0x35e   : > { %v10608_v5 = vpop.f32.mrb[132].mxu1  ;;  %14982 = vst [vmem:[#allocation172_spill] sm:$0xff] %v10616_v60  ;;  %v10628_v1 = vpop.f32.mrb[103].mxu0 }
 0x35f   : > { %14979 = vst [vmem:[#allocation169_spill] sm:$0xff] %v10608_v5  ;;  %v10612_v37 = vpop.f32.mrb[133].mxu1  ;;  %14985 = vst [vmem:[#allocation175_spill] sm:$0xff] %v10628_v1  ;;  %v7620_v58 = vpop.eup %7619 }
 0x360   : > { %14981 = vst [vmem:[#allocation171_spill] sm:$0xff] %v10612_v37  ;;  %v10618_v15 = vpop.f32.mrb[134].mxu1  ;;  %v1469_v31 = vmul.f32 %v7620_v58, %v10084_v32  ;;  %v1383_v37 = vpop.xlane.xlu1 %1382 }
 0x361   : > { %14983 = vst [vmem:[#allocation173_spill] sm:$0xff] %v10618_v15  ;;  %v10630_v13 = vpop.f32.mrb[135].mxu1  ;;  %7623 = vrcp.f32 %v1383_v37  ;;  %v1380_v32 = vpop.xlane.xlu0 %1379 }
 0x362   : > { %14986 = vst [vmem:[#allocation176_spill] sm:$0xff] %v10630_v13  ;;  %7625 = vrcp.f32 %v1380_v32 }
 0x363   : > { %v7622_v12 = vpop.eup %7621  ;;  %v10633_v43 = vpop.f32.mrb[104].mxu0 }
 0x364   : > { %14987 = vst [vmem:[#allocation177_spill] sm:$0xff] %v10633_v43  ;;  %v1468_v30 = vmul.f32 %v7622_v12, %v10088_v51  ;;  %v10638_v15 = vpop.f32.mrb[105].mxu0 }
 0x365   : > { %14989 = vst [vmem:[#allocation179_spill] sm:$0xff] %v10638_v15  ;;  %v10644_v1 = vpop.f32.mrb[106].mxu0 }
 0x366   : > { %v10635_v22 = vpop.f32.mrb[136].mxu1  ;;  %v10642_v55 = vpack.c.bf16 %v1469_v31, %v1468_v30  ;;  %14992 = vst [vmem:[#allocation182_spill] sm:$0xff] %v10644_v1  ;;  %v10652_v51 = vpop.f32.mrb[107].mxu0  ;;  %v14996_v31 = vlaneseq }
 0x367   : > { %14988 = vst [vmem:[#allocation178_spill] sm:$0xff] %v10635_v22  ;;  %v10640_v60 = vpop.f32.mrb[137].mxu1  ;;  %14994 = vst [vmem:[#allocation184_spill] sm:$0xff] %v10652_v51  ;;  %v2149_v51 = vld [vmem:[%s14441_s7] sm:$0xff] }
 0x368   : > { %14990 = vst [vmem:[#allocation180_spill] sm:$0xff] %v10640_v60  ;;  %14991 = vst [vmem:[#allocation181_spill] sm:$0xff] %v10642_v55  ;;  %v10646_v13 = vpop.f32.mrb[138].mxu1  ;;  %7000 = vmatmul.mubr.msk.bf16.gmra.mrb[176].mxu0 %vm1131_vm0, %v10642_v55  ;;  %7017 = vmatmul.mubr.msk.bf16.gmra.mrb[208].mxu1 %vm1131_vm0, %v10642_v55  ;;  %v10659_v12 = vshrl.u32 %v14996_v31, 7 }
 0x369   : > { %14993 = vst [vmem:[#allocation183_spill] sm:$0xff] %v10646_v13  ;;  %5310 = vmatprep.mubr.bf16.mxu0 %v14775_v53  ;;  %5503 = vmatprep.mubr.bf16.mxu1 %v14775_v53  ;;  %v10656_v58 = vpop.f32.mrb[139].mxu1 }
 0x36a   : > { %14995 = vst [vmem:[#allocation185_spill] sm:$0xff] %v10656_v58  ;;  %14997 = vst [vmem:[#allocation186_spill] sm:$0xff] %v10659_v12  ;;  %v2153_v60 = vsub.s32 0, %v10659_v12  ;;  %v2161_v15 = vsub.s32 2, %v10659_v12  ;;  %v2157_v31 = vsub.s32 1, %v10659_v12 }
 0x36b   : > { %v10661_v37 = vpop.f32.mrb[108].mxu0  ;;  %v7624_v13 = vpop.eup %7623 }
 0x36c   : > { %14998 = vst [vmem:[#allocation187_spill] sm:$0xff] %v10661_v37  ;;  %v10665_v1 = vpop.f32.mrb[109].mxu0  ;;  %v1471_v32 = vmul.f32 %v7624_v13, %v10094_v47  ;;  %v7626_v58 = vpop.eup %7625  ;;  %v10680_v55 = vrot.slane %v2149_v51, %v2161_v15  ;;  %v10688_v47 = vrot.slane %v2149_v51, %v2157_v31 }
 0x36d   : > { %15000 = vst [vmem:[#allocation189_spill] sm:$0xff] %v10665_v1  ;;  %v1470_v37 = vmul.f32 %v7626_v58, %v10096_v54  ;;  %v10678_v1 = vrot.slane %v2149_v51, %v2153_v60  ;;  %v10684_v20 = vpop.f32.mrb[110].mxu0  ;;  %v1389_v13 = vpop.xlane.xlu1 %1388 }
 0x36e   : > { %v10663_v30 = vpop.f32.mrb[140].mxu1  ;;  %15004 = vst [vmem:[#allocation193_spill] sm:$0xff] %v10684_v20  ;;  %v10702_v60 = vpop.f32.mrb[111].mxu0  ;;  %v10706_v15 = vadd.f32 %v10132_v56, %v10680_v55  ;;  %7627 = vrcp.f32 %v1389_v13  ;;  %v10712_v58 = vadd.f32 %v10134_v35, %v10688_v47  ;;  %v10726_v31 = vadd.f32 %v10140_v9, %v10680_v55 }
 0x36f   : > { %14999 = vst [vmem:[#allocation188_spill] sm:$0xff] %v10663_v30  ;;  %v10674_v22 = vpop.f32.mrb[141].mxu1  ;;  %v2165_v30 = vsub.s32 3, %v10659_v12  ;;  %15002 = vst [vmem:[#allocation191_spill] sm:$0xff] %v10678_v1  ;;  %v10682_v43 = vpack.c.bf16 %v1471_v32, %v1470_v37  ;;  %v10698_v54 = vadd.f32 %v10130_v41, %v10678_v1  ;;  %v1386_v37 = vpop.xlane.xlu0 %1385  ;;  %v10721_v32 = vadd.f32 %v10138_v3, %v10678_v1  ;;  %v15053_v12 = vld [vmem:[#allocation11_spill] sm:$0xff] }
 0x370   : > { %15001 = vst [vmem:[#allocation190_spill] sm:$0xff] %v10674_v22  ;;  %v10686_v5 = vpop.f32.mrb[142].mxu1  ;;  %15006 = vst [vmem:[#allocation195_spill] sm:$0xff] %v10702_v60  ;;  %v3285_v56 = vsub.f32 0.0, %v10706_v15  ;;  %7629 = vrcp.f32 %v1386_v37  ;;  %v3284_v35 = vsub.f32 0.0, %v10712_v58  ;;  %v10731_v13 = vadd.f32 %v10142_v27, %v10688_v47 }
 0x371   : > { %15003 = vst [vmem:[#allocation192_spill] sm:$0xff] %v10682_v43  ;;  %15005 = vst [vmem:[#allocation194_spill] sm:$0xff] %v10686_v5  ;;  %v10690_v2 = vrot.slane %v2149_v51, %v2165_v30  ;;  %7001 = vmatmul.mubr.msk.bf16.gmra.mrb[180].mxu0 %vm1131_vm0, %v10682_v43  ;;  %7018 = vmatmul.mubr.msk.bf16.gmra.mrb[212].mxu1 %vm1131_vm0, %v10682_v43  ;;  %v10708_v51 = vpop.f32.mrb[143].mxu1  ;;  %v3283_v30 = vsub.f32 0.0, %v10698_v54  ;;  %v3291_v60 = vsub.f32 0.0, %v10721_v32  ;;  %v3293_v20 = vsub.f32 0.0, %v10726_v31 }
 0x372   : > { %5320 = vmatprep.mubr.bf16.mxu0 %v14775_v53  ;;  %5513 = vmatprep.mubr.bf16.mxu1 %v14775_v53  ;;  %15007 = vst [vmem:[#allocation196_spill] sm:$0xff] %v10708_v51  ;;  %v3543_v37 = vmul.f32 1.442695, %v3285_v56  ;;  %v10746_v27 = vadd.f32 %v10150_v21, %v10678_v1  ;;  %v3541_v43 = vmul.f32 1.442695, %v3284_v35  ;;  %v3292_v40 = vsub.f32 0.0, %v10731_v13 }
 0x373   : > { %v10716_v41 = vadd.f32 %v10136_v50, %v10690_v2  ;;  %v3539_v51 = vmul.f32 1.442695, %v3283_v30  ;;  %v10737_v3 = vadd.f32 %v10144_v36, %v10690_v2  ;;  %v10739_v5 = vpop.f32.mrb[112].mxu0  ;;  %v3555_v56 = vmul.f32 1.442695, %v3291_v60 }
 0x374   : > { %15008 = vst [vmem:[#allocation197_spill] sm:$0xff] %v10739_v5  ;;  %v10748_v22 = vpop.f32.mrb[113].mxu0  ;;  %v3559_v21 = vmul.f32 1.442695, %v3293_v20  ;;  %v3299_v24 = vsub.f32 0.0, %v10746_v27  ;;  %v10761_v35 = vadd.f32 %v10152_v42, %v10680_v55  ;;  %v10768_v60 = vadd.f32 %v10154_v4, %v10688_v47  ;;  %v1395_v42 = vpop.xlane.xlu1 %1394 }
 0x375   : > { %v3286_v50 = vsub.f32 0.0, %v10716_v41  ;;  %15010 = vst [vmem:[#allocation199_spill] sm:$0xff] %v10748_v22  ;;  %v10753_v36 = vpop.f32.mrb[114].mxu0  ;;  %7631 = vpow2.f32 %v3539_v51  ;;  %v3557_v22 = vmul.f32 1.442695, %v3292_v40  ;;  %v10774_v40 = vadd.f32 %v10156_v59, %v10690_v2 }
 0x376   : > { %v10741_v9 = vpop.f32.mrb[144].mxu1  ;;  %15012 = vst [vmem:[#allocation201_spill] sm:$0xff] %v10753_v36  ;;  %7633 = vpow2.f32 %v3543_v37  ;;  %v3301_v4 = vsub.f32 0.0, %v10761_v35  ;;  %v1392_v37 = vpop.xlane.xlu0 %1391  ;;  %v10888_v29 = vadd.f32 %v15050_v6, %v10678_v1 }
 0x377   : > { %15009 = vst [vmem:[#allocation198_spill] sm:$0xff] %v10741_v9  ;;  %v10750_v30 = vpop.f32.mrb[145].mxu1  ;;  %v3545_v5 = vmul.f32 1.442695, %v3286_v50  ;;  %v3294_v9 = vsub.f32 0.0, %v10737_v3  ;;  %7635 = vpow2.f32 %v3541_v43  ;;  %15016 = vst [vmem:[#allocation205_spill] sm:$0xff] %v10774_v40 }
 0x378   : > { %15011 = vst [vmem:[#allocation200_spill] sm:$0xff] %v10750_v30  ;;  %v7628_v23 = vpop.eup %7627  ;;  %v10755_v62 = vpop.f32.mrb[146].mxu1  ;;  %v3302_v59 = vsub.f32 0.0, %v10774_v40  ;;  %15051 = vst [vmem:[#allocation10_spill] sm:$0xff] %v10888_v29 }
 0x379   : > { %15013 = vst [vmem:[#allocation202_spill] sm:$0xff] %v10755_v62  ;;  %v1473_v36 = vmul.f32 %v7628_v23, %v10104_v16  ;;  %v10764_v30 = vpop.f32.mrb[115].mxu0  ;;  %7637 = vpow2.f32 %v3545_v5  ;;  %v10770_v51 = vpop.f32.mrb[147].mxu1  ;;  %v3561_v20 = vmul.f32 1.442695, %v3294_v9  ;;  %v10779_v23 = vadd.f32 %v10158_v63, %v10678_v1 }
 0x37a   : > { %15014 = vst [vmem:[#allocation203_spill] sm:$0xff] %v10764_v30  ;;  %v7630_v50 = vpop.eup %7629  ;;  %15015 = vst [vmem:[#allocation204_spill] sm:$0xff] %v10770_v51  ;;  %7639 = vpow2.f32 %v3555_v56  ;;  %v3571_v16 = vmul.f32 1.442695, %v3299_v24  ;;  %v3300_v9 = vsub.f32 0.0, %v10768_v60  ;;  %v10799_v30 = vadd.f32 %v10160_v14, %v10680_v55 }
 0x37b   : > { %v1472_v43 = vmul.f32 %v7630_v50, %v10108_v19  ;;  %7641 = vpow2.f32 %v3559_v21  ;;  %15017 = vst [vmem:[#allocation206_spill] sm:$0xff] %v10779_v23  ;;  %v3307_v19 = vsub.f32 0.0, %v10779_v23  ;;  %v3575_v24 = vmul.f32 1.442695, %v3301_v4 }
 0x37c   : > { %7643 = vpow2.f32 %v3557_v22  ;;  %v3577_v21 = vmul.f32 1.442695, %v3302_v59  ;;  %15021 = vst [vmem:[#allocation210_spill] sm:$0xff] %v10799_v30  ;;  %v10807_v59 = vadd.f32 %v10162_v49, %v10688_v47  ;;  %v10813_v14 = vadd.f32 %v10164_v48, %v10690_v2 }
 0x37d   : > { %v10782_v5 = vpack.c.bf16 %v1473_v36, %v1472_v43  ;;  %7645 = vrcp.f32 %v1395_v42  ;;  %v3573_v36 = vmul.f32 1.442695, %v3300_v9  ;;  %v10793_v42 = vpop.f32.mrb[116].mxu0  ;;  %v3309_v49 = vsub.f32 0.0, %v10799_v30 }
 0x37e   : > { %7647 = vpow2.f32 %v3561_v20  ;;  %v3587_v20 = vmul.f32 1.442695, %v3307_v19  ;;  %15019 = vst [vmem:[#allocation208_spill] sm:$0xff] %v10793_v42  ;;  %v10795_v43 = vpop.f32.mrb[148].mxu1  ;;  %v10801_v62 = vpop.f32.mrb[117].mxu0  ;;  %15024 = vst [vmem:[#allocation213_spill] sm:$0xff] %v10807_v59  ;;  %v10825_v48 = vadd.f32 %v10172_v0, %v10680_v55 }
 0x37f   : > { %15018 = vst [vmem:[#allocation207_spill] sm:$0xff] %v10782_v5  ;;  %7002 = vmatmul.mubr.msk.bf16.gmra.mrb[184].mxu0 %vm1131_vm0, %v10782_v5  ;;  %7019 = vmatmul.mubr.msk.bf16.gmra.mrb[216].mxu1 %vm1131_vm0, %v10782_v5  ;;  %7649 = vpow2.f32 %v3571_v16  ;;  %v7632_v63 = vpop.eup %7631  ;;  %15020 = vst [vmem:[#allocation209_spill] sm:$0xff] %v10795_v43  ;;  %v10803_v4 = vpop.f32.mrb[149].mxu1  ;;  %v3310_v5 = vsub.f32 0.0, %v10813_v14  ;;  %v15034_v0 = vld [vmem:[#allocation9_spill] sm:$0xff] }
 0x380   : > { %5330 = vmatprep.mubr.bf16.mxu0 %v14775_v53  ;;  %5523 = vmatprep.mubr.bf16.mxu1 %v14775_v53  ;;  %v7634_v22 = vpop.eup %7633  ;;  %7651 = vrcp.f32 %v1392_v37  ;;  %v4051_v51 = vadd.f32 1.0, %v7632_v63  ;;  %15022 = vst [vmem:[#allocation211_spill] sm:$0xff] %v10801_v62  ;;  %15023 = vst [vmem:[#allocation212_spill] sm:$0xff] %v10803_v4  ;;  %v10809_v63 = vpop.f32.mrb[118].mxu0  ;;  %v10839_v46 = vadd.f32 %v15034_v0, %v10690_v2  ;;  %v3591_v52 = vmul.f32 1.442695, %v3309_v49 }
 0x381   : > { %v7636_v56 = vpop.eup %7635  ;;  %7653 = vpow2.f32 %v3575_v24  ;;  %v4053_v37 = vadd.f32 1.0, %v7634_v22  ;;  %15025 = vst [vmem:[#allocation214_spill] sm:$0xff] %v10809_v63  ;;  %15026 = vst [vmem:[#allocation215_spill] sm:$0xff] %v10813_v14  ;;  %v10815_v4 = vpop.f32.mrb[150].mxu1 }
 0x382   : > { %7655 = vpow2.f32 %v3573_v36  ;;  %v4052_v43 = vadd.f32 1.0, %v7636_v56  ;;  %15027 = vst [vmem:[#allocation216_spill] sm:$0xff] %v10815_v4  ;;  %v10820_v56 = vadd.f32 %v10170_v39, %v10678_v1  ;;  %15029 = vst [vmem:[#allocation218_spill] sm:$0xff] %v10825_v48  ;;  %v15032_v4 = vld [vmem:[#allocation7_spill] sm:$0xff]  ;;  %v10834_v62 = vpop.f32.mrb[151].mxu1 }
 0x383   : > { %v7638_v50 = vpop.eup %7637  ;;  %7657 = vpow2.f32 %v3577_v21  ;;  %15033 = vst [vmem:[#allocation7_spill] sm:$0xff] %v10834_v62  ;;  %15035 = vst [vmem:[#allocation9_spill] sm:$0xff] %v10839_v46 }
 0x384   : > { %v7640_v16 = vpop.eup %7639  ;;  %v4054_v42 = vadd.f32 1.0, %v7638_v50  ;;  %7659 = vpow2.f32 %v3587_v20  ;;  %15028 = vst [vmem:[#allocation217_spill] sm:$0xff] %v10820_v56  ;;  %v3308_v50 = vsub.f32 0.0, %v10807_v59  ;;  %v10827_v20 = vpop.f32.mrb[119].mxu0 }
 0x385   : > { %v7642_v9 = vpop.eup %7641  ;;  %7661 = vrcp.f32 %v4051_v51  ;;  %v4059_v36 = vadd.f32 1.0, %v7640_v16  ;;  %15030 = vst [vmem:[#allocation219_spill] sm:$0xff] %v10827_v20  ;;  %v10831_v16 = vadd.f32 %v10174_v7, %v10688_v47  ;;  %v15036_v20 = vld [vmem:[#allocation8_spill] sm:$0xff] }
 0x386   : > { %v7644_v19 = vpop.eup %7643  ;;  %7663 = vrcp.f32 %v4053_v37  ;;  %v4061_v63 = vadd.f32 1.0, %v7642_v9  ;;  %v3589_v62 = vmul.f32 1.442695, %v3308_v50 }
 0x387   : > { %v7646_v24 = vpop.eup %7645  ;;  %7665 = vrcp.f32 %v4052_v43  ;;  %v4060_v51 = vadd.f32 1.0, %v7644_v19  ;;  %15031 = vst [vmem:[#allocation220_spill] sm:$0xff] %v10831_v16  ;;  %v3315_v19 = vsub.f32 0.0, %v10820_v56  ;;  %v3316_v0 = vsub.f32 0.0, %v10831_v16 }
 0x388   : > { %v7648_v22 = vpop.eup %7647  ;;  %v1475_v39 = vmul.f32 %v7646_v24, %v15032_v4  ;;  %7667 = vrcp.f32 %v4054_v42  ;;  %v3317_v4 = vsub.f32 0.0, %v10825_v48  ;;  %v15037_v24 = vld [vmem:[#allocation20_spill] sm:$0xff]  ;;  %v15095_v48 = vld [vmem:[#allocation18_spill] sm:$0xff] }
 0x389   : > { %v7650_v21 = vpop.eup %7649  ;;  %v4062_v9 = vadd.f32 1.0, %v7648_v22  ;;  %7669 = vrcp.f32 %v4059_v36  ;;  %v10846_v42 = vadd.f32 %v15037_v24, %v10678_v1  ;;  %v10858_v24 = vpop.f32.mrb[152].mxu1  ;;  %v3603_v50 = vmul.f32 1.442695, %v3315_v19 }
 0x38a   : > { %v7652_v37 = vpop.eup %7651  ;;  %v4067_v43 = vadd.f32 1.0, %v7650_v21  ;;  %7671 = vrcp.f32 %v4061_v63  ;;  %v3593_v21 = vmul.f32 1.442695, %v3310_v5  ;;  %v15040_v63 = vld [vmem:[#allocation21_spill] sm:$0xff]  ;;  %15043 = vst [vmem:[#allocation222_spill] sm:$0xff] %v10858_v24  ;;  %v10871_v24 = vpop.f32.mrb[153].mxu1 }
 0x38b   : > { %v1474_v7 = vmul.f32 %v7652_v37, %v15036_v20  ;;  %15038 = vst [vmem:[#allocation8_spill] sm:$0xff] %v10846_v42  ;;  %v7654_v22 = vpop.eup %7653  ;;  %7673 = vrcp.f32 %v4060_v51  ;;  %v3318_v20 = vsub.f32 0.0, %v10839_v46  ;;  %v10854_v49 = vadd.f32 %v15040_v63, %v10680_v55  ;;  %v10856_v37 = vpop.f32.mrb[120].mxu0  ;;  %15047 = vst [vmem:[#allocation224_spill] sm:$0xff] %v10871_v24  ;;  %v15085_v46 = vld [vmem:[#allocation28_spill] sm:$0xff] }
 0x38c   : > { %v7656_v36 = vpop.eup %7655  ;;  %7675 = vrcp.f32 %v4062_v9  ;;  %15042 = vst [vmem:[#allocation221_spill] sm:$0xff] %v10856_v37  ;;  %v10864_v5 = vpop.f32.mrb[121].mxu0  ;;  %v3323_v9 = vsub.f32 0.0, %v10846_v42  ;;  %v3605_v19 = vmul.f32 1.442695, %v3316_v0  ;;  %v15048_v37 = vld [vmem:[#allocation23_spill] sm:$0xff] }
 0x38d   : > { %v10849_v17 = vpack.c.bf16 %v1475_v39, %v1474_v7  ;;  %15041 = vst [vmem:[#allocation21_spill] sm:$0xff] %v10854_v49  ;;  %v7658_v26 = vpop.eup %7657  ;;  %7677 = vrcp.f32 %v4067_v43  ;;  %15044 = vst [vmem:[#allocation223_spill] sm:$0xff] %v10864_v5  ;;  %v3607_v39 = vmul.f32 1.442695, %v3317_v4  ;;  %v15045_v7 = vld [vmem:[#allocation22_spill] sm:$0xff]  ;;  %v3325_v4 = vsub.f32 0.0, %v10854_v49 }
 0x38e   : > { %v7660_v51 = vpop.eup %7659  ;;  %7679 = vpow2.f32 %v3591_v52  ;;  %v10869_v63 = vadd.f32 %v15045_v7, %v10688_v47  ;;  %v3609_v52 = vmul.f32 1.442695, %v3318_v20  ;;  %v10882_v7 = vadd.f32 %v15048_v37, %v10690_v2 }
 0x38f   : > { %15039 = vst [vmem:[#allocation20_spill] sm:$0xff] %v10849_v17  ;;  %7003 = vmatmul.mubr.msk.bf16.gmra.mrb[188].mxu0 %vm1131_vm0, %v10849_v17  ;;  %7020 = vmatmul.mubr.msk.bf16.gmra.mrb[220].mxu1 %vm1131_vm0, %v10849_v17  ;;  %v10875_v43 = vpop.eup %7661  ;;  %7681 = vpow2.f32 %v3589_v62  ;;  %v4069_v24 = vadd.f32 1.0, %v7654_v22  ;;  %v10890_v62 = vpop.f32.mrb[122].mxu0  ;;  %v10897_v37 = vadd.f32 %v15053_v12, %v10680_v55  ;;  %v4068_v22 = vadd.f32 1.0, %v7656_v36 }
 0x390   : > { %15046 = vst [vmem:[#allocation22_spill] sm:$0xff] %v10869_v63  ;;  %5340 = vmatprep.mubr.bf16.mxu0 %v14775_v53  ;;  %5533 = vmatprep.mubr.bf16.mxu1 %v14775_v53  ;;  %v10877_v5 = vpop.eup %7663  ;;  %7683 = vpow2.f32 %v3593_v21  ;;  %15049 = vst [vmem:[#allocation23_spill] sm:$0xff] %v10882_v7  ;;  %v3619_v21 = vmul.f32 1.442695, %v3323_v9  ;;  %v3324_v20 = vsub.f32 0.0, %v10869_v63  ;;  %v3331_v9 = vsub.f32 0.0, %v10888_v29 }
 0x391   : > { %v10884_v17 = vpop.eup %7665  ;;  %7685 = vpow2.f32 %v3603_v50  ;;  %15052 = vst [vmem:[#allocation225_spill] sm:$0xff] %v10890_v62  ;;  %15054 = vst [vmem:[#allocation11_spill] sm:$0xff] %v10897_v37  ;;  %v3623_v6 = vmul.f32 1.442695, %v3325_v4  ;;  %v3326_v62 = vsub.f32 0.0, %v10882_v7  ;;  %v10907_v53 = vpop.f32.mrb[154].mxu1 }
 0x392   : > { %v10892_v0 = vpop.eup %7667  ;;  %7687 = vpow2.f32 %v3607_v39  ;;  %v4070_v39 = vadd.f32 1.0, %v7658_v26  ;;  %15055 = vst [vmem:[#allocation226_spill] sm:$0xff] %v10907_v53  ;;  %v3621_v11 = vmul.f32 1.442695, %v3324_v20  ;;  %v3333_v36 = vsub.f32 0.0, %v10897_v37  ;;  %v10914_v44 = vpop.f32.mrb[123].mxu0 }
 0x393   : > { %v10899_v33 = vpop.eup %7669  ;;  %7689 = vpow2.f32 %v3605_v19  ;;  %v3625_v18 = vmul.f32 1.442695, %v3326_v62  ;;  %15056 = vst [vmem:[#allocation227_spill] sm:$0xff] %v10914_v44  ;;  %v10916_v26 = vpop.f32.mrb[155].mxu1  ;;  %v3635_v53 = vmul.f32 1.442695, %v3331_v9 }
 0x394   : > { %v10901_v50 = vpop.eup %7671  ;;  %7691 = vpow2.f32 %v3609_v52  ;;  %v4075_v52 = vadd.f32 1.0, %v7660_v51  ;;  %15057 = vst [vmem:[#allocation228_spill] sm:$0xff] %v10916_v26  ;;  %v15058_v20 = vld [vmem:[#allocation24_spill] sm:$0xff]  ;;  %v15060_v62 = vld [vmem:[#allocation25_spill] sm:$0xff] }
 0x395   : > { %v10904_v34 = vpop.eup %7673  ;;  %7693 = vrcp.f32 %v4069_v24  ;;  %v10920_v37 = vadd.f32 %v15058_v20, %v10688_v47  ;;  %v10924_v44 = vadd.f32 %v15060_v62, %v10690_v2  ;;  %v15062_v20 = vld [vmem:[#allocation12_spill] sm:$0xff] }
 0x396   : > { %v10909_v12 = vpop.eup %7675  ;;  %7695 = vpow2.f32 %v3619_v21  ;;  %v3639_v21 = vmul.f32 1.442695, %v3333_v36  ;;  %v10929_v28 = vadd.f32 %v15062_v20, %v10678_v1 }
 0x397   : > { %v10912_v19 = vpop.eup %7677  ;;  %7697 = vrcp.f32 %v4068_v22  ;;  %15059 = vst [vmem:[#allocation24_spill] sm:$0xff] %v10920_v37  ;;  %15061 = vst [vmem:[#allocation25_spill] sm:$0xff] %v10924_v44  ;;  %v3332_v36 = vsub.f32 0.0, %v10920_v37 }
 0x398   : > { %v7680_v4 = vpop.eup %7679  ;;  %7699 = vpow2.f32 %v3623_v6  ;;  %15063 = vst [vmem:[#allocation12_spill] sm:$0xff] %v10929_v28 }
 0x399   : > { %v7682_v24 = vpop.eup %7681  ;;  %7701 = vrcp.f32 %v4070_v39  ;;  %v4077_v51 = vadd.f32 1.0, %v7680_v4  ;;  %v10933_v4 = vpop.f32.mrb[124].mxu0 }
 0x39a   : > { %v7684_v57 = vpop.eup %7683  ;;  %7703 = vpow2.f32 %v3621_v11  ;;  %v4076_v6 = vadd.f32 1.0, %v7682_v24  ;;  %15064 = vst [vmem:[#allocation229_spill] sm:$0xff] %v10933_v4  ;;  %v10935_v24 = vpop.f32.mrb[156].mxu1 }
 0x39b   : > { %v7686_v29 = vpop.eup %7685  ;;  %7705 = vrcp.f32 %v4075_v52  ;;  %v4078_v39 = vadd.f32 1.0, %v7684_v57  ;;  %15065 = vst [vmem:[#allocation230_spill] sm:$0xff] %v10935_v24  ;;  %v3334_v57 = vsub.f32 0.0, %v10924_v44  ;;  %v10942_v37 = vpop.f32.mrb[125].mxu0  ;;  %v3339_v44 = vsub.f32 0.0, %v10929_v28 }
 0x39c   : > { %v7688_v22 = vpop.eup %7687  ;;  %7707 = vpow2.f32 %v3625_v18  ;;  %v4083_v11 = vadd.f32 1.0, %v7686_v29  ;;  %v15066_v29 = vld [vmem:[#allocation26_spill] sm:$0xff]  ;;  %15068 = vst [vmem:[#allocation231_spill] sm:$0xff] %v10942_v37  ;;  %v10944_v20 = vpop.f32.mrb[157].mxu1 }
 0x39d   : > { %v7690_v26 = vpop.eup %7689  ;;  %7709 = vpow2.f32 %v3635_v53  ;;  %v4085_v18 = vadd.f32 1.0, %v7688_v22  ;;  %15069 = vst [vmem:[#allocation232_spill] sm:$0xff] %v10944_v20  ;;  %v15071_v22 = vld [vmem:[#allocation13_spill] sm:$0xff] }
 0x39e   : > { %v7692_v9 = vpop.eup %7691  ;;  %7711 = vpow2.f32 %v3639_v21  ;;  %v4084_v53 = vadd.f32 1.0, %v7690_v26  ;;  %v10940_v21 = vadd.f32 %v15066_v29, %v10680_v55  ;;  %v10950_v24 = vadd.f32 %v15071_v22, %v10688_v47  ;;  %v10954_v26 = vpop.f32.mrb[158].mxu1 }
 0x39f   : > { %v10931_v52 = vpop.eup %7693  ;;  %7713 = vrcp.f32 %v4077_v51  ;;  %v4086_v51 = vadd.f32 1.0, %v7692_v9  ;;  %15074 = vst [vmem:[#allocation235_spill] sm:$0xff] %v10954_v26  ;;  %v3637_v29 = vmul.f32 1.442695, %v3332_v36  ;;  %v3641_v22 = vmul.f32 1.442695, %v3334_v57 }
 0x3a0   : > { %v7696_v62 = vpop.eup %7695  ;;  %7715 = vrcp.f32 %v4076_v6  ;;  %15067 = vst [vmem:[#allocation26_spill] sm:$0xff] %v10940_v21  ;;  %15072 = vst [vmem:[#allocation13_spill] sm:$0xff] %v10950_v24  ;;  %v10952_v6 = vpop.f32.mrb[126].mxu0  ;;  %v15078_v26 = vld [vmem:[#allocation14_spill] sm:$0xff] }
 0x3a1   : > { %v10946_v7 = vpop.eup %7697  ;;  %7717 = vrcp.f32 %v4078_v39  ;;  %15073 = vst [vmem:[#allocation234_spill] sm:$0xff] %v10952_v6  ;;  %v4091_v20 = vadd.f32 1.0, %v7696_v62  ;;  %v15076_v39 = vld [vmem:[#allocation27_spill] sm:$0xff]  ;;  %v3341_v6 = vsub.f32 0.0, %v10940_v21  ;;  %v10966_v49 = vadd.f32 %v15078_v26, %v10678_v1  ;;  %v10977_v21 = vpop.f32.mrb[159].mxu1 }
 0x3a2   : > { %15070 = vst [vmem:[#allocation233_spill] sm:$0xff] %v10946_v7  ;;  %v7700_v4 = vpop.eup %7699  ;;  %7719 = vrcp.f32 %v4083_v11  ;;  %v10961_v9 = vadd.f32 %v15076_v39, %v10690_v2  ;;  %v10968_v11 = vpop.f32.mrb[127].mxu0  ;;  %v3340_v62 = vsub.f32 0.0, %v10950_v24  ;;  %v3651_v39 = vmul.f32 1.442695, %v3339_v44  ;;  %15084 = vst [vmem:[#allocation239_spill] sm:$0xff] %v10977_v21 }
 0x3a3   : > { %v10957_v37 = vpop.eup %7701  ;;  %7721 = vrcp.f32 %v4085_v18  ;;  %15079 = vst [vmem:[#allocation14_spill] sm:$0xff] %v10966_v49  ;;  %15080 = vst [vmem:[#allocation237_spill] sm:$0xff] %v10968_v11  ;;  %v4093_v18 = vadd.f32 1.0, %v7700_v4  ;;  %v3655_v24 = vmul.f32 1.442695, %v3341_v6  ;;  %v3347_v44 = vsub.f32 0.0, %v10966_v49 }
 0x3a4   : > { %15075 = vst [vmem:[#allocation236_spill] sm:$0xff] %v10957_v37  ;;  %15077 = vst [vmem:[#allocation27_spill] sm:$0xff] %v10961_v9  ;;  %v7704_v63 = vpop.eup %7703  ;;  %7723 = vrcp.f32 %v4084_v53  ;;  %v15082_v53 = vld [vmem:[#allocation15_spill] sm:$0xff]  ;;  %v3342_v11 = vsub.f32 0.0, %v10961_v9  ;;  %v15088_v21 = vld [vmem:[#allocation16_spill] sm:$0xff] }
 0x3a5   : > { %v10970_v36 = vpop.eup %7705  ;;  %7725 = vrcp.f32 %v4086_v51  ;;  %v10975_v57 = vadd.f32 %v15082_v53, %v10680_v55  ;;  %v4092_v26 = vadd.f32 1.0, %v7704_v63  ;;  %v10982_v51 = vadd.f32 %v15085_v46, %v10688_v47  ;;  %v15091_v9 = vld [vmem:[#allocation17_spill] sm:$0xff] }
 0x3a6   : > { %15081 = vst [vmem:[#allocation238_spill] sm:$0xff] %v10970_v36  ;;  %v7708_v28 = vpop.eup %7707  ;;  %7727 = vpow2.f32 %v3637_v29  ;;  %v3653_v53 = vmul.f32 1.442695, %v3340_v62  ;;  %v10989_v16 = vadd.f32 %v15088_v21, %v10690_v2  ;;  %v3657_v49 = vmul.f32 1.442695, %v3342_v11 }
 0x3a7   : > { %15083 = vst [vmem:[#allocation15_spill] sm:$0xff] %v10975_v57  ;;  %v7710_v42 = vpop.eup %7709  ;;  %7729 = vrcp.f32 %v4091_v20  ;;  %15086 = vst [vmem:[#allocation28_spill] sm:$0xff] %v10982_v51  ;;  %v4094_v20 = vadd.f32 1.0, %v7708_v28  ;;  %v3349_v46 = vsub.f32 0.0, %v10975_v57  ;;  %v3667_v21 = vmul.f32 1.442695, %v3347_v44 }
 0x3a8   : > { %v7712_v4 = vpop.eup %7711  ;;  %7731 = vpow2.f32 %v3641_v22  ;;  %15089 = vst [vmem:[#allocation16_spill] sm:$0xff] %v10989_v16  ;;  %v10996_v22 = vadd.f32 %v15091_v9, %v10678_v1  ;;  %v11005_v28 = vadd.f32 %v15095_v48, %v10680_v55  ;;  %v4099_v57 = vadd.f32 1.0, %v7710_v42 }
 0x3a9   : > { %v10985_v29 = vpop.eup %7713  ;;  %7733 = vrcp.f32 %v4093_v18  ;;  %v3348_v18 = vsub.f32 0.0, %v10982_v51  ;;  %v3350_v9 = vsub.f32 0.0, %v10989_v16  ;;  %v3671_v11 = vmul.f32 1.442695, %v3349_v46  ;;  %v15099_v51 = vld [vmem:[#allocation19_spill] sm:$0xff] }
 0x3aa   : > { %15087 = vst [vmem:[#allocation240_spill] sm:$0xff] %v10985_v29  ;;  %v10991_v63 = vpop.eup %7715  ;;  %7735 = vpow2.f32 %v3651_v39  ;;  %15092 = vst [vmem:[#allocation17_spill] sm:$0xff] %v10996_v22  ;;  %v3357_v42 = vsub.f32 0.0, %v11005_v28 }
 0x3ab   : > { %15090 = vst [vmem:[#allocation241_spill] sm:$0xff] %v10991_v63  ;;  %v10998_v6 = vpop.eup %7717  ;;  %7737 = vrcp.f32 %v4092_v26  ;;  %15096 = vst [vmem:[#allocation18_spill] sm:$0xff] %v11005_v28  ;;  %v3355_v26 = vsub.f32 0.0, %v10996_v22  ;;  %v3669_v48 = vmul.f32 1.442695, %v3348_v18 }
 0x3ac   : > { %15093 = vst [vmem:[#allocation242_spill] sm:$0xff] %v10998_v6  ;;  %v11001_v62 = vpop.eup %7719  ;;  %7739 = vpow2.f32 %v3655_v24  ;;  %v11015_v24 = vadd.f32 %v15099_v51, %v10688_v47  ;;  %v3673_v46 = vmul.f32 1.442695, %v3350_v9 }
 0x3ad   : > { %15094 = vst [vmem:[#allocation243_spill] sm:$0xff] %v11001_v62  ;;  %v11007_v39 = vpop.eup %7721  ;;  %7741 = vpow2.f32 %v3653_v53  ;;  %v15102_v53 = vld [vmem:[#allocation29_spill] sm:$0xff]  ;;  %v3683_v51 = vmul.f32 1.442695, %v3355_v26 }
 0x3ae   : > { %15097 = vst [vmem:[#allocation244_spill] sm:$0xff] %v11007_v39  ;;  %v11010_v56 = vpop.eup %7723  ;;  %7743 = vrcp.f32 %v4094_v20  ;;  %15100 = vst [vmem:[#allocation19_spill] sm:$0xff] %v11015_v24  ;;  %v4101_v39 = vadd.f32 1.0, %v7712_v4  ;;  %v11022_v16 = vadd.f32 %v15102_v53, %v10690_v2  ;;  %v15106_v4 = vld [vmem:[#allocation30_spill] sm:$0xff]  ;;  %v3687_v53 = vmul.f32 1.442695, %v3357_v42 }
 0x3af   : > { %15098 = vst [vmem:[#allocation245_spill] sm:$0xff] %v11010_v56  ;;  %v11017_v44 = vpop.eup %7725  ;;  %7745 = vpow2.f32 %v3657_v49 }
 0x3b0   : > { %15101 = vst [vmem:[#allocation246_spill] sm:$0xff] %v11017_v44  ;;  %v7728_v62 = vpop.eup %7727  ;;  %7747 = vpow2.f32 %v3667_v21  ;;  %15103 = vst [vmem:[#allocation29_spill] sm:$0xff] %v11022_v16  ;;  %v3356_v44 = vsub.f32 0.0, %v11015_v24  ;;  %v11031_v21 = vadd.f32 %v15106_v4, %v10678_v1  ;;  %v15109_v24 = vld [vmem:[#allocation31_spill] sm:$0xff] }
 0x3b1   : > { %v11024_v20 = vpop.eup %7729  ;;  %7749 = vrcp.f32 %v4099_v57  ;;  %v4100_v18 = vadd.f32 1.0, %v7728_v62  ;;  %v11038_v62 = vadd.f32 %v15109_v24, %v10680_v55 }
 0x3b2   : > { %15104 = vst [vmem:[#allocation247_spill] sm:$0xff] %v11024_v20  ;;  %v7732_v22 = vpop.eup %7731  ;;  %7751 = vpow2.f32 %v3671_v11  ;;  %15107 = vst [vmem:[#allocation30_spill] sm:$0xff] %v11031_v21  ;;  %v3358_v20 = vsub.f32 0.0, %v11022_v16  ;;  %v3685_v26 = vmul.f32 1.442695, %v3356_v44  ;;  %v11043_v16 = vpop.f32.mrb[128].mxu0 }
 0x3b3   : > { %v11027_v49 = vpop.eup %7733  ;;  %7753 = vpow2.f32 %v3669_v48  ;;  %v4102_v9 = vadd.f32 1.0, %v7732_v22  ;;  %15110 = vst [vmem:[#allocation31_spill] sm:$0xff] %v11038_v62  ;;  %15112 = vst [vmem:[#allocation251_spill] sm:$0xff] %v11043_v16  ;;  %v11045_v22 = vpop.f32.mrb[160].mxu1 }
 0x3b4   : > { %15105 = vst [vmem:[#allocation248_spill] sm:$0xff] %v11027_v49  ;;  %v7736_v28 = vpop.eup %7735  ;;  %7755 = vrcp.f32 %v4101_v39  ;;  %v3363_v49 = vsub.f32 0.0, %v11031_v21  ;;  %v3689_v42 = vmul.f32 1.442695, %v3358_v20  ;;  %15113 = vst [vmem:[#allocation252_spill] sm:$0xff] %v11045_v22  ;;  %v3365_v20 = vsub.f32 0.0, %v11038_v62 }
 0x3b5   : > { %v11034_v57 = vpop.eup %7737  ;;  %7757 = vpow2.f32 %v3673_v46  ;;  %v4107_v4 = vadd.f32 1.0, %v7736_v28  ;;  %v11053_v28 = vpop.f32.mrb[161].mxu1 }
 0x3b6   : > { %15108 = vst [vmem:[#allocation249_spill] sm:$0xff] %v11034_v57  ;;  %v7740_v11 = vpop.eup %7739  ;;  %7759 = vpow2.f32 %v3683_v51  ;;  %v15114_v51 = vld [vmem:[#allocation32_spill] sm:$0xff]  ;;  %v11051_v57 = vpop.f32.mrb[129].mxu0  ;;  %15117 = vst [vmem:[#allocation254_spill] sm:$0xff] %v11053_v28 }
 0x3b7   : > { %v7742_v48 = vpop.eup %7741  ;;  %7761 = vrcp.f32 %v4100_v18  ;;  %v4109_v44 = vadd.f32 1.0, %v7740_v11  ;;  %v11049_v24 = vadd.f32 %v15114_v51, %v10688_v47  ;;  %15116 = vst [vmem:[#allocation253_spill] sm:$0xff] %v11051_v57  ;;  %v11058_v16 = vpop.f32.mrb[162].mxu1 }
 0x3b8   : > { %v11041_v39 = vpop.eup %7743  ;;  %7763 = vpow2.f32 %v3687_v53  ;;  %v4108_v21 = vadd.f32 1.0, %v7742_v48  ;;  %v11056_v53 = vpop.f32.mrb[130].mxu0  ;;  %15119 = vst [vmem:[#allocation256_spill] sm:$0xff] %v11058_v16  ;;  %v15123_v48 = vld [vmem:[#allocation33_spill] sm:$0xff] }
 0x3b9   : > { %15111 = vst [vmem:[#allocation250_spill] sm:$0xff] %v11041_v39  ;;  %v7746_v46 = vpop.eup %7745  ;;  %7765 = vrcp.f32 %v4102_v9  ;;  %15115 = vst [vmem:[#allocation32_spill] sm:$0xff] %v11049_v24  ;;  %v3699_v9 = vmul.f32 1.442695, %v3363_v49  ;;  %v11062_v11 = vpop.f32.mrb[131].mxu0  ;;  %v3364_v16 = vsub.f32 0.0, %v11049_v24 }
 0x3ba   : > { %v7748_v18 = vpop.eup %7747  ;;  %7767 = vpow2.f32 %v3685_v26  ;;  %15118 = vst [vmem:[#allocation255_spill] sm:$0xff] %v11056_v53  ;;  %15121 = vst [vmem:[#allocation258_spill] sm:$0xff] %v11062_v11  ;;  %v11064_v51 = vpop.f32.mrb[163].mxu1  ;;  %v4110_v39 = vadd.f32 1.0, %v7746_v46  ;;  %v11068_v26 = vadd.f32 %v15123_v48, %v10690_v2  ;;  %v3703_v49 = vmul.f32 1.442695, %v3365_v20 }
 0x3bb   : > { %v11060_v22 = vpop.eup %7749  ;;  %7769 = vrcp.f32 %v4107_v4  ;;  %15122 = vst [vmem:[#allocation259_spill] sm:$0xff] %v11064_v51  ;;  %v4115_v53 = vadd.f32 1.0, %v7748_v18  ;;  %v15126_v4 = vld [vmem:[#allocation34_spill] sm:$0xff] }
 0x3bc   : > { %15120 = vst [vmem:[#allocation257_spill] sm:$0xff] %v11060_v22  ;;  %v7752_v57 = vpop.eup %7751  ;;  %7771 = vpow2.f32 %v3689_v42  ;;  %15124 = vst [vmem:[#allocation33_spill] sm:$0xff] %v11068_v26  ;;  %v11075_v11 = vadd.f32 %v15126_v4, %v10678_v1  ;;  %v3366_v22 = vsub.f32 0.0, %v11068_v26 }
 0x3bd   : > { %v7754_v28 = vpop.eup %7753  ;;  %7773 = vrcp.f32 %v4109_v44  ;;  %v4117_v46 = vadd.f32 1.0, %v7752_v57  ;;  %v15128_v44 = vld [vmem:[#allocation35_spill] sm:$0xff]  ;;  %v15131_v57 = vld [vmem:[#allocation36_spill] sm:$0xff] }
 0x3be   : > { %v11071_v62 = vpop.eup %7755  ;;  %7775 = vrcp.f32 %v4108_v21  ;;  %15127 = vst [vmem:[#allocation34_spill] sm:$0xff] %v11075_v11  ;;  %v4116_v48 = vadd.f32 1.0, %v7754_v28  ;;  %v11080_v18 = vadd.f32 %v15128_v44, %v10680_v55  ;;  %v3701_v21 = vmul.f32 1.442695, %v3364_v16  ;;  %v15134_v44 = vld [vmem:[#allocation37_spill] sm:$0xff] }
 0x3bf   : > { %15125 = vst [vmem:[#allocation260_spill] sm:$0xff] %v11071_v62  ;;  %v7758_v51 = vpop.eup %7757  ;;  %7777 = vpow2.f32 %v3699_v9  ;;  %v3371_v4 = vsub.f32 0.0, %v11075_v11  ;;  %v11087_v9 = vadd.f32 %v15131_v57, %v10688_v47  ;;  %v11093_v26 = vadd.f32 %v15134_v44, %v10690_v2  ;;  %v15137_v57 = vld [vmem:[#allocation38_spill] sm:$0xff] }
 0x3c0   : > { %v7760_v42 = vpop.eup %7759  ;;  %7779 = vrcp.f32 %v4110_v39  ;;  %15129 = vst [vmem:[#allocation35_spill] sm:$0xff] %v11080_v18  ;;  %v4118_v62 = vadd.f32 1.0, %v7758_v51  ;;  %v3705_v16 = vmul.f32 1.442695, %v3366_v22  ;;  %v11100_v11 = vadd.f32 %v15137_v57, %v10678_v1  ;;  %v15141_v22 = vld [vmem:[#allocation39_spill] sm:$0xff] }
 0x3c1   : > { %v11082_v24 = vpop.eup %7761  ;;  %7781 = vrcp.f32 %v4115_v53  ;;  %15132 = vst [vmem:[#allocation36_spill] sm:$0xff] %v11087_v9  ;;  %v4123_v28 = vadd.f32 1.0, %v7760_v42  ;;  %15135 = vst [vmem:[#allocation37_spill] sm:$0xff] %v11093_v26  ;;  %v3373_v53 = vsub.f32 0.0, %v11080_v18  ;;  %v3715_v44 = vmul.f32 1.442695, %v3371_v4 }
 0x3c2   : > { %15130 = vst [vmem:[#allocation261_spill] sm:$0xff] %v11082_v24  ;;  %v7764_v20 = vpop.eup %7763  ;;  %7783 = vpow2.f32 %v3703_v49  ;;  %15138 = vst [vmem:[#allocation38_spill] sm:$0xff] %v11100_v11  ;;  %v11109_v18 = vadd.f32 %v15141_v22, %v10680_v55  ;;  %v15147_v4 = vld [vmem:[#allocation40_spill] sm:$0xff] }
 0x3c3   : > { %v11089_v39 = vpop.eup %7765  ;;  %7785 = vrcp.f32 %v4117_v46  ;;  %v4125_v49 = vadd.f32 1.0, %v7764_v20  ;;  %v11104_v46 = vpop.f32.mrb[164].mxu1 }
 0x3c4   : > { %15133 = vst [vmem:[#allocation262_spill] sm:$0xff] %v11089_v39  ;;  %v7768_v24 = vpop.eup %7767  ;;  %7787 = vrcp.f32 %v4116_v48  ;;  %v11102_v39 = vpop.f32.mrb[132].mxu0  ;;  %15140 = vst [vmem:[#allocation265_spill] sm:$0xff] %v11104_v46  ;;  %v3372_v48 = vsub.f32 0.0, %v11087_v9  ;;  %v11122_v9 = vadd.f32 %v15147_v4, %v10688_v47  ;;  %v15154_v4 = vld [vmem:[#allocation42_spill] sm:$0xff] }
 0x3c5   : > { %v11096_v51 = vpop.eup %7769  ;;  %7789 = vpow2.f32 %v3701_v21  ;;  %15139 = vst [vmem:[#allocation264_spill] sm:$0xff] %v11102_v39  ;;  %15142 = vst [vmem:[#allocation39_spill] sm:$0xff] %v11109_v18  ;;  %v11113_v21 = vpop.f32.mrb[165].mxu1  ;;  %v4124_v57 = vadd.f32 1.0, %v7768_v24  ;;  %v3374_v39 = vsub.f32 0.0, %v11093_v26 }
 0x3c6   : > { %15136 = vst [vmem:[#allocation263_spill] sm:$0xff] %v11096_v51  ;;  %v7772_v42 = vpop.eup %7771  ;;  %7791 = vrcp.f32 %v4118_v62  ;;  %v11111_v51 = vpop.f32.mrb[133].mxu0  ;;  %15144 = vst [vmem:[#allocation267_spill] sm:$0xff] %v11113_v21  ;;  %v3719_v62 = vmul.f32 1.442695, %v3373_v53  ;;  %v15149_v21 = vld [vmem:[#allocation41_spill] sm:$0xff] }
 0x3c7   : > { %15143 = vst [vmem:[#allocation266_spill] sm:$0xff] %v11111_v51  ;;  %v11115_v20 = vpop.eup %7773  ;;  %7793 = vrcp.f32 %v4123_v28  ;;  %15148 = vst [vmem:[#allocation40_spill] sm:$0xff] %v11122_v9  ;;  %v4126_v56 = vadd.f32 1.0, %v7772_v42  ;;  %v3379_v51 = vsub.f32 0.0, %v11100_v11  ;;  %v11129_v24 = vpop.f32.mrb[134].mxu0  ;;  %v3381_v53 = vsub.f32 0.0, %v11109_v18 }
 0x3c8   : > { %15145 = vst [vmem:[#allocation268_spill] sm:$0xff] %v11115_v20  ;;  %v11118_v46 = vpop.eup %7775  ;;  %7795 = vpow2.f32 %v3705_v16  ;;  %v11127_v20 = vadd.f32 %v15149_v21, %v10690_v2  ;;  %15151 = vst [vmem:[#allocation270_spill] sm:$0xff] %v11129_v24  ;;  %v11131_v28 = vpop.f32.mrb[166].mxu1  ;;  %v3717_v16 = vmul.f32 1.442695, %v3372_v48  ;;  %v15157_v21 = vld [vmem:[#allocation43_spill] sm:$0xff] }
 0x3c9   : > { %15146 = vst [vmem:[#allocation269_spill] sm:$0xff] %v11118_v46  ;;  %v7778_v22 = vpop.eup %7777  ;;  %7797 = vrcp.f32 %v4125_v49  ;;  %15152 = vst [vmem:[#allocation271_spill] sm:$0xff] %v11131_v28  ;;  %v11138_v49 = vadd.f32 %v15154_v4, %v10678_v1  ;;  %v3721_v11 = vmul.f32 1.442695, %v3374_v39  ;;  %v11144_v46 = vadd.f32 %v15157_v21, %v10680_v55  ;;  %v11147_v48 = vpop.f32.mrb[135].mxu0 }
 0x3ca   : > { %15150 = vst [vmem:[#allocation41_spill] sm:$0xff] %v11127_v20  ;;  %v11133_v26 = vpop.eup %7779  ;;  %7799 = vpow2.f32 %v3715_v44  ;;  %v4131_v28 = vadd.f32 1.0, %v7778_v22  ;;  %v3380_v44 = vsub.f32 0.0, %v11122_v9  ;;  %15159 = vst [vmem:[#allocation274_spill] sm:$0xff] %v11147_v48  ;;  %v11149_v18 = vpop.f32.mrb[167].mxu1 }
 0x3cb   : > { %15153 = vst [vmem:[#allocation272_spill] sm:$0xff] %v11133_v26  ;;  %15155 = vst [vmem:[#allocation42_spill] sm:$0xff] %v11138_v49  ;;  %v11140_v42 = vpop.eup %7781  ;;  %7801 = vrcp.f32 %v4124_v57  ;;  %v3731_v4 = vmul.f32 1.442695, %v3379_v51  ;;  %v3382_v57 = vsub.f32 0.0, %v11127_v20  ;;  %v15166_v51 = vld [vmem:[#allocation45_spill] sm:$0xff] }
 0x3cc   : > { %15156 = vst [vmem:[#allocation273_spill] sm:$0xff] %v11140_v42  ;;  %15158 = vst [vmem:[#allocation43_spill] sm:$0xff] %v11144_v46  ;;  %v7784_v24 = vpop.eup %7783  ;;  %7803 = vpow2.f32 %v3719_v62  ;;  %v3735_v21 = vmul.f32 1.442695, %v3381_v53  ;;  %v3387_v42 = vsub.f32 0.0, %v11138_v49  ;;  %v15163_v62 = vld [vmem:[#allocation44_spill] sm:$0xff]  ;;  %v11166_v20 = vadd.f32 %v15166_v51, %v10690_v2 }
 0x3cd   : > { %15160 = vst [vmem:[#allocation275_spill] sm:$0xff] %v11149_v18  ;;  %v11151_v26 = vpop.eup %7785  ;;  %7805 = vrcp.f32 %v4126_v56  ;;  %v11159_v22 = vadd.f32 %v15163_v62, %v10688_v47  ;;  %v4133_v48 = vadd.f32 1.0, %v7784_v24  ;;  %v3389_v18 = vsub.f32 0.0, %v11144_v46  ;;  %v15169_v62 = vld [vmem:[#allocation46_spill] sm:$0xff] }
 0x3ce   : > { %15161 = vst [vmem:[#allocation276_spill] sm:$0xff] %v11151_v26  ;;  %v11154_v39 = vpop.eup %7787  ;;  %7807 = vpow2.f32 %v3717_v16  ;;  %v3733_v56 = vmul.f32 1.442695, %v3380_v44  ;;  %15167 = vst [vmem:[#allocation45_spill] sm:$0xff] %v11166_v20  ;;  %v3737_v53 = vmul.f32 1.442695, %v3382_v57  ;;  %v11172_v49 = vadd.f32 %v15169_v62, %v10678_v1 }
 0x3cf   : > { %15162 = vst [vmem:[#allocation277_spill] sm:$0xff] %v11154_v39  ;;  %15164 = vst [vmem:[#allocation44_spill] sm:$0xff] %v11159_v22  ;;  %v7790_v9 = vpop.eup %7789  ;;  %7809 = vpow2.f32 %v3721_v11  ;;  %v3747_v11 = vmul.f32 1.442695, %v3387_v42  ;;  %v3388_v46 = vsub.f32 0.0, %v11159_v22 }
 0x3d0   : > { %v11162_v26 = vpop.eup %7791  ;;  %7811 = vrcp.f32 %v4131_v28  ;;  %15170 = vst [vmem:[#allocation46_spill] sm:$0xff] %v11172_v49  ;;  %v3751_v28 = vmul.f32 1.442695, %v3389_v18  ;;  %v4132_v51 = vadd.f32 1.0, %v7790_v9  ;;  %v3395_v62 = vsub.f32 0.0, %v11172_v49  ;;  %v15176_v9 = vld [vmem:[#allocation48_spill] sm:$0xff] }
 0x3d1   : > { %15165 = vst [vmem:[#allocation278_spill] sm:$0xff] %v11162_v26  ;;  %v11168_v16 = vpop.eup %7793  ;;  %7813 = vpow2.f32 %v3731_v4 }
 0x3d2   : > { %15168 = vst [vmem:[#allocation279_spill] sm:$0xff] %v11168_v16  ;;  %v7796_v24 = vpop.eup %7795  ;;  %7815 = vpow2.f32 %v3735_v21  ;;  %v3390_v16 = vsub.f32 0.0, %v11166_v20  ;;  %v15173_v21 = vld [vmem:[#allocation47_spill] sm:$0xff]  ;;  %v3763_v49 = vmul.f32 1.442695, %v3395_v62 }
 0x3d3   : > { %v11175_v26 = vpop.eup %7797  ;;  %7817 = vrcp.f32 %v4133_v48  ;;  %v4134_v57 = vadd.f32 1.0, %v7796_v24  ;;  %v11183_v42 = vadd.f32 %v15173_v21, %v10680_v55 }
 0x3d4   : > { %15171 = vst [vmem:[#allocation280_spill] sm:$0xff] %v11175_v26  ;;  %v7800_v44 = vpop.eup %7799  ;;  %7819 = vpow2.f32 %v3733_v56  ;;  %v3749_v26 = vmul.f32 1.442695, %v3388_v46  ;;  %v11189_v56 = vadd.f32 %v15176_v9, %v10688_v47  ;;  %v11194_v46 = vpop.f32.mrb[136].mxu0 }
 0x3d5   : > { %v11178_v4 = vpop.eup %7801  ;;  %7821 = vpow2.f32 %v3737_v53  ;;  %15174 = vst [vmem:[#allocation47_spill] sm:$0xff] %v11183_v42  ;;  %v4139_v18 = vadd.f32 1.0, %v7800_v44  ;;  %v3753_v53 = vmul.f32 1.442695, %v3390_v16  ;;  %v3397_v21 = vsub.f32 0.0, %v11183_v42  ;;  %15179 = vst [vmem:[#allocation284_spill] sm:$0xff] %v11194_v46 }
 0x3d6   : > { %15172 = vst [vmem:[#allocation281_spill] sm:$0xff] %v11178_v4  ;;  %v7804_v22 = vpop.eup %7803  ;;  %7823 = vpow2.f32 %v3747_v11  ;;  %15177 = vst [vmem:[#allocation48_spill] sm:$0xff] %v11189_v56  ;;  %v11196_v44 = vpop.f32.mrb[168].mxu1  ;;  %v15183_v42 = vld [vmem:[#allocation49_spill] sm:$0xff] }
 0x3d7   : > { %v11185_v48 = vpop.eup %7805  ;;  %7825 = vpow2.f32 %v3751_v28  ;;  %v4141_v11 = vadd.f32 1.0, %v7804_v22  ;;  %15180 = vst [vmem:[#allocation285_spill] sm:$0xff] %v11196_v44  ;;  %v11201_v16 = vpop.f32.mrb[169].mxu1  ;;  %v11205_v22 = vadd.f32 %v15183_v42, %v10690_v2 }
 0x3d8   : > { %15175 = vst [vmem:[#allocation282_spill] sm:$0xff] %v11185_v48  ;;  %v7808_v20 = vpop.eup %7807  ;;  %7827 = vrcp.f32 %v4132_v51  ;;  %v3396_v48 = vsub.f32 0.0, %v11189_v56  ;;  %v11199_v51 = vpop.f32.mrb[137].mxu0  ;;  %15182 = vst [vmem:[#allocation287_spill] sm:$0xff] %v11201_v16  ;;  %v15190_v16 = vld [vmem:[#allocation51_spill] sm:$0xff] }
 0x3d9   : > { %v7810_v24 = vpop.eup %7809  ;;  %7829 = vrcp.f32 %v4134_v57  ;;  %v4140_v9 = vadd.f32 1.0, %v7808_v20  ;;  %15181 = vst [vmem:[#allocation286_spill] sm:$0xff] %v11199_v51  ;;  %15184 = vst [vmem:[#allocation49_spill] sm:$0xff] %v11205_v22  ;;  %v11211_v44 = vpop.f32.mrb[138].mxu0  ;;  %v3767_v51 = vmul.f32 1.442695, %v3397_v21 }
 0x3da   : > { %v11192_v4 = vpop.eup %7811  ;;  %7831 = vpow2.f32 %v3749_v26  ;;  %v4142_v62 = vadd.f32 1.0, %v7810_v24  ;;  %v15185_v26 = vld [vmem:[#allocation50_spill] sm:$0xff]  ;;  %15187 = vst [vmem:[#allocation288_spill] sm:$0xff] %v11211_v44  ;;  %v11213_v20 = vpop.f32.mrb[170].mxu1  ;;  %v11219_v24 = vadd.f32 %v15190_v16, %v10680_v55  ;;  %v3765_v16 = vmul.f32 1.442695, %v3396_v48 }
 0x3db   : > { %15178 = vst [vmem:[#allocation283_spill] sm:$0xff] %v11192_v4  ;;  %v7814_v28 = vpop.eup %7813  ;;  %7833 = vrcp.f32 %v4139_v18  ;;  %v11209_v46 = vadd.f32 %v15185_v26, %v10678_v1  ;;  %15188 = vst [vmem:[#allocation289_spill] sm:$0xff] %v11213_v20  ;;  %v11225_v56 = vpop.f32.mrb[139].mxu0  ;;  %v15196_v20 = vld [vmem:[#allocation53_spill] sm:$0xff] }
 0x3dc   : > { %v7816_v57 = vpop.eup %7815  ;;  %7835 = vpow2.f32 %v3753_v53  ;;  %15191 = vst [vmem:[#allocation51_spill] sm:$0xff] %v11219_v24  ;;  %v15192_v53 = vld [vmem:[#allocation52_spill] sm:$0xff]  ;;  %15194 = vst [vmem:[#allocation291_spill] sm:$0xff] %v11225_v56  ;;  %v11227_v26 = vpop.f32.mrb[171].mxu1  ;;  %v4147_v44 = vadd.f32 1.0, %v7814_v28 }
 0x3dd   : > { %15186 = vst [vmem:[#allocation50_spill] sm:$0xff] %v11209_v46  ;;  %v11215_v18 = vpop.eup %7817  ;;  %7837 = vpow2.f32 %v3763_v49  ;;  %v11223_v42 = vadd.f32 %v15192_v53, %v10688_v47  ;;  %15195 = vst [vmem:[#allocation292_spill] sm:$0xff] %v11227_v26  ;;  %v4149_v21 = vadd.f32 1.0, %v7816_v57  ;;  %v3398_v53 = vsub.f32 0.0, %v11205_v22 }
 0x3de   : > { %15189 = vst [vmem:[#allocation290_spill] sm:$0xff] %v11215_v18  ;;  %v7820_v4 = vpop.eup %7819  ;;  %7839 = vrcp.f32 %v4141_v11  ;;  %v11231_v18 = vadd.f32 %v15196_v20, %v10690_v2  ;;  %v3403_v10 = vsub.f32 0.0, %v11209_v46  ;;  %v11237_v26 = vadd.f32 %v10280_v61, %v10678_v1 }
 0x3df   : > { %15193 = vst [vmem:[#allocation52_spill] sm:$0xff] %v11223_v42  ;;  %v7822_v49 = vpop.eup %7821  ;;  %7841 = vrcp.f32 %v4140_v9  ;;  %v4148_v28 = vadd.f32 1.0, %v7820_v4  ;;  %v3405_v20 = vsub.f32 0.0, %v11219_v24  ;;  %v3404_v56 = vsub.f32 0.0, %v11223_v42  ;;  %v15203_v4 = vld [vmem:[#allocation55_spill] sm:$0xff]  ;;  %v15205_v42 = vld [vmem:[#allocation56_spill] sm:$0xff] }
 0x3e0   : > { %15197 = vst [vmem:[#allocation53_spill] sm:$0xff] %v11231_v18  ;;  %v7824_v39 = vpop.eup %7823  ;;  %7843 = vrcp.f32 %v4142_v62  ;;  %15198 = vst [vmem:[#allocation293_spill] sm:$0xff] %v11237_v26  ;;  %v4150_v48 = vadd.f32 1.0, %v7822_v49  ;;  %v3406_v57 = vsub.f32 0.0, %v11231_v18  ;;  %v15200_v62 = vld [vmem:[#allocation54_spill] sm:$0xff]  ;;  %v11256_v24 = vadd.f32 %v15205_v42, %v10690_v2 }
 0x3e1   : > { %v7826_v11 = vpop.eup %7825  ;;  %7845 = vpow2.f32 %v3767_v51  ;;  %v11246_v46 = vadd.f32 %v15200_v62, %v10680_v55  ;;  %v4155_v61 = vadd.f32 1.0, %v7824_v39  ;;  %v11252_v51 = vadd.f32 %v15203_v4, %v10688_v47  ;;  %v15207_v62 = vld [vmem:[#allocation57_spill] sm:$0xff] }
 0x3e2   : > { %v11241_v9 = vpop.eup %7827  ;;  %7847 = vrcp.f32 %v4147_v44  ;;  %15206 = vst [vmem:[#allocation56_spill] sm:$0xff] %v11256_v24  ;;  %v4157_v49 = vadd.f32 1.0, %v7826_v11  ;;  %v3411_v18 = vsub.f32 0.0, %v11237_v26  ;;  %v3769_v39 = vmul.f32 1.442695, %v3398_v53 }
 0x3e3   : > { %15199 = vst [vmem:[#allocation294_spill] sm:$0xff] %v11241_v9  ;;  %15201 = vst [vmem:[#allocation54_spill] sm:$0xff] %v11246_v46  ;;  %v11248_v22 = vpop.eup %7829  ;;  %7849 = vrcp.f32 %v4149_v21  ;;  %v11261_v9 = vadd.f32 %v15207_v62, %v10678_v1  ;;  %v3779_v21 = vmul.f32 1.442695, %v3403_v10  ;;  %v3783_v4 = vmul.f32 1.442695, %v3405_v20 }
 0x3e4   : > { %15202 = vst [vmem:[#allocation295_spill] sm:$0xff] %v11248_v22  ;;  %15204 = vst [vmem:[#allocation55_spill] sm:$0xff] %v11252_v51  ;;  %v7832_v44 = vpop.eup %7831  ;;  %7851 = vpow2.f32 %v3765_v16  ;;  %v3781_v14 = vmul.f32 1.442695, %v3404_v56  ;;  %v3785_v42 = vmul.f32 1.442695, %v3406_v57 }
 0x3e5   : > { %15208 = vst [vmem:[#allocation57_spill] sm:$0xff] %v11261_v9  ;;  %v11263_v22 = vpop.eup %7833  ;;  %7853 = vrcp.f32 %v4148_v28  ;;  %v3413_v63 = vsub.f32 0.0, %v11246_v46  ;;  %v4156_v16 = vadd.f32 1.0, %v7832_v44  ;;  %v3412_v26 = vsub.f32 0.0, %v11252_v51  ;;  %v15210_v62 = vld [vmem:[#allocation58_spill] sm:$0xff] }
 0x3e6   : > { %15209 = vst [vmem:[#allocation296_spill] sm:$0xff] %v11263_v22  ;;  %v7836_v6 = vpop.eup %7835  ;;  %7855 = vrcp.f32 %v4150_v48  ;;  %v11269_v59 = vadd.f32 %v15210_v62, %v10680_v55  ;;  %v3795_v10 = vmul.f32 1.442695, %v3411_v18  ;;  %v3414_v53 = vsub.f32 0.0, %v11256_v24  ;;  %v15214_v48 = vld [vmem:[#allocation59_spill] sm:$0xff]  ;;  %v15219_v24 = vld [vmem:[#allocation61_spill] sm:$0xff] }
 0x3e7   : > { %v7838_v11 = vpop.eup %7837  ;;  %7857 = vrcp.f32 %v4155_v61  ;;  %v3419_v56 = vsub.f32 0.0, %v11261_v9  ;;  %v4158_v20 = vadd.f32 1.0, %v7836_v6  ;;  %v11279_v57 = vadd.f32 %v15214_v48, %v10688_v47  ;;  %v15216_v61 = vld [vmem:[#allocation60_spill] sm:$0xff] }
 0x3e8   : > { %15211 = vst [vmem:[#allocation58_spill] sm:$0xff] %v11269_v59  ;;  %v11271_v22 = vpop.eup %7839  ;;  %7859 = vrcp.f32 %v4157_v49  ;;  %v11283_v44 = vadd.f32 %v15216_v61, %v10690_v2  ;;  %v4163_v49 = vadd.f32 1.0, %v7838_v11  ;;  %v3799_v18 = vmul.f32 1.442695, %v3413_v63  ;;  %v15223_v61 = vld [vmem:[#allocation63_spill] sm:$0xff]  ;;  %v15228_v11 = vld [vmem:[#allocation65_spill] sm:$0xff] }
 0x3e9   : > { %15212 = vst [vmem:[#allocation297_spill] sm:$0xff] %v11271_v22  ;;  %v11275_v28 = vpop.eup %7841  ;;  %7861 = vpow2.f32 %v3769_v39  ;;  %15215 = vst [vmem:[#allocation59_spill] sm:$0xff] %v11279_v57  ;;  %v11289_v9 = vadd.f32 %v15219_v24, %v10678_v1  ;;  %v3421_v6 = vsub.f32 0.0, %v11269_v59  ;;  %v15221_v39 = vld [vmem:[#allocation62_spill] sm:$0xff]  ;;  %v11298_v46 = vadd.f32 %v15223_v61, %v10688_v47  ;;  %v11310_v59 = vpop.f32.mrb[140].mxu0 }
 0x3ea   : > { %15213 = vst [vmem:[#allocation298_spill] sm:$0xff] %v11275_v28  ;;  %15217 = vst [vmem:[#allocation60_spill] sm:$0xff] %v11283_v44  ;;  %v11285_v62 = vpop.eup %7843  ;;  %7863 = vpow2.f32 %v3779_v21  ;;  %v11294_v48 = vadd.f32 %v15221_v39, %v10680_v55  ;;  %v3797_v63 = vmul.f32 1.442695, %v3412_v26  ;;  %v15226_v21 = vld [vmem:[#allocation64_spill] sm:$0xff]  ;;  %v11312_v39 = vpop.f32.mrb[172].mxu1 }
 0x3eb   : > { %15218 = vst [vmem:[#allocation299_spill] sm:$0xff] %v11285_v62  ;;  %15220 = vst [vmem:[#allocation61_spill] sm:$0xff] %v11289_v9  ;;  %v7846_v51 = vpop.eup %7845  ;;  %7865 = vrcp.f32 %v4156_v16  ;;  %v11304_v24 = vadd.f32 %v15226_v21, %v10690_v2  ;;  %v11308_v16 = vadd.f32 %v15228_v11, %v10678_v1  ;;  %v3801_v61 = vmul.f32 1.442695, %v3414_v53  ;;  %v11320_v21 = vpop.f32.mrb[173].mxu1 }
 0x3ec   : > { %15222 = vst [vmem:[#allocation62_spill] sm:$0xff] %v11294_v48  ;;  %15224 = vst [vmem:[#allocation63_spill] sm:$0xff] %v11298_v46  ;;  %v11300_v62 = vpop.eup %7847  ;;  %7867 = vpow2.f32 %v3783_v4  ;;  %v3422_v26 = vsub.f32 0.0, %v11283_v44  ;;  %v11318_v4 = vpop.f32.mrb[141].mxu0  ;;  %v4165_v11 = vadd.f32 1.0, %v7846_v51  ;;  %v3429_v44 = vsub.f32 0.0, %v11294_v48 }
 0x3ed   : > { %15225 = vst [vmem:[#allocation300_spill] sm:$0xff] %v11300_v62  ;;  %15227 = vst [vmem:[#allocation64_spill] sm:$0xff] %v11304_v24  ;;  %v11314_v28 = vpop.eup %7849  ;;  %7869 = vrcp.f32 %v4158_v20  ;;  %v3420_v62 = vsub.f32 0.0, %v11279_v57  ;;  %v3811_v29 = vmul.f32 1.442695, %v3419_v56  ;;  %v11323_v30 = vpop.f32.mrb[142].mxu0 }
 0x3ee   : > { %15229 = vst [vmem:[#allocation65_spill] sm:$0xff] %v11308_v16  ;;  %15230 = vst [vmem:[#allocation301_spill] sm:$0xff] %v11310_v59  ;;  %v7852_v22 = vpop.eup %7851  ;;  %7871 = vrcp.f32 %v4163_v49  ;;  %v3427_v59 = vsub.f32 0.0, %v11289_v9  ;;  %v3815_v53 = vmul.f32 1.442695, %v3421_v6  ;;  %v11331_v57 = vpop.f32.mrb[143].mxu0 }
 0x3ef   : > { %15231 = vst [vmem:[#allocation302_spill] sm:$0xff] %v11312_v39  ;;  %15232 = vst [vmem:[#allocation303_spill] sm:$0xff] %v11314_v28  ;;  %v11325_v39 = vpop.f32.mrb[174].mxu1  ;;  %v11327_v20 = vpop.eup %7853  ;;  %7873 = vpow2.f32 %v3781_v14  ;;  %v3430_v56 = vsub.f32 0.0, %v11304_v24  ;;  %v3435_v49 = vsub.f32 0.0, %v11308_v16  ;;  %v15247_v24 = vld [vmem:[#allocation69_spill] sm:$0xff] }
 0x3f0   : > { %15233 = vst [vmem:[#allocation304_spill] sm:$0xff] %v11318_v4  ;;  %15234 = vst [vmem:[#allocation305_spill] sm:$0xff] %v11320_v21  ;;  %v3428_v4 = vsub.f32 0.0, %v11298_v46  ;;  %v11333_v21 = vpop.f32.mrb[175].mxu1  ;;  %v11335_v51 = vpop.eup %7855  ;;  %7875 = vpow2.f32 %v3785_v42  ;;  %v3813_v6 = vmul.f32 1.442695, %v3420_v62  ;;  %v11353_v16 = vadd.f32 %v15247_v24, %v10690_v2 }
 0x3f1   : > { %15235 = vst [vmem:[#allocation306_spill] sm:$0xff] %v11323_v30  ;;  %15236 = vst [vmem:[#allocation307_spill] sm:$0xff] %v11325_v39  ;;  %v15241_v39 = vld [vmem:[#allocation66_spill] sm:$0xff]  ;;  %v11343_v14 = vpop.eup %7857  ;;  %7877 = vpow2.f32 %v3795_v10  ;;  %v3817_v46 = vmul.f32 1.442695, %v3422_v26 }
 0x3f2   : > { %15237 = vst [vmem:[#allocation308_spill] sm:$0xff] %v11327_v20  ;;  %15238 = vst [vmem:[#allocation309_spill] sm:$0xff] %v11331_v57  ;;  %v11341_v30 = vadd.f32 %v15241_v39, %v10680_v55  ;;  %v15244_v57 = vld [vmem:[#allocation67_spill] sm:$0xff]  ;;  %7879 = vrcp.f32 %v4165_v11  ;;  %v3827_v42 = vmul.f32 1.442695, %v3427_v59  ;;  %v15249_v39 = vld [vmem:[#allocation72_spill] sm:$0xff] }
 0x3f3   : > { %15239 = vst [vmem:[#allocation310_spill] sm:$0xff] %v11333_v21  ;;  %15240 = vst [vmem:[#allocation311_spill] sm:$0xff] %v11335_v51  ;;  %v11347_v48 = vadd.f32 %v15244_v57, %v10688_v47  ;;  %v11349_v21 = vpop.eup %7859  ;;  %v11357_v9 = vadd.f32 %v15249_v39, %v10678_v1  ;;  %7881 = vpow2.f32 %v3799_v18  ;;  %v3831_v10 = vmul.f32 1.442695, %v3429_v44  ;;  %v15251_v57 = vld [vmem:[#allocation73_spill] sm:$0xff]  ;;  %v15254_v18 = vld [vmem:[#allocation74_spill] sm:$0xff] }
 0x3f4   : > { %15242 = vst [vmem:[#allocation66_spill] sm:$0xff] %v11341_v30  ;;  %15243 = vst [vmem:[#allocation312_spill] sm:$0xff] %v11343_v14  ;;  %v7862_v14 = vpop.eup %7861  ;;  %v11359_v62 = vmul.f32 1.442695, %v3428_v4  ;;  %v11363_v26 = vadd.f32 %v15251_v57, %v10680_v55  ;;  %7883 = vpow2.f32 %v3797_v63  ;;  %v11365_v59 = vmul.f32 1.442695, %v3430_v56 }
 0x3f5   : > { %15245 = vst [vmem:[#allocation67_spill] sm:$0xff] %v11347_v48  ;;  %15246 = vst [vmem:[#allocation313_spill] sm:$0xff] %v11349_v21  ;;  %v7864_v21 = vpop.eup %7863  ;;  %v11367_v11 = vmul.f32 1.442695, %v3435_v49  ;;  %v3437_v24 = vsub.f32 0.0, %v11341_v30  ;;  %v4164_v39 = vadd.f32 1.0, %v7852_v22  ;;  %7885 = vpow2.f32 %v3801_v61 }
 0x3f6   : > { %15248 = vst [vmem:[#allocation69_spill] sm:$0xff] %v11353_v16  ;;  %15250 = vst [vmem:[#allocation72_spill] sm:$0xff] %v11357_v9  ;;  %v11370_v51 = vpop.eup %7865  ;;  %v3436_v44 = vsub.f32 0.0, %v11347_v48  ;;  %v11375_v4 = vadd.f32 %v15254_v18, %v10688_v47  ;;  %v4166_v20 = vadd.f32 1.0, %v7862_v14  ;;  %7887 = vpow2.f32 %v3811_v29  ;;  %v15257_v61 = vld [vmem:[#allocation75_spill] sm:$0xff]  ;;  %v15260_v29 = vld [vmem:[#allocation76_spill] sm:$0xff] }
 0x3f7   : > { %15252 = vst [vmem:[#allocation73_spill] sm:$0xff] %v11363_v26  ;;  %15253 = vst [vmem:[#allocation314_spill] sm:$0xff] %v11370_v51  ;;  %v7868_v57 = vpop.eup %7867  ;;  %v3438_v63 = vsub.f32 0.0, %v11353_v16  ;;  %v3443_v56 = vsub.f32 0.0, %v11357_v9  ;;  %v4171_v30 = vadd.f32 1.0, %v7864_v21  ;;  %7889 = vpow2.f32 %v3815_v53  ;;  %v15262_v9 = vld [vmem:[#allocation77_spill] sm:$0xff] }
 0x3f8   : > { %15255 = vst [vmem:[#allocation74_spill] sm:$0xff] %v11375_v4  ;;  %v11379_v49 = vpop.eup %7869  ;;  %v3445_v22 = vsub.f32 0.0, %v11363_v26  ;;  %v11384_v48 = vadd.f32 %v15257_v61, %v10690_v2  ;;  %7891 = vpow2.f32 %v3813_v6  ;;  %v11388_v18 = vmul.f32 1.442695, %v3437_v24  ;;  %v15264_v61 = vld [vmem:[#allocation78_spill] sm:$0xff] }
 0x3f9   : > { %15256 = vst [vmem:[#allocation315_spill] sm:$0xff] %v11379_v49  ;;  %v11386_v51 = vpop.eup %7871  ;;  %v11392_v14 = vadd.f32 %v15260_v29, %v10678_v1  ;;  %v11396_v16 = vadd.f32 %v15262_v9, %v10680_v55  ;;  %7893 = vrcp.f32 %v4164_v39  ;;  %v4173_v53 = vadd.f32 1.0, %v7868_v57 }
 0x3fa   : > { %15258 = vst [vmem:[#allocation75_spill] sm:$0xff] %v11384_v48  ;;  %15259 = vst [vmem:[#allocation316_spill] sm:$0xff] %v11386_v51  ;;  %v7874_v21 = vpop.eup %7873  ;;  %v11398_v26 = vmul.f32 1.442695, %v3436_v44  ;;  %v11402_v49 = vadd.f32 %v15264_v61, %v10688_v47  ;;  %7895 = vrcp.f32 %v4166_v20  ;;  %v11404_v24 = vmul.f32 1.442695, %v3438_v63 }
 0x3fb   : > { %15261 = vst [vmem:[#allocation76_spill] sm:$0xff] %v11392_v14  ;;  %15263 = vst [vmem:[#allocation77_spill] sm:$0xff] %v11396_v16  ;;  %v7876_v6 = vpop.eup %7875  ;;  %v3444_v29 = vsub.f32 0.0, %v11375_v4  ;;  %v15266_v51 = vld [vmem:[#allocation79_spill] sm:$0xff]  ;;  %7897 = vrcp.f32 %v4171_v30  ;;  %v11411_v39 = vmul.f32 1.442695, %v3443_v56 }
 0x3fc   : > { %15265 = vst [vmem:[#allocation78_spill] sm:$0xff] %v11402_v49  ;;  %v11409_v28 = vadd.f32 %v15266_v51, %v10690_v2  ;;  %v7878_v9 = vpop.eup %7877  ;;  %v11413_v44 = vmul.f32 1.442695, %v3445_v22  ;;  %v3446_v57 = vsub.f32 0.0, %v11384_v48  ;;  %v4172_v36 = vadd.f32 1.0, %v7874_v21  ;;  %v15269_v30 = vld [vmem:[#allocation80_spill] sm:$0xff] }
 0x3fd   : > { %v11416_v61 = vpop.eup %7879  ;;  %7899 = vpow2.f32 %v3817_v46  ;;  %v3451_v20 = vsub.f32 0.0, %v11392_v14  ;;  %v3453_v63 = vsub.f32 0.0, %v11396_v16  ;;  %v4174_v51 = vadd.f32 1.0, %v7876_v6 }
 0x3fe   : > { %15267 = vst [vmem:[#allocation79_spill] sm:$0xff] %v11409_v28  ;;  %15268 = vst [vmem:[#allocation317_spill] sm:$0xff] %v11416_v61  ;;  %v7882_v4 = vpop.eup %7881  ;;  %7901 = vrcp.f32 %v4173_v53  ;;  %v3452_v23 = vsub.f32 0.0, %v11402_v49  ;;  %v11423_v56 = vadd.f32 %v15269_v30, %v10678_v1  ;;  %v4179_v37 = vadd.f32 1.0, %v7878_v9  ;;  %v15271_v53 = vld [vmem:[#allocation81_spill] sm:$0xff]  ;;  %v15273_v49 = vld [vmem:[#allocation82_spill] sm:$0xff] }
 0x3ff   : > { %v7884_v22 = vpop.eup %7883  ;;  %7903 = vpow2.f32 %v3827_v42  ;;  %v11425_v48 = vmul.f32 1.442695, %v3444_v29  ;;  %v3454_v46 = vsub.f32 0.0, %v11409_v28  ;;  %v11428_v14 = vmul.f32 1.442695, %v3446_v57 }
 0x400   : > { %15270 = vst [vmem:[#allocation80_spill] sm:$0xff] %v11423_v56  ;;  %v7886_v21 = vpop.eup %7885  ;;  %7905 = vpow2.f32 %v3831_v10  ;;  %v11432_v6 = vadd.f32 %v15271_v53, %v10680_v55  ;;  %v11436_v16 = vadd.f32 %v15273_v49, %v10688_v47  ;;  %v4181_v9 = vadd.f32 1.0, %v7882_v4  ;;  %v15275_v49 = vld [vmem:[#allocation83_spill] sm:$0xff] }
 0x401   : > { %v7888_v30 = vpop.eup %7887  ;;  %7907 = vrcp.f32 %v4172_v36  ;;  %v11438_v42 = vmul.f32 1.442695, %v3451_v20  ;;  %v11440_v29 = vmul.f32 1.442695, %v3453_v63  ;;  %v4180_v10 = vadd.f32 1.0, %v7884_v22  ;;  %v15279_v22 = vld [vmem:[#allocation84_spill] sm:$0xff] }
 0x402   : > { %15272 = vst [vmem:[#allocation81_spill] sm:$0xff] %v11432_v6  ;;  %15274 = vst [vmem:[#allocation82_spill] sm:$0xff] %v11436_v16  ;;  %v7890_v28 = vpop.eup %7889  ;;  %7909 = vrcp.f32 %v4174_v51  ;;  %v11442_v57 = vmul.f32 1.442695, %v3452_v23  ;;  %v3459_v61 = vsub.f32 0.0, %v11423_v56  ;;  %v4182_v40 = vadd.f32 1.0, %v7886_v21 }
 0x403   : > { %v7892_v53 = vpop.eup %7891  ;;  %7911 = vrcp.f32 %v4179_v37  ;;  %v11445_v7 = vmul.f32 1.442695, %v3454_v46  ;;  %v11449_v36 = vadd.f32 %v15275_v49, %v10690_v2  ;;  %v4187_v20 = vadd.f32 1.0, %v7888_v30  ;;  %v15281_v21 = vld [vmem:[#allocation85_spill] sm:$0xff] }
 0x404   : > { %v11451_v4 = vpop.eup %7893  ;;  %7913 = vpow2.f32 %v11359_v62  ;;  %v3461_v63 = vsub.f32 0.0, %v11432_v6  ;;  %v3460_v23 = vsub.f32 0.0, %v11436_v16  ;;  %v4189_v37 = vadd.f32 1.0, %v7890_v28  ;;  %v15285_v16 = vld [vmem:[#allocation86_spill] sm:$0xff]  ;;  %v15287_v28 = vld [vmem:[#allocation87_spill] sm:$0xff] }
 0x405   : > { %15276 = vst [vmem:[#allocation83_spill] sm:$0xff] %v11449_v36  ;;  %15277 = vst [vmem:[#allocation318_spill] sm:$0xff] %v11451_v4  ;;  %v11456_v51 = vpop.eup %7895  ;;  %7915 = vrcp.f32 %v4181_v9  ;;  %v11460_v46 = vadd.f32 %v15279_v22, %v10678_v1  ;;  %v11464_v49 = vadd.f32 %v15281_v21, %v10680_v55  ;;  %v4188_v62 = vadd.f32 1.0, %v7892_v53 }
 0x406   : > { %15278 = vst [vmem:[#allocation319_spill] sm:$0xff] %v11456_v51  ;;  %v11466_v56 = vpop.eup %7897  ;;  %7917 = vrcp.f32 %v4180_v10  ;;  %v11468_v30 = vmul.f32 1.442695, %v3459_v61  ;;  %v11472_v6 = vadd.f32 %v15285_v16, %v10688_v47  ;;  %v11476_v22 = vadd.f32 %v15287_v28, %v10690_v2 }
 0x407   : > { %15280 = vst [vmem:[#allocation84_spill] sm:$0xff] %v11460_v46  ;;  %15282 = vst [vmem:[#allocation85_spill] sm:$0xff] %v11464_v49  ;;  %v7900_v9 = vpop.eup %7899  ;;  %7919 = vrcp.f32 %v4182_v40  ;;  %v11480_v21 = vadd.f32 %v10363_v38, %v10678_v1  ;;  %v11488_v53 = vmul.f32 1.442695, %v3461_v63  ;;  %v3462_v16 = vsub.f32 0.0, %v11449_v36  ;;  %v15294_v40 = vld [vmem:[#allocation89_spill] sm:$0xff] }
 0x408   : > { %15283 = vst [vmem:[#allocation320_spill] sm:$0xff] %v11466_v56  ;;  %15284 = vst [vmem:[#allocation321_spill] sm:$0xff] %v11468_v30  ;;  %v15290_v56 = vld [vmem:[#allocation88_spill] sm:$0xff]  ;;  %v11486_v61 = vpop.eup %7901  ;;  %7921 = vrcp.f32 %v4187_v20  ;;  %v11493_v51 = vadd.f32 %v15294_v40, %v10688_v47  ;;  %v11495_v4 = vmul.f32 1.442695, %v3460_v23  ;;  %v3467_v38 = vsub.f32 0.0, %v11460_v46 }
 0x409   : > { %15286 = vst [vmem:[#allocation86_spill] sm:$0xff] %v11472_v6  ;;  %15288 = vst [vmem:[#allocation87_spill] sm:$0xff] %v11476_v22  ;;  %v11484_v10 = vadd.f32 %v15290_v56, %v10680_v55  ;;  %v7904_v28 = vpop.eup %7903  ;;  %7923 = vrcp.f32 %v4189_v37  ;;  %v3469_v56 = vsub.f32 0.0, %v11464_v49  ;;  %v3468_v20 = vsub.f32 0.0, %v11472_v6  ;;  %v15296_v63 = vld [vmem:[#allocation90_spill] sm:$0xff] }
 0x40a   : > { %15289 = vst [vmem:[#allocation322_spill] sm:$0xff] %v11480_v21  ;;  %15292 = vst [vmem:[#allocation323_spill] sm:$0xff] %v11486_v61  ;;  %v7906_v30 = vpop.eup %7905  ;;  %7925 = vrcp.f32 %v4188_v62  ;;  %v4190_v61 = vadd.f32 1.0, %v7900_v9  ;;  %v11502_v36 = vadd.f32 %v15296_v63, %v10690_v2  ;;  %v3470_v23 = vsub.f32 0.0, %v11476_v22 }
 0x40b   : > { %15291 = vst [vmem:[#allocation88_spill] sm:$0xff] %v11484_v10  ;;  %15293 = vst [vmem:[#allocation324_spill] sm:$0xff] %v11488_v53  ;;  %v11504_v53 = vpop.eup %7907  ;;  %7927 = vpow2.f32 %v11365_v59  ;;  %v3475_v37 = vsub.f32 0.0, %v11480_v21  ;;  %v3477_v40 = vsub.f32 0.0, %v11484_v10  ;;  %v4195_v62 = vadd.f32 1.0, %v7904_v28 }
 0x40c   : > { %15295 = vst [vmem:[#allocation89_spill] sm:$0xff] %v11493_v51  ;;  %15297 = vst [vmem:[#allocation90_spill] sm:$0xff] %v11502_v36  ;;  %v11510_v49 = vpop.eup %7909  ;;  %7929 = vpow2.f32 %v11367_v11  ;;  %v3476_v9 = vsub.f32 0.0, %v11493_v51  ;;  %v11516_v63 = vadd.f32 %v10373_v25, %v10678_v1  ;;  %v4197_v59 = vadd.f32 1.0, %v7906_v30 }
 0x40d   : > { %v11518_v6 = vpop.eup %7911  ;;  %7931 = vpow2.f32 %v11388_v18  ;;  %v11521_v22 = vmul.f32 1.442695, %v3462_v16  ;;  %v11523_v21 = vmul.f32 1.442695, %v3467_v38  ;;  %v11525_v28 = vmul.f32 1.442695, %v3469_v56 }
 0x40e   : > { %15298 = vst [vmem:[#allocation325_spill] sm:$0xff] %v11516_v63  ;;  %v7914_v10 = vpop.eup %7913  ;;  %7933 = vrcp.f32 %v4190_v61  ;;  %v11527_v11 = vmul.f32 1.442695, %v3468_v20  ;;  %v3478_v51 = vsub.f32 0.0, %v11502_v36  ;;  %v11533_v25 = vmul.f32 1.442695, %v3470_v23 }
 0x40f   : > { %v11530_v46 = vpop.eup %7915  ;;  %7935 = vpow2.f32 %v11398_v26  ;;  %v11535_v30 = vmul.f32 1.442695, %v3475_v37  ;;  %v11537_v18 = vmul.f32 1.442695, %v3477_v40  ;;  %v11541_v61 = vmul.f32 1.442695, %v3476_v9 }
 0x410   : > { %v11539_v16 = vpop.eup %7917  ;;  %7937 = vrcp.f32 %v4195_v62  ;;  %v3483_v38 = vsub.f32 0.0, %v11516_v63  ;;  %v11546_v56 = vadd.f32 %v10375_v45, %v10680_v55  ;;  %v4196_v26 = vadd.f32 1.0, %v7914_v10  ;;  %v5222_v9 = vpop.f32.mrb[144].mxu0 }
 0x411   : > { %15299 = vst [vmem:[#allocation326_spill] sm:$0xff] %v11541_v61  ;;  %v11548_v20 = vpop.eup %7919  ;;  %7939 = vrcp.f32 %v4197_v59  ;;  %v4819_v23 = vmul.f32 %v10875_v43, %v10698_v54  ;;  %v4821_v37 = vmul.f32 %v10877_v5, %v10706_v15  ;;  %v11557_v62 = vmul.f32 1.442695, %v3478_v51  ;;  %v5415_v63 = vpop.f32.mrb[176].mxu1 }
 0x412   : > { %15300 = vst [vmem:[#allocation327_spill] sm:$0xff] %v11546_v56  ;;  %v11554_v40 = vpop.eup %7921  ;;  %7941 = vpow2.f32 %v11404_v24  ;;  %v4820_v45 = vmul.f32 %v10884_v17, %v10712_v58  ;;  %v4822_v10 = vmul.f32 %v10892_v0, %v10716_v41  ;;  %v5224_v36 = vpop.f32.mrb[145].mxu0  ;;  %v4827_v5 = vmul.f32 %v10899_v33, %v10721_v32 }
 0x413   : > { %15301 = vst [vmem:[#allocation328_spill] sm:$0xff] %v11557_v62  ;;  %v11563_v59 = vpop.eup %7923  ;;  %v5960_v54 = vmul.f32 %v5222_v9, %v4819_v23  ;;  %v5962_v43 = vmul.f32 %v5415_v63, %v4821_v37  ;;  %v5417_v15 = vpop.f32.mrb[177].mxu1  ;;  %v4829_v24 = vmul.f32 %v10901_v50, %v10726_v31  ;;  %7943 = vpow2.f32 %v11411_v39 }
 0x414   : > { %v11569_v51 = vpop.eup %7925  ;;  %v5961_v17 = vmul.f32 %v5224_v36, %v4820_v45  ;;  %v5963_v58 = vmul.f32 %v5417_v15, %v4822_v10  ;;  %v5226_v62 = vpop.f32.mrb[146].mxu0  ;;  %v4828_v0 = vmul.f32 %v10904_v34, %v10731_v13  ;;  %7945 = vrcp.f32 %v4196_v26 }
 0x415   : > { %v5419_v41 = vpop.f32.mrb[178].mxu1  ;;  %v7928_v63 = vpop.eup %7927  ;;  %v5968_v23 = vmul.f32 %v5226_v62, %v4827_v5  ;;  %v4830_v33 = vmul.f32 %v10909_v12, %v10737_v3  ;;  %7947 = vpow2.f32 %v11413_v44  ;;  %v11578_v10 = vmul.f32 1.442695, %v3483_v38 }
 0x416   : > { %v5970_v37 = vmul.f32 %v5419_v41, %v4829_v24  ;;  %v5228_v9 = vpop.f32.mrb[147].mxu0  ;;  %v5421_v32 = vpop.f32.mrb[179].mxu1  ;;  %v6216_v50 = vadd.f32 %v5961_v17, %v5960_v54  ;;  %v6248_v39 = vadd.f32 %v5963_v58, %v5962_v43  ;;  %7949 = vpow2.f32 %v11425_v48  ;;  %v15305_v17 = vld [vmem:[#allocation233_spill] sm:$0xff]  ;;  %v15307_v41 = vld [vmem:[#allocation236_spill] sm:$0xff] }
 0x417   : > { %v7930_v31 = vpop.eup %7929  ;;  %v5969_v36 = vmul.f32 %v5228_v9, %v4828_v0  ;;  %15302 = vst [vmem:[#allocation329_spill] sm:$0xff] %v11578_v10  ;;  %v11582_v34 = vadd.f32 %v10378_v8, %v10688_v47  ;;  %v5971_v13 = vmul.f32 %v5421_v32, %v4830_v33  ;;  %v4198_v3 = vadd.f32 1.0, %v7928_v63  ;;  %v5232_v5 = vpop.f32.mrb[148].mxu0  ;;  %v15306_v58 = vld [vmem:[#allocation205_spill] sm:$0xff]  ;;  %v15308_v63 = vld [vmem:[#allocation206_spill] sm:$0xff] }
 0x418   : > { %v7932_v45 = vpop.eup %7931  ;;  %7951 = vpow2.f32 %v11428_v14  ;;  %v11587_v12 = vadd.f32 %v6248_v39, %v6216_v50  ;;  %v4203_v54 = vadd.f32 1.0, %v7930_v31  ;;  %v4835_v48 = vmul.f32 %v10912_v19, %v10746_v27  ;;  %v5425_v24 = vpop.f32.mrb[180].mxu1  ;;  %v15311_v32 = vld [vmem:[#allocation210_spill] sm:$0xff]  ;;  %v15312_v31 = vld [vmem:[#allocation240_spill] sm:$0xff] }
 0x419   : > { %15303 = vst [vmem:[#allocation330_spill] sm:$0xff] %v11582_v34  ;;  %v11584_v26 = vpop.eup %7933  ;;  %v6217_v44 = vadd.f32 %v5969_v36, %v5968_v23  ;;  %v6249_v43 = vadd.f32 %v5971_v13, %v5970_v37  ;;  %v4837_v38 = vmul.f32 %v10931_v52, %v10761_v35  ;;  %v4205_v15 = vadd.f32 1.0, %v7932_v45  ;;  %v15309_v23 = vld [vmem:[#allocation238_spill] sm:$0xff]  ;;  %v5234_v52 = vpop.f32.mrb[149].mxu0 }
 0x41a   : > { %15304 = vst [vmem:[#allocation331_spill] sm:$0xff] %v11587_v12  ;;  %v7936_v62 = vpop.eup %7935  ;;  %v4836_v14 = vmul.f32 %v15305_v17, %v10768_v60  ;;  %v4838_v0 = vmul.f32 %v15307_v41, %v15306_v58  ;;  %v4843_v37 = vmul.f32 %v15309_v23, %v15308_v63  ;;  %v5976_v19 = vmul.f32 %v5232_v5, %v4835_v48  ;;  %v5427_v33 = vpop.f32.mrb[181].mxu1  ;;  %v15313_v58 = vld [vmem:[#allocation213_spill] sm:$0xff]  ;;  %v15315_v48 = vld [vmem:[#allocation215_spill] sm:$0xff] }
 0x41b   : > { %v11593_v8 = vpop.eup %7937  ;;  %v11603_v27 = vadd.f32 %v6249_v43, %v6217_v44  ;;  %v5978_v35 = vmul.f32 %v5425_v24, %v4837_v38  ;;  %v4845_v50 = vmul.f32 %v15312_v31, %v15311_v32  ;;  %v4204_v36 = vadd.f32 1.0, %v7936_v62  ;;  %v5236_v13 = vpop.f32.mrb[150].mxu0  ;;  %v15314_v41 = vld [vmem:[#allocation241_spill] sm:$0xff]  ;;  %v15316_v38 = vld [vmem:[#allocation242_spill] sm:$0xff] }
 0x41c   : > { %v11601_v9 = vpop.eup %7939  ;;  %v5977_v60 = vmul.f32 %v5234_v52, %v4836_v14  ;;  %v5979_v45 = vmul.f32 %v5427_v33, %v4838_v0  ;;  %v5429_v17 = vpop.f32.mrb[182].mxu1  ;;  %v4844_v63 = vmul.f32 %v15314_v41, %v15313_v58  ;;  %7953 = vrcp.f32 %v4198_v3  ;;  %v15318_v33 = vld [vmem:[#allocation91_spill] sm:$0xff]  ;;  %v15333_v52 = vld [vmem:[#allocation248_spill] sm:$0xff] }
 0x41d   : > { %15310 = vst [vmem:[#allocation233_spill] sm:$0xff] %v11603_v27  ;;  %v7942_v39 = vpop.eup %7941  ;;  %v5984_v23 = vmul.f32 %v5236_v13, %v4843_v37  ;;  %v5986_v44 = vmul.f32 %v5429_v17, %v4845_v50  ;;  %v5238_v43 = vpop.f32.mrb[151].mxu0  ;;  %v4846_v5 = vmul.f32 %v15316_v38, %v15315_v48  ;;  %7955 = vrcp.f32 %v4203_v54 }
 0x41e   : > { %v5431_v24 = vpop.f32.mrb[183].mxu1  ;;  %v7944_v27 = vpop.eup %7943  ;;  %v6218_v32 = vadd.f32 %v5977_v60, %v5976_v19  ;;  %v6250_v31 = vadd.f32 %v5979_v45, %v5978_v35  ;;  %v5985_v62 = vmul.f32 %v5238_v43, %v4844_v63  ;;  %7957 = vrcp.f32 %v4205_v15  ;;  %v15321_v15 = vld [vmem:[#allocation217_spill] sm:$0xff]  ;;  %v15322_v45 = vld [vmem:[#allocation243_spill] sm:$0xff]  ;;  %v15323_v43 = vld [vmem:[#allocation218_spill] sm:$0xff] }
 0x41f   : > { %v11611_v14 = vpop.eup %7945  ;;  %v3485_v0 = vsub.f32 0.0, %v11546_v56  ;;  %v5987_v3 = vmul.f32 %v5431_v24, %v4846_v5  ;;  %7959 = vrcp.f32 %v4204_v36  ;;  %v11617_v50 = vadd.f32 %v15318_v33, %v10690_v2  ;;  %v5242_v63 = vpop.f32.mrb[152].mxu0  ;;  %v15324_v36 = vld [vmem:[#allocation244_spill] sm:$0xff]  ;;  %v15326_v24 = vld [vmem:[#allocation245_spill] sm:$0xff] }
 0x420   : > { %15317 = vst [vmem:[#allocation205_spill] sm:$0xff] %v11611_v14  ;;  %v7948_v37 = vpop.eup %7947  ;;  %v11619_v13 = vadd.f32 %v6250_v31, %v6218_v32  ;;  %v6219_v54 = vadd.f32 %v5985_v62, %v5984_v23  ;;  %v4206_v35 = vadd.f32 1.0, %v7942_v39  ;;  %7961 = vpow2.f32 %v11438_v42  ;;  %v5435_v38 = vpop.f32.mrb[184].mxu1  ;;  %v15325_v5 = vld [vmem:[#allocation220_spill] sm:$0xff]  ;;  %v15327_v31 = vld [vmem:[#allocation9_spill] sm:$0xff]  ;;  %v15328_v23 = vld [vmem:[#allocation246_spill] sm:$0xff] }
 0x421   : > { %15319 = vst [vmem:[#allocation236_spill] sm:$0xff] %v11617_v50  ;;  %v7950_v19 = vpop.eup %7949  ;;  %v6251_v60 = vadd.f32 %v5987_v3, %v5986_v44  ;;  %v4851_v17 = vmul.f32 %v15322_v45, %v15321_v15  ;;  %v4211_v41 = vadd.f32 1.0, %v7944_v27  ;;  %v4853_v48 = vmul.f32 %v15324_v36, %v15323_v43  ;;  %v5244_v44 = vpop.f32.mrb[153].mxu0  ;;  %v15330_v33 = vld [vmem:[#allocation8_spill] sm:$0xff]  ;;  %v15331_v15 = vld [vmem:[#allocation247_spill] sm:$0xff]  ;;  %v15332_v27 = vld [vmem:[#allocation21_spill] sm:$0xff] }
 0x422   : > { %15320 = vst [vmem:[#allocation206_spill] sm:$0xff] %v11619_v13  ;;  %v7952_v58 = vpop.eup %7951  ;;  %v4852_v32 = vmul.f32 %v15326_v24, %v15325_v5  ;;  %v4854_v62 = vmul.f32 %v15328_v23, %v15327_v31  ;;  %v5437_v3 = vpop.f32.mrb[185].mxu1  ;;  %v4859_v45 = vmul.f32 %v15331_v15, %v15330_v33  ;;  %v4861_v13 = vmul.f32 %v15333_v52, %v15332_v27  ;;  %v15334_v5 = vld [vmem:[#allocation22_spill] sm:$0xff]  ;;  %v15335_v24 = vld [vmem:[#allocation249_spill] sm:$0xff]  ;;  %v15345_v27 = vld [vmem:[#allocation260_spill] sm:$0xff] }
 0x423   : > { %v11630_v39 = vadd.f32 %v6251_v60, %v6219_v54  ;;  %v5992_v42 = vmul.f32 %v5242_v63, %v4851_v17  ;;  %v5994_v12 = vmul.f32 %v5435_v38, %v4853_v48  ;;  %v5246_v56 = vpop.f32.mrb[154].mxu0  ;;  %v5439_v10 = vpop.f32.mrb[186].mxu1  ;;  %v4860_v61 = vmul.f32 %v15335_v24, %v15334_v5  ;;  %v15336_v63 = vld [vmem:[#allocation23_spill] sm:$0xff]  ;;  %v15337_v23 = vld [vmem:[#allocation250_spill] sm:$0xff]  ;;  %v15347_v5 = vld [vmem:[#allocation261_spill] sm:$0xff] }
 0x424   : > { %v5993_v43 = vmul.f32 %v5244_v44, %v4852_v32  ;;  %v5995_v36 = vmul.f32 %v5437_v3, %v4854_v62  ;;  %v4213_v31 = vadd.f32 1.0, %v7948_v37  ;;  %v6000_v54 = vmul.f32 %v5246_v56, %v4859_v45  ;;  %v5248_v17 = vpop.f32.mrb[155].mxu0  ;;  %v5441_v14 = vpop.f32.mrb[187].mxu1  ;;  %v15339_v62 = vld [vmem:[#allocation93_spill] sm:$0xff] }
 0x425   : > { %15329 = vst [vmem:[#allocation238_spill] sm:$0xff] %v11630_v39  ;;  %v6002_v60 = vmul.f32 %v5439_v10, %v4861_v13  ;;  %v4862_v39 = vmul.f32 %v15337_v23, %v15336_v63  ;;  %7963 = vpow2.f32 %v11440_v29  ;;  %v6001_v48 = vmul.f32 %v5248_v17, %v4860_v61  ;;  %v15349_v17 = vld [vmem:[#allocation262_spill] sm:$0xff] }
 0x426   : > { %v6220_v33 = vadd.f32 %v5993_v43, %v5992_v42  ;;  %v6252_v52 = vadd.f32 %v5995_v36, %v5994_v12  ;;  %v11641_v38 = vpop.eup %7953  ;;  %7965 = vrcp.f32 %v4206_v35  ;;  %v11643_v32 = vmul.f32 1.442695, %v3485_v0  ;;  %v15342_v0 = vld [vmem:[#allocation10_spill] sm:$0xff]  ;;  %v15343_v42 = vld [vmem:[#allocation257_spill] sm:$0xff]  ;;  %v5445_v43 = vpop.f32.mrb[188].mxu1  ;;  %v15346_v36 = vld [vmem:[#allocation24_spill] sm:$0xff] }
 0x427   : > { %v11647_v37 = vadd.f32 %v15339_v62, %v10678_v1  ;;  %v6003_v56 = vmul.f32 %v5441_v14, %v4862_v39  ;;  %v11649_v10 = vpop.eup %7955  ;;  %7967 = vrcp.f32 %v4211_v41  ;;  %v3486_v13 = vsub.f32 0.0, %v11617_v50  ;;  %v5252_v14 = vpop.f32.mrb[156].mxu0  ;;  %v15344_v39 = vld [vmem:[#allocation11_spill] sm:$0xff]  ;;  %v15353_v62 = vld [vmem:[#allocation26_spill] sm:$0xff]  ;;  %v15356_v50 = vld [vmem:[#allocation269_spill] sm:$0xff] }
 0x428   : > { %15338 = vst [vmem:[#allocation210_spill] sm:$0xff] %v11643_v32  ;;  %v11652_v44 = vadd.f32 %v6252_v52, %v6220_v33  ;;  %v6221_v29 = vadd.f32 %v6001_v48, %v6000_v54  ;;  %v11654_v12 = vpop.eup %7957  ;;  %7969 = vrcp.f32 %v4213_v31  ;;  %v4212_v61 = vadd.f32 1.0, %v7950_v19  ;;  %v15348_v54 = vld [vmem:[#allocation25_spill] sm:$0xff]  ;;  %v5254_v23 = vpop.f32.mrb[157].mxu0  ;;  %v15351_v52 = vld [vmem:[#allocation12_spill] sm:$0xff]  ;;  %v15352_v48 = vld [vmem:[#allocation263_spill] sm:$0xff] }
 0x429   : > { %15340 = vst [vmem:[#allocation240_spill] sm:$0xff] %v11647_v37  ;;  %v6253_v35 = vadd.f32 %v6003_v56, %v6002_v60  ;;  %v4867_v3 = vmul.f32 %v15343_v42, %v15342_v0  ;;  %v11658_v15 = vpop.eup %7959  ;;  %v4214_v45 = vadd.f32 1.0, %v7952_v58  ;;  %v4869_v41 = vmul.f32 %v15345_v27, %v15344_v39  ;;  %v5447_v33 = vpop.f32.mrb[189].mxu1  ;;  %v15354_v56 = vld [vmem:[#allocation268_spill] sm:$0xff] }
 0x42a   : > { %15341 = vst [vmem:[#allocation213_spill] sm:$0xff] %v11652_v44  ;;  %v4868_v24 = vmul.f32 %v15347_v5, %v15346_v36  ;;  %v4870_v63 = vmul.f32 %v15349_v17, %v15348_v54  ;;  %v7962_v31 = vpop.eup %7961  ;;  %v4875_v58 = vmul.f32 %v15352_v48, %v15351_v52  ;;  %v4877_v0 = vmul.f32 %v15354_v56, %v15353_v62  ;;  %v5256_v44 = vpop.f32.mrb[158].mxu0  ;;  %v15355_v5 = vld [vmem:[#allocation13_spill] sm:$0xff]  ;;  %v15358_v17 = vld [vmem:[#allocation272_spill] sm:$0xff] }
 0x42b   : > { %v11666_v19 = vadd.f32 %v6253_v35, %v6221_v29  ;;  %v6008_v60 = vmul.f32 %v5252_v14, %v4867_v3  ;;  %v6010_v42 = vmul.f32 %v5445_v43, %v4869_v41  ;;  %v5449_v36 = vpop.f32.mrb[190].mxu1  ;;  %v4876_v54 = vmul.f32 %v15356_v50, %v15355_v5  ;;  %v5258_v3 = vpop.f32.mrb[159].mxu0  ;;  %v15357_v14 = vld [vmem:[#allocation27_spill] sm:$0xff] }
 0x42c   : > { %v6009_v39 = vmul.f32 %v5254_v23, %v4868_v24  ;;  %v6011_v27 = vmul.f32 %v5447_v33, %v4870_v63  ;;  %7971 = vrcp.f32 %v4212_v61  ;;  %v6016_v29 = vmul.f32 %v5256_v44, %v4875_v58  ;;  %v5451_v32 = vpop.f32.mrb[191].mxu1  ;;  %v15361_v24 = vld [vmem:[#allocation94_spill] sm:$0xff]  ;;  %v1398_v56 = vpop.xlane.xlu0 %1397 }
 0x42d   : > { %15350 = vst [vmem:[#allocation241_spill] sm:$0xff] %v11666_v19  ;;  %v6018_v35 = vmul.f32 %v5449_v36, %v4877_v0  ;;  %v4878_v19 = vmul.f32 %v15358_v17, %v15357_v14  ;;  %7973 = vrcp.f32 %v4214_v45  ;;  %v6017_v62 = vmul.f32 %v5258_v3, %v4876_v54  ;;  %v1401_v45 = vpop.xlane.xlu1 %1400  ;;  %v15369_v36 = vld [vmem:[#allocation276_spill] sm:$0xff]  ;;  %v5455_v54 = vpop.f32.mrb[192].mxu1 }
 0x42e   : > { %v6222_v52 = vadd.f32 %v6009_v39, %v6008_v60  ;;  %v6254_v48 = vadd.f32 %v6011_v27, %v6010_v42  ;;  %7975 = vpow2.f32 %v11442_v57  ;;  %v15359_v41 = vsub.f32 0.0, %v11582_v34  ;;  %v15364_v57 = vld [vmem:[#allocation321_spill] sm:$0xff]  ;;  %v5262_v39 = vpop.f32.mrb[160].mxu0  ;;  %v15368_v27 = vld [vmem:[#allocation15_spill] sm:$0xff]  ;;  %v15370_v3 = vld [vmem:[#allocation28_spill] sm:$0xff] }
 0x42f   : > { %v3491_v50 = vsub.f32 0.0, %v11647_v37  ;;  %v6019_v61 = vmul.f32 %v5451_v32, %v4878_v19  ;;  %v7964_v44 = vpop.eup %7963  ;;  %7977 = vpow2.f32 %v11445_v7  ;;  %v11685_v63 = vadd.f32 %v15361_v24, %v10680_v55  ;;  %v15366_v32 = vld [vmem:[#allocation14_spill] sm:$0xff]  ;;  %v15367_v19 = vld [vmem:[#allocation273_spill] sm:$0xff]  ;;  %v15372_v17 = vld [vmem:[#allocation16_spill] sm:$0xff] }
 0x430   : > { %v11679_v43 = vmul.f32 1.442695, %v15359_v41  ;;  %v11687_v60 = vadd.f32 %v6254_v48, %v6222_v52  ;;  %v6223_v23 = vadd.f32 %v6017_v62, %v6016_v29  ;;  %v11689_v33 = vpop.eup %7965  ;;  %7979 = vpow2.f32 %v15364_v57  ;;  %v15371_v29 = vld [vmem:[#allocation277_spill] sm:$0xff]  ;;  %v15373_v52 = vld [vmem:[#allocation278_spill] sm:$0xff]  ;;  %v15375_v62 = vld [vmem:[#allocation279_spill] sm:$0xff]  ;;  %v5264_v57 = vpop.f32.mrb[161].mxu0 }
 0x431   : > { %15362 = vst [vmem:[#allocation242_spill] sm:$0xff] %v11685_v63  ;;  %v11692_v58 = vmul.f32 1.442695, %v3486_v13  ;;  %v6255_v0 = vadd.f32 %v6019_v61, %v6018_v35  ;;  %v4883_v42 = vmul.f32 %v15367_v19, %v15366_v32  ;;  %v11696_v7 = vpop.eup %7967  ;;  %v4885_v5 = vmul.f32 %v15369_v36, %v15368_v27  ;;  %v15374_v13 = vld [vmem:[#allocation17_spill] sm:$0xff]  ;;  %v5457_v32 = vpop.f32.mrb[193].mxu1  ;;  %v15378_v19 = vld [vmem:[#allocation18_spill] sm:$0xff] }
 0x432   : > { %15360 = vst [vmem:[#allocation215_spill] sm:$0xff] %v11679_v43  ;;  %15363 = vst [vmem:[#allocation91_spill] sm:$0xff] %v11687_v60  ;;  %v4884_v14 = vmul.f32 %v15371_v29, %v15370_v3  ;;  %v4886_v48 = vmul.f32 %v15373_v52, %v15372_v17  ;;  %v4891_v41 = vmul.f32 %v15375_v62, %v15374_v13  ;;  %v11706_v35 = vpop.eup %7969  ;;  %7981 = vrcp.f32 %v1401_v45  ;;  %v15379_v27 = vld [vmem:[#allocation280_spill] sm:$0xff]  ;;  %v5266_v29 = vpop.f32.mrb[162].mxu0  ;;  %v15380_v17 = vld [vmem:[#allocation19_spill] sm:$0xff] }
 0x433   : > { %15365 = vst [vmem:[#allocation217_spill] sm:$0xff] %v11692_v58  ;;  %15376 = vst [vmem:[#allocation243_spill] sm:$0xff] %v11706_v35  ;;  %v11708_v61 = vadd.f32 %v6255_v0, %v6223_v23  ;;  %v6024_v24 = vmul.f32 %v5262_v39, %v4883_v42  ;;  %v4893_v36 = vmul.f32 %v15379_v27, %v15378_v19  ;;  %v4219_v60 = vadd.f32 1.0, %v7962_v31  ;;  %v5459_v34 = vpop.f32.mrb[194].mxu1  ;;  %v15381_v52 = vld [vmem:[#allocation281_spill] sm:$0xff]  ;;  %v5268_v45 = vpop.f32.mrb[163].mxu0 }
 0x434   : > { %v6026_v37 = vmul.f32 %v5455_v54, %v4885_v5  ;;  %v6025_v3 = vmul.f32 %v5264_v57, %v4884_v14  ;;  %v4892_v58 = vmul.f32 %v15381_v52, %v15380_v17  ;;  %v6027_v13 = vmul.f32 %v5457_v32, %v4886_v48  ;;  %v15382_v23 = vld [vmem:[#allocation29_spill] sm:$0xff]  ;;  %v15383_v0 = vld [vmem:[#allocation282_spill] sm:$0xff]  ;;  %v5461_v39 = vpop.f32.mrb[195].mxu1  ;;  %v15384_v35 = vld [vmem:[#allocation324_spill] sm:$0xff] }
 0x435   : > { %15377 = vst [vmem:[#allocation218_spill] sm:$0xff] %v11708_v61  ;;  %v6032_v62 = vmul.f32 %v5266_v29, %v4891_v41  ;;  %v6034_v43 = vmul.f32 %v5459_v34, %v4893_v36  ;;  %v4894_v42 = vmul.f32 %v15383_v0, %v15382_v23  ;;  %v4221_v61 = vadd.f32 1.0, %v7964_v44  ;;  %v15385_v54 = vld [vmem:[#allocation95_spill] sm:$0xff]  ;;  %v15388_v44 = vld [vmem:[#allocation96_spill] sm:$0xff]  ;;  %v15394_v29 = vld [vmem:[#allocation290_spill] sm:$0xff]  ;;  %v5465_v52 = vpop.f32.mrb[196].mxu1 }
 0x436   : > { %7983 = vpow2.f32 %v15384_v35  ;;  %v6224_v19 = vadd.f32 %v6025_v3, %v6024_v24  ;;  %v6033_v31 = vmul.f32 %v5268_v45, %v4892_v58  ;;  %v11717_v5 = vpop.eup %7971  ;;  %v11721_v14 = vadd.f32 %v15385_v54, %v10688_v47  ;;  %v15396_v45 = vld [vmem:[#allocation294_spill] sm:$0xff]  ;;  %v15397_v23 = vld [vmem:[#allocation33_spill] sm:$0xff]  ;;  %v15398_v0 = vld [vmem:[#allocation295_spill] sm:$0xff] }
 0x437   : > { %7985 = vrcp.f32 %v1398_v56  ;;  %v6256_v48 = vadd.f32 %v6027_v13, %v6026_v37  ;;  %v6035_v41 = vmul.f32 %v5461_v39, %v4894_v42  ;;  %v11723_v34 = vpop.eup %7973  ;;  %v11726_v57 = vmul.f32 1.442695, %v3491_v50  ;;  %v15391_v56 = vld [vmem:[#allocation30_spill] sm:$0xff]  ;;  %v15392_v37 = vld [vmem:[#allocation283_spill] sm:$0xff]  ;;  %v15395_v13 = vld [vmem:[#allocation32_spill] sm:$0xff] }
 0x438   : > { %15386 = vst [vmem:[#allocation244_spill] sm:$0xff] %v11721_v14  ;;  %7987 = vpow2.f32 %v11495_v4  ;;  %v11730_v35 = vadd.f32 %v15388_v44, %v10690_v2  ;;  %v6225_v58 = vadd.f32 %v6033_v31, %v6032_v62  ;;  %v11732_v24 = vpop.eup %7975  ;;  %v4899_v36 = vmul.f32 %v15392_v37, %v15391_v56  ;;  %v5272_v4 = vpop.f32.mrb[164].mxu0  ;;  %v15393_v50 = vld [vmem:[#allocation31_spill] sm:$0xff]  ;;  %v15400_v54 = vld [vmem:[#allocation34_spill] sm:$0xff]  ;;  %v15403_v44 = vld [vmem:[#allocation297_spill] sm:$0xff] }
 0x439   : > { %15387 = vst [vmem:[#allocation220_spill] sm:$0xff] %v11726_v57  ;;  %7989 = vrcp.f32 %v4219_v60  ;;  %v11734_v32 = vadd.f32 %v6256_v48, %v6224_v19  ;;  %v6257_v27 = vadd.f32 %v6035_v41, %v6034_v43  ;;  %v11738_v3 = vpop.eup %7977  ;;  %v4901_v17 = vmul.f32 %v15394_v29, %v15393_v50  ;;  %v5274_v19 = vpop.f32.mrb[165].mxu0  ;;  %v15402_v41 = vld [vmem:[#allocation35_spill] sm:$0xff] }
 0x43a   : > { %15389 = vst [vmem:[#allocation245_spill] sm:$0xff] %v11730_v35  ;;  %7991 = vrcp.f32 %v4221_v61  ;;  %v4900_v62 = vmul.f32 %v15396_v45, %v15395_v13  ;;  %v4902_v60 = vmul.f32 %v15398_v0, %v15397_v23  ;;  %v11746_v42 = vpop.eup %7979  ;;  %v6040_v39 = vmul.f32 %v5272_v4, %v4899_v36  ;;  %v5467_v31 = vpop.f32.mrb[197].mxu1  ;;  %v15401_v61 = vld [vmem:[#allocation296_spill] sm:$0xff]  ;;  %v15405_v23 = vld [vmem:[#allocation298_spill] sm:$0xff]  ;;  %v15406_v4 = vld [vmem:[#allocation37_spill] sm:$0xff] }
 0x43b   : > { %15390 = vst [vmem:[#allocation9_spill] sm:$0xff] %v11734_v32  ;;  %v11748_v43 = vadd.f32 %v6257_v27, %v6225_v58  ;;  %v4907_v48 = vmul.f32 %v15401_v61, %v15400_v54  ;;  %v4909_v56 = vmul.f32 %v15403_v44, %v15402_v41  ;;  %v6042_v37 = vmul.f32 %v5465_v52, %v4901_v17  ;;  %v5276_v13 = vpop.f32.mrb[166].mxu0  ;;  %v5469_v45 = vpop.f32.mrb[198].mxu1  ;;  %v15404_v32 = vld [vmem:[#allocation36_spill] sm:$0xff] }
 0x43c   : > { %v6041_v50 = vmul.f32 %v5274_v19, %v4900_v62  ;;  %v6043_v29 = vmul.f32 %v5467_v31, %v4902_v60  ;;  %v4908_v0 = vmul.f32 %v15405_v23, %v15404_v32  ;;  %v7982_v57 = vpop.eup %7981  ;;  %7993 = vpow2.f32 %v11521_v22  ;;  %v5278_v36 = vpop.f32.mrb[167].mxu0  ;;  %v15408_v32 = vld [vmem:[#allocation97_spill] sm:$0xff] }
 0x43d   : > { %15399 = vst [vmem:[#allocation246_spill] sm:$0xff] %v11748_v43  ;;  %v6048_v58 = vmul.f32 %v5276_v13, %v4907_v48  ;;  %v6050_v27 = vmul.f32 %v5469_v45, %v4909_v56  ;;  %v15407_v43 = vld [vmem:[#allocation299_spill] sm:$0xff]  ;;  %v5471_v61 = vpop.f32.mrb[199].mxu1  ;;  %7995 = vpow2.f32 %v11523_v21  ;;  %v11764_v19 = vadd.f32 %v15408_v32, %v10678_v1  ;;  %v15410_v48 = vld [vmem:[#allocation68_spill] sm:$0xff]  ;;  %v1404_v56 = vpop.xlane.xlu0 %1403  ;;  %v15421_v32 = vld [vmem:[#allocation42_spill] sm:$0xff] }
 0x43e   : > { %v4910_v54 = vmul.f32 %v15407_v43, %v15406_v4  ;;  %v6226_v17 = vadd.f32 %v6041_v50, %v6040_v39  ;;  %v6258_v52 = vadd.f32 %v6043_v29, %v6042_v37  ;;  %v6049_v62 = vmul.f32 %v5278_v36, %v4908_v0  ;;  %v1407_v43 = vpop.xlane.xlu1 %1406  ;;  %v15412_v37 = vld [vmem:[#allocation38_spill] sm:$0xff]  ;;  %v15413_v50 = vld [vmem:[#allocation300_spill] sm:$0xff]  ;;  %v15414_v13 = vld [vmem:[#allocation39_spill] sm:$0xff] }
 0x43f   : > { %7997 = vpow2.f32 %v11525_v28  ;;  %15409 = vst [vmem:[#allocation8_spill] sm:$0xff] %v11764_v19  ;;  %v1477_v41 = vmul.f32 %v7982_v57, %v15410_v48  ;;  %v4915_v29 = vmul.f32 %v15413_v50, %v15412_v37  ;;  %v15415_v45 = vld [vmem:[#allocation303_spill] sm:$0xff]  ;;  %v15416_v0 = vld [vmem:[#allocation40_spill] sm:$0xff]  ;;  %v5282_v57 = vpop.f32.mrb[168].mxu0  ;;  %v15424_v37 = vld [vmem:[#allocation313_spill] sm:$0xff] }
 0x440   : > { %v6051_v22 = vmul.f32 %v5471_v61, %v4910_v54  ;;  %v11766_v31 = vpop.eup %7983  ;;  %7999 = vpow2.f32 %v11527_v11  ;;  %v11770_v21 = vadd.f32 %v6258_v52, %v6226_v17  ;;  %v6227_v39 = vadd.f32 %v6049_v62, %v6048_v58  ;;  %v15417_v36 = vld [vmem:[#allocation308_spill] sm:$0xff]  ;;  %v15418_v11 = vld [vmem:[#allocation71_spill] sm:$0xff]  ;;  %v5475_v17 = vpop.f32.mrb[200].mxu1  ;;  %v15419_v52 = vld [vmem:[#allocation41_spill] sm:$0xff] }
 0x441   : > { %v7986_v44 = vpop.eup %7985  ;;  %v4917_v23 = vmul.f32 %v15415_v45, %v15414_v13  ;;  %v4916_v4 = vmul.f32 %v15417_v36, %v15416_v0  ;;  %v15420_v58 = vld [vmem:[#allocation311_spill] sm:$0xff]  ;;  %8001 = vrcp.f32 %v1407_v43  ;;  %v6056_v45 = vmul.f32 %v5282_v57, %v4915_v29  ;;  %v5284_v36 = vpop.f32.mrb[169].mxu0  ;;  %v15429_v1 = vld [vmem:[#allocation314_spill] sm:$0xff]  ;;  %v15430_v29 = vld [vmem:[#allocation45_spill] sm:$0xff] }
 0x442   : > { %15411 = vst [vmem:[#allocation247_spill] sm:$0xff] %v11770_v21  ;;  %v6259_v28 = vadd.f32 %v6051_v22, %v6050_v27  ;;  %v11778_v54 = vpop.eup %7987  ;;  %v1476_v61 = vmul.f32 %v7986_v44, %v15418_v11  ;;  %v4918_v62 = vmul.f32 %v15420_v58, %v15419_v52  ;;  %v15422_v27 = vld [vmem:[#allocation312_spill] sm:$0xff]  ;;  %v15423_v48 = vld [vmem:[#allocation43_spill] sm:$0xff]  ;;  %v5477_v44 = vpop.f32.mrb[201].mxu1  ;;  %8003 = vrcp.f32 %v1404_v56 }
 0x443   : > { %v4923_v22 = vmul.f32 %v15422_v27, %v15421_v32  ;;  %v4925_v50 = vmul.f32 %v15424_v37, %v15423_v48  ;;  %v11787_v60 = vpop.eup %7989  ;;  %v6058_v0 = vmul.f32 %v5475_v17, %v4917_v23  ;;  %v6057_v52 = vmul.f32 %v5284_v36, %v4916_v4  ;;  %v5286_v58 = vpop.f32.mrb[170].mxu0  ;;  %v15428_v27 = vld [vmem:[#allocation44_spill] sm:$0xff]  ;;  %v15431_v23 = vld [vmem:[#allocation315_spill] sm:$0xff] }
 0x444   : > { %v11789_v13 = vadd.f32 %v6259_v28, %v6227_v39  ;;  %v11791_v11 = vpop.eup %7991  ;;  %v11793_v21 = vpack.c.bf16 %v1477_v41, %v1476_v61  ;;  %v5479_v32 = vpop.f32.mrb[202].mxu1  ;;  %v4924_v48 = vmul.f32 %v15429_v1, %v15428_v27  ;;  %v4220_v37 = vadd.f32 1.0, %v11732_v24 }
 0x445   : > { %15426 = vst [vmem:[#allocation248_spill] sm:$0xff] %v11791_v11  ;;  %v6059_v43 = vmul.f32 %v5477_v44, %v4918_v62  ;;  %v6064_v39 = vmul.f32 %v5286_v58, %v4923_v22  ;;  %v5288_v28 = vpop.f32.mrb[171].mxu0  ;;  %v4926_v57 = vmul.f32 %v15431_v23, %v15430_v29  ;;  %v5481_v17 = vpop.f32.mrb[203].mxu1  ;;  %v6228_v41 = vadd.f32 %v6057_v52, %v6056_v45  ;;  %v15434_v58 = vld [vmem:[#allocation46_spill] sm:$0xff] }
 0x446   : > { %15425 = vst [vmem:[#allocation21_spill] sm:$0xff] %v11789_v13  ;;  %15427 = vst [vmem:[#allocation22_spill] sm:$0xff] %v11793_v21  ;;  %v4222_v13 = vadd.f32 1.0, %v11738_v3  ;;  %7004 = vmatmul.mubr.msk.bf16.gmra.mrb[192].mxu0 %vm1131_vm0, %v11793_v21  ;;  %7021 = vmatmul.mubr.msk.bf16.gmra.mrb[224].mxu1 %vm1131_vm0, %v11793_v21  ;;  %v6066_v56 = vmul.f32 %v5479_v32, %v4925_v50  ;;  %v6065_v1 = vmul.f32 %v5288_v28, %v4924_v48  ;;  %v7994_v4 = vpop.eup %7993  ;;  %v15432_v61 = vmov 0   ;;  %v15435_v32 = vld [vmem:[#allocation316_spill] sm:$0xff]  ;;  %v5485_v29 = vpop.f32.mrb[204].mxu1 }
 0x447   : > { %8005 = vpow2.f32 %v11533_v25  ;;  %5350 = vmatprep.mubr.bf16.mxu0 %v15432_v61  ;;  %5543 = vmatprep.mubr.bf16.mxu1 %v15432_v61  ;;  %v6260_v62 = vadd.f32 %v6059_v43, %v6058_v0  ;;  %v6067_v3 = vmul.f32 %v5481_v17, %v4926_v57  ;;  %v7996_v22 = vpop.eup %7995  ;;  %v4227_v36 = vadd.f32 1.0, %v11746_v42  ;;  %v5292_v42 = vpop.f32.mrb[172].mxu0  ;;  %v15436_v43 = vld [vmem:[#allocation47_spill] sm:$0xff]  ;;  %v15439_v23 = vld [vmem:[#allocation318_spill] sm:$0xff] }
 0x448   : > { %8007 = vpow2.f32 %v11535_v30  ;;  %v6229_v50 = vadd.f32 %v6065_v1, %v6064_v39  ;;  %v4931_v27 = vmul.f32 %v15435_v32, %v15434_v58  ;;  %v4229_v0 = vadd.f32 1.0, %v11766_v31  ;;  %v15437_v30 = vld [vmem:[#allocation317_spill] sm:$0xff]  ;;  %v15438_v39 = vld [vmem:[#allocation48_spill] sm:$0xff]  ;;  %v15442_v1 = vld [vmem:[#allocation319_spill] sm:$0xff] }
 0x449   : > { %v11812_v44 = vpop.eup %7997  ;;  %8009 = vrcp.f32 %v4220_v37  ;;  %v11814_v25 = vadd.f32 %v6260_v62, %v6228_v41  ;;  %v6261_v52 = vadd.f32 %v6067_v3, %v6066_v56  ;;  %v4933_v28 = vmul.f32 %v15437_v30, %v15436_v43  ;;  %v5294_v41 = vpop.f32.mrb[173].mxu0  ;;  %v15441_v56 = vld [vmem:[#allocation49_spill] sm:$0xff]  ;;  %v15443_v58 = vld [vmem:[#allocation50_spill] sm:$0xff]  ;;  %v15445_v43 = vld [vmem:[#allocation51_spill] sm:$0xff] }
 0x44a   : > { %v11818_v48 = vpop.eup %7999  ;;  %8011 = vrcp.f32 %v4222_v13  ;;  %v4932_v57 = vmul.f32 %v15439_v23, %v15438_v39  ;;  %v6072_v17 = vmul.f32 %v5292_v42, %v4931_v27  ;;  %v4934_v62 = vmul.f32 %v15442_v1, %v15441_v56  ;;  %v5487_v3 = vpop.f32.mrb[205].mxu1  ;;  %v15444_v13 = vld [vmem:[#allocation320_spill] sm:$0xff]  ;;  %v15446_v30 = vld [vmem:[#allocation323_spill] sm:$0xff] }
 0x44b   : > { %15433 = vst [vmem:[#allocation249_spill] sm:$0xff] %v11814_v25  ;;  %v11825_v37 = vadd.f32 %v6261_v52, %v6229_v50  ;;  %v4939_v32 = vmul.f32 %v15444_v13, %v15443_v58  ;;  %8013 = vrcp.f32 %v4227_v36  ;;  %v6074_v31 = vmul.f32 %v5485_v29, %v4933_v28  ;;  %v5296_v24 = vpop.f32.mrb[174].mxu0  ;;  %v5489_v21 = vpop.f32.mrb[206].mxu1  ;;  %v15447_v42 = vld [vmem:[#allocation52_spill] sm:$0xff]  ;;  %v15448_v58 = vld [vmem:[#allocation99_spill] sm:$0xff] }
 0x44c   : > { %v6073_v45 = vmul.f32 %v5294_v41, %v4932_v57  ;;  %v4941_v25 = vmul.f32 %v15446_v30, %v15445_v43  ;;  %v8002_v39 = vpop.eup %8001  ;;  %v4228_v50 = vadd.f32 1.0, %v11778_v54  ;;  %v6075_v52 = vmul.f32 %v5487_v3, %v4934_v62  ;;  %v5298_v56 = vpop.f32.mrb[175].mxu0  ;;  %v15449_v57 = vld [vmem:[#allocation53_spill] sm:$0xff]  ;;  %v15450_v13 = vld [vmem:[#allocation100_spill] sm:$0xff] }
 0x44d   : > { %15440 = vst [vmem:[#allocation23_spill] sm:$0xff] %v11825_v37  ;;  %v6080_v27 = vmul.f32 %v5296_v24, %v4939_v32  ;;  %v4940_v23 = vmul.f32 %v11504_v53, %v15447_v42  ;;  %v5491_v1 = vpop.f32.mrb[207].mxu1  ;;  %v8004_v37 = vpop.eup %8003  ;;  %v1479_v36 = vmul.f32 %v8002_v39, %v15448_v58  ;;  %v4942_v41 = vmul.f32 %v11510_v49, %v15449_v57  ;;  %v15451_v3 = vld [vmem:[#allocation293_spill] sm:$0xff]  ;;  %v15452_v32 = vld [vmem:[#allocation54_spill] sm:$0xff] }
 0x44e   : > { %v6230_v28 = vadd.f32 %v6073_v45, %v6072_v17  ;;  %v6082_v29 = vmul.f32 %v5489_v21, %v4941_v25  ;;  %8015 = vrcp.f32 %v4229_v0  ;;  %v1478_v43 = vmul.f32 %v8004_v37, %v15450_v13  ;;  %v1413_v45 = vpop.xlane.xlu1 %1412  ;;  %v15454_v0 = vld [vmem:[#allocation55_spill] sm:$0xff]  ;;  %v5495_v39 = vpop.f32.mrb[208].mxu1 }
 0x44f   : > { %v6262_v30 = vadd.f32 %v6075_v52, %v6074_v31  ;;  %v6081_v54 = vmul.f32 %v5298_v56, %v4940_v23  ;;  %v4230_v62 = vadd.f32 1.0, %v7994_v4  ;;  %v6083_v24 = vmul.f32 %v5491_v1, %v4942_v41  ;;  %v5302_v31 = vpop.f32.mrb[176].mxu0  ;;  %v15457_v56 = vld [vmem:[#allocation58_spill] sm:$0xff] }
 0x450   : > { %v4947_v53 = vmul.f32 %v11518_v6, %v15451_v3  ;;  %v4949_v42 = vmul.f32 %v11530_v46, %v15452_v32  ;;  %v11846_v21 = vpack.c.bf16 %v1479_v36, %v1478_v43  ;;  %v4948_v37 = vmul.f32 %v11539_v16, %v15454_v0  ;;  %v15455_v6 = vld [vmem:[#allocation56_spill] sm:$0xff]  ;;  %v15456_v46 = vld [vmem:[#allocation57_spill] sm:$0xff]  ;;  %v1410_v32 = vpop.xlane.xlu0 %1409 }
 0x451   : > { %v11844_v11 = vpop.eup %8005  ;;  %v11848_v25 = vadd.f32 %v6262_v30, %v6230_v28  ;;  %v6231_v49 = vadd.f32 %v6081_v54, %v6080_v27  ;;  %v6263_v4 = vadd.f32 %v6083_v24, %v6082_v29  ;;  %v4950_v52 = vmul.f32 %v11548_v20, %v15455_v6  ;;  %v5304_v28 = vpop.f32.mrb[177].mxu0  ;;  %v15458_v20 = vld [vmem:[#allocation59_spill] sm:$0xff]  ;;  %v15460_v3 = vld [vmem:[#allocation60_spill] sm:$0xff] }
 0x452   : > { %v11852_v17 = vpop.eup %8007  ;;  %v4955_v23 = vmul.f32 %v11554_v40, %v15456_v46  ;;  %v4957_v1 = vmul.f32 %v11563_v59, %v15457_v56  ;;  %v4235_v27 = vadd.f32 1.0, %v7996_v22  ;;  %7005 = vmatmul.mubr.msk.bf16.gmra.mrb[196].mxu0 %vm1131_vm0, %v11846_v21  ;;  %7022 = vmatmul.mubr.msk.bf16.gmra.mrb[228].mxu1 %vm1131_vm0, %v11846_v21  ;;  %v6088_v16 = vmul.f32 %v5302_v31, %v4947_v53  ;;  %v5497_v29 = vpop.f32.mrb[209].mxu1  ;;  %v15464_v56 = vld [vmem:[#allocation61_spill] sm:$0xff] }
 0x453   : > { %15453 = vst [vmem:[#allocation250_spill] sm:$0xff] %v11848_v25  ;;  %v11860_v58 = vpop.eup %8009  ;;  %v6090_v36 = vmul.f32 %v5495_v39, %v4949_v42  ;;  %v4956_v57 = vmul.f32 %v11569_v51, %v15458_v20  ;;  %8017 = vrcp.f32 %v4228_v50  ;;  %5360 = vmatprep.mubr.bf16.mxu0 %v15432_v61  ;;  %5553 = vmatprep.mubr.bf16.mxu1 %v15432_v61  ;;  %v5306_v13 = vpop.f32.mrb[178].mxu0  ;;  %v15462_v39 = vsub.f32 0.0, %v11721_v14  ;;  %v15467_v20 = vld [vmem:[#allocation205_spill] sm:$0xff] }
 0x454   : > { %v11868_v40 = vpop.eup %8011  ;;  %v11872_v59 = vadd.f32 %v6263_v4, %v6231_v49  ;;  %v6089_v22 = vmul.f32 %v5304_v28, %v4948_v37  ;;  %v6091_v41 = vmul.f32 %v5497_v29, %v4950_v52  ;;  %v5499_v43 = vpop.f32.mrb[210].mxu1  ;;  %8019 = vpow2.f32 %v11537_v18 }
 0x455   : > { %v6096_v30 = vmul.f32 %v5306_v13, %v4955_v23  ;;  %v6098_v54 = vmul.f32 %v5499_v43, %v4957_v1  ;;  %v5308_v24 = vpop.f32.mrb[179].mxu0  ;;  %v4958_v51 = vmul.f32 %v11584_v26, %v15460_v3  ;;  %v5501_v53 = vpop.f32.mrb[211].mxu1  ;;  %8021 = vrcp.f32 %v4230_v62 }
 0x456   : > { %15459 = vst [vmem:[#allocation93_spill] sm:$0xff] %v11872_v59  ;;  %v11877_v50 = vpop.eup %8013  ;;  %v6232_v42 = vadd.f32 %v6089_v22, %v6088_v16  ;;  %v6264_v49 = vadd.f32 %v6091_v41, %v6090_v36  ;;  %v6097_v0 = vmul.f32 %v5308_v24, %v4956_v57  ;;  %8023 = vrcp.f32 %v4235_v27  ;;  %v5312_v16 = vpop.f32.mrb[180].mxu0  ;;  %v15465_v36 = vld [vmem:[#allocation62_spill] sm:$0xff]  ;;  %v15468_v22 = vld [vmem:[#allocation64_spill] sm:$0xff] }
 0x457   : > { %v15461_v37 = vsub.f32 0.0, %v11685_v63  ;;  %v3499_v18 = vsub.f32 0.0, %v11764_v19  ;;  %v6099_v31 = vmul.f32 %v5501_v53, %v4958_v51  ;;  %v11886_v6 = vmul.f32 1.442695, %v15462_v39  ;;  %v5505_v29 = vpop.f32.mrb[212].mxu1  ;;  %v5314_v43 = vpop.f32.mrb[181].mxu0 }
 0x458   : > { %8025 = vrcp.f32 %v1413_v45  ;;  %v11888_v26 = vadd.f32 %v6264_v49, %v6232_v42  ;;  %v6233_v62 = vadd.f32 %v6097_v0, %v6096_v30  ;;  %v11890_v52 = vpop.eup %8015  ;;  %v4237_v46 = vadd.f32 1.0, %v11812_v44  ;;  %v15466_v45 = vld [vmem:[#allocation63_spill] sm:$0xff]  ;;  %v5507_v30 = vpop.f32.mrb[213].mxu1  ;;  %v15473_v39 = vld [vmem:[#allocation69_spill] sm:$0xff] }
 0x459   : > { %v11881_v4 = vmul.f32 1.442695, %v15461_v37  ;;  %8027 = vrcp.f32 %v1410_v32  ;;  %v6265_v23 = vadd.f32 %v6099_v31, %v6098_v54  ;;  %v4963_v1 = vmul.f32 %v11593_v8, %v15464_v56  ;;  %v15470_v54 = vld [vmem:[#allocation65_spill] sm:$0xff]  ;;  %v5316_v53 = vpop.f32.mrb[182].mxu0  ;;  %v5509_v32 = vpop.f32.mrb[214].mxu1  ;;  %v15472_v42 = vld [vmem:[#allocation67_spill] sm:$0xff] }
 0x45a   : > { %15463 = vst [vmem:[#allocation10_spill] sm:$0xff] %v11888_v26  ;;  %v4236_v27 = vadd.f32 1.0, %v11818_v48  ;;  %v4965_v28 = vmul.f32 %v11601_v9, %v15465_v36  ;;  %v4964_v57 = vmul.f32 %v15467_v20, %v15466_v45  ;;  %v4966_v41 = vmul.f32 %v11641_v38, %v15468_v22  ;;  %v15471_v48 = vld [vmem:[#allocation66_spill] sm:$0xff]  ;;  %v5318_v31 = vpop.f32.mrb[183].mxu0  ;;  %v15477_v45 = vld [vmem:[#allocation101_spill] sm:$0xff] }
 0x45b   : > { %v11902_v13 = vadd.f32 %v6265_v23, %v6233_v62  ;;  %v6104_v44 = vmul.f32 %v5312_v16, %v4963_v1  ;;  %v4971_v8 = vmul.f32 %v11649_v10, %v15470_v54  ;;  %v4973_v24 = vmul.f32 %v11654_v12, %v15471_v48  ;;  %v5511_v10 = vpop.f32.mrb[215].mxu1  ;;  %v15479_v20 = vld [vmem:[#allocation102_spill] sm:$0xff] }
 0x45c   : > { %v4238_v9 = vadd.f32 1.0, %v11844_v11  ;;  %v6106_v3 = vmul.f32 %v5505_v29, %v4965_v28  ;;  %v6105_v51 = vmul.f32 %v5314_v43, %v4964_v57  ;;  %v4972_v38 = vmul.f32 %v11658_v15, %v15472_v42  ;;  %v15475_v15 = vld [vmem:[#allocation98_spill] sm:$0xff] }
 0x45d   : > { %15469 = vst [vmem:[#allocation257_spill] sm:$0xff] %v11902_v13  ;;  %v6107_v49 = vmul.f32 %v5507_v30, %v4966_v41  ;;  %v6112_v0 = vmul.f32 %v5316_v53, %v4971_v8  ;;  %v6114_v37 = vmul.f32 %v5509_v32, %v4973_v24  ;;  %v4974_v62 = vmul.f32 %v11689_v33, %v15473_v39  ;;  %v11913_v23 = vpop.eup %8017  ;;  %v15483_v30 = vld [vmem:[#allocation72_spill] sm:$0xff]  ;;  %v5322_v24 = vpop.f32.mrb[184].mxu0  ;;  %v15486_v32 = vld [vmem:[#allocation74_spill] sm:$0xff] }
 0x45e   : > { %8029 = vrcp.f32 %v4237_v46  ;;  %v15474_v12 = vsub.f32 0.0, %v11730_v35  ;;  %v6234_v56 = vadd.f32 %v6105_v51, %v6104_v44  ;;  %v6113_v1 = vmul.f32 %v5318_v31, %v4972_v38  ;;  %v11919_v16 = vpop.eup %8019  ;;  %v15481_v44 = vld [vmem:[#allocation326_spill] sm:$0xff]  ;;  %v5515_v53 = vpop.f32.mrb[216].mxu1  ;;  %v15487_v38 = vld [vmem:[#allocation75_spill] sm:$0xff] }
 0x45f   : > { %8031 = vrcp.f32 %v4236_v27  ;;  %v11923_v36 = vadd.f32 %v15475_v15, %v10680_v55  ;;  %v6266_v28 = vadd.f32 %v6107_v49, %v6106_v3  ;;  %v6115_v29 = vmul.f32 %v5511_v10, %v4974_v62  ;;  %v8022_v33 = vpop.eup %8021  ;;  %v15485_v3 = vld [vmem:[#allocation243_spill] sm:$0xff]  ;;  %v5324_v62 = vpop.f32.mrb[185].mxu0  ;;  %v15490_v10 = vld [vmem:[#allocation76_spill] sm:$0xff] }
 0x460   : > { %v11917_v11 = vmul.f32 1.442695, %v15474_v12  ;;  %8033 = vrcp.f32 %v4238_v9  ;;  %v11927_v46 = vadd.f32 %v15477_v45, %v10688_v47  ;;  %v11931_v57 = vadd.f32 %v15479_v20, %v10690_v2  ;;  %v8024_v41 = vpop.eup %8023  ;;  %v15484_v9 = vld [vmem:[#allocation73_spill] sm:$0xff] }
 0x461   : > { %15476 = vst [vmem:[#allocation11_spill] sm:$0xff] %v11923_v36  ;;  %v6235_v22 = vadd.f32 %v6113_v1, %v6112_v0  ;;  %8035 = vpow2.f32 %v15481_v44  ;;  %v11934_v27 = vadd.f32 %v6266_v28, %v6234_v56  ;;  %v6267_v43 = vadd.f32 %v6115_v29, %v6114_v37  ;;  %v15488_v37 = vld [vmem:[#allocation107_spill] sm:$0xff]  ;;  %v15491_v56 = vld [vmem:[#allocation328_spill] sm:$0xff]  ;;  %v15492_v1 = vld [vmem:[#allocation109_spill] sm:$0xff]  ;;  %v5326_v29 = vpop.f32.mrb[186].mxu0 }
 0x462   : > { %15478 = vst [vmem:[#allocation260_spill] sm:$0xff] %v11927_v46  ;;  %15480 = vst [vmem:[#allocation24_spill] sm:$0xff] %v11931_v57  ;;  %v4979_v54 = vmul.f32 %v11696_v7, %v15483_v30  ;;  %v8026_v8 = vpop.eup %8025  ;;  %v11939_v48 = vadd.f32 1.0, %v11852_v17  ;;  %v4981_v51 = vmul.f32 %v15485_v3, %v15484_v9  ;;  %v4980_v42 = vmul.f32 %v11717_v5, %v15486_v32  ;;  %v5517_v17 = vpop.f32.mrb[217].mxu1  ;;  %v15496_v9 = vld [vmem:[#allocation78_spill] sm:$0xff]  ;;  %v15497_v32 = vld [vmem:[#allocation79_spill] sm:$0xff] }
 0x463   : > { %15482 = vst [vmem:[#allocation261_spill] sm:$0xff] %v11934_v27  ;;  %v4982_v49 = vmul.f32 %v11723_v34, %v15487_v38  ;;  %v8028_v0 = vpop.eup %8027  ;;  %v1481_v31 = vmul.f32 %v8026_v8, %v15488_v37  ;;  %v11948_v39 = vadd.f32 %v6267_v43, %v6235_v22  ;;  %v4987_v12 = vmul.f32 %v11787_v60, %v15490_v10  ;;  %v5519_v45 = vpop.f32.mrb[218].mxu1  ;;  %v15493_v34 = vld [vmem:[#allocation329_spill] sm:$0xff]  ;;  %v15495_v43 = vld [vmem:[#allocation248_spill] sm:$0xff] }
 0x464   : > { %v6120_v7 = vmul.f32 %v5322_v24, %v4979_v54  ;;  %8037 = vpow2.f32 %v15491_v56  ;;  %v1480_v15 = vmul.f32 %v8028_v0, %v15492_v1  ;;  %v6122_v28 = vmul.f32 %v5515_v53, %v4981_v51  ;;  %v15494_v22 = vld [vmem:[#allocation77_spill] sm:$0xff]  ;;  %v5328_v54 = vpop.f32.mrb[187].mxu0  ;;  %v5521_v8 = vpop.f32.mrb[219].mxu1  ;;  %v15498_v53 = vld [vmem:[#allocation210_spill] sm:$0xff]  ;;  %v15499_v0 = vld [vmem:[#allocation80_spill] sm:$0xff] }
 0x465   : > { %15489 = vst [vmem:[#allocation25_spill] sm:$0xff] %v11948_v39  ;;  %v6121_v5 = vmul.f32 %v5324_v62, %v4980_v42  ;;  %8039 = vpow2.f32 %v15493_v34  ;;  %v6123_v20 = vmul.f32 %v5517_v17, %v4982_v49  ;;  %v6128_v44 = vmul.f32 %v5326_v29, %v4987_v12  ;;  %v1419_v42 = vpop.xlane.xlu1 %1418  ;;  %v15500_v17 = vld [vmem:[#allocation215_spill] sm:$0xff]  ;;  %v15502_v56 = vld [vmem:[#allocation217_spill] sm:$0xff]  ;;  %v15504_v1 = vld [vmem:[#allocation82_spill] sm:$0xff] }
 0x466   : > { %v4989_v30 = vmul.f32 %v15495_v43, %v15494_v22  ;;  %v11957_v24 = vpack.c.bf16 %v1481_v31, %v1480_v15  ;;  %v4988_v3 = vmul.f32 %v11860_v58, %v15496_v9  ;;  %v4990_v51 = vmul.f32 %v11868_v40, %v15497_v32  ;;  %v1416_v31 = vpop.xlane.xlu0 %1415  ;;  %v15506_v22 = vld [vmem:[#allocation84_spill] sm:$0xff] }
 0x467   : > { %v6236_v60 = vadd.f32 %v6121_v5, %v6120_v7  ;;  %8041 = vpow2.f32 %v15498_v53  ;;  %v6268_v38 = vadd.f32 %v6123_v20, %v6122_v28  ;;  %v4995_v37 = vmul.f32 %v11877_v50, %v15499_v0  ;;  %v15501_v7 = vld [vmem:[#allocation81_spill] sm:$0xff]  ;;  %v15505_v28 = vld [vmem:[#allocation83_spill] sm:$0xff]  ;;  %v5332_v20 = vpop.f32.mrb[188].mxu0 }
 0x468   : > { %v6130_v49 = vmul.f32 %v5519_v45, %v4989_v30  ;;  %v8030_v62 = vpop.eup %8029  ;;  %8043 = vpow2.f32 %v15500_v17  ;;  %7006 = vmatmul.mubr.msk.bf16.gmra.mrb[200].mxu0 %vm1131_vm0, %v11957_v24  ;;  %7023 = vmatmul.mubr.msk.bf16.gmra.mrb[232].mxu1 %vm1131_vm0, %v11957_v24  ;;  %v6129_v58 = vmul.f32 %v5328_v54, %v4988_v3  ;;  %v6131_v40 = vmul.f32 %v5521_v8, %v4990_v51  ;;  %v5334_v9 = vpop.f32.mrb[189].mxu0  ;;  %v15507_v3 = vld [vmem:[#allocation85_spill] sm:$0xff] }
 0x469   : > { %v4997_v10 = vmul.f32 %v11890_v52, %v15501_v7  ;;  %v8032_v12 = vpop.eup %8031  ;;  %8045 = vpow2.f32 %v15502_v56  ;;  %5370 = vmatprep.mubr.bf16.mxu0 %v15432_v61  ;;  %5563 = vmatprep.mubr.bf16.mxu1 %v15432_v61  ;;  %v11976_v50 = vadd.f32 %v6268_v38, %v6236_v60  ;;  %v4996_v15 = vmul.f32 %v11913_v23, %v15504_v1  ;;  %v5525_v52 = vpop.f32.mrb[220].mxu1  ;;  %v15511_v7 = vld [vmem:[#allocation220_spill] sm:$0xff] }
 0x46a   : > { %v4998_v5 = vmul.f32 %v8022_v33, %v15505_v28  ;;  %v8034_v29 = vpop.eup %8033  ;;  %8047 = vrcp.f32 %v1419_v42  ;;  %v6237_v45 = vadd.f32 %v6129_v58, %v6128_v44  ;;  %v6269_v34 = vadd.f32 %v6131_v40, %v6130_v49  ;;  %v5527_v60 = vpop.f32.mrb[221].mxu1  ;;  %v15509_v44 = vld [vmem:[#allocation86_spill] sm:$0xff]  ;;  %v15513_v28 = vld [vmem:[#allocation103_spill] sm:$0xff] }
 0x46b   : > { %15503 = vst [vmem:[#allocation262_spill] sm:$0xff] %v11976_v50  ;;  %v5003_v43 = vmul.f32 %v8024_v41, %v15506_v22  ;;  %v8036_v30 = vpop.eup %8035  ;;  %8049 = vrcp.f32 %v1416_v31  ;;  %v6136_v54 = vmul.f32 %v5332_v20, %v4995_v37  ;;  %v6138_v8 = vmul.f32 %v5525_v52, %v4997_v10  ;;  %v5336_v53 = vpop.f32.mrb[190].mxu0  ;;  %v15510_v31 = vld [vmem:[#allocation87_spill] sm:$0xff] }
 0x46c   : > { %v5005_v32 = vmul.f32 %v8030_v62, %v15507_v3  ;;  %v11983_v51 = vadd.f32 %v6269_v34, %v6237_v45  ;;  %v6137_v23 = vmul.f32 %v5334_v9, %v4996_v15  ;;  %v6139_v33 = vmul.f32 %v5527_v60, %v4998_v5  ;;  %v5529_v42 = vpop.f32.mrb[222].mxu1  ;;  %v5338_v17 = vpop.f32.mrb[191].mxu0 }
 0x46d   : > { %v5004_v38 = vmul.f32 %v8032_v12, %v15509_v44  ;;  %v4245_v49 = vadd.f32 1.0, %v11919_v16  ;;  %v6144_v0 = vmul.f32 %v5336_v53, %v5003_v43  ;;  %v5006_v37 = vmul.f32 %v8034_v29, %v15510_v31  ;;  %v5531_v58 = vpop.f32.mrb[223].mxu1  ;;  %v15512_v12 = vld [vmem:[#allocation191_spill] sm:$0xff]  ;;  %v15521_v44 = vld [vmem:[#allocation121_spill] sm:$0xff] }
 0x46e   : > { %15508 = vst [vmem:[#allocation12_spill] sm:$0xff] %v11983_v51  ;;  %v6146_v41 = vmul.f32 %v5529_v42, %v5005_v32  ;;  %v8038_v40 = vpop.eup %8037  ;;  %8051 = vpow2.f32 %v15511_v7  ;;  %v6238_v62 = vadd.f32 %v6137_v23, %v6136_v54  ;;  %v6270_v10 = vadd.f32 %v6139_v33, %v6138_v8 }
 0x46f   : > { %v6145_v56 = vmul.f32 %v5338_v17, %v5004_v38  ;;  %v8040_v1 = vpop.eup %8039  ;;  %8053 = vrcp.f32 %v11939_v48  ;;  %v3501_v15 = vsub.f32 0.0, %v11923_v36  ;;  %v11993_v16 = vadd.f32 %v15513_v28, %v15512_v12  ;;  %v15516_v48 = vld [vmem:[#allocation104_spill] sm:$0xff] }
 0x470   : > { %v6147_v5 = vmul.f32 %v5531_v58, %v5006_v37  ;;  %v4244_v45 = vadd.f32 1.0, %v8036_v30  ;;  %8055 = vpow2.f32 %v11881_v4  ;;  %v11996_v29 = vadd.f32 %v6270_v10, %v6238_v62  ;;  %v15518_v4 = vld [vmem:[#allocation105_spill] sm:$0xff] }
 0x471   : > { %15514 = vst [vmem:[#allocation263_spill] sm:$0xff] %v11993_v16  ;;  %v6239_v34 = vadd.f32 %v6145_v56, %v6144_v0  ;;  %v8042_v20 = vpop.eup %8041  ;;  %8057 = vrcp.f32 %v4245_v49  ;;  %v3971_v52 = vmul.f32 1.442695, %v3499_v18  ;;  %v12002_v22 = vadd.f32 %v15516_v48, %v10680_v55  ;;  %v15522_v0 = vld [vmem:[#allocation106_spill] sm:$0xff] }
 0x472   : > { %15515 = vst [vmem:[#allocation26_spill] sm:$0xff] %v11996_v29  ;;  %v6271_v43 = vadd.f32 %v6147_v5, %v6146_v41  ;;  %v8044_v54 = vpop.eup %8043  ;;  %v4246_v8 = vadd.f32 1.0, %v8038_v40  ;;  %8059 = vpow2.f32 %v11886_v6  ;;  %v3500_v30 = vsub.f32 0.0, %v11927_v46  ;;  %v15527_v5 = vld [vmem:[#allocation111_spill] sm:$0xff] }
 0x473   : > { %15517 = vst [vmem:[#allocation268_spill] sm:$0xff] %v12002_v22  ;;  %v12008_v9 = vadd.f32 %v15518_v4, %v10688_v47  ;;  %v8046_v60 = vpop.eup %8045  ;;  %v4251_v3 = vadd.f32 1.0, %v8040_v1  ;;  %8061 = vpow2.f32 %v11917_v11  ;;  %v3502_v18 = vsub.f32 0.0, %v11931_v57  ;;  %v15524_v11 = vld [vmem:[#allocation124_spill] sm:$0xff] }
 0x474   : > { %v12012_v32 = vadd.f32 %v6271_v43, %v6239_v34  ;;  %v8048_v23 = vpop.eup %8047  ;;  %8063 = vrcp.f32 %v4244_v45  ;;  %v3975_v33 = vmul.f32 1.442695, %v3501_v15  ;;  %v3507_v53 = vsub.f32 0.0, %v11993_v16  ;;  %v15525_v15 = vld [vmem:[#allocation110_spill] sm:$0xff]  ;;  %v15531_v43 = vld [vmem:[#allocation113_spill] sm:$0xff] }
 0x475   : > { %15519 = vst [vmem:[#allocation13_spill] sm:$0xff] %v12008_v9  ;;  %v8050_v6 = vpop.eup %8049  ;;  %v4253_v42 = vadd.f32 1.0, %v8042_v20  ;;  %8065 = vpow2.f32 %v3971_v52  ;;  %v1483_v38 = vmul.f32 %v8048_v23, %v15521_v44  ;;  %v3973_v49 = vmul.f32 1.442695, %v3500_v30  ;;  %v15529_v52 = vld [vmem:[#allocation112_spill] sm:$0xff] }
 0x476   : > { %15520 = vst [vmem:[#allocation269_spill] sm:$0xff] %v12012_v32  ;;  %8067 = vrcp.f32 %v4246_v8  ;;  %v12018_v41 = vadd.f32 %v15522_v0, %v10690_v2  ;;  %v1482_v17 = vmul.f32 %v8050_v6, %v15524_v11  ;;  %v3977_v31 = vmul.f32 1.442695, %v3502_v18  ;;  %v7387_v8 = vld [vmem:[%s14442_s8] sm:$0xff]  }
 0x477   : > { %8069 = vrcp.f32 %v4251_v3  ;;  %v3509_v37 = vsub.f32 0.0, %v12002_v22  ;;  %v3508_v58 = vsub.f32 0.0, %v12008_v9  ;;  %v4252_v7 = vadd.f32 1.0, %v8044_v54  ;;  %7250 = vmatprep.subr.bf16.mxu0 %v7387_v8  ;;  %v15600_v9 = vld [vmem:[#allocation144_spill] sm:$0xff] }
 0x478   : > { %15523 = vst [vmem:[#allocation27_spill] sm:$0xff] %v12018_v41  ;;  %v8052_v40 = vpop.eup %8051  ;;  %8071 = vpow2.f32 %v3975_v33  ;;  %v3987_v62 = vmul.f32 1.442695, %v3507_v53  ;;  %v12023_v10 = vpack.c.bf16 %v1483_v38, %v1482_v17  ;;  %v4254_v1 = vadd.f32 1.0, %v8046_v60  ;;  %v15533_v60 = vld [vmem:[#allocation186_spill] sm:$0xff] }
 0x479   : > { %v12025_v56 = vpop.eup %8053  ;;  %8073 = vrcp.f32 %v4253_v42  ;;  %v12029_v28 = vadd.f32 %v15525_v15, %v15512_v12  ;;  %v12033_v45 = vadd.f32 %v15527_v5, %v10680_v55  ;;  %v3510_v20 = vsub.f32 0.0, %v12018_v41  ;;  %v15534_v53 = vld [vmem:[#allocation114_spill] sm:$0xff] }
 0x47a   : > { %v8056_v34 = vpop.eup %8055  ;;  %8075 = vpow2.f32 %v3973_v49  ;;  %v12038_v48 = vadd.f32 %v15529_v52, %v10688_v47  ;;  %v12042_v54 = vadd.f32 %v15531_v43, %v10690_v2  ;;  %7007 = vmatmul.mubr.msk.bf16.gmra.mrb[204].mxu0 %vm1131_vm0, %v12023_v10  ;;  %7024 = vmatmul.mubr.msk.bf16.gmra.mrb[236].mxu1 %vm1131_vm0, %v12023_v10  ;;  %v4259_v4 = vadd.f32 1.0, %v8052_v40  ;;  %v15536_v40 = vld [vmem:[#allocation115_spill] sm:$0xff]  ;;  %v15591_v41 = vld [vmem:[#allocation118_spill] sm:$0xff] }
 0x47b   : > { %15526 = vst [vmem:[#allocation272_spill] sm:$0xff] %v12029_v28  ;;  %15528 = vst [vmem:[#allocation94_spill] sm:$0xff] %v12033_v45  ;;  %v12051_v30 = vpop.eup %8057  ;;  %8077 = vpow2.f32 %v3977_v31  ;;  %v2169_v3 = vsub.s32 4, %v15533_v60  ;;  %5606 = vmatprep.mubr.bf16.mxu0 %v15432_v61  ;;  %5799 = vmatprep.mubr.bf16.mxu1 %v15432_v61  ;;  %v3991_v23 = vmul.f32 1.442695, %v3509_v37  ;;  %v12058_v6 = vadd.f32 %v15534_v53, %v15512_v12 }
 0x47c   : > { %15530 = vst [vmem:[#allocation321_spill] sm:$0xff] %v12038_v48  ;;  %15532 = vst [vmem:[#allocation14_spill] sm:$0xff] %v12042_v54  ;;  %v8060_v18 = vpop.eup %8059  ;;  %8079 = vrcp.f32 %v4252_v7  ;;  %v3989_v33 = vmul.f32 1.442695, %v3508_v58  ;;  %v4261_v44 = vadd.f32 1.0, %v8056_v34  ;;  %v3515_v38 = vsub.f32 0.0, %v12029_v28 }
 0x47d   : > { %15535 = vst [vmem:[#allocation273_spill] sm:$0xff] %v12058_v6  ;;  %v8062_v42 = vpop.eup %8061  ;;  %8081 = vrcp.f32 %v4254_v1  ;;  %v3517_v49 = vsub.f32 0.0, %v12033_v45  ;;  %v3993_v11 = vmul.f32 1.442695, %v3510_v20  ;;  %v3516_v17 = vsub.f32 0.0, %v12038_v48  ;;  %v12073_v1 = vld [vmem:[%s14441_s7] sm:$0xff] }
 0x47e   : > { %v12062_v0 = vpop.eup %8063  ;;  %8083 = vpow2.f32 %v3987_v62  ;;  %v3518_v31 = vsub.f32 0.0, %v12042_v54  ;;  %v4260_v58 = vadd.f32 1.0, %v8060_v18  ;;  %v12068_v7 = vadd.f32 %v15536_v40, %v10680_v55  ;;  %v15538_v18 = vld [vmem:[#allocation116_spill] sm:$0xff] }
 0x47f   : > { %v8066_v37 = vpop.eup %8065  ;;  %8085 = vrcp.f32 %v4259_v4  ;;  %v12076_v15 = vrot.slane %v12073_v1, %v2169_v3  ;;  %v4262_v5 = vadd.f32 1.0, %v8062_v42  ;;  %v3523_v34 = vsub.f32 0.0, %v12058_v6  ;;  %v7388_v3 = vld [vmem:[%s14442_s8 + $0x8] sm:$0xff]  }
 0x480   : > { %15537 = vst [vmem:[#allocation15_spill] sm:$0xff] %v12068_v7  ;;  %v12078_v62 = vpop.eup %8067  ;;  %8087 = vpow2.f32 %v3991_v23  ;;  %v2177_v20 = vsub.s32 6, %v15533_v60  ;;  %v4003_v43 = vmul.f32 1.442695, %v3515_v38  ;;  %v4007_v4 = vmul.f32 1.442695, %v3517_v49 }
 0x481   : > { %v12082_v52 = vpop.eup %8069  ;;  %8089 = vrcp.f32 %v4261_v44  ;;  %v12086_v53 = vadd.f32 %v15538_v18, %v10688_v47  ;;  %v4267_v42 = vadd.f32 1.0, %v8066_v37  ;;  %v15540_v23 = vld [vmem:[#allocation117_spill] sm:$0xff]  ;;  %v2173_v29 = vsub.s32 5, %v15533_v60  ;;  %v15542_v44 = vld [vmem:[#allocation70_spill] sm:$0xff]  ;;  %v15578_v6 = vld [vmem:[#allocation108_spill] sm:$0xff] }
 0x482   : > { %v8072_v40 = vpop.eup %8071  ;;  %8091 = vpow2.f32 %v3989_v33  ;;  %v12093_v32 = vadd.f32 %v15540_v23, %v10690_v2  ;;  %7026 = vmatmul.mubr.msk.bf16.vlgmr.msra.gmra.mrb[208].mxu0 %vm1131_vm0, %v15542_v44  ;;  %7043 = vmatmul.mubr.msk.bf16.vlgmr.msra.gmra.mrb[240].mxu1 %vm1131_vm0, %v15542_v44  ;;  %v4005_v49 = vmul.f32 1.442695, %v3516_v17  ;;  %v4009_v18 = vmul.f32 1.442695, %v3518_v31  ;;  %v15543_v37 = vld [vmem:[#allocation125_spill] sm:$0xff] }
 0x483   : > { %15539 = vst [vmem:[#allocation276_spill] sm:$0xff] %v12086_v53  ;;  %v12100_v38 = vpop.eup %8073  ;;  %8093 = vrcp.f32 %v4260_v58  ;;  %v12104_v33 = vadd.f32 %v15543_v37, %v12076_v15  ;;  %5616 = vmatprep.mubr.bf16.mxu0 %v15432_v61  ;;  %5809 = vmatprep.mubr.bf16.mxu1 %v15432_v61  ;;  %v4019_v51 = vmul.f32 1.442695, %v3523_v34  ;;  %v3525_v50 = vsub.f32 0.0, %v12068_v7  ;;  %v15545_v37 = vld [vmem:[#allocation119_spill] sm:$0xff]  ;;  %v15547_v34 = vld [vmem:[#allocation120_spill] sm:$0xff] }
 0x484   : > { %15541 = vst [vmem:[#allocation28_spill] sm:$0xff] %v12093_v32  ;;  %v8076_v23 = vpop.eup %8075  ;;  %8095 = vrcp.f32 %v4262_v5  ;;  %v12110_v44 = vrot.slane %v12073_v1, %v2177_v20  ;;  %7251 = vmatpush3.bf16.msra.mxu0 %v7387_v8  ;;  %v4269_v17 = vadd.f32 1.0, %v8072_v40  ;;  %v3524_v31 = vsub.f32 0.0, %v12086_v53 }
 0x485   : > { %15544 = vst [vmem:[#allocation277_spill] sm:$0xff] %v12104_v33  ;;  %v8078_v58 = vpop.eup %8077  ;;  %8097 = vpow2.f32 %v3993_v11  ;;  %v12115_v39 = vadd.f32 %v15545_v37, %v15512_v12  ;;  %7252 = vmatprep.subr.bf16.mxu0 %v7388_v3  ;;  %v3526_v5 = vsub.f32 0.0, %v12093_v32  ;;  %v12122_v20 = vadd.f32 %v15547_v34, %v10680_v55  ;;  %v15552_v55 = vld [vmem:[#allocation126_spill] sm:$0xff] }
 0x486   : > { %v12117_v27 = vpop.eup %8079  ;;  %8099 = vrcp.f32 %v4267_v42  ;;  %v12125_v8 = vrot.slane %v12073_v1, %v2173_v29  ;;  %v4268_v40 = vadd.f32 1.0, %v8076_v23  ;;  %v3287_v12 = vsub.f32 0.0, %v12104_v33  ;;  %v15550_v42 = vld [vmem:[#allocation122_spill] sm:$0xff] }
 0x487   : > { %15546 = vst [vmem:[#allocation16_spill] sm:$0xff] %v12115_v39  ;;  %15548 = vst [vmem:[#allocation278_spill] sm:$0xff] %v12122_v20  ;;  %v12127_v11 = vpop.eup %8081  ;;  %8101 = vpow2.f32 %v4003_v43  ;;  %v2181_v37 = vsub.s32 7, %v15533_v60  ;;  %v4270_v26 = vadd.f32 1.0, %v8078_v58  ;;  %v12133_v59 = vadd.f32 %v15550_v42, %v10688_v47  ;;  %v15555_v60 = vld [vmem:[#allocation123_spill] sm:$0xff] }
 0x488   : > { %15549 = vst [vmem:[#allocation17_spill] sm:$0xff] %v12127_v11  ;;  %v8084_v13 = vpop.eup %8083  ;;  %8103 = vpow2.f32 %v4007_v4  ;;  %v12137_v34 = vadd.f32 %v15552_v55, %v12110_v44  ;;  %7253 = vmatpush3.bf16.msra.mxu0 %v7388_v3  ;;  %v4023_v43 = vmul.f32 1.442695, %v3525_v50  ;;  %v3531_v23 = vsub.f32 0.0, %v12115_v39  ;;  %v15557_v42 = vld [vmem:[#allocation127_spill] sm:$0xff]  ;;  %v15559_v3 = vld [vmem:[#allocation92_spill] sm:$0xff] }
 0x489   : > { %15551 = vst [vmem:[#allocation279_spill] sm:$0xff] %v12133_v59  ;;  %v12139_v29 = vpop.eup %8085  ;;  %8105 = vrcp.f32 %v4269_v17  ;;  %v12144_v25 = vadd.f32 %v15555_v60, %v10690_v2  ;;  %v4021_v58 = vmul.f32 1.442695, %v3524_v31  ;;  %v3533_v47 = vsub.f32 0.0, %v12122_v20  ;;  %v15565_v39 = vld [vmem:[#allocation128_spill] sm:$0xff] }
 0x48a   : > { %15553 = vst [vmem:[#allocation18_spill] sm:$0xff] %v12137_v34  ;;  %15554 = vst [vmem:[#allocation280_spill] sm:$0xff] %v12139_v29  ;;  %v8088_v4 = vpop.eup %8087  ;;  %8107 = vpow2.f32 %v4005_v49  ;;  %v12149_v55 = vadd.f32 %v15557_v42, %v12125_v8  ;;  %7027 = vmatmul.mubr.msk.bf16.gmra.mrb[212].mxu0 %vm1131_vm0, %v15559_v3  ;;  %7044 = vmatmul.mubr.msk.bf16.gmra.mrb[244].mxu1 %vm1131_vm0, %v15559_v3  ;;  %v4275_v2 = vadd.f32 1.0, %v8084_v13  ;;  %v4025_v17 = vmul.f32 1.442695, %v3526_v5 }
 0x48b   : > { %15556 = vst [vmem:[#allocation19_spill] sm:$0xff] %v12144_v25  ;;  %v12155_v50 = vpop.eup %8089  ;;  %8109 = vrcp.f32 %v4268_v40  ;;  %v12158_v49 = vrot.slane %v12073_v1, %v2181_v37  ;;  %5626 = vmatprep.mubr.bf16.mxu0 %v15432_v61  ;;  %5819 = vmatprep.mubr.bf16.mxu1 %v15432_v61  ;;  %v3532_v60 = vsub.f32 0.0, %v12133_v59  ;;  %v12163_v42 = vmul.f32 1.442695, %v3287_v12 }
 0x48c   : > { %15558 = vst [vmem:[#allocation281_spill] sm:$0xff] %v12149_v55  ;;  %15560 = vst [vmem:[#allocation29_spill] sm:$0xff] %v12155_v50  ;;  %v8092_v31 = vpop.eup %8091  ;;  %8111 = vrcp.f32 %v4270_v26  ;;  %v3289_v3 = vsub.f32 0.0, %v12137_v34  ;;  %v4277_v40 = vadd.f32 1.0, %v8088_v4  ;;  %v4035_v13 = vmul.f32 1.442695, %v3531_v23 }
 0x48d   : > { %v12166_v33 = vpop.eup %8093  ;;  %8113 = vpow2.f32 %v4009_v18  ;;  %v3534_v1 = vsub.f32 0.0, %v12144_v25  ;;  %v4039_v37 = vmul.f32 1.442695, %v3533_v47  ;;  %v3288_v20 = vsub.f32 0.0, %v12149_v55  ;;  %v15563_v26 = vld [vmem:[#allocation130_spill] sm:$0xff]  ;;  %v15567_v18 = vld [vmem:[#allocation131_spill] sm:$0xff] }
 0x48e   : > { %15561 = vst [vmem:[#allocation282_spill] sm:$0xff] %v12166_v33  ;;  %v12169_v5 = vpop.eup %8095  ;;  %8115 = vpow2.f32 %v4019_v51  ;;  %v12174_v59 = vadd.f32 %v15563_v26, %v12076_v15  ;;  %v4276_v34 = vadd.f32 1.0, %v8092_v31  ;;  %v12178_v4 = vadd.f32 %v15565_v39, %v12158_v49  ;;  %v15570_v26 = vld [vmem:[#allocation132_spill] sm:$0xff]  ;;  %v15572_v39 = vld [vmem:[#allocation133_spill] sm:$0xff] }
 0x48f   : > { %15562 = vst [vmem:[#allocation324_spill] sm:$0xff] %v12169_v5  ;;  %v8098_v12 = vpop.eup %8097  ;;  %8117 = vrcp.f32 %v4275_v2  ;;  %v12182_v23 = vadd.f32 %v15567_v18, %v12110_v44  ;;  %v4037_v51 = vmul.f32 1.442695, %v3532_v60  ;;  %v12186_v47 = vmul.f32 1.442695, %v3289_v3  ;;  %v15574_v18 = vld [vmem:[#allocation134_spill] sm:$0xff] }
 0x490   : > { %15564 = vst [vmem:[#allocation95_spill] sm:$0xff] %v12174_v59  ;;  %15566 = vst [vmem:[#allocation96_spill] sm:$0xff] %v12178_v4  ;;  %v12184_v25 = vpop.eup %8099  ;;  %8119 = vpow2.f32 %v4023_v43  ;;  %v12190_v55 = vadd.f32 %v15570_v26, %v12125_v8  ;;  %v4041_v31 = vmul.f32 1.442695, %v3534_v1  ;;  %v12194_v32 = vadd.f32 %v15572_v39, %v12158_v49  ;;  %v15576_v3 = vld [vmem:[#allocation135_spill] sm:$0xff] }
 0x491   : > { %15568 = vst [vmem:[#allocation30_spill] sm:$0xff] %v12182_v23  ;;  %15569 = vst [vmem:[#allocation283_spill] sm:$0xff] %v12184_v25  ;;  %v8102_v2 = vpop.eup %8101  ;;  %8121 = vrcp.f32 %v4277_v40  ;;  %v12198_v53 = vadd.f32 %v15574_v18, %v12076_v15  ;;  %v4278_v43 = vadd.f32 1.0, %v8098_v12  ;;  %v3295_v60 = vsub.f32 0.0, %v12174_v59 }
 0x492   : > { %15571 = vst [vmem:[#allocation31_spill] sm:$0xff] %v12190_v55  ;;  %15573 = vst [vmem:[#allocation290_spill] sm:$0xff] %v12194_v32  ;;  %v8104_v7 = vpop.eup %8103  ;;  %8123 = vpow2.f32 %v4021_v58  ;;  %v12203_v26 = vadd.f32 %v15576_v3, %v12110_v44  ;;  %7028 = vmatmul.mubr.msk.bf16.gmra.mrb[216].mxu0 %vm1131_vm0, %v15578_v6  ;;  %7045 = vmatmul.mubr.msk.bf16.gmra.mrb[248].mxu1 %vm1131_vm0, %v15578_v6  ;;  %v12211_v1 = vmul.f32 1.442695, %v3288_v20  ;;  %v3290_v12 = vsub.f32 0.0, %v12178_v4  ;;  %v15580_v6 = vld [vmem:[#allocation136_spill] sm:$0xff] }
 0x493   : > { %15575 = vst [vmem:[#allocation32_spill] sm:$0xff] %v12198_v53  ;;  %v12209_v40 = vpop.eup %8105  ;;  %8125 = vrcp.f32 %v4276_v34  ;;  %v3297_v58 = vsub.f32 0.0, %v12182_v23  ;;  %5636 = vmatprep.mubr.bf16.mxu0 %v15432_v61  ;;  %5829 = vmatprep.mubr.bf16.mxu1 %v15432_v61  ;;  %v4283_v18 = vadd.f32 1.0, %v8102_v2  ;;  %v3296_v3 = vsub.f32 0.0, %v12190_v55  ;;  %v15584_v2 = vld [vmem:[#allocation137_spill] sm:$0xff] }
 0x494   : > { %15577 = vst [vmem:[#allocation294_spill] sm:$0xff] %v12203_v26  ;;  %15579 = vst [vmem:[#allocation33_spill] sm:$0xff] %v12209_v40  ;;  %v8108_v39 = vpop.eup %8107  ;;  %8127 = vpow2.f32 %v4025_v17  ;;  %v12220_v59 = vadd.f32 %v15580_v6, %v12125_v8  ;;  %v4285_v20 = vadd.f32 1.0, %v8104_v7  ;;  %v3298_v4 = vsub.f32 0.0, %v12194_v32 }
 0x495   : > { %v12222_v34 = vpop.eup %8109  ;;  %8129 = vpow2.f32 %v4035_v13  ;;  %v3303_v23 = vsub.f32 0.0, %v12198_v53  ;;  %v12228_v48 = vmul.f32 1.442695, %v3295_v60  ;;  %v3305_v17 = vsub.f32 0.0, %v12203_v26  ;;  %v15588_v26 = vld [vmem:[#allocation139_spill] sm:$0xff] }
 0x496   : > { %15581 = vst [vmem:[#allocation295_spill] sm:$0xff] %v12220_v59  ;;  %15582 = vst [vmem:[#allocation34_spill] sm:$0xff] %v12222_v34  ;;  %v12226_v54 = vpop.eup %8111  ;;  %8131 = vrcp.f32 %v4278_v43  ;;  %v12233_v55 = vadd.f32 %v15584_v2, %v12158_v49  ;;  %v4284_v45 = vadd.f32 1.0, %v8108_v39  ;;  %v12235_v7 = vmul.f32 1.442695, %v3290_v12  ;;  %v15586_v43 = vld [vmem:[#allocation138_spill] sm:$0xff] }
 0x497   : > { %15583 = vst [vmem:[#allocation296_spill] sm:$0xff] %v12226_v54  ;;  %v8114_v6 = vpop.eup %8113  ;;  %8133 = vpow2.f32 %v4039_v37  ;;  %v12237_v13 = vmul.f32 1.442695, %v3297_v58  ;;  %v3304_v53 = vsub.f32 0.0, %v12220_v59  ;;  %v12242_v60 = vadd.f32 %v15586_v43, %v12076_v15 }
 0x498   : > { %15585 = vst [vmem:[#allocation35_spill] sm:$0xff] %v12233_v55  ;;  %v8116_v32 = vpop.eup %8115  ;;  %8135 = vrcp.f32 %v4283_v18  ;;  %v12246_v28 = vadd.f32 %v15588_v26, %v12110_v44  ;;  %v12250_v37 = vmul.f32 1.442695, %v3296_v3  ;;  %v12252_v12 = vmul.f32 1.442695, %v3298_v4 }
 0x499   : > { %15587 = vst [vmem:[#allocation297_spill] sm:$0xff] %v12242_v60  ;;  %v12248_v2 = vpop.eup %8117  ;;  %8137 = vrcp.f32 %v4285_v20  ;;  %v12254_v58 = vmul.f32 1.442695, %v3303_v23  ;;  %v4286_v18 = vadd.f32 1.0, %v8114_v6  ;;  %v12256_v59 = vmul.f32 1.442695, %v3305_v17 }
 0x49a   : > { %15589 = vst [vmem:[#allocation36_spill] sm:$0xff] %v12246_v28  ;;  %15590 = vst [vmem:[#allocation298_spill] sm:$0xff] %v12248_v2  ;;  %v8120_v39 = vpop.eup %8119  ;;  %8139 = vpow2.f32 %v4037_v51  ;;  %v3306_v43 = vsub.f32 0.0, %v12233_v55  ;;  %7029 = vmatmul.mubr.msk.bf16.gmra.mrb[220].mxu0 %vm1131_vm0, %v15591_v41  ;;  %7046 = vmatmul.mubr.msk.bf16.gmra.mrb[252].mxu1 %vm1131_vm0, %v15591_v41  ;;  %v4291_v4 = vadd.f32 1.0, %v8116_v32  ;;  %v15593_v23 = vld [vmem:[#allocation141_spill] sm:$0xff]  ;;  %v15595_v51 = vld [vmem:[#allocation142_spill] sm:$0xff] }
 0x49b   : > { %v12263_v26 = vpop.eup %8121  ;;  %8141 = vrcp.f32 %v4284_v45  ;;  %v12267_v3 = vadd.f32 %v15593_v23, %v12125_v8  ;;  %v12271_v20 = vadd.f32 %v15595_v51, %v12158_v49  ;;  %5646 = vmatprep.mubr.bf16.mxu0 %v15432_v61  ;;  %5839 = vmatprep.mubr.bf16.mxu1 %v15432_v61  ;;  %v12275_v6 = vmul.f32 1.442695, %v3304_v53  ;;  %v15598_v51 = vld [vmem:[#allocation143_spill] sm:$0xff] }
 0x49c   : > { %15592 = vst [vmem:[#allocation37_spill] sm:$0xff] %v12263_v26  ;;  %v8124_v17 = vpop.eup %8123  ;;  %8143 = vpow2.f32 %v4041_v31  ;;  %v3311_v41 = vsub.f32 0.0, %v12242_v60  ;;  %v3313_v32 = vsub.f32 0.0, %v12246_v28  ;;  %v4293_v23 = vadd.f32 1.0, %v8120_v39  ;;  %v15602_v60 = vld [vmem:[#allocation145_spill] sm:$0xff]  ;;  %v15604_v39 = vld [vmem:[#allocation146_spill] sm:$0xff] }
 0x49d   : > { %15594 = vst [vmem:[#allocation299_spill] sm:$0xff] %v12267_v3  ;;  %15596 = vst [vmem:[#allocation97_spill] sm:$0xff] %v12271_v20  ;;  %v12279_v45 = vpop.eup %8125  ;;  %8145 = vpow2.f32 %v12163_v42  ;;  %v12284_v55 = vadd.f32 %v15598_v51, %v12076_v15  ;;  %v12288_v26 = vadd.f32 %v15600_v9, %v12110_v44  ;;  %v12290_v53 = vmul.f32 1.442695, %v3306_v43 }
 0x49e   : > { %15597 = vst [vmem:[#allocation68_spill] sm:$0xff] %v12279_v45  ;;  %v8128_v31 = vpop.eup %8127  ;;  %8147 = vrcp.f32 %v4286_v18  ;;  %v12294_v28 = vadd.f32 %v15602_v60, %v12125_v8  ;;  %v12298_v45 = vadd.f32 %v15604_v39, %v12158_v49  ;;  %v4292_v51 = vadd.f32 1.0, %v8124_v17  ;;  %v15607_v60 = vld [vmem:[#allocation147_spill] sm:$0xff] }
 0x49f   : > { %15599 = vst [vmem:[#allocation38_spill] sm:$0xff] %v12284_v55  ;;  %15601 = vst [vmem:[#allocation300_spill] sm:$0xff] %v12288_v26  ;;  %v8130_v42 = vpop.eup %8129  ;;  %8149 = vrcp.f32 %v4291_v4  ;;  %v3312_v22 = vsub.f32 0.0, %v12267_v3  ;;  %v3314_v9 = vsub.f32 0.0, %v12271_v20  ;;  %v12305_v18 = vmul.f32 1.442695, %v3311_v41 }
 0x4a0   : > { %15603 = vst [vmem:[#allocation39_spill] sm:$0xff] %v12294_v28  ;;  %15605 = vst [vmem:[#allocation303_spill] sm:$0xff] %v12298_v45  ;;  %v12302_v2 = vpop.eup %8131  ;;  %8151 = vpow2.f32 %v12186_v47  ;;  %v12307_v43 = vmul.f32 1.442695, %v3313_v32  ;;  %v12311_v16 = vadd.f32 %v15607_v60, %v12076_v15  ;;  %v4294_v4 = vadd.f32 1.0, %v8128_v31  ;;  %v15610_v32 = vld [vmem:[#allocation129_spill] sm:$0xff] }
 0x4a1   : > { %15606 = vst [vmem:[#allocation40_spill] sm:$0xff] %v12302_v2  ;;  %v8134_v39 = vpop.eup %8133  ;;  %8153 = vrcp.f32 %v4293_v23  ;;  %v3319_v17 = vsub.f32 0.0, %v12284_v55  ;;  %v3321_v3 = vsub.f32 0.0, %v12288_v26  ;;  %v4299_v2 = vadd.f32 1.0, %v8130_v42  ;;  %v15612_v42 = vld [vmem:[#allocation148_spill] sm:$0xff]  ;;  %v15617_v55 = vld [vmem:[#allocation150_spill] sm:$0xff] }
 0x4a2   : > { %15608 = vst [vmem:[#allocation308_spill] sm:$0xff] %v12311_v16  ;;  %v12315_v20 = vpop.eup %8135  ;;  %8155 = vpow2.f32 %v12211_v1  ;;  %v3320_v47 = vsub.f32 0.0, %v12294_v28  ;;  %v3322_v41 = vsub.f32 0.0, %v12298_v45  ;;  %7030 = vmatmul.mubr.msk.bf16.gmra.mrb[224].mxu0 %vm1131_vm0, %v15610_v32  ;;  %7047 = vmatmul.mubr.msk.bf16.gmra.mrb[0].mxu1 %vm1131_vm0, %v15610_v32  ;;  %v12326_v31 = vmul.f32 1.442695, %v3312_v22 }
 0x4a3   : > { %15609 = vst [vmem:[#allocation71_spill] sm:$0xff] %v12315_v20  ;;  %v12324_v23 = vpop.eup %8137  ;;  %8157 = vrcp.f32 %v4292_v51  ;;  %v12328_v60 = vmul.f32 1.442695, %v3314_v9  ;;  %v12332_v1 = vadd.f32 %v15612_v42, %v12110_v44  ;;  %5656 = vmatprep.mubr.bf16.mxu0 %v15432_v61  ;;  %5849 = vmatprep.mubr.bf16.mxu1 %v15432_v61  ;;  %v4301_v28 = vadd.f32 1.0, %v8134_v39  ;;  %v15614_v51 = vld [vmem:[#allocation149_spill] sm:$0xff] }
 0x4a4   : > { %15611 = vst [vmem:[#allocation41_spill] sm:$0xff] %v12324_v23  ;;  %v8140_v45 = vpop.eup %8139  ;;  %8159 = vpow2.f32 %v12235_v7  ;;  %v3327_v32 = vsub.f32 0.0, %v12311_v16  ;;  %v12340_v22 = vadd.f32 %v15614_v51, %v12125_v8  ;;  %v12344_v26 = vmul.f32 1.442695, %v3319_v17  ;;  %v15619_v51 = vld [vmem:[#allocation151_spill] sm:$0xff]  ;;  %v15621_v17 = vld [vmem:[#allocation152_spill] sm:$0xff] }
 0x4a5   : > { %15613 = vst [vmem:[#allocation311_spill] sm:$0xff] %v12332_v1  ;;  %v12342_v9 = vpop.eup %8141  ;;  %8161 = vrcp.f32 %v4294_v4  ;;  %v12346_v42 = vmul.f32 1.442695, %v3321_v3  ;;  %v12350_v23 = vadd.f32 %v15617_v55, %v12158_v49  ;;  %v12352_v7 = vmul.f32 1.442695, %v3320_v47 }
 0x4a6   : > { %15615 = vst [vmem:[#allocation42_spill] sm:$0xff] %v12340_v22  ;;  %15616 = vst [vmem:[#allocation312_spill] sm:$0xff] %v12342_v9  ;;  %v8144_v39 = vpop.eup %8143  ;;  %8163 = vrcp.f32 %v4299_v2  ;;  %v12354_v16 = vmul.f32 1.442695, %v3322_v41  ;;  %v12358_v20 = vadd.f32 %v15619_v51, %v12076_v15  ;;  %v4300_v4 = vadd.f32 1.0, %v8140_v45  ;;  %v15624_v41 = vld [vmem:[#allocation153_spill] sm:$0xff] }
 0x4a7   : > { %15618 = vst [vmem:[#allocation43_spill] sm:$0xff] %v12350_v23  ;;  %v8146_v9 = vpop.eup %8145  ;;  %8165 = vpow2.f32 %v12228_v48  ;;  %v3329_v3 = vsub.f32 0.0, %v12332_v1  ;;  %v12364_v55 = vadd.f32 %v15621_v17, %v12110_v44  ;;  %v12368_v2 = vmul.f32 1.442695, %v3327_v32  ;;  %v15627_v17 = vld [vmem:[#allocation154_spill] sm:$0xff] }
 0x4a8   : > { %15620 = vst [vmem:[#allocation313_spill] sm:$0xff] %v12358_v20  ;;  %v12366_v54 = vpop.eup %8147  ;;  %8167 = vrcp.f32 %v4301_v28  ;;  %v3328_v47 = vsub.f32 0.0, %v12340_v22  ;;  %v12373_v51 = vadd.f32 %v15624_v41, %v12125_v8  ;;  %v4302_v48 = vadd.f32 1.0, %v8144_v39  ;;  %v15629_v41 = vld [vmem:[#allocation156_spill] sm:$0xff] }
 0x4a9   : > { %15622 = vst [vmem:[#allocation44_spill] sm:$0xff] %v12364_v55  ;;  %15623 = vst [vmem:[#allocation314_spill] sm:$0xff] %v12366_v54  ;;  %v12375_v45 = vpop.eup %8149  ;;  %8169 = vpow2.f32 %v12237_v13  ;;  %v3330_v1 = vsub.f32 0.0, %v12350_v23  ;;  %v12381_v57 = vadd.f32 %v15627_v17, %v12158_v49  ;;  %v4055_v32 = vadd.f32 1.0, %v8146_v9 }
 0x4aa   : > { %15625 = vst [vmem:[#allocation45_spill] sm:$0xff] %v12373_v51  ;;  %15626 = vst [vmem:[#allocation315_spill] sm:$0xff] %v12375_v45  ;;  %v8152_v28 = vpop.eup %8151  ;;  %8171 = vpow2.f32 %v12250_v37  ;;  %v3335_v22 = vsub.f32 0.0, %v12358_v20  ;;  %v12387_v54 = vadd.f32 %v15629_v41, %v12076_v15  ;;  %v15631_v45 = vld [vmem:[#allocation140_spill] sm:$0xff]  ;;  %v12395_v39 = vmul.f32 1.442695, %v3329_v3 }
 0x4ab   : > { %15628 = vst [vmem:[#allocation46_spill] sm:$0xff] %v12381_v57  ;;  %7031 = vmatmul.mubr.msk.bf16.gmra.mrb[228].mxu0 %vm1131_vm0, %v15631_v45  ;;  %7048 = vmatmul.mubr.msk.bf16.gmra.mrb[4].mxu1 %vm1131_vm0, %v15631_v45  ;;  %v12393_v13 = vpop.eup %8153  ;;  %8173 = vrcp.f32 %v4300_v4  ;;  %v3337_v9 = vsub.f32 0.0, %v12364_v55  ;;  %v15633_v37 = vld [vmem:[#allocation157_spill] sm:$0xff]  ;;  %v12405_v20 = vmul.f32 1.442695, %v3328_v47  ;;  %v3336_v45 = vsub.f32 0.0, %v12373_v51 }
 0x4ac   : > { %15630 = vst [vmem:[#allocation316_spill] sm:$0xff] %v12387_v54  ;;  %15632 = vst [vmem:[#allocation47_spill] sm:$0xff] %v12393_v13  ;;  %v12400_v17 = vadd.f32 %v15633_v37, %v12110_v44  ;;  %5666 = vmatprep.mubr.bf16.mxu0 %v15432_v61  ;;  %5859 = vmatprep.mubr.bf16.mxu1 %v15432_v61  ;;  %v8156_v41 = vpop.eup %8155  ;;  %8175 = vpow2.f32 %v12252_v12  ;;  %v15635_v4 = vld [vmem:[#allocation158_spill] sm:$0xff]  ;;  %v4057_v37 = vadd.f32 1.0, %v8152_v28  ;;  %v12414_v23 = vmul.f32 1.442695, %v3330_v1 }
 0x4ad   : > { %v12410_v3 = vadd.f32 %v15635_v4, %v12125_v8  ;;  %v12412_v55 = vpop.eup %8157  ;;  %8177 = vrcp.f32 %v4302_v48  ;;  %v15638_v13 = vld [vmem:[#allocation159_spill] sm:$0xff]  ;;  %v12420_v12 = vmul.f32 1.442695, %v3335_v22  ;;  %v3338_v47 = vsub.f32 0.0, %v12381_v57  ;;  %v7389_v4 = vld [vmem:[%s14442_s8 + $0x10] sm:$0xff]   ;;  %v15642_v57 = vld [vmem:[#allocation160_spill] sm:$0xff] }
 0x4ae   : > { %15634 = vst [vmem:[#allocation317_spill] sm:$0xff] %v12400_v17  ;;  %15637 = vst [vmem:[#allocation318_spill] sm:$0xff] %v12412_v55  ;;  %v12418_v34 = vadd.f32 %v15638_v13, %v12158_v49  ;;  %v8160_v46 = vpop.eup %8159  ;;  %8179 = vrcp.f32 %v4055_v32  ;;  %v3343_v51 = vsub.f32 0.0, %v12387_v54  ;;  %v4056_v1 = vadd.f32 1.0, %v8156_v41  ;;  %7254 = vmatprep.subr.bf16.mxu0 %v7389_v4 }
 0x4af   : > { %15636 = vst [vmem:[#allocation48_spill] sm:$0xff] %v12410_v3  ;;  %v12427_v48 = vpop.eup %8161  ;;  %8181 = vpow2.f32 %v12254_v58  ;;  %v12430_v28 = vmul.f32 1.442695, %v3337_v9  ;;  %v3345_v13 = vsub.f32 0.0, %v12400_v17  ;;  %v12436_v22 = vmul.f32 1.442695, %v3336_v45  ;;  %7255 = vmatpush3.bf16.msra.mxu0 %v7389_v4 }
 0x4b0   : > { %15639 = vst [vmem:[#allocation49_spill] sm:$0xff] %v12418_v34  ;;  %15640 = vst [vmem:[#allocation319_spill] sm:$0xff] %v12427_v48  ;;  %v12433_v32 = vpop.eup %8163  ;;  %8183 = vpow2.f32 %v12256_v59  ;;  %v3344_v54 = vsub.f32 0.0, %v12410_v3  ;;  %v12441_v55 = vadd.f32 %v15642_v57, %v12076_v15  ;;  %v4058_v58 = vadd.f32 1.0, %v8160_v46  ;;  %v15644_v17 = vld [vmem:[#allocation161_spill] sm:$0xff]  ;;  %v15647_v57 = vld [vmem:[#allocation162_spill] sm:$0xff] }
 0x4b1   : > { %15641 = vst [vmem:[#allocation50_spill] sm:$0xff] %v12433_v32  ;;  %v8166_v41 = vpop.eup %8165  ;;  %8185 = vrcp.f32 %v4057_v37  ;;  %v3346_v9 = vsub.f32 0.0, %v12418_v34  ;;  %v12446_v48 = vadd.f32 %v15644_v17, %v12110_v44  ;;  %v12451_v45 = vmul.f32 1.442695, %v3338_v47  ;;  %v15649_v46 = vld [vmem:[#allocation155_spill] sm:$0xff] }
 0x4b2   : > { %15643 = vst [vmem:[#allocation320_spill] sm:$0xff] %v12441_v55  ;;  %v12448_v59 = vpop.eup %8167  ;;  %8187 = vpow2.f32 %v12275_v6  ;;  %v12453_v3 = vmul.f32 1.442695, %v3343_v51  ;;  %v12457_v32 = vadd.f32 %v15647_v57, %v12125_v8  ;;  %v12463_v37 = vmul.f32 1.442695, %v3345_v13  ;;  %v15650_v6 = vld [vmem:[#allocation163_spill] sm:$0xff] }
 0x4b3   : > { %15645 = vst [vmem:[#allocation51_spill] sm:$0xff] %v12446_v48  ;;  %15646 = vst [vmem:[#allocation323_spill] sm:$0xff] %v12448_v59  ;;  %7032 = vmatmul.mubr.msk.bf16.gmra.mrb[232].mxu0 %vm1131_vm0, %v15649_v46  ;;  %7049 = vmatmul.mubr.msk.bf16.gmra.mrb[8].mxu1 %vm1131_vm0, %v15649_v46  ;;  %v8170_v17 = vpop.eup %8169  ;;  %8189 = vrcp.f32 %v4056_v1  ;;  %v12467_v47 = vadd.f32 %v15650_v6, %v12158_v49  ;;  %v15652_v51 = vld [vmem:[#allocation164_spill] sm:$0xff]  ;;  %v4063_v34 = vadd.f32 1.0, %v8166_v41  ;;  %v3351_v1 = vsub.f32 0.0, %v12441_v55  ;;  %v15654_v13 = vld [vmem:[#allocation165_spill] sm:$0xff] }
 0x4b4   : > { %15648 = vst [vmem:[#allocation52_spill] sm:$0xff] %v12457_v32  ;;  %v12471_v4 = vadd.f32 %v15652_v51, %v12076_v15  ;;  %5676 = vmatprep.mubr.bf16.mxu0 %v15432_v61  ;;  %5869 = vmatprep.mubr.bf16.mxu1 %v15432_v61  ;;  %v8172_v57 = vpop.eup %8171  ;;  %8191 = vpow2.f32 %v12290_v53  ;;  %v12479_v46 = vadd.f32 %v15654_v13, %v12110_v44  ;;  %v12483_v59 = vmul.f32 1.442695, %v3344_v54  ;;  %v15657_v41 = vld [vmem:[#allocation166_spill] sm:$0xff] }
 0x4b5   : > { %15651 = vst [vmem:[#allocation99_spill] sm:$0xff] %v12467_v47  ;;  %v12481_v6 = vpop.eup %8173  ;;  %8193 = vrcp.f32 %v4058_v58  ;;  %v12485_v51 = vmul.f32 1.442695, %v3346_v9  ;;  %v3353_v40 = vsub.f32 0.0, %v12446_v48  ;;  %v4065_v25 = vadd.f32 1.0, %v8170_v17 }
 0x4b6   : > { %15653 = vst [vmem:[#allocation53_spill] sm:$0xff] %v12471_v4  ;;  %15655 = vst [vmem:[#allocation100_spill] sm:$0xff] %v12479_v46  ;;  %v8176_v36 = vpop.eup %8175  ;;  %8195 = vpow2.f32 %v12305_v18  ;;  %v3352_v53 = vsub.f32 0.0, %v12457_v32  ;;  %v12492_v55 = vadd.f32 %v15657_v41, %v12125_v8  ;;  %v3354_v54 = vsub.f32 0.0, %v12467_v47  ;;  %v15661_v32 = vld [vmem:[#allocation167_spill] sm:$0xff] }
 0x4b7   : > { %15656 = vst [vmem:[#allocation293_spill] sm:$0xff] %v12481_v6  ;;  %v12494_v13 = vpop.eup %8177  ;;  %v4064_v6 = vadd.f32 1.0, %v8172_v57  ;;  %8197 = vpow2.f32 %v12307_v43  ;;  %v3359_v58 = vsub.f32 0.0, %v12471_v4  ;;  %v12501_v17 = vmul.f32 1.442695, %v3351_v1  ;;  %v15663_v57 = vld [vmem:[#allocation168_spill] sm:$0xff] }
 0x4b8   : > { %15658 = vst [vmem:[#allocation54_spill] sm:$0xff] %v12492_v55  ;;  %15659 = vst [vmem:[#allocation55_spill] sm:$0xff] %v12494_v13  ;;  %v12499_v9 = vpop.eup %8179  ;;  %8199 = vrcp.f32 %v4063_v34  ;;  %v3361_v18 = vsub.f32 0.0, %v12479_v46  ;;  %v12506_v41 = vadd.f32 %v15661_v32, %v12158_v49  ;;  %v4066_v13 = vadd.f32 1.0, %v8176_v36  ;;  %v15665_v1 = vld [vmem:[#allocation169_spill] sm:$0xff]  ;;  %v15667_v32 = vld [vmem:[#allocation170_spill] sm:$0xff] }
 0x4b9   : > { %15660 = vst [vmem:[#allocation56_spill] sm:$0xff] %v12499_v9  ;;  %v8182_v48 = vpop.eup %8181  ;;  %8201 = vpow2.f32 %v12326_v31  ;;  %v12509_v43 = vmul.f32 1.442695, %v3353_v40  ;;  %v12513_v4 = vadd.f32 %v15663_v57, %v12076_v15  ;;  %v3360_v34 = vsub.f32 0.0, %v12492_v55  ;;  %v15669_v36 = vld [vmem:[#allocation174_spill] sm:$0xff] }
 0x4ba   : > { %15662 = vst [vmem:[#allocation57_spill] sm:$0xff] %v12506_v41  ;;  %v8184_v47 = vpop.eup %8183  ;;  %8203 = vrcp.f32 %v4065_v25  ;;  %v12518_v46 = vadd.f32 %v15665_v1, %v12110_v44  ;;  %v12522_v9 = vadd.f32 %v15667_v32, %v12125_v8  ;;  %v12530_v25 = vmul.f32 1.442695, %v3352_v53 }
 0x4bb   : > { %15664 = vst [vmem:[#allocation58_spill] sm:$0xff] %v12513_v4  ;;  %7033 = vmatmul.mubr.msk.bf16.gmra.mrb[236].mxu0 %vm1131_vm0, %v15669_v36  ;;  %7050 = vmatmul.mubr.msk.bf16.gmra.mrb[12].mxu1 %vm1131_vm0, %v15669_v36  ;;  %v12528_v40 = vpop.eup %8185  ;;  %8205 = vrcp.f32 %v4064_v6  ;;  %v12532_v31 = vmul.f32 1.442695, %v3354_v54  ;;  %v12534_v57 = vmul.f32 1.442695, %v3359_v58  ;;  %v4071_v32 = vadd.f32 1.0, %v8182_v48 }
 0x4bc   : > { %15666 = vst [vmem:[#allocation59_spill] sm:$0xff] %v12518_v46  ;;  %15668 = vst [vmem:[#allocation60_spill] sm:$0xff] %v12522_v9  ;;  %5686 = vmatprep.mubr.bf16.mxu0 %v15432_v61  ;;  %5879 = vmatprep.mubr.bf16.mxu1 %v15432_v61  ;;  %v8188_v1 = vpop.eup %8187  ;;  %8207 = vpow2.f32 %v12328_v60  ;;  %v12539_v55 = vmul.f32 1.442695, %v3361_v18  ;;  %v3362_v36 = vsub.f32 0.0, %v12506_v41  ;;  %v4073_v6 = vadd.f32 1.0, %v8184_v47 }
 0x4bd   : > { %15670 = vst [vmem:[#allocation61_spill] sm:$0xff] %v12528_v40  ;;  %v12542_v40 = vpop.eup %8189  ;;  %8209 = vrcp.f32 %v4066_v13  ;;  %v3367_v53 = vsub.f32 0.0, %v12513_v4  ;;  %v15672_v54 = vld [vmem:[#allocation171_spill] sm:$0xff]  ;;  %v12550_v48 = vmul.f32 1.442695, %v3360_v34  ;;  %v3369_v60 = vsub.f32 0.0, %v12518_v46 }
 0x4be   : > { %15671 = vst [vmem:[#allocation62_spill] sm:$0xff] %v12542_v40  ;;  %v12547_v58 = vadd.f32 %v15672_v54, %v12158_v49  ;;  %v8192_v19 = vpop.eup %8191  ;;  %8211 = vpow2.f32 %v12344_v26  ;;  %v3368_v18 = vsub.f32 0.0, %v12522_v9  ;;  %v4072_v40 = vadd.f32 1.0, %v8188_v1  ;;  %v15675_v47 = vld [vmem:[#allocation172_spill] sm:$0xff]  ;;  %v15677_v54 = vld [vmem:[#allocation173_spill] sm:$0xff]  ;;  %v15679_v46 = vld [vmem:[#allocation175_spill] sm:$0xff] }
 0x4bf   : > { %v12554_v41 = vpop.eup %8193  ;;  %8213 = vpow2.f32 %v12346_v42  ;;  %v12559_v13 = vadd.f32 %v15675_v47, %v12076_v15  ;;  %v12563_v4 = vadd.f32 %v15677_v54, %v12110_v44  ;;  %v12565_v34 = vmul.f32 1.442695, %v3362_v36  ;;  %v15681_v1 = vld [vmem:[#allocation176_spill] sm:$0xff] }
 0x4c0   : > { %15673 = vst [vmem:[#allocation63_spill] sm:$0xff] %v12547_v58  ;;  %15674 = vst [vmem:[#allocation205_spill] sm:$0xff] %v12554_v41  ;;  %v8196_v26 = vpop.eup %8195  ;;  %8215 = vrcp.f32 %v4071_v32  ;;  %v12569_v9 = vadd.f32 %v15679_v46, %v12125_v8  ;;  %v12573_v41 = vadd.f32 %v15681_v1, %v12158_v49  ;;  %v4074_v47 = vadd.f32 1.0, %v8192_v19  ;;  %v15684_v46 = vld [vmem:[#allocation177_spill] sm:$0xff] }
 0x4c1   : > { %15676 = vst [vmem:[#allocation64_spill] sm:$0xff] %v12559_v13  ;;  %15678 = vst [vmem:[#allocation65_spill] sm:$0xff] %v12563_v4  ;;  %v8198_v42 = vpop.eup %8197  ;;  %8217 = vrcp.f32 %v4073_v6  ;;  %v12575_v5 = vmul.f32 1.442695, %v3367_v53  ;;  %v3370_v54 = vsub.f32 0.0, %v12547_v58  ;;  %v12587_v33 = vadd.f32 %v15684_v46, %v12076_v15  ;;  %v15686_v1 = vld [vmem:[#allocation181_spill] sm:$0xff] }
 0x4c2   : > { %15680 = vst [vmem:[#allocation66_spill] sm:$0xff] %v12569_v9  ;;  %15682 = vst [vmem:[#allocation67_spill] sm:$0xff] %v12573_v41  ;;  %v12578_v35 = vpop.eup %8199  ;;  %8219 = vpow2.f32 %v12352_v7  ;;  %v12581_v32 = vmul.f32 1.442695, %v3369_v60  ;;  %v12583_v36 = vmul.f32 1.442695, %v3368_v18 }
 0x4c3   : > { %15683 = vst [vmem:[#allocation69_spill] sm:$0xff] %v12578_v35  ;;  %15685 = vst [vmem:[#allocation98_spill] sm:$0xff] %v12587_v33  ;;  %7034 = vmatmul.mubr.msk.bf16.gmra.mrb[240].mxu0 %vm1131_vm0, %v15686_v1  ;;  %7051 = vmatmul.mubr.msk.bf16.gmra.mrb[16].mxu1 %vm1131_vm0, %v15686_v1  ;;  %v8202_v19 = vpop.eup %8201  ;;  %8221 = vrcp.f32 %v4072_v40  ;;  %v4079_v6 = vadd.f32 1.0, %v8196_v26  ;;  %v3375_v53 = vsub.f32 0.0, %v12559_v13  ;;  %v3377_v7 = vsub.f32 0.0, %v12563_v4  ;;  %v15689_v26 = vld [vmem:[#allocation178_spill] sm:$0xff] }
 0x4c4   : > { %5696 = vmatprep.mubr.bf16.mxu0 %v15432_v61  ;;  %5889 = vmatprep.mubr.bf16.mxu1 %v15432_v61  ;;  %v12597_v60 = vpop.eup %8203  ;;  %v4081_v18 = vadd.f32 1.0, %v8198_v42  ;;  %8223 = vpow2.f32 %v12354_v16  ;;  %v3376_v46 = vsub.f32 0.0, %v12569_v9  ;;  %v3378_v1 = vsub.f32 0.0, %v12573_v41  ;;  %v15691_v13 = vld [vmem:[#allocation179_spill] sm:$0xff]  ;;  %v15693_v41 = vld [vmem:[#allocation180_spill] sm:$0xff] }
 0x4c5   : > { %15687 = vst [vmem:[#allocation101_spill] sm:$0xff] %v12597_v60  ;;  %v12602_v58 = vpop.eup %8205  ;;  %8225 = vrcp.f32 %v4074_v47  ;;  %v12604_v40 = vmul.f32 1.442695, %v3370_v54  ;;  %v12608_v4 = vadd.f32 %v15689_v26, %v12110_v44  ;;  %v12612_v35 = vadd.f32 %v15691_v13, %v12125_v8  ;;  %v15696_v26 = vld [vmem:[#allocation182_spill] sm:$0xff]  ;;  %v15698_v13 = vld [vmem:[#allocation183_spill] sm:$0xff] }
 0x4c6   : > { %15688 = vst [vmem:[#allocation102_spill] sm:$0xff] %v12602_v58  ;;  %v8208_v42 = vpop.eup %8207  ;;  %v4080_v60 = vadd.f32 1.0, %v8202_v19  ;;  %8227 = vpow2.f32 %v12368_v2  ;;  %v3383_v16 = vsub.f32 0.0, %v12587_v33  ;;  %v12618_v9 = vadd.f32 %v15693_v41, %v12158_v49 }
 0x4c7   : > { %15690 = vst [vmem:[#allocation326_spill] sm:$0xff] %v12608_v4  ;;  %15692 = vst [vmem:[#allocation72_spill] sm:$0xff] %v12612_v35  ;;  %v12620_v47 = vpop.eup %8209  ;;  %8229 = vrcp.f32 %v4079_v6  ;;  %v12622_v54 = vmul.f32 1.442695, %v3375_v53  ;;  %v12626_v58 = vadd.f32 %v15696_v26, %v12076_v15  ;;  %v12630_v19 = vadd.f32 %v15698_v13, %v12110_v44 }
 0x4c8   : > { %15694 = vst [vmem:[#allocation73_spill] sm:$0xff] %v12618_v9  ;;  %15695 = vst [vmem:[#allocation243_spill] sm:$0xff] %v12620_v47  ;;  %v8212_v2 = vpop.eup %8211  ;;  %8231 = vrcp.f32 %v4081_v18  ;;  %v12632_v33 = vmul.f32 1.442695, %v3377_v7  ;;  %v12634_v14 = vmul.f32 1.442695, %v3376_v46 }
 0x4c9   : > { %15697 = vst [vmem:[#allocation74_spill] sm:$0xff] %v12626_v58  ;;  %15699 = vst [vmem:[#allocation75_spill] sm:$0xff] %v12630_v19  ;;  %v12636_v41 = vmul.f32 1.442695, %v3378_v1  ;;  %v8214_v47 = vpop.eup %8213  ;;  %v4082_v6 = vadd.f32 1.0, %v8208_v42  ;;  %8233 = vpow2.f32 %v12395_v39  ;;  %v3385_v53 = vsub.f32 0.0, %v12608_v4 }
 0x4ca   : > { %v3384_v26 = vsub.f32 0.0, %v12612_v35  ;;  %v12641_v50 = vpop.eup %8215  ;;  %8235 = vrcp.f32 %v4080_v60  ;;  %v12643_v13 = vmul.f32 1.442695, %v3383_v16  ;;  %v3386_v7 = vsub.f32 0.0, %v12618_v9  ;;  %v15701_v18 = vld [vmem:[#allocation184_spill] sm:$0xff]  ;;  %v15705_v35 = vld [vmem:[#allocation185_spill] sm:$0xff] }
 0x4cb   : > { %15700 = vst [vmem:[#allocation107_spill] sm:$0xff] %v12641_v50  ;;  %v12648_v46 = vadd.f32 %v15701_v18, %v12125_v8  ;;  %v15703_v1 = vld [vmem:[#allocation192_spill] sm:$0xff]  ;;  %v12654_v39 = vpop.eup %8217  ;;  %v4087_v42 = vadd.f32 1.0, %v8212_v2  ;;  %8237 = vpow2.f32 %v12405_v20  ;;  %v3391_v60 = vsub.f32 0.0, %v12626_v58  ;;  %v15707_v2 = vld [vmem:[#allocation187_spill] sm:$0xff] }
 0x4cc   : > { %7035 = vmatmul.mubr.msk.bf16.gmra.mrb[244].mxu0 %vm1131_vm0, %v15703_v1  ;;  %7052 = vmatmul.mubr.msk.bf16.gmra.mrb[20].mxu1 %vm1131_vm0, %v15703_v1  ;;  %15704 = vst [vmem:[#allocation328_spill] sm:$0xff] %v12654_v39  ;;  %v3393_v16 = vsub.f32 0.0, %v12630_v19  ;;  %v8220_v18 = vpop.eup %8219  ;;  %v4089_v9 = vadd.f32 1.0, %v8214_v47  ;;  %8239 = vpow2.f32 %v12414_v23  ;;  %v12664_v1 = vadd.f32 %v15705_v35, %v12158_v49  ;;  %v15710_v58 = vld [vmem:[#allocation188_spill] sm:$0xff]  ;;  %v15712_v47 = vld [vmem:[#allocation189_spill] sm:$0xff] }
 0x4cd   : > { %15702 = vst [vmem:[#allocation76_spill] sm:$0xff] %v12648_v46  ;;  %5706 = vmatprep.mubr.bf16.mxu0 %v15432_v61  ;;  %5899 = vmatprep.mubr.bf16.mxu1 %v15432_v61  ;;  %v12668_v4 = vadd.f32 %v15707_v2, %v12076_v15  ;;  %v12670_v20 = vpop.eup %8221  ;;  %8241 = vrcp.f32 %v4082_v6  ;;  %v12672_v19 = vmul.f32 1.442695, %v3385_v53  ;;  %v12676_v39 = vadd.f32 %v15710_v58, %v12110_v44 }
 0x4ce   : > { %15706 = vst [vmem:[#allocation109_spill] sm:$0xff] %v12664_v1  ;;  %15709 = vst [vmem:[#allocation77_spill] sm:$0xff] %v12670_v20  ;;  %v12680_v23 = vadd.f32 %v15712_v47, %v12125_v8  ;;  %v8224_v50 = vpop.eup %8223  ;;  %8243 = vpow2.f32 %v12420_v12  ;;  %v12683_v35 = vmul.f32 1.442695, %v3384_v26  ;;  %v3392_v2 = vsub.f32 0.0, %v12648_v46  ;;  %v15714_v20 = vld [vmem:[#allocation190_spill] sm:$0xff] }
 0x4cf   : > { %15708 = vst [vmem:[#allocation329_spill] sm:$0xff] %v12668_v4  ;;  %15711 = vst [vmem:[#allocation248_spill] sm:$0xff] %v12676_v39  ;;  %v12688_v6 = vadd.f32 %v15714_v20, %v12158_v49  ;;  %v12690_v53 = vpop.eup %8225  ;;  %8245 = vrcp.f32 %v4087_v42  ;;  %v4088_v58 = vadd.f32 1.0, %v8220_v18  ;;  %v12692_v63 = vmul.f32 1.442695, %v3386_v7 }
 0x4d0   : > { %15713 = vst [vmem:[#allocation78_spill] sm:$0xff] %v12680_v23  ;;  %15716 = vst [vmem:[#allocation210_spill] sm:$0xff] %v12690_v53  ;;  %v12694_v29 = vmul.f32 1.442695, %v3391_v60  ;;  %v8228_v47 = vpop.eup %8227  ;;  %8247 = vrcp.f32 %v4089_v9  ;;  %v12696_v11 = vmul.f32 1.442695, %v3393_v16 }
 0x4d1   : > { %15715 = vst [vmem:[#allocation79_spill] sm:$0xff] %v12688_v6  ;;  %v3394_v12 = vsub.f32 0.0, %v12664_v1  ;;  %v3399_v26 = vsub.f32 0.0, %v12668_v4  ;;  %v12700_v46 = vpop.eup %8229  ;;  %v4090_v20 = vadd.f32 1.0, %v8224_v50  ;;  %8249 = vpow2.f32 %v12430_v28  ;;  %v15719_v16 = vld [vmem:[#allocation193_spill] sm:$0xff]  ;;  %v15721_v1 = vld [vmem:[#allocation207_spill] sm:$0xff] }
 0x4d2   : > { %15717 = vst [vmem:[#allocation80_spill] sm:$0xff] %v12700_v46  ;;  %v3401_v42 = vsub.f32 0.0, %v12676_v39  ;;  %v3400_v7 = vsub.f32 0.0, %v12680_v23  ;;  %v12705_v18 = vpop.eup %8231  ;;  %8251 = vpow2.f32 %v12436_v22  ;;  %v12708_v9 = vmul.f32 1.442695, %v3392_v2  ;;  %v15722_v23 = vld [vmem:[#allocation194_spill] sm:$0xff] }
 0x4d3   : > { %15718 = vst [vmem:[#allocation215_spill] sm:$0xff] %v12705_v18  ;;  %v3402_v60 = vsub.f32 0.0, %v12688_v6  ;;  %v12713_v4 = vadd.f32 %v15719_v16, %v12076_v15  ;;  %v8234_v50 = vpop.eup %8233  ;;  %8253 = vrcp.f32 %v4088_v58  ;;  %v4095_v28 = vadd.f32 1.0, %v8228_v47  ;;  %v15724_v2 = vld [vmem:[#allocation195_spill] sm:$0xff]  ;;  %v15727_v47 = vld [vmem:[#allocation196_spill] sm:$0xff]  ;;  %v15731_v46 = vld [vmem:[#allocation197_spill] sm:$0xff] }
 0x4d4   : > { %7036 = vmatmul.mubr.msk.bf16.gmra.mrb[248].mxu0 %vm1131_vm0, %v15721_v1  ;;  %7053 = vmatmul.mubr.msk.bf16.gmra.mrb[24].mxu1 %vm1131_vm0, %v15721_v1  ;;  %v12721_v22 = vadd.f32 %v15722_v23, %v12110_v44  ;;  %v12725_v6 = vadd.f32 %v15724_v2, %v12125_v8  ;;  %v12729_v16 = vpop.eup %8235  ;;  %8255 = vpow2.f32 %v12451_v45  ;;  %v12732_v1 = vmul.f32 1.442695, %v3394_v12  ;;  %v7390_v45 = vld [vmem:[%s14442_s8 + $0x18] sm:$0xff]  }
 0x4d5   : > { %15720 = vst [vmem:[#allocation81_spill] sm:$0xff] %v12713_v4  ;;  %5716 = vmatprep.mubr.bf16.mxu0 %v15432_v61  ;;  %5909 = vmatprep.mubr.bf16.mxu1 %v15432_v61  ;;  %15726 = vst [vmem:[#allocation83_spill] sm:$0xff] %v12729_v16  ;;  %v12734_v58 = vmul.f32 1.442695, %v3399_v26  ;;  %v12738_v23 = vadd.f32 %v15727_v47, %v12158_v49  ;;  %v8238_v39 = vpop.eup %8237  ;;  %8257 = vrcp.f32 %v4090_v20  ;;  %v12740_v2 = vmul.f32 1.442695, %v3401_v42 }
 0x4d6   : > { %15723 = vst [vmem:[#allocation217_spill] sm:$0xff] %v12721_v22  ;;  %15725 = vst [vmem:[#allocation82_spill] sm:$0xff] %v12725_v6  ;;  %v12742_v18 = vmul.f32 1.442695, %v3400_v7  ;;  %v12746_v53 = vadd.f32 %v15731_v46, %v12076_v15  ;;  %v8240_v12 = vpop.eup %8239  ;;  %v4097_v26 = vadd.f32 1.0, %v8234_v50  ;;  %8259 = vpow2.f32 %v12453_v3  ;;  %v15733_v20 = vld [vmem:[#allocation198_spill] sm:$0xff]  ;;  %7256 = vmatprep.subr.bf16.mxu0 %v7390_v45 }
 0x4d7   : > { %15728 = vst [vmem:[#allocation84_spill] sm:$0xff] %v12738_v23  ;;  %15729 = vst [vmem:[#allocation85_spill] sm:$0xff] %v12740_v2  ;;  %v3407_v47 = vsub.f32 0.0, %v12713_v4  ;;  %v12755_v42 = vadd.f32 %v15733_v20, %v12110_v44  ;;  %v12757_v7 = vpop.eup %8241  ;;  %8261 = vrcp.f32 %v4095_v28  ;;  %v12759_v16 = vmul.f32 1.442695, %v3402_v60  ;;  %v15736_v4 = vld [vmem:[#allocation199_spill] sm:$0xff]  ;;  %7257 = vmatpush3.bf16.msra.mxu0 %v7390_v45 }
 0x4d8   : > { %15730 = vst [vmem:[#allocation86_spill] sm:$0xff] %v12742_v18  ;;  %15732 = vst [vmem:[#allocation87_spill] sm:$0xff] %v12746_v53  ;;  %v3409_v46 = vsub.f32 0.0, %v12721_v22  ;;  %v3408_v18 = vsub.f32 0.0, %v12725_v6  ;;  %v8244_v2 = vpop.eup %8243  ;;  %v4096_v50 = vadd.f32 1.0, %v8238_v39  ;;  %8263 = vpow2.f32 %v12463_v37  ;;  %v15739_v6 = vld [vmem:[#allocation200_spill] sm:$0xff] }
 0x4d9   : > { %15734 = vst [vmem:[#allocation220_spill] sm:$0xff] %v12755_v42  ;;  %15735 = vst [vmem:[#allocation191_spill] sm:$0xff] %v12757_v7  ;;  %v3410_v3 = vsub.f32 0.0, %v12738_v23  ;;  %v12767_v20 = vadd.f32 %v15736_v4, %v12125_v8  ;;  %v12769_v7 = vpop.eup %8245  ;;  %v4098_v60 = vadd.f32 1.0, %v8240_v12  ;;  %8265 = vpow2.f32 %v12483_v59  ;;  %v15742_v45 = vld [vmem:[#allocation201_spill] sm:$0xff]  ;;  %v15744_v12 = vld [vmem:[#allocation20_spill] sm:$0xff] }
 0x4da   : > { %15738 = vst [vmem:[#allocation104_spill] sm:$0xff] %v12769_v7  ;;  %v3415_v28 = vsub.f32 0.0, %v12746_v53  ;;  %v12775_v22 = vadd.f32 %v15739_v6, %v12158_v49  ;;  %v12777_v39 = vpop.eup %8247  ;;  %8267 = vrcp.f32 %v4097_v26  ;;  %v12779_v37 = vmul.f32 1.442695, %v3407_v47  ;;  %v7391_v59 = vld [vmem:[%s14442_s8 + $0x20] sm:$0xff]  }
 0x4db   : > { %15737 = vst [vmem:[#allocation103_spill] sm:$0xff] %v12767_v20  ;;  %15741 = vst [vmem:[#allocation121_spill] sm:$0xff] %v12777_v39  ;;  %v3417_v4 = vsub.f32 0.0, %v12755_v42  ;;  %v12784_v23 = vadd.f32 %v15742_v45, %v12076_v15  ;;  %v8250_v6 = vpop.eup %8249  ;;  %v4103_v26 = vadd.f32 1.0, %v8244_v2  ;;  %8269 = vpow2.f32 %v12485_v51  ;;  %v15746_v42 = vld [vmem:[#allocation202_spill] sm:$0xff]  ;;  %v15748_v2 = vld [vmem:[#allocation203_spill] sm:$0xff]  ;;  %7258 = vmatprep.subr.bf16.mxu0 %v7391_v59 }
 0x4dc   : > { %15740 = vst [vmem:[#allocation105_spill] sm:$0xff] %v12775_v22  ;;  %7037 = vmatmul.mubr.msk.bf16.gmra.mrb[252].mxu0 %vm1131_vm0, %v15744_v12  ;;  %7054 = vmatmul.mubr.msk.bf16.gmra.mrb[28].mxu1 %vm1131_vm0, %v15744_v12  ;;  %v12794_v47 = vmul.f32 1.442695, %v3409_v46  ;;  %v12798_v45 = vadd.f32 %v15746_v42, %v12110_v44  ;;  %v8252_v53 = vpop.eup %8251  ;;  %8271 = vrcp.f32 %v4096_v50  ;;  %v12802_v12 = vmul.f32 1.442695, %v3408_v18 }
 0x4dd   : > { %15743 = vst [vmem:[#allocation106_spill] sm:$0xff] %v12784_v23  ;;  %5726 = vmatprep.mubr.bf16.mxu0 %v15432_v61  ;;  %5919 = vmatprep.mubr.bf16.mxu1 %v15432_v61  ;;  %v3416_v39 = vsub.f32 0.0, %v12767_v20  ;;  %v12807_v7 = vadd.f32 %v15748_v2, %v12125_v8  ;;  %v12809_v51 = vpop.eup %8253  ;;  %8273 = vrcp.f32 %v4098_v60  ;;  %v12811_v42 = vmul.f32 1.442695, %v3410_v3 }
 0x4de   : > { %15745 = vst [vmem:[#allocation124_spill] sm:$0xff] %v12794_v47  ;;  %15747 = vst [vmem:[#allocation110_spill] sm:$0xff] %v12798_v45  ;;  %v12813_v46 = vmul.f32 1.442695, %v3415_v28  ;;  %v3418_v47 = vsub.f32 0.0, %v12775_v22  ;;  %7259 = vmatpush3.bf16.msra.mxu0 %v7391_v59  ;;  %v8256_v50 = vpop.eup %8255  ;;  %v4105_v18 = vadd.f32 1.0, %v8250_v6  ;;  %8275 = vpow2.f32 %v12501_v17 }
 0x4df   : > { %15749 = vst [vmem:[#allocation111_spill] sm:$0xff] %v12807_v7  ;;  %15750 = vst [vmem:[#allocation112_spill] sm:$0xff] %v12809_v51  ;;  %v12817_v20 = vmul.f32 1.442695, %v3417_v4  ;;  %v3423_v2 = vsub.f32 0.0, %v12784_v23  ;;  %v7392_v51 = vld [vmem:[%s14442_s8 + $0x28] sm:$0xff]   ;;  %v12823_v60 = vpop.eup %8257  ;;  %8277 = vrcp.f32 %v4103_v26 }
 0x4e0   : > { %15752 = vst [vmem:[#allocation186_spill] sm:$0xff] %v12823_v60  ;;  %v4104_v3 = vadd.f32 1.0, %v8252_v53  ;;  %v3425_v28 = vsub.f32 0.0, %v12798_v45  ;;  %v15753_v59 = vld [vmem:[#allocation204_spill] sm:$0xff]  ;;  %v8260_v6 = vpop.eup %8259  ;;  %8279 = vpow2.f32 %v12509_v43  ;;  %v12831_v17 = vmul.f32 1.442695, %v3416_v39  ;;  %7260 = vmatprep.subr.bf16.mxu0 %v7392_v51 }
 0x4e1   : > { %15751 = vst [vmem:[#allocation113_spill] sm:$0xff] %v12817_v20  ;;  %v12828_v22 = vadd.f32 %v15753_v59, %v12158_v49  ;;  %v3424_v4 = vsub.f32 0.0, %v12807_v7  ;;  %v15756_v23 = vld [vmem:[#allocation208_spill] sm:$0xff]  ;;  %v12838_v26 = vpop.eup %8261  ;;  %v4106_v53 = vadd.f32 1.0, %v8256_v50  ;;  %8281 = vpow2.f32 %v12530_v25  ;;  %v15759_v59 = vld [vmem:[#allocation209_spill] sm:$0xff]  ;;  %v15761_v43 = vld [vmem:[#allocation211_spill] sm:$0xff] }
 0x4e2   : > { %15755 = vst [vmem:[#allocation115_spill] sm:$0xff] %v12831_v17  ;;  %v12836_v20 = vadd.f32 %v15756_v23, %v12076_v15  ;;  %15758 = vst [vmem:[#allocation117_spill] sm:$0xff] %v12838_v26  ;;  %v12843_v45 = vadd.f32 %v15759_v59, %v12110_v44  ;;  %v12847_v39 = vadd.f32 %v15761_v43, %v12125_v8  ;;  %7261 = vmatpush3.bf16.msra.mxu0 %v7392_v51  ;;  %v8264_v7 = vpop.eup %8263  ;;  %v15764_v23 = vld [vmem:[#allocation212_spill] sm:$0xff]  ;;  %v15766_v50 = vld [vmem:[#allocation214_spill] sm:$0xff] }
 0x4e3   : > { %15754 = vst [vmem:[#allocation114_spill] sm:$0xff] %v12828_v22  ;;  %8283 = vrcp.f32 %v4105_v18  ;;  %v12849_v60 = vmul.f32 1.442695, %v3418_v47  ;;  %v12853_v17 = vadd.f32 %v15764_v23, %v12158_v49  ;;  %v12857_v25 = vadd.f32 %v15766_v50, %v12076_v15  ;;  %v15768_v26 = vld [vmem:[#allocation22_spill] sm:$0xff]  ;;  %v7393_v51 = vld [vmem:[%s14442_s8 + $0x30] sm:$0xff]   ;;  %v8266_v47 = vpop.eup %8265 }
 0x4e4   : > { %15757 = vst [vmem:[#allocation116_spill] sm:$0xff] %v12836_v20  ;;  %15760 = vst [vmem:[#allocation70_spill] sm:$0xff] %v12843_v45  ;;  %7038 = vmatmul.mubr.msk.bf16.gmra.mrb[0].mxu0 %vm1131_vm0, %v15768_v26  ;;  %7055 = vmatmul.mubr.msk.bf16.gmra.mrb[32].mxu1 %vm1131_vm0, %v15768_v26  ;;  %8285 = vrcp.f32 %v4104_v3  ;;  %v12866_v18 = vmul.f32 1.442695, %v3423_v2  ;;  %v12868_v59 = vmul.f32 1.442695, %v3425_v28  ;;  %v12873_v23 = vpop.eup %8267 }
 0x4e5   : > { %15762 = vst [vmem:[#allocation125_spill] sm:$0xff] %v12847_v39  ;;  %15763 = vst [vmem:[#allocation119_spill] sm:$0xff] %v12849_v60  ;;  %v3426_v43 = vsub.f32 0.0, %v12828_v22  ;;  %5736 = vmatprep.mubr.bf16.mxu0 %v15432_v61  ;;  %5929 = vmatprep.mubr.bf16.mxu1 %v15432_v61  ;;  %v4111_v50 = vadd.f32 1.0, %v8260_v6  ;;  %8287 = vpow2.f32 %v12532_v31  ;;  %v12876_v26 = vmul.f32 1.442695, %v3424_v4  ;;  %v8270_v2 = vpop.eup %8269 }
 0x4e6   : > { %15765 = vst [vmem:[#allocation120_spill] sm:$0xff] %v12853_v17  ;;  %15767 = vst [vmem:[#allocation122_spill] sm:$0xff] %v12857_v25  ;;  %v3431_v60 = vsub.f32 0.0, %v12836_v20  ;;  %7262 = vmatprep.subr.bf16.mxu0 %v7393_v51  ;;  %8289 = vrcp.f32 %v4106_v53  ;;  %v4113_v3 = vadd.f32 1.0, %v8264_v7  ;;  %v3433_v28 = vsub.f32 0.0, %v12843_v45  ;;  %v7394_v4 = vld [vmem:[%s14442_s8 + $0x38] sm:$0xff]  }
 0x4e7   : > { %15769 = vst [vmem:[#allocation126_spill] sm:$0xff] %v12866_v18  ;;  %15770 = vst [vmem:[#allocation123_spill] sm:$0xff] %v12868_v59  ;;  %v3432_v22 = vsub.f32 0.0, %v12847_v39  ;;  %7263 = vmatpush3.bf16.msra.mxu0 %v7393_v51  ;;  %v12881_v59 = vpop.eup %8271  ;;  %v4112_v18 = vadd.f32 1.0, %v8266_v47  ;;  %8291 = vpow2.f32 %v12534_v57  ;;  %v3434_v31 = vsub.f32 0.0, %v12853_v17  ;;  %v15774_v51 = vld [vmem:[#allocation216_spill] sm:$0xff] }
 0x4e8   : > { %15771 = vst [vmem:[#allocation127_spill] sm:$0xff] %v12873_v23  ;;  %15772 = vst [vmem:[#allocation92_spill] sm:$0xff] %v12881_v59  ;;  %v3439_v6 = vsub.f32 0.0, %v12857_v25  ;;  %v12889_v53 = vpop.eup %8273  ;;  %8293 = vpow2.f32 %v12539_v55  ;;  %v12892_v7 = vmul.f32 1.442695, %v3426_v43  ;;  %v12896_v39 = vadd.f32 %v15774_v51, %v12110_v44  ;;  %v15776_v57 = vld [vmem:[#allocation219_spill] sm:$0xff]  ;;  %7264 = vmatprep.subr.bf16.mxu0 %v7394_v4 }
 0x4e9   : > { %15773 = vst [vmem:[#allocation130_spill] sm:$0xff] %v12889_v53  ;;  %v12900_v47 = vadd.f32 %v15776_v57, %v12125_v8  ;;  %v8276_v17 = vpop.eup %8275  ;;  %8295 = vrcp.f32 %v4111_v50  ;;  %v4114_v25 = vadd.f32 1.0, %v8270_v2  ;;  %v15778_v45 = vld [vmem:[#allocation7_spill] sm:$0xff]  ;;  %v15780_v53 = vld [vmem:[#allocation221_spill] sm:$0xff]  ;;  %v12912_v51 = vmul.f32 1.442695, %v3431_v60 }
 0x4ea   : > { %15775 = vst [vmem:[#allocation128_spill] sm:$0xff] %v12896_v39  ;;  %v12904_v20 = vadd.f32 %v15778_v45, %v12158_v49  ;;  %v12908_v55 = vadd.f32 %v15780_v53, %v12076_v15  ;;  %v12910_v43 = vpop.eup %8277  ;;  %8297 = vrcp.f32 %v4113_v3  ;;  %v12914_v59 = vmul.f32 1.442695, %v3433_v28  ;;  %v15782_v57 = vld [vmem:[#allocation222_spill] sm:$0xff] }
 0x4eb   : > { %15777 = vst [vmem:[#allocation131_spill] sm:$0xff] %v12900_v47  ;;  %v12918_v50 = vadd.f32 %v15782_v57, %v12110_v44  ;;  %7265 = vmatpush3.bf16.msra.mxu0 %v7394_v4  ;;  %v8280_v2 = vpop.eup %8279  ;;  %8299 = vrcp.f32 %v4112_v18  ;;  %v12920_v45 = vmul.f32 1.442695, %v3432_v22  ;;  %v12922_v23 = vmul.f32 1.442695, %v3434_v31  ;;  %v15787_v18 = vld [vmem:[#allocation223_spill] sm:$0xff] }
 0x4ec   : > { %15779 = vst [vmem:[#allocation132_spill] sm:$0xff] %v12904_v20  ;;  %15781 = vst [vmem:[#allocation133_spill] sm:$0xff] %v12908_v55  ;;  %v12924_v53 = vmul.f32 1.442695, %v3439_v6  ;;  %7039 = vmatmul.mubr.msk.bf16.gmra.mrb[4].mxu0 %vm1131_vm0, %v11846_v21  ;;  %7056 = vmatmul.mubr.msk.bf16.gmra.mrb[36].mxu1 %vm1131_vm0, %v11846_v21  ;;  %v8282_v60 = vpop.eup %8281  ;;  %v4119_v3 = vadd.f32 1.0, %v8276_v17  ;;  %8301 = vpow2.f32 %v12550_v48  ;;  %v3441_v28 = vsub.f32 0.0, %v12896_v39 }
 0x4ed   : > { %15783 = vst [vmem:[#allocation134_spill] sm:$0xff] %v12918_v50  ;;  %15784 = vst [vmem:[#allocation135_spill] sm:$0xff] %v12920_v45  ;;  %v12934_v22 = vadd.f32 %v15787_v18, %v12125_v8  ;;  %5746 = vmatprep.mubr.bf16.mxu0 %v15432_v61  ;;  %5939 = vmatprep.mubr.bf16.mxu1 %v15432_v61  ;;  %v12938_v31 = vpop.eup %8283  ;;  %8303 = vrcp.f32 %v4114_v25  ;;  %v3440_v6 = vsub.f32 0.0, %v12900_v47  ;;  %v3442_v21 = vsub.f32 0.0, %v12904_v20  ;;  %v15790_v18 = vld [vmem:[#allocation224_spill] sm:$0xff]  ;;  %v15792_v25 = vld [vmem:[#allocation225_spill] sm:$0xff] }
 0x4ee   : > { %15785 = vst [vmem:[#allocation108_spill] sm:$0xff] %v12922_v23  ;;  %15786 = vst [vmem:[#allocation136_spill] sm:$0xff] %v12924_v53  ;;  %v3447_v17 = vsub.f32 0.0, %v12908_v55  ;;  %v12943_v48 = vpop.eup %8285  ;;  %v4121_v4 = vadd.f32 1.0, %v8280_v2  ;;  %8305 = vpow2.f32 %v12565_v34  ;;  %v3449_v57 = vsub.f32 0.0, %v12918_v50  ;;  %v15794_v55 = vld [vmem:[#allocation226_spill] sm:$0xff] }
 0x4ef   : > { %15788 = vst [vmem:[#allocation137_spill] sm:$0xff] %v12934_v22  ;;  %15789 = vst [vmem:[#allocation138_spill] sm:$0xff] %v12943_v48  ;;  %v12949_v39 = vadd.f32 %v15790_v18, %v12158_v49  ;;  %v8288_v53 = vpop.eup %8287  ;;  %v4120_v23 = vadd.f32 1.0, %v8282_v60  ;;  %8307 = vpow2.f32 %v12575_v5  ;;  %v12954_v20 = vadd.f32 %v15792_v25, %v12076_v15  ;;  %v15798_v50 = vld [vmem:[#allocation227_spill] sm:$0xff] }
 0x4f0   : > { %v12958_v47 = vadd.f32 %v15794_v55, %v12110_v44  ;;  %v12960_v2 = vpop.eup %8289  ;;  %8309 = vrcp.f32 %v4119_v3  ;;  %v12962_v34 = vmul.f32 1.442695, %v3441_v28  ;;  %v3448_v18 = vsub.f32 0.0, %v12934_v22  ;;  %v15802_v55 = vld [vmem:[#allocation228_spill] sm:$0xff] }
 0x4f1   : > { %15791 = vst [vmem:[#allocation139_spill] sm:$0xff] %v12949_v39  ;;  %15793 = vst [vmem:[#allocation118_spill] sm:$0xff] %v12954_v20  ;;  %v12967_v60 = vadd.f32 %v15798_v50, %v12125_v8  ;;  %v8292_v5 = vpop.eup %8291  ;;  %8311 = vpow2.f32 %v12581_v32  ;;  %v12970_v25 = vmul.f32 1.442695, %v3440_v6  ;;  %v12972_v45 = vmul.f32 1.442695, %v3442_v21 }
 0x4f2   : > { %15795 = vst [vmem:[#allocation141_spill] sm:$0xff] %v12958_v47  ;;  %15796 = vst [vmem:[#allocation142_spill] sm:$0xff] %v12960_v2  ;;  %v12976_v48 = vadd.f32 %v15802_v55, %v12158_v49  ;;  %v8294_v3 = vpop.eup %8293  ;;  %8313 = vrcp.f32 %v4121_v4  ;;  %v4122_v28 = vadd.f32 1.0, %v8288_v53  ;;  %v3450_v22 = vsub.f32 0.0, %v12949_v39  ;;  %v15807_v55 = vld [vmem:[#allocation229_spill] sm:$0xff]  ;;  %v15819_v39 = vld [vmem:[#allocation234_spill] sm:$0xff] }
 0x4f3   : > { %15797 = vst [vmem:[#allocation143_spill] sm:$0xff] %v12962_v34  ;;  %15799 = vst [vmem:[#allocation144_spill] sm:$0xff] %v12967_v60  ;;  %v12978_v34 = vmul.f32 1.442695, %v3447_v17  ;;  %v12981_v50 = vpop.eup %8295  ;;  %8315 = vrcp.f32 %v4120_v23  ;;  %v12983_v2 = vmul.f32 1.442695, %v3449_v57 }
 0x4f4   : > { %15800 = vst [vmem:[#allocation145_spill] sm:$0xff] %v12970_v25  ;;  %15801 = vst [vmem:[#allocation146_spill] sm:$0xff] %v12972_v45  ;;  %v3455_v32 = vsub.f32 0.0, %v12954_v20  ;;  %v3457_v6 = vsub.f32 0.0, %v12958_v47  ;;  %7040 = vmatmul.mubr.msk.bf16.gmra.mrb[8].mxu0 %vm1131_vm0, %v11957_v24  ;;  %7057 = vmatmul.mubr.msk.bf16.gmra.mrb[40].mxu1 %vm1131_vm0, %v11957_v24  ;;  %v12991_v53 = vpop.eup %8297  ;;  %v4127_v21 = vadd.f32 1.0, %v8292_v5  ;;  %8317 = vpow2.f32 %v12583_v36  ;;  %v15870_v25 = vld [vmem:[#allocation68_spill] sm:$0xff] }
 0x4f5   : > { %15803 = vst [vmem:[#allocation147_spill] sm:$0xff] %v12976_v48  ;;  %15804 = vst [vmem:[#allocation129_spill] sm:$0xff] %v12978_v34  ;;  %v12994_v17 = vmul.f32 1.442695, %v3448_v18  ;;  %v3456_v23 = vsub.f32 0.0, %v12967_v60  ;;  %5756 = vmatprep.mubr.bf16.mxu0 %v15432_v61  ;;  %5949 = vmatprep.mubr.bf16.mxu1 %v15432_v61  ;;  %v12999_v4 = vpop.eup %8299  ;;  %v4129_v57 = vadd.f32 1.0, %v8294_v3  ;;  %8319 = vpow2.f32 %v12604_v40 }
 0x4f6   : > { %15805 = vst [vmem:[#allocation148_spill] sm:$0xff] %v12983_v2  ;;  %v3458_v24 = vsub.f32 0.0, %v12976_v48  ;;  %v13005_v5 = vadd.f32 %v15807_v55, %v12076_v15  ;;  %v8302_v36 = vpop.eup %8301  ;;  %8321 = vrcp.f32 %v4122_v28  ;;  %v13007_v18 = vmul.f32 1.442695, %v3450_v22  ;;  %v15810_v60 = vld [vmem:[#allocation230_spill] sm:$0xff]  ;;  %v15812_v61 = vld [vmem:[#allocation231_spill] sm:$0xff] }
 0x4f7   : > { %15806 = vst [vmem:[#allocation149_spill] sm:$0xff] %v12994_v17  ;;  %v13011_v47 = vadd.f32 %v15810_v60, %v12110_v44  ;;  %v13015_v20 = vadd.f32 %v15812_v61, %v12125_v8  ;;  %v13017_v3 = vpop.eup %8303  ;;  %8323 = vpow2.f32 %v12622_v54  ;;  %v13020_v40 = vmul.f32 1.442695, %v3455_v32  ;;  %v15816_v28 = vld [vmem:[#allocation232_spill] sm:$0xff] }
 0x4f8   : > { %15808 = vst [vmem:[#allocation150_spill] sm:$0xff] %v13005_v5  ;;  %15809 = vst [vmem:[#allocation151_spill] sm:$0xff] %v13007_v18  ;;  %v13022_v55 = vmul.f32 1.442695, %v3457_v6  ;;  %v13026_v22 = vadd.f32 %v15816_v28, %v12158_v49  ;;  %v8306_v48 = vpop.eup %8305  ;;  %8325 = vrcp.f32 %v4127_v21  ;;  %v13028_v60 = vmul.f32 1.442695, %v3456_v23 }
 0x4f9   : > { %15811 = vst [vmem:[#allocation152_spill] sm:$0xff] %v13011_v47  ;;  %15813 = vst [vmem:[#allocation153_spill] sm:$0xff] %v13015_v20  ;;  %v13032_v61 = vadd.f32 %v15819_v39, %v12076_v15  ;;  %v15821_v18 = vld [vmem:[#allocation235_spill] sm:$0xff]  ;;  %v8308_v54 = vpop.eup %8307  ;;  %8327 = vrcp.f32 %v4129_v57  ;;  %v4128_v32 = vadd.f32 1.0, %v8302_v36  ;;  %v13038_v6 = vmul.f32 1.442695, %v3458_v24 }
 0x4fa   : > { %15814 = vst [vmem:[#allocation154_spill] sm:$0xff] %v13020_v40  ;;  %15815 = vst [vmem:[#allocation156_spill] sm:$0xff] %v13022_v55  ;;  %v13036_v17 = vadd.f32 %v15821_v18, %v12110_v44  ;;  %v3463_v28 = vsub.f32 0.0, %v13005_v5  ;;  %v13041_v55 = vpop.eup %8309  ;;  %8329 = vpow2.f32 %v12632_v33  ;;  %v3465_v21 = vsub.f32 0.0, %v13011_v47  ;;  %v15824_v23 = vld [vmem:[#allocation237_spill] sm:$0xff]  ;;  %v15826_v24 = vld [vmem:[#allocation239_spill] sm:$0xff] }
 0x4fb   : > { %15817 = vst [vmem:[#allocation140_spill] sm:$0xff] %v13026_v22  ;;  %15818 = vst [vmem:[#allocation157_spill] sm:$0xff] %v13028_v60  ;;  %v3464_v39 = vsub.f32 0.0, %v13015_v20  ;;  %v13048_v60 = vadd.f32 %v15824_v23, %v12125_v8  ;;  %v8312_v18 = vpop.eup %8311  ;;  %v4130_v40 = vadd.f32 1.0, %v8306_v48  ;;  %8331 = vpow2.f32 %v12634_v14  ;;  %v15828_v23 = vld [vmem:[#allocation322_spill] sm:$0xff]  ;;  %v15830_v5 = vld [vmem:[#allocation88_spill] sm:$0xff] }
 0x4fc   : > { %15820 = vst [vmem:[#allocation158_spill] sm:$0xff] %v13032_v61  ;;  %15822 = vst [vmem:[#allocation159_spill] sm:$0xff] %v13036_v17  ;;  %v3466_v57 = vsub.f32 0.0, %v13026_v22  ;;  %v13054_v36 = vadd.f32 %v15826_v24, %v12158_v49  ;;  %7041 = vmatmul.mubr.msk.bf16.gmra.mrb[12].mxu0 %vm1131_vm0, %v12023_v10  ;;  %7058 = vmatmul.mubr.msk.bf16.gmra.mrb[44].mxu1 %vm1131_vm0, %v12023_v10  ;;  %v13060_v33 = vpop.eup %8313  ;;  %8333 = vpow2.f32 %v12636_v41  ;;  %v3471_v48 = vsub.f32 0.0, %v13032_v61  ;;  %v15866_v34 = vld [vmem:[#allocation268_spill] sm:$0xff] }
 0x4fd   : > { %15823 = vst [vmem:[#allocation160_spill] sm:$0xff] %v13038_v6  ;;  %15825 = vst [vmem:[#allocation161_spill] sm:$0xff] %v13048_v60  ;;  %v3473_v14 = vsub.f32 0.0, %v13036_v17  ;;  %v13067_v22 = vmul.f32 %v12025_v56, %v15828_v23  ;;  %v13069_v24 = vpop.eup %8315  ;;  %8335 = vrcp.f32 %v4128_v32  ;;  %v4135_v20 = vadd.f32 1.0, %v8308_v54 }
 0x4fe   : > { %15827 = vst [vmem:[#allocation162_spill] sm:$0xff] %v13054_v36  ;;  %v13071_v47 = vmul.f32 1.442695, %v3463_v28  ;;  %v13075_v10 = vmul.f32 %v12051_v30, %v15830_v5  ;;  %v8318_v6 = vpop.eup %8317  ;;  %8337 = vpow2.f32 %v12643_v13  ;;  %v13078_v41 = vmul.f32 1.442695, %v3465_v21  ;;  %v15836_v5 = vld [vmem:[#allocation89_spill] sm:$0xff] }
 0x4ff   : > { %v13080_v17 = vmul.f32 1.442695, %v3464_v39  ;;  %v3472_v56 = vsub.f32 0.0, %v13048_v60  ;;  %v8320_v23 = vpop.eup %8319  ;;  %8339 = vrcp.f32 %v4130_v40  ;;  %v4137_v61 = vadd.f32 1.0, %v8312_v18  ;;  %v15837_v18 = vld [vmem:[#allocation90_spill] sm:$0xff] }
 0x500   : > { %15829 = vst [vmem:[#allocation155_spill] sm:$0xff] %v13071_v47  ;;  %15831 = vst [vmem:[#allocation163_spill] sm:$0xff] %v13078_v41  ;;  %v13083_v32 = vmul.f32 1.442695, %v3466_v57  ;;  %v3474_v54 = vsub.f32 0.0, %v13054_v36  ;;  %v13086_v28 = vpop.eup %8321  ;;  %8341 = vpow2.f32 %v12672_v19  ;;  %v13095_v21 = vmul.f32 %v12062_v0, %v15836_v5  ;;  %v15838_v36 = vld [vmem:[#allocation325_spill] sm:$0xff] }
 0x501   : > { %15832 = vst [vmem:[#allocation164_spill] sm:$0xff] %v13080_v17  ;;  %v13089_v30 = vmul.f32 1.442695, %v3471_v48  ;;  %v13091_v13 = vmul.f32 1.442695, %v3473_v14  ;;  %v8324_v39 = vpop.eup %8323  ;;  %8343 = vrcp.f32 %v4135_v20  ;;  %v4136_v40 = vadd.f32 1.0, %v8318_v6 }
 0x502   : > { %15833 = vst [vmem:[#allocation165_spill] sm:$0xff] %v13083_v32  ;;  %v13099_v57 = vmul.f32 %v12078_v62, %v15837_v18  ;;  %v13103_v60 = vmul.f32 %v12082_v52, %v15838_v36  ;;  %v13105_v19 = vpop.eup %8325  ;;  %v4138_v48 = vadd.f32 1.0, %v8320_v23  ;;  %8345 = vpow2.f32 %v12683_v35  ;;  %v15840_v0 = vld [vmem:[#allocation327_spill] sm:$0xff]  ;;  %v15843_v6 = vld [vmem:[#allocation330_spill] sm:$0xff]  ;;  %v15844_v36 = vld [vmem:[#allocation236_spill] sm:$0xff] }
 0x503   : > { %15834 = vst [vmem:[#allocation166_spill] sm:$0xff] %v13089_v30  ;;  %15835 = vst [vmem:[#allocation167_spill] sm:$0xff] %v13091_v13  ;;  %v13108_v14 = vmul.f32 1.442695, %v3472_v56  ;;  %v13112_v5 = vmul.f32 %v12100_v38, %v15840_v0  ;;  %v13114_v20 = vpop.eup %8327  ;;  %8347 = vrcp.f32 %v4137_v61  ;;  %v13116_v62 = vmul.f32 1.442695, %v3474_v54 }
 0x504   : > { %15841 = vst [vmem:[#allocation169_spill] sm:$0xff] %v13114_v20  ;;  %v13120_v52 = vmul.f32 %v12117_v27, %v15843_v6  ;;  %v15845_v18 = vld [vmem:[#allocation17_spill] sm:$0xff]  ;;  %v8330_v35 = vpop.eup %8329  ;;  %v4143_v56 = vadd.f32 1.0, %v8324_v39  ;;  %8349 = vpow2.f32 %v12692_v63  ;;  %v15847_v38 = vld [vmem:[#allocation280_spill] sm:$0xff]  ;;  %v15848_v13 = vld [vmem:[#allocation242_spill] sm:$0xff] }
 0x505   : > { %15839 = vst [vmem:[#allocation168_spill] sm:$0xff] %v13108_v14  ;;  %15842 = vst [vmem:[#allocation170_spill] sm:$0xff] %v13116_v62  ;;  %v13124_v23 = vmul.f32 %v15845_v18, %v15844_v36  ;;  %v15846_v14 = vld [vmem:[#allocation240_spill] sm:$0xff]  ;;  %v15849_v61 = vld [vmem:[#allocation29_spill] sm:$0xff]  ;;  %v8332_v62 = vpop.eup %8331  ;;  %8351 = vrcp.f32 %v4136_v40 }
 0x506   : > { %v13129_v0 = vmul.f32 %v15847_v38, %v15846_v14  ;;  %v13133_v54 = vmul.f32 %v15849_v61, %v15848_v13  ;;  %v15850_v27 = vld [vmem:[#allocation244_spill] sm:$0xff]  ;;  %v15851_v6 = vld [vmem:[#allocation282_spill] sm:$0xff]  ;;  %v15852_v36 = vld [vmem:[#allocation245_spill] sm:$0xff]  ;;  %v8334_v14 = vpop.eup %8333  ;;  %8353 = vrcp.f32 %v4138_v48 }
 0x507   : > { %v13137_v30 = vmul.f32 %v15851_v6, %v15850_v27  ;;  %v15853_v18 = vld [vmem:[#allocation324_spill] sm:$0xff]  ;;  %v15855_v63 = vld [vmem:[#allocation283_spill] sm:$0xff]  ;;  %v15857_v41 = vld [vmem:[#allocation33_spill] sm:$0xff]  ;;  %8355 = vpow2.f32 %v12694_v29  ;;  %v4146_v20 = vadd.f32 1.0, %v8334_v14 }
 0x508   : > { %v13141_v32 = vmul.f32 %v15853_v18, %v15852_v36  ;;  %v15854_v39 = vld [vmem:[#allocation8_spill] sm:$0xff]  ;;  %v15856_v38 = vld [vmem:[#allocation11_spill] sm:$0xff]  ;;  %v15859_v40 = vld [vmem:[#allocation34_spill] sm:$0xff]  ;;  %v13159_v36 = vpop.eup %8335  ;;  %v4145_v18 = vadd.f32 1.0, %v8330_v35  ;;  %8357 = vrcp.f32 %v4143_v56 }
 0x509   : > { %v13145_v17 = vmul.f32 %v15855_v63, %v15854_v39  ;;  %v13149_v13 = vmul.f32 %v15857_v41, %v15856_v38  ;;  %v15858_v61 = vld [vmem:[#allocation260_spill] sm:$0xff]  ;;  %15862 = vst [vmem:[#allocation174_spill] sm:$0xff] %v13159_v36  ;;  %v15863_v39 = vld [vmem:[#allocation263_spill] sm:$0xff]  ;;  %v15864_v63 = vld [vmem:[#allocation298_spill] sm:$0xff]  ;;  %v8338_v45 = vpop.eup %8337  ;;  %8359 = vpow2.f32 %v12696_v11 }
 0x50a   : > { %v13153_v47 = vmul.f32 %v15859_v40, %v15858_v61  ;;  %v15860_v27 = vld [vmem:[#allocation24_spill] sm:$0xff]  ;;  %v13164_v48 = vmul.f32 %v15864_v63, %v15863_v39  ;;  %v15867_v41 = vld [vmem:[#allocation37_spill] sm:$0xff]  ;;  %v4144_v61 = vadd.f32 1.0, %v8332_v62  ;;  %v13178_v29 = vpop.eup %8339  ;;  %v15877_v63 = vld [vmem:[#allocation71_spill] sm:$0xff]  ;;  %8361 = vpow2.f32 %v12708_v9 }
 0x50b   : > { %v15861_v6 = vld [vmem:[#allocation296_spill] sm:$0xff]  ;;  %v13168_v38 = vmul.f32 %v15867_v41, %v15866_v34  ;;  %v15869_v40 = vld [vmem:[#allocation13_spill] sm:$0xff]  ;;  %15875 = vst [vmem:[#allocation176_spill] sm:$0xff] %v13178_v29  ;;  %v15879_v41 = vld [vmem:[#allocation94_spill] sm:$0xff]  ;;  %8363 = vrcp.f32 %v4145_v18 }
 0x50c   : > { %v13157_v2 = vmul.f32 %v15861_v6, %v15860_v27  ;;  %15865 = vst [vmem:[#allocation171_spill] sm:$0xff] %v13164_v48  ;;  %v13172_v27 = vmul.f32 %v15870_v25, %v15869_v40  ;;  %v15872_v6 = vld [vmem:[#allocation27_spill] sm:$0xff]  ;;  %v15873_v36 = vld [vmem:[#allocation40_spill] sm:$0xff]  ;;  %v15880_v56 = vld [vmem:[#allocation41_spill] sm:$0xff]  ;;  %8365 = vrcp.f32 %v4144_v61 }
 0x50d   : > { %15868 = vst [vmem:[#allocation172_spill] sm:$0xff] %v13168_v38  ;;  %v13176_v35 = vmul.f32 %v15873_v36, %v15872_v6  ;;  %v15876_v39 = vld [vmem:[#allocation272_spill] sm:$0xff]  ;;  %v13187_v62 = vmul.f32 %v15880_v56, %v15879_v41  ;;  %v8342_v38 = vpop.eup %8341  ;;  %v15882_v25 = vld [vmem:[#allocation321_spill] sm:$0xff]  ;;  %v15885_v6 = vld [vmem:[#allocation14_spill] sm:$0xff]  ;;  %8367 = vrcp.f32 %v4146_v20 }
 0x50e   : > { %15871 = vst [vmem:[#allocation173_spill] sm:$0xff] %v13172_v27  ;;  %v13183_v34 = vmul.f32 %v15877_v63, %v15876_v39  ;;  %v15883_v40 = vld [vmem:[#allocation312_spill] sm:$0xff]  ;;  %v15888_v11 = vld [vmem:[#allocation273_spill] sm:$0xff]  ;;  %v15889_v27 = vld [vmem:[#allocation315_spill] sm:$0xff]  ;;  %v13202_v39 = vpop.eup %8343  ;;  %v4151_v63 = vadd.f32 1.0, %v8338_v45  ;;  %8369 = vpow2.f32 %v12732_v1 }
 0x50f   : > { %15874 = vst [vmem:[#allocation175_spill] sm:$0xff] %v13176_v35  ;;  %15881 = vst [vmem:[#allocation181_spill] sm:$0xff] %v13187_v62  ;;  %v13192_v36 = vmul.f32 %v15883_v40, %v15882_v25  ;;  %v15886_v35 = vld [vmem:[#allocation314_spill] sm:$0xff]  ;;  %v13200_v48 = vmul.f32 %v15889_v27, %v15888_v11  ;;  %v15892_v41 = vld [vmem:[#allocation15_spill] sm:$0xff]  ;;  %v8346_v40 = vpop.eup %8345 }
 0x510   : > { %15878 = vst [vmem:[#allocation177_spill] sm:$0xff] %v13183_v34  ;;  %v13196_v14 = vmul.f32 %v15886_v35, %v15885_v6  ;;  %15891 = vst [vmem:[#allocation182_spill] sm:$0xff] %v13202_v39  ;;  %v15893_v56 = vld [vmem:[#allocation47_spill] sm:$0xff]  ;;  %v15895_v9 = vld [vmem:[#allocation276_spill] sm:$0xff]  ;;  %8371 = vrcp.f32 %v4151_v63 }
 0x511   : > { %15884 = vst [vmem:[#allocation178_spill] sm:$0xff] %v13192_v36  ;;  %15890 = vst [vmem:[#allocation180_spill] sm:$0xff] %v13200_v48  ;;  %v13206_v62 = vmul.f32 %v15893_v56, %v15892_v41  ;;  %v15896_v34 = vld [vmem:[#allocation318_spill] sm:$0xff]  ;;  %v15898_v35 = vld [vmem:[#allocation28_spill] sm:$0xff]  ;;  %v13224_v41 = vpop.eup %8347  ;;  %v4153_v56 = vadd.f32 1.0, %v8342_v38  ;;  %8373 = vpow2.f32 %v12734_v58 }
 0x512   : > { %15887 = vst [vmem:[#allocation179_spill] sm:$0xff] %v13196_v14  ;;  %v13210_v25 = vmul.f32 %v15896_v34, %v15895_v9  ;;  %v15899_v6 = vld [vmem:[#allocation319_spill] sm:$0xff]  ;;  %v15901_v27 = vld [vmem:[#allocation16_spill] sm:$0xff]  ;;  %v15902_v11 = vld [vmem:[#allocation50_spill] sm:$0xff] }
 0x513   : > { %15894 = vst [vmem:[#allocation183_spill] sm:$0xff] %v13206_v62  ;;  %v13214_v14 = vmul.f32 %v15899_v6, %v15898_v35  ;;  %v13218_v48 = vmul.f32 %v15902_v11, %v15901_v27  ;;  %v15904_v18 = vld [vmem:[#allocation278_spill] sm:$0xff]  ;;  %v15905_v45 = vld [vmem:[#allocation323_spill] sm:$0xff]  ;;  %15907 = vst [vmem:[#allocation188_spill] sm:$0xff] %v13224_v41  ;;  %v8350_v6 = vpop.eup %8349  ;;  %8375 = vrcp.f32 %v4153_v56 }
 0x514   : > { %15897 = vst [vmem:[#allocation184_spill] sm:$0xff] %v13210_v25  ;;  %v13222_v36 = vmul.f32 %v15905_v45, %v15904_v18  ;;  %v15908_v34 = vld [vmem:[#allocation279_spill] sm:$0xff]  ;;  %v15909_v9 = vld [vmem:[#allocation293_spill] sm:$0xff]  ;;  %v15917_v45 = vld [vmem:[#allocation56_spill] sm:$0xff] }
 0x515   : > { %15900 = vst [vmem:[#allocation192_spill] sm:$0xff] %v13214_v14  ;;  %15903 = vst [vmem:[#allocation185_spill] sm:$0xff] %v13218_v48  ;;  %v13228_v25 = vmul.f32 %v15909_v9, %v15908_v34  ;;  %v15911_v61 = vld [vmem:[#allocation19_spill] sm:$0xff]  ;;  %v15916_v18 = vld [vmem:[#allocation277_spill] sm:$0xff]  ;;  %v13247_v34 = vpop.eup %8351 }
 0x516   : > { %15906 = vst [vmem:[#allocation187_spill] sm:$0xff] %v13222_v36  ;;  %v15912_v62 = vld [vmem:[#allocation55_spill] sm:$0xff]  ;;  %v13241_v36 = vmul.f32 %v15917_v45, %v15916_v18  ;;  %v15919_v20 = vld [vmem:[#allocation18_spill] sm:$0xff]  ;;  %v15920_v38 = vld [vmem:[#allocation61_spill] sm:$0xff] }
 0x517   : > { %15910 = vst [vmem:[#allocation189_spill] sm:$0xff] %v13228_v25  ;;  %v13232_v35 = vmul.f32 %v15912_v62, %v15911_v61  ;;  %v15914_v27 = vld [vmem:[#allocation251_spill] sm:$0xff]  ;;  %v13245_v48 = vmul.f32 %v15920_v38, %v15919_v20  ;;  %15922 = vst [vmem:[#allocation195_spill] sm:$0xff] %v13247_v34  ;;  %v4152_v62 = vadd.f32 1.0, %v8346_v40  ;;  %v15923_v9 = vld [vmem:[#allocation252_spill] sm:$0xff] }
 0x518   : > { %v13237_v11 = vadd.f32 %v15914_v27, %v12076_v15  ;;  %15918 = vst [vmem:[#allocation207_spill] sm:$0xff] %v13241_v36  ;;  %v13251_v61 = vadd.f32 %v15923_v9, %v12110_v44  ;;  %v15925_v1 = vld [vmem:[#allocation253_spill] sm:$0xff]  ;;  %v15928_v18 = vld [vmem:[#allocation254_spill] sm:$0xff]  ;;  %v15930_v20 = vld [vmem:[#allocation255_spill] sm:$0xff] }
 0x519   : > { %15913 = vst [vmem:[#allocation190_spill] sm:$0xff] %v13232_v35  ;;  %15921 = vst [vmem:[#allocation194_spill] sm:$0xff] %v13245_v48  ;;  %v13255_v27 = vadd.f32 %v15925_v1, %v12125_v8  ;;  %v13257_v35 = vpop.eup %8353  ;;  %v13262_v45 = vadd.f32 %v15928_v18, %v12158_v49  ;;  %v13266_v63 = vadd.f32 %v15930_v20, %v12076_v15  ;;  %v15932_v40 = vld [vmem:[#allocation281_spill] sm:$0xff]  ;;  %v15933_v38 = vld [vmem:[#allocation62_spill] sm:$0xff]  ;;  %v4154_v1 = vadd.f32 1.0, %v8350_v6 }
 0x51a   : > { %15915 = vst [vmem:[#allocation193_spill] sm:$0xff] %v13237_v11  ;;  %15924 = vst [vmem:[#allocation196_spill] sm:$0xff] %v13251_v61  ;;  %v13270_v9 = vmul.f32 %v15933_v38, %v15932_v40  ;;  %v8356_v48 = vpop.eup %8355  ;;  %v15935_v36 = vld [vmem:[#allocation256_spill] sm:$0xff]  ;;  %v15938_v14 = vld [vmem:[#allocation205_spill] sm:$0xff] }
 0x51b   : > { %15926 = vst [vmem:[#allocation197_spill] sm:$0xff] %v13255_v27  ;;  %15927 = vst [vmem:[#allocation198_spill] sm:$0xff] %v13257_v35  ;;  %v13274_v25 = vadd.f32 %v15935_v36, %v12110_v44  ;;  %v15937_v58 = vld [vmem:[#allocation96_spill] sm:$0xff]  ;;  %v13280_v18 = vpop.eup %8357  ;;  %v15941_v34 = vld [vmem:[#allocation85_spill] sm:$0xff]  ;;  %v3482_v29 = vsub.f32 0.0, %v13262_v45 }
 0x51c   : > { %15929 = vst [vmem:[#allocation199_spill] sm:$0xff] %v13262_v45  ;;  %15931 = vst [vmem:[#allocation200_spill] sm:$0xff] %v13266_v63  ;;  %v13278_v35 = vmul.f32 %v15938_v14, %v15937_v58  ;;  %8377 = vpow2.f32 %v15941_v34  ;;  %v15942_v20 = vld [vmem:[#allocation258_spill] sm:$0xff]  ;;  %v15944_v40 = vld [vmem:[#allocation95_spill] sm:$0xff]  ;;  %v8360_v39 = vpop.eup %8359  ;;  %v3479_v14 = vsub.f32 0.0, %v13237_v11  ;;  %v3481_v58 = vsub.f32 0.0, %v13251_v61 }
 0x51d   : > { %15934 = vst [vmem:[#allocation201_spill] sm:$0xff] %v13270_v9  ;;  %15936 = vst [vmem:[#allocation20_spill] sm:$0xff] %v13274_v25  ;;  %v13285_v41 = vadd.f32 %v15942_v20, %v12125_v8  ;;  %v15945_v38 = vld [vmem:[#allocation69_spill] sm:$0xff]  ;;  %v15947_v6 = vld [vmem:[#allocation30_spill] sm:$0xff]  ;;  %8379 = vrcp.f32 %v4152_v62  ;;  %v3480_v34 = vsub.f32 0.0, %v13255_v27 }
 0x51e   : > { %15939 = vst [vmem:[#allocation202_spill] sm:$0xff] %v13278_v35  ;;  %15940 = vst [vmem:[#allocation203_spill] sm:$0xff] %v13280_v18  ;;  %v13289_v56 = vmul.f32 %v15945_v38, %v15944_v40  ;;  %v15948_v9 = vld [vmem:[#allocation101_spill] sm:$0xff]  ;;  %v8362_v35 = vpop.eup %8361  ;;  %v4159_v18 = vadd.f32 1.0, %v8356_v48  ;;  %v15950_v20 = vld [vmem:[#allocation86_spill] sm:$0xff]  ;;  %v3487_v40 = vsub.f32 0.0, %v13266_v63 }
 0x51f   : > { %15943 = vst [vmem:[#allocation204_spill] sm:$0xff] %v13285_v41  ;;  %v13293_v36 = vmul.f32 %v15948_v9, %v15947_v6  ;;  %8381 = vpow2.f32 %v15950_v20  ;;  %v13301_v38 = vpop.eup %8363  ;;  %v3489_v9 = vsub.f32 0.0, %v13274_v25  ;;  %v15951_v62 = vld [vmem:[#allocation31_spill] sm:$0xff]  ;;  %v15952_v6 = vld [vmem:[#allocation102_spill] sm:$0xff]  ;;  %v4161_v20 = vadd.f32 1.0, %v8360_v39 }
 0x520   : > { %15946 = vst [vmem:[#allocation208_spill] sm:$0xff] %v13289_v56  ;;  %8383 = vrcp.f32 %v4154_v1  ;;  %v13306_v11 = vmul.f32 %v15952_v6, %v15951_v62  ;;  %v15953_v61 = vld [vmem:[#allocation290_spill] sm:$0xff]  ;;  %v13312_v48 = vpop.eup %8365  ;;  %v3488_v63 = vsub.f32 0.0, %v13285_v41  ;;  %v15956_v45 = vld [vmem:[#allocation259_spill] sm:$0xff]  ;;  %v4160_v56 = vadd.f32 1.0, %v8362_v35  ;;  %v15965_v35 = vld [vmem:[#allocation32_spill] sm:$0xff] }
 0x521   : > { %15949 = vst [vmem:[#allocation209_spill] sm:$0xff] %v13293_v36  ;;  %v15954_v36 = vld [vmem:[#allocation243_spill] sm:$0xff]  ;;  %8385 = vpow2.f32 %v12759_v16  ;;  %v13318_v1 = vadd.f32 %v15956_v45, %v12158_v49  ;;  %v13320_v25 = vpop.eup %8367  ;;  %v13323_v62 = vmul.f32 1.442695, %v3479_v14  ;;  %v13327_v39 = vmul.f32 1.442695, %v3480_v34 }
 0x522   : > { %v13310_v27 = vmul.f32 %v15954_v36, %v15953_v61  ;;  %8387 = vpow2.f32 %v12779_v37  ;;  %v13325_v61 = vmul.f32 1.442695, %v3481_v58  ;;  %v8370_v36 = vpop.eup %8369  ;;  %v13329_v16 = vmul.f32 1.442695, %v3482_v29  ;;  %v15963_v45 = vld [vmem:[#allocation124_spill] sm:$0xff]  ;;  %v15966_v37 = vld [vmem:[#allocation107_spill] sm:$0xff] }
 0x523   : > { %15957 = vst [vmem:[#allocation212_spill] sm:$0xff] %v13318_v1  ;;  %15958 = vst [vmem:[#allocation214_spill] sm:$0xff] %v13323_v62  ;;  %8389 = vrcp.f32 %v4159_v18  ;;  %v13331_v6 = vmul.f32 1.442695, %v3487_v40  ;;  %v13333_v41 = vpop.eup %8371  ;;  %v13340_v14 = vmul.f32 %v15966_v37, %v15965_v35  ;;  %v15967_v58 = vld [vmem:[#allocation294_spill] sm:$0xff]  ;;  %v3490_v34 = vsub.f32 0.0, %v13318_v1 }
 0x524   : > { %15955 = vst [vmem:[#allocation211_spill] sm:$0xff] %v13310_v27  ;;  %15959 = vst [vmem:[#allocation22_spill] sm:$0xff] %v13325_v61  ;;  %8391 = vpow2.f32 %v15963_v45  ;;  %v13336_v27 = vmul.f32 1.442695, %v3489_v9  ;;  %v15968_v61 = vld [vmem:[#allocation328_spill] sm:$0xff]  ;;  %v8374_v18 = vpop.eup %8373  ;;  %v5342_v40 = vpop.f32.mrb[192].mxu0 }
 0x525   : > { %15960 = vst [vmem:[#allocation216_spill] sm:$0xff] %v13327_v39  ;;  %15961 = vst [vmem:[#allocation219_spill] sm:$0xff] %v13329_v16  ;;  %v13344_v62 = vmul.f32 %v15968_v61, %v15967_v58  ;;  %8393 = vrcp.f32 %v4161_v20  ;;  %v13346_v29 = vmul.f32 1.442695, %v3488_v63  ;;  %v15971_v16 = vld [vmem:[#allocation295_spill] sm:$0xff]  ;;  %v15972_v45 = vld [vmem:[#allocation77_spill] sm:$0xff]  ;;  %v6152_v35 = vmul.f32 %v5342_v40, %v13067_v22 }
 0x526   : > { %15962 = vst [vmem:[#allocation7_spill] sm:$0xff] %v13331_v6  ;;  %15964 = vst [vmem:[#allocation221_spill] sm:$0xff] %v13336_v27  ;;  %v5535_v6 = vpop.f32.mrb[224].mxu1  ;;  %v13351_v9 = vmul.f32 %v15972_v45, %v15971_v16  ;;  %v13353_v27 = vpop.eup %8375  ;;  %8395 = vrcp.f32 %v4160_v56  ;;  %v15974_v20 = vld [vmem:[#allocation35_spill] sm:$0xff]  ;;  %v15975_v63 = vld [vmem:[#allocation210_spill] sm:$0xff]  ;;  %v4162_v39 = vadd.f32 1.0, %v8370_v36 }
 0x527   : > { %15969 = vst [vmem:[#allocation222_spill] sm:$0xff] %v13344_v62  ;;  %15970 = vst [vmem:[#allocation223_spill] sm:$0xff] %v13346_v29  ;;  %v6154_v61 = vmul.f32 %v5535_v6, %v13075_v10  ;;  %v5344_v37 = vpop.f32.mrb[193].mxu0  ;;  %v5537_v58 = vpop.f32.mrb[225].mxu1  ;;  %v13359_v29 = vmul.f32 %v15975_v63, %v15974_v20  ;;  %8397 = vpow2.f32 %v12802_v12  ;;  %v4167_v22 = vadd.f32 1.0, %v8374_v18 }
 0x528   : > { %15973 = vst [vmem:[#allocation224_spill] sm:$0xff] %v13351_v9  ;;  %v8378_v1 = vpop.eup %8377  ;;  %v6153_v16 = vmul.f32 %v5344_v37, %v13095_v21  ;;  %v6155_v45 = vmul.f32 %v5537_v58, %v13099_v57  ;;  %v5346_v9 = vpop.f32.mrb[194].mxu0  ;;  %8399 = vpow2.f32 %v12811_v42  ;;  %v13374_v18 = vmul.f32 1.442695, %v3490_v34  ;;  %v15979_v42 = vld [vmem:[#allocation297_spill] sm:$0xff] }
 0x529   : > { %v5539_v56 = vpop.f32.mrb[226].mxu1  ;;  %v13364_v62 = vpop.eup %8379  ;;  %v6160_v10 = vmul.f32 %v5346_v9, %v13103_v60  ;;  %v4169_v58 = vadd.f32 1.0, %v8378_v1  ;;  %8401 = vpow2.f32 %v12813_v46  ;;  %v15980_v60 = vld [vmem:[#allocation80_spill] sm:$0xff]  ;;  %v15984_v46 = vld [vmem:[#allocation265_spill] sm:$0xff] }
 0x52a   : > { %15976 = vst [vmem:[#allocation225_spill] sm:$0xff] %v13364_v62  ;;  %v6162_v6 = vmul.f32 %v5539_v56, %v13112_v5  ;;  %v5348_v40 = vpop.f32.mrb[195].mxu0  ;;  %v5541_v20 = vpop.f32.mrb[227].mxu1  ;;  %v6240_v63 = vadd.f32 %v6153_v16, %v6152_v35  ;;  %v6272_v12 = vadd.f32 %v6155_v45, %v6154_v61  ;;  %15978 = vst [vmem:[#allocation227_spill] sm:$0xff] %v13374_v18  ;;  %8403 = vrcp.f32 %v4162_v39  ;;  %v15982_v16 = vld [vmem:[#allocation264_spill] sm:$0xff]  ;;  %v15988_v39 = vld [vmem:[#allocation266_spill] sm:$0xff] }
 0x52b   : > { %v8382_v36 = vpop.eup %8381  ;;  %v6161_v21 = vmul.f32 %v5348_v40, %v13120_v52  ;;  %v6163_v57 = vmul.f32 %v5541_v20, %v13124_v23  ;;  %v13378_v9 = vmul.f32 %v15980_v60, %v15979_v42  ;;  %8405 = vrcp.f32 %v4167_v22  ;;  %v15987_v40 = vld [vmem:[#allocation113_spill] sm:$0xff]  ;;  %v15996_v42 = vld [vmem:[#allocation299_spill] sm:$0xff] }
 0x52c   : > { %v13371_v37 = vpop.eup %8383  ;;  %v13380_v56 = vadd.f32 %v6272_v12, %v6240_v63  ;;  %v4168_v23 = vadd.f32 1.0, %v8382_v36  ;;  %v13384_v1 = vadd.f32 %v15982_v16, %v12076_v15  ;;  %v13388_v34 = vadd.f32 %v15984_v46, %v12110_v44  ;;  %v15993_v12 = vld [vmem:[#allocation36_spill] sm:$0xff]  ;;  %v15997_v60 = vld [vmem:[#allocation83_spill] sm:$0xff] }
 0x52d   : > { %15977 = vst [vmem:[#allocation226_spill] sm:$0xff] %v13371_v37  ;;  %v8386_v5 = vpop.eup %8385  ;;  %v6241_v35 = vadd.f32 %v6161_v21, %v6160_v10  ;;  %v6273_v61 = vadd.f32 %v6163_v57, %v6162_v6  ;;  %8407 = vpow2.f32 %v15987_v40  ;;  %v13395_v20 = vadd.f32 %v15988_v39, %v12125_v8  ;;  %v15990_v10 = vld [vmem:[#allocation267_spill] sm:$0xff] }
 0x52e   : > { %15981 = vst [vmem:[#allocation228_spill] sm:$0xff] %v13380_v56  ;;  %v8388_v52 = vpop.eup %8387  ;;  %15983 = vst [vmem:[#allocation229_spill] sm:$0xff] %v13384_v1  ;;  %v13399_v22 = vadd.f32 %v15990_v10, %v12158_v49  ;;  %8409 = vrcp.f32 %v4169_v58  ;;  %v4170_v63 = vadd.f32 1.0, %v8386_v5  ;;  %v15994_v21 = vld [vmem:[#allocation215_spill] sm:$0xff]  ;;  %v13409_v16 = vmul.f32 %v15997_v60, %v15996_v42  ;;  %v16001_v10 = vld [vmem:[#allocation97_spill] sm:$0xff] }
 0x52f   : > { %15985 = vst [vmem:[#allocation230_spill] sm:$0xff] %v13388_v34  ;;  %v13390_v45 = vpop.eup %8389  ;;  %15989 = vst [vmem:[#allocation232_spill] sm:$0xff] %v13395_v20  ;;  %v13401_v6 = vadd.f32 %v6273_v61, %v6241_v35  ;;  %v13405_v57 = vmul.f32 %v15994_v21, %v15993_v12  ;;  %v4175_v40 = vadd.f32 1.0, %v8388_v52  ;;  %v16000_v39 = vld [vmem:[#allocation115_spill] sm:$0xff]  ;;  %v16004_v61 = vld [vmem:[#allocation38_spill] sm:$0xff]  ;;  %v3495_v12 = vsub.f32 0.0, %v13384_v1 }
 0x530   : > { %15986 = vst [vmem:[#allocation231_spill] sm:$0xff] %v13390_v45  ;;  %15991 = vst [vmem:[#allocation234_spill] sm:$0xff] %v13399_v22  ;;  %v8392_v36 = vpop.eup %8391  ;;  %8411 = vpow2.f32 %v16000_v39  ;;  %v16002_v56 = vld [vmem:[#allocation191_spill] sm:$0xff]  ;;  %v16005_v58 = vld [vmem:[#allocation104_spill] sm:$0xff]  ;;  %v3497_v21 = vsub.f32 0.0, %v13388_v34 }
 0x531   : > { %15992 = vst [vmem:[#allocation235_spill] sm:$0xff] %v13401_v6  ;;  %15995 = vst [vmem:[#allocation237_spill] sm:$0xff] %v13405_v57  ;;  %v13411_v46 = vpop.eup %8393  ;;  %v13416_v35 = vmul.f32 %v16002_v56, %v16001_v10  ;;  %v13420_v5 = vmul.f32 %v16005_v58, %v16004_v61  ;;  %8413 = vrcp.f32 %v4168_v23  ;;  %v16008_v42 = vld [vmem:[#allocation300_spill] sm:$0xff]  ;;  %v16009_v60 = vld [vmem:[#allocation121_spill] sm:$0xff]  ;;  %v4177_v18 = vadd.f32 1.0, %v8392_v36  ;;  %v5352_v36 = vpop.f32.mrb[196].mxu0 }
 0x532   : > { %15998 = vst [vmem:[#allocation239_spill] sm:$0xff] %v13409_v16  ;;  %15999 = vst [vmem:[#allocation322_spill] sm:$0xff] %v13411_v46  ;;  %v13422_v6 = vpop.eup %8395  ;;  %v13428_v52 = vmul.f32 %v16009_v60, %v16008_v42  ;;  %v16011_v46 = vld [vmem:[#allocation119_spill] sm:$0xff]  ;;  %v3496_v56 = vsub.f32 0.0, %v13395_v20  ;;  %v3498_v10 = vsub.f32 0.0, %v13399_v22  ;;  %v16012_v23 = vld [vmem:[#allocation270_spill] sm:$0xff] }
 0x533   : > { %16003 = vst [vmem:[#allocation88_spill] sm:$0xff] %v13416_v35  ;;  %16006 = vst [vmem:[#allocation89_spill] sm:$0xff] %v13420_v5  ;;  %v8398_v39 = vpop.eup %8397  ;;  %8415 = vpow2.f32 %v16011_v46  ;;  %v13435_v58 = vadd.f32 %v16012_v23, %v12076_v15  ;;  %v16014_v34 = vld [vmem:[#allocation271_spill] sm:$0xff]  ;;  %v16016_v42 = vld [vmem:[#allocation274_spill] sm:$0xff]  ;;  %v5545_v46 = vpop.f32.mrb[228].mxu1 }
 0x534   : > { %16007 = vst [vmem:[#allocation90_spill] sm:$0xff] %v13422_v6  ;;  %16010 = vst [vmem:[#allocation325_spill] sm:$0xff] %v13428_v52  ;;  %v8400_v61 = vpop.eup %8399  ;;  %8417 = vrcp.f32 %v4170_v63  ;;  %v13439_v1 = vadd.f32 %v16014_v34, %v12110_v44  ;;  %v13443_v60 = vadd.f32 %v16016_v42, %v12125_v8  ;;  %v16018_v20 = vld [vmem:[#allocation275_spill] sm:$0xff]  ;;  %v6168_v63 = vmul.f32 %v5352_v36, %v13129_v0  ;;  %v5354_v6 = vpop.f32.mrb[197].mxu0  ;;  %v16020_v5 = vld [vmem:[#allocation126_spill] sm:$0xff] }
 0x535   : > { %16013 = vst [vmem:[#allocation327_spill] sm:$0xff] %v13435_v58  ;;  %8419 = vrcp.f32 %v4175_v40  ;;  %v13447_v22 = vadd.f32 %v16018_v20, %v12158_v49  ;;  %v6170_v23 = vmul.f32 %v5545_v46, %v13133_v54  ;;  %v5547_v45 = vpop.f32.mrb[229].mxu1  ;;  %v8402_v52 = vpop.eup %8401  ;;  %v4176_v34 = vadd.f32 1.0, %v8398_v39  ;;  %v16021_v57 = vld [vmem:[#allocation123_spill] sm:$0xff] }
 0x536   : > { %16015 = vst [vmem:[#allocation330_spill] sm:$0xff] %v13439_v1  ;;  %16017 = vst [vmem:[#allocation236_spill] sm:$0xff] %v13443_v60  ;;  %8421 = vpow2.f32 %v16020_v5  ;;  %v6169_v42 = vmul.f32 %v5354_v6, %v13137_v30  ;;  %v6171_v37 = vmul.f32 %v5547_v45, %v13141_v32  ;;  %v5356_v62 = vpop.f32.mrb[198].mxu0  ;;  %v5549_v40 = vpop.f32.mrb[230].mxu1  ;;  %v4178_v20 = vadd.f32 1.0, %v8400_v61 }
 0x537   : > { %16019 = vst [vmem:[#allocation17_spill] sm:$0xff] %v13447_v22  ;;  %v13454_v35 = vpop.eup %8403  ;;  %8423 = vrcp.f32 %v4177_v18  ;;  %v6176_v0 = vmul.f32 %v5356_v62, %v13145_v17  ;;  %v6178_v54 = vmul.f32 %v5549_v40, %v13149_v13  ;;  %v5358_v36 = vpop.f32.mrb[199].mxu0  ;;  %v4183_v6 = vadd.f32 1.0, %v8402_v52 }
 0x538   : > { %v5551_v46 = vpop.f32.mrb[231].mxu1  ;;  %v13458_v16 = vpop.eup %8405  ;;  %v6242_v39 = vadd.f32 %v6169_v42, %v6168_v63  ;;  %v6274_v5 = vadd.f32 %v6171_v37, %v6170_v23  ;;  %v6177_v30 = vmul.f32 %v5358_v36, %v13153_v47  ;;  %8425 = vpow2.f32 %v16021_v57 }
 0x539   : > { %v6179_v32 = vmul.f32 %v5551_v46, %v13157_v2  ;;  %v8408_v45 = vpop.eup %8407  ;;  %v13463_v18 = vmul.f32 1.442695, %v3495_v12  ;;  %v13465_v61 = vmul.f32 1.442695, %v3497_v21  ;;  %8427 = vrcp.f32 %v4176_v34 }
 0x53a   : > { %v13467_v17 = vpop.eup %8409  ;;  %v13469_v13 = vadd.f32 %v6274_v5, %v6242_v39  ;;  %v6243_v62 = vadd.f32 %v6177_v30, %v6176_v0  ;;  %8429 = vpow2.f32 %v12876_v26  ;;  %v3503_v47 = vsub.f32 0.0, %v13435_v58  ;;  %v16028_v26 = vld [vmem:[#allocation39_spill] sm:$0xff]  ;;  %v16029_v0 = vld [vmem:[#allocation112_spill] sm:$0xff]  ;;  %v16031_v39 = vld [vmem:[#allocation186_spill] sm:$0xff] }
 0x53b   : > { %16022 = vst [vmem:[#allocation240_spill] sm:$0xff] %v13463_v18  ;;  %16023 = vst [vmem:[#allocation280_spill] sm:$0xff] %v13465_v61  ;;  %v6275_v63 = vadd.f32 %v6179_v32, %v6178_v54  ;;  %v8412_v37 = vpop.eup %8411  ;;  %v3505_v2 = vsub.f32 0.0, %v13439_v1  ;;  %v3504_v57 = vsub.f32 0.0, %v13443_v60  ;;  %8431 = vrcp.f32 %v4178_v20  ;;  %v16030_v20 = vld [vmem:[#allocation303_spill] sm:$0xff]  ;;  %v16032_v30 = vld [vmem:[#allocation308_spill] sm:$0xff] }
 0x53c   : > { %16024 = vst [vmem:[#allocation242_spill] sm:$0xff] %v13469_v13  ;;  %v13475_v12 = vpop.eup %8413  ;;  %v4185_v21 = vadd.f32 1.0, %v8408_v45  ;;  %v3506_v52 = vsub.f32 0.0, %v13447_v22  ;;  %8433 = vrcp.f32 %v4183_v6  ;;  %v13480_v42 = vmul.f32 1.442695, %v3496_v56  ;;  %v16033_v32 = vld [vmem:[#allocation117_spill] sm:$0xff] }
 0x53d   : > { %v13478_v23 = vadd.f32 %v6275_v63, %v6243_v62  ;;  %v8416_v34 = vpop.eup %8415  ;;  %v13482_v40 = vmul.f32 1.442695, %v3498_v10  ;;  %v13486_v54 = vmul.f32 %v16029_v0, %v16028_v26  ;;  %v4184_v46 = vadd.f32 1.0, %v8412_v37  ;;  %v16039_v26 = vld [vmem:[#allocation311_spill] sm:$0xff]  ;;  %v16050_v13 = vld [vmem:[#allocation46_spill] sm:$0xff]  ;;  %v16060_v60 = vld [vmem:[#allocation108_spill] sm:$0xff] }
 0x53e   : > { %16026 = vst [vmem:[#allocation244_spill] sm:$0xff] %v13480_v42  ;;  %v13488_v36 = vpop.eup %8417  ;;  %8435 = vpow2.f32 %v12892_v7  ;;  %v13493_v5 = vmul.f32 %v16031_v39, %v16030_v20  ;;  %v13497_v45 = vmul.f32 %v16033_v32, %v16032_v30  ;;  %v13502_v10 = vmul.f32 1.442695, %v3503_v47  ;;  %v16040_v0 = vld [vmem:[#allocation127_spill] sm:$0xff]  ;;  %v16043_v47 = vld [vmem:[#allocation92_spill] sm:$0xff]  ;;  %v16071_v1 = vld [vmem:[#allocation53_spill] sm:$0xff] }
 0x53f   : > { %16025 = vst [vmem:[#allocation29_spill] sm:$0xff] %v13478_v23  ;;  %16027 = vst [vmem:[#allocation282_spill] sm:$0xff] %v13482_v40  ;;  %v13499_v56 = vpop.eup %8419  ;;  %8437 = vpow2.f32 %v12912_v51  ;;  %v13504_v6 = vmul.f32 1.442695, %v3505_v2  ;;  %v13506_v62 = vmul.f32 1.442695, %v3504_v57  ;;  %v13512_v20 = vmul.f32 %v16040_v0, %v16039_v26 }
 0x540   : > { %16034 = vst [vmem:[#allocation245_spill] sm:$0xff] %v13499_v56  ;;  %16035 = vst [vmem:[#allocation324_spill] sm:$0xff] %v13502_v10  ;;  %v8422_v63 = vpop.eup %8421  ;;  %8439 = vrcp.f32 %v4185_v21  ;;  %v4186_v7 = vadd.f32 1.0, %v8416_v34  ;;  %v13508_v37 = vmul.f32 1.442695, %v3506_v52  ;;  %v16042_v51 = vld [vmem:[#allocation42_spill] sm:$0xff] }
 0x541   : > { %16036 = vst [vmem:[#allocation8_spill] sm:$0xff] %v13504_v6  ;;  %16037 = vst [vmem:[#allocation283_spill] sm:$0xff] %v13506_v62  ;;  %v13514_v39 = vpop.eup %8423  ;;  %8441 = vpow2.f32 %v12914_v59  ;;  %v13519_v30 = vmul.f32 %v16043_v47, %v16042_v51  ;;  %v16044_v2 = vld [vmem:[#allocation43_spill] sm:$0xff]  ;;  %v16045_v57 = vld [vmem:[#allocation130_spill] sm:$0xff]  ;;  %v5362_v61 = vpop.f32.mrb[200].mxu0 }
 0x542   : > { %16038 = vst [vmem:[#allocation11_spill] sm:$0xff] %v13508_v37  ;;  %16041 = vst [vmem:[#allocation33_spill] sm:$0xff] %v13514_v39  ;;  %v13523_v32 = vmul.f32 %v16045_v57, %v16044_v2  ;;  %v16046_v21 = vld [vmem:[#allocation313_spill] sm:$0xff]  ;;  %8443 = vrcp.f32 %v4184_v46  ;;  %v16047_v34 = vld [vmem:[#allocation44_spill] sm:$0xff]  ;;  %v8426_v22 = vpop.eup %8425 }
 0x543   : > { %v13527_v52 = vmul.f32 %v12910_v43, %v16046_v21  ;;  %v13531_v26 = vmul.f32 %v12938_v31, %v16047_v34  ;;  %v16048_v0 = vld [vmem:[#allocation45_spill] sm:$0xff]  ;;  %v16049_v23 = vld [vmem:[#allocation138_spill] sm:$0xff]  ;;  %v16052_v2 = vld [vmem:[#allocation135_spill] sm:$0xff] }
 0x544   : > { %v13535_v59 = vmul.f32 %v16049_v23, %v16048_v0  ;;  %v16051_v51 = vld [vmem:[#allocation142_spill] sm:$0xff]  ;;  %8445 = vpow2.f32 %v16052_v2  ;;  %v16053_v57 = vld [vmem:[#allocation316_spill] sm:$0xff]  ;;  %v16054_v46 = vld [vmem:[#allocation317_spill] sm:$0xff]  ;;  %v13554_v23 = vpop.eup %8427 }
 0x545   : > { %v13539_v47 = vmul.f32 %v16051_v51, %v16050_v13  ;;  %v13544_v43 = vmul.f32 %v12981_v50, %v16053_v57  ;;  %v13548_v21 = vmul.f32 %v12991_v53, %v16054_v46  ;;  %v16055_v31 = vld [vmem:[#allocation48_spill] sm:$0xff]  ;;  %16056 = vst [vmem:[#allocation260_spill] sm:$0xff] %v13554_v23  ;;  %8447 = vrcp.f32 %v4186_v7  ;;  %v16057_v0 = vld [vmem:[#allocation49_spill] sm:$0xff]  ;;  %v8430_v57 = vpop.eup %8429  ;;  %v16078_v37 = vld [vmem:[#allocation54_spill] sm:$0xff]  ;;  %v5364_v23 = vpop.f32.mrb[201].mxu0 }
 0x546   : > { %v13552_v34 = vmul.f32 %v12999_v4, %v16055_v31  ;;  %v4191_v13 = vadd.f32 1.0, %v8422_v63  ;;  %v13558_v51 = vmul.f32 %v13017_v3, %v16057_v0  ;;  %v16058_v2 = vld [vmem:[#allocation320_spill] sm:$0xff]  ;;  %8449 = vpow2.f32 %v16060_v60  ;;  %v16063_v4 = vld [vmem:[#allocation51_spill] sm:$0xff]  ;;  %v13577_v3 = vpop.eup %8431  ;;  %v16106_v56 = vld [vmem:[#allocation178_spill] sm:$0xff] }
 0x547   : > { %v13562_v50 = vmul.f32 %v13041_v55, %v16058_v2  ;;  %v16061_v53 = vld [vmem:[#allocation284_spill] sm:$0xff]  ;;  %v13571_v31 = vmul.f32 %v13060_v33, %v16063_v4  ;;  %16067 = vst [vmem:[#allocation298_spill] sm:$0xff] %v13577_v3  ;;  %v4193_v0 = vadd.f32 1.0, %v8426_v22  ;;  %v16069_v2 = vld [vmem:[#allocation99_spill] sm:$0xff]  ;;  %v13588_v58 = vpop.eup %8433  ;;  %v16079_v22 = vld [vmem:[#allocation174_spill] sm:$0xff] }
 0x548   : > { %v13567_v46 = vadd.f32 %v16061_v53, %v12076_v15  ;;  %v16065_v63 = vld [vmem:[#allocation52_spill] sm:$0xff]  ;;  %v13582_v60 = vmul.f32 %v13086_v28, %v16069_v2  ;;  %v13586_v53 = vmul.f32 %v13105_v19, %v16071_v1  ;;  %16073 = vst [vmem:[#allocation13_spill] sm:$0xff] %v13588_v58  ;;  %v16074_v33 = vld [vmem:[#allocation143_spill] sm:$0xff]  ;;  %v13597_v62 = vmul.f32 %v16079_v22, %v16078_v37  ;;  %v8436_v2 = vpop.eup %8435  ;;  %v16084_v19 = vld [vmem:[#allocation285_spill] sm:$0xff] }
 0x549   : > { %16059 = vst [vmem:[#allocation34_spill] sm:$0xff] %v13562_v50  ;;  %16064 = vst [vmem:[#allocation296_spill] sm:$0xff] %v13571_v31  ;;  %v13575_v7 = vmul.f32 %v13069_v24, %v16065_v63  ;;  %v16068_v55 = vld [vmem:[#allocation136_spill] sm:$0xff]  ;;  %v16076_v24 = vld [vmem:[#allocation169_spill] sm:$0xff]  ;;  %v13605_v1 = vadd.f32 %v16084_v19, %v12110_v44  ;;  %v8438_v37 = vpop.eup %8437  ;;  %v4194_v18 = vadd.f32 1.0, %v8436_v2 }
 0x54a   : > { %16062 = vst [vmem:[#allocation24_spill] sm:$0xff] %v13567_v46  ;;  %8451 = vpow2.f32 %v16068_v55  ;;  %16070 = vst [vmem:[#allocation268_spill] sm:$0xff] %v13582_v60  ;;  %v16075_v4 = vld [vmem:[#allocation100_spill] sm:$0xff]  ;;  %v16081_v55 = vld [vmem:[#allocation57_spill] sm:$0xff]  ;;  %v13625_v58 = vpop.eup %8439  ;;  %v5366_v60 = vpop.f32.mrb[202].mxu0 }
 0x54b   : > { %16066 = vst [vmem:[#allocation263_spill] sm:$0xff] %v13575_v7  ;;  %16072 = vst [vmem:[#allocation37_spill] sm:$0xff] %v13586_v53  ;;  %8453 = vpow2.f32 %v16074_v33  ;;  %v13593_v63 = vmul.f32 %v16076_v24, %v16075_v4  ;;  %v16082_v6 = vld [vmem:[#allocation176_spill] sm:$0xff]  ;;  %v16086_v33 = vld [vmem:[#allocation286_spill] sm:$0xff] }
 0x54c   : > { %16080 = vst [vmem:[#allocation27_spill] sm:$0xff] %v13597_v62  ;;  %v13601_v28 = vmul.f32 %v16082_v6, %v16081_v55  ;;  %8455 = vrcp.f32 %v4191_v13  ;;  %16085 = vst [vmem:[#allocation272_spill] sm:$0xff] %v13605_v1  ;;  %v13609_v10 = vadd.f32 %v16086_v33, %v12125_v8  ;;  %v16088_v4 = vld [vmem:[#allocation58_spill] sm:$0xff]  ;;  %v16091_v22 = vld [vmem:[#allocation145_spill] sm:$0xff]  ;;  %v5555_v33 = vpop.f32.mrb[232].mxu1 }
 0x54d   : > { %16077 = vst [vmem:[#allocation68_spill] sm:$0xff] %v13593_v63  ;;  %v16089_v24 = vld [vmem:[#allocation182_spill] sm:$0xff]  ;;  %8457 = vpow2.f32 %v16091_v22  ;;  %v16092_v55 = vld [vmem:[#allocation287_spill] sm:$0xff]  ;;  %v16094_v19 = vld [vmem:[#allocation288_spill] sm:$0xff]  ;;  %v5557_v6 = vpop.f32.mrb[233].mxu1 }
 0x54e   : > { %16083 = vst [vmem:[#allocation40_spill] sm:$0xff] %v13601_v28  ;;  %16087 = vst [vmem:[#allocation71_spill] sm:$0xff] %v13609_v10  ;;  %v13613_v40 = vmul.f32 %v16089_v24, %v16088_v4  ;;  %v13619_v13 = vadd.f32 %v16092_v55, %v12158_v49  ;;  %v13623_v42 = vadd.f32 %v16094_v19, %v12076_v15  ;;  %8459 = vrcp.f32 %v4193_v0  ;;  %v16097_v24 = vld [vmem:[#allocation171_spill] sm:$0xff]  ;;  %v16098_v3 = vld [vmem:[#allocation172_spill] sm:$0xff]  ;;  %v8442_v28 = vpop.eup %8441  ;;  %v5559_v7 = vpop.f32.mrb[234].mxu1 }
 0x54f   : > { %16096 = vst [vmem:[#allocation312_spill] sm:$0xff] %v13625_v58  ;;  %v4192_v4 = vadd.f32 1.0, %v8430_v57  ;;  %v6186_v22 = vmul.f32 %v5555_v33, %v16098_v3  ;;  %v16099_v55 = vld [vmem:[#allocation146_spill] sm:$0xff]  ;;  %v16100_v62 = vld [vmem:[#allocation173_spill] sm:$0xff]  ;;  %v16101_v19 = vld [vmem:[#allocation175_spill] sm:$0xff]  ;;  %v13632_v39 = vpop.eup %8443  ;;  %v4199_v0 = vadd.f32 1.0, %v8438_v37 }
 0x550   : > { %16090 = vst [vmem:[#allocation94_spill] sm:$0xff] %v13613_v40  ;;  %16093 = vst [vmem:[#allocation41_spill] sm:$0xff] %v13619_v13  ;;  %v6184_v40 = vmul.f32 %v5362_v61, %v16097_v24  ;;  %8461 = vpow2.f32 %v16099_v55  ;;  %v6185_v63 = vmul.f32 %v5364_v23, %v16100_v62  ;;  %v6187_v53 = vmul.f32 %v5557_v6, %v16101_v19  ;;  %v16103_v57 = vld [vmem:[#allocation129_spill] sm:$0xff]  ;;  %v5368_v58 = vpop.f32.mrb[203].mxu0  ;;  %v5561_v31 = vpop.f32.mrb[235].mxu1  ;;  %v16107_v23 = vld [vmem:[#allocation179_spill] sm:$0xff] }
 0x551   : > { %16095 = vst [vmem:[#allocation321_spill] sm:$0xff] %v13623_v42  ;;  %16102 = vst [vmem:[#allocation14_spill] sm:$0xff] %v13632_v39  ;;  %8463 = vpow2.f32 %v16103_v57  ;;  %v16104_v61 = vld [vmem:[#allocation177_spill] sm:$0xff]  ;;  %v8446_v2 = vpop.eup %8445  ;;  %v6193_v62 = vmul.f32 %v5368_v58, %v16106_v56  ;;  %v6195_v6 = vmul.f32 %v5561_v31, %v16107_v23  ;;  %v4201_v39 = vadd.f32 1.0, %v8442_v28  ;;  %v16113_v28 = vld [vmem:[#allocation292_spill] sm:$0xff] }
 0x552   : > { %v6192_v24 = vmul.f32 %v5366_v60, %v16104_v61  ;;  %v16105_v3 = vld [vmem:[#allocation181_spill] sm:$0xff]  ;;  %v6244_v50 = vadd.f32 %v6185_v63, %v6184_v40  ;;  %v6276_v55 = vadd.f32 %v6187_v53, %v6186_v22  ;;  %v13639_v19 = vpop.eup %8447  ;;  %8465 = vrcp.f32 %v4192_v4  ;;  %v16110_v60 = vld [vmem:[#allocation291_spill] sm:$0xff] }
 0x553   : > { %v6194_v33 = vmul.f32 %v5559_v7, %v16105_v3  ;;  %v16108_v37 = vld [vmem:[#allocation289_spill] sm:$0xff]  ;;  %v13647_v7 = vadd.f32 %v16110_v60, %v12125_v8  ;;  %v8450_v61 = vpop.eup %8449  ;;  %8467 = vrcp.f32 %v4194_v18  ;;  %v4200_v31 = vadd.f32 1.0, %v8446_v2  ;;  %v16115_v3 = vld [vmem:[#allocation148_spill] sm:$0xff]  ;;  %v16118_v2 = vld [vmem:[#allocation59_spill] sm:$0xff] }
 0x554   : > { %v13643_v57 = vadd.f32 %v16108_v37, %v12110_v44  ;;  %v13649_v40 = vadd.f32 %v6276_v55, %v6244_v50  ;;  %v6245_v53 = vadd.f32 %v6193_v62, %v6192_v24  ;;  %v8452_v56 = vpop.eup %8451  ;;  %8469 = vrcp.f32 %v4199_v0  ;;  %v16119_v55 = vld [vmem:[#allocation188_spill] sm:$0xff]  ;;  %v16120_v60 = vld [vmem:[#allocation149_spill] sm:$0xff] }
 0x555   : > { %16111 = vst [vmem:[#allocation273_spill] sm:$0xff] %v13647_v7  ;;  %v6277_v58 = vadd.f32 %v6195_v6, %v6194_v33  ;;  %v3513_v63 = vsub.f32 0.0, %v13605_v1  ;;  %v13654_v4 = vadd.f32 %v16113_v28, %v12158_v49  ;;  %v8454_v22 = vpop.eup %8453  ;;  %8471 = vpow2.f32 %v16115_v3 }
 0x556   : > { %16109 = vst [vmem:[#allocation314_spill] sm:$0xff] %v13643_v57  ;;  %16112 = vst [vmem:[#allocation315_spill] sm:$0xff] %v13649_v40  ;;  %v3512_v23 = vsub.f32 0.0, %v13609_v10  ;;  %v3514_v18 = vsub.f32 0.0, %v13619_v13  ;;  %v13661_v24 = vpop.eup %8455  ;;  %8473 = vrcp.f32 %v4201_v39  ;;  %v4202_v0 = vadd.f32 1.0, %v8450_v61  ;;  %v16138_v10 = vld [vmem:[#allocation203_spill] sm:$0xff] }
 0x557   : > { %16114 = vst [vmem:[#allocation15_spill] sm:$0xff] %v13654_v4  ;;  %v13659_v50 = vadd.f32 %v6277_v58, %v6245_v53  ;;  %16117 = vst [vmem:[#allocation276_spill] sm:$0xff] %v13661_v24  ;;  %v3519_v33 = vsub.f32 0.0, %v13623_v42  ;;  %v13666_v62 = vmul.f32 %v16119_v55, %v16118_v2  ;;  %v8458_v6 = vpop.eup %8457  ;;  %v4207_v37 = vadd.f32 1.0, %v8452_v56  ;;  %v16124_v55 = vld [vmem:[#allocation151_spill] sm:$0xff]  ;;  %v16168_v24 = vld [vmem:[#allocation189_spill] sm:$0xff] }
 0x558   : > { %8475 = vpow2.f32 %v16120_v60  ;;  %v3521_v28 = vsub.f32 0.0, %v13643_v57  ;;  %v3520_v3 = vsub.f32 0.0, %v13647_v7  ;;  %v13671_v53 = vpop.eup %8459  ;;  %v4209_v58 = vadd.f32 1.0, %v8454_v22  ;;  %v16129_v22 = vld [vmem:[#allocation60_spill] sm:$0xff]  ;;  %v16130_v42 = vld [vmem:[#allocation195_spill] sm:$0xff] }
 0x559   : > { %16116 = vst [vmem:[#allocation47_spill] sm:$0xff] %v13659_v50  ;;  %16121 = vst [vmem:[#allocation318_spill] sm:$0xff] %v13671_v53  ;;  %8477 = vrcp.f32 %v4200_v31  ;;  %v16122_v39 = vsub.f32 0.0, %v13567_v46  ;;  %v3522_v50 = vsub.f32 0.0, %v13654_v4  ;;  %v13679_v56 = vmul.f32 1.442695, %v3513_v63 }
 0x55a   : > { %v8462_v2 = vpop.eup %8461  ;;  %8479 = vpow2.f32 %v16124_v55  ;;  %v13681_v60 = vmul.f32 1.442695, %v3512_v23  ;;  %v13683_v40 = vmul.f32 1.442695, %v3514_v18  ;;  %v4208_v57 = vadd.f32 1.0, %v8458_v6  ;;  %v16133_v63 = vld [vmem:[#allocation63_spill] sm:$0xff] }
 0x55b   : > { %v13675_v61 = vmul.f32 1.442695, %v16122_v39  ;;  %16125 = vst [vmem:[#allocation319_spill] sm:$0xff] %v13679_v56  ;;  %v8464_v7 = vpop.eup %8463  ;;  %8481 = vrcp.f32 %v4202_v0  ;;  %v13685_v31 = vmul.f32 1.442695, %v3519_v33  ;;  %v13689_v39 = vmul.f32 %v16130_v42, %v16129_v22  ;;  %v16134_v55 = vld [vmem:[#allocation198_spill] sm:$0xff] }
 0x55c   : > { %16126 = vst [vmem:[#allocation16_spill] sm:$0xff] %v13681_v60  ;;  %16127 = vst [vmem:[#allocation50_spill] sm:$0xff] %v13683_v40  ;;  %8483 = vrcp.f32 %v4207_v37  ;;  %v13691_v4 = vmul.f32 1.442695, %v3521_v28  ;;  %v13693_v13 = vmul.f32 1.442695, %v3520_v3  ;;  %v13697_v23 = vmul.f32 %v16134_v55, %v16133_v63  ;;  %v13699_v18 = vpop.eup %8465 }
 0x55d   : > { %16123 = vst [vmem:[#allocation28_spill] sm:$0xff] %v13675_v61  ;;  %16128 = vst [vmem:[#allocation278_spill] sm:$0xff] %v13685_v31  ;;  %8485 = vrcp.f32 %v4209_v58  ;;  %v4210_v0 = vadd.f32 1.0, %v8462_v2  ;;  %v13701_v6 = vmul.f32 1.442695, %v3522_v50  ;;  %v16137_v33 = vld [vmem:[#allocation64_spill] sm:$0xff]  ;;  %v13707_v42 = vpop.eup %8467 }
 0x55e   : > { %16131 = vst [vmem:[#allocation323_spill] sm:$0xff] %v13691_v4  ;;  %16132 = vst [vmem:[#allocation279_spill] sm:$0xff] %v13693_v13  ;;  %v13705_v1 = vmul.f32 %v16138_v10, %v16137_v33  ;;  %v4215_v37 = vadd.f32 1.0, %v8464_v7  ;;  %v16140_v28 = vld [vmem:[#allocation154_spill] sm:$0xff]  ;;  %v16141_v3 = vld [vmem:[#allocation301_spill] sm:$0xff]  ;;  %v13718_v58 = vpop.eup %8469 }
 0x55f   : > { %16135 = vst [vmem:[#allocation293_spill] sm:$0xff] %v13699_v18  ;;  %16136 = vst [vmem:[#allocation19_spill] sm:$0xff] %v13701_v6  ;;  %8487 = vpow2.f32 %v16140_v28  ;;  %v13712_v22 = vadd.f32 %v16141_v3, %v12076_v15  ;;  %v16143_v63 = vld [vmem:[#allocation65_spill] sm:$0xff]  ;;  %v16145_v50 = vld [vmem:[#allocation66_spill] sm:$0xff]  ;;  %v8472_v3 = vpop.eup %8471 }
 0x560   : > { %16139 = vst [vmem:[#allocation55_spill] sm:$0xff] %v13707_v42  ;;  %v13716_v55 = vmul.f32 %v13301_v38, %v16143_v63  ;;  %16144 = vst [vmem:[#allocation277_spill] sm:$0xff] %v13718_v58  ;;  %8489 = vrcp.f32 %v4208_v57  ;;  %v13722_v10 = vmul.f32 %v13312_v48, %v16145_v50  ;;  %v16146_v2 = vld [vmem:[#allocation67_spill] sm:$0xff]  ;;  %v16148_v33 = vld [vmem:[#allocation98_spill] sm:$0xff]  ;;  %v5372_v48 = vpop.f32.mrb[204].mxu0  ;;  %v5565_v50 = vpop.f32.mrb[236].mxu1 }
 0x561   : > { %16142 = vst [vmem:[#allocation251_spill] sm:$0xff] %v13712_v22  ;;  %v13726_v7 = vmul.f32 %v13320_v25, %v16146_v2  ;;  %v13730_v28 = vmul.f32 %v13333_v41, %v16148_v33  ;;  %v16150_v46 = vld [vmem:[#allocation156_spill] sm:$0xff]  ;;  %v16151_v38 = vld [vmem:[#allocation302_spill] sm:$0xff]  ;;  %v13745_v2 = vpop.eup %8473  ;;  %v16158_v41 = vld [vmem:[#allocation305_spill] sm:$0xff]  ;;  %v5374_v40 = vpop.f32.mrb[205].mxu0  ;;  %v3527_v56 = vsub.f32 0.0, %v13712_v22 }
 0x562   : > { %8491 = vpow2.f32 %v16150_v46  ;;  %v13735_v63 = vadd.f32 %v16151_v38, %v12110_v44  ;;  %v16153_v57 = vld [vmem:[#allocation304_spill] sm:$0xff]  ;;  %v16155_v13 = vld [vmem:[#allocation326_spill] sm:$0xff]  ;;  %16157 = vst [vmem:[#allocation254_spill] sm:$0xff] %v13745_v2  ;;  %v13749_v46 = vadd.f32 %v16158_v41, %v12158_v49  ;;  %v16161_v4 = vld [vmem:[#allocation183_spill] sm:$0xff]  ;;  %v8476_v60 = vpop.eup %8475  ;;  %v5376_v2 = vpop.f32.mrb[206].mxu0  ;;  %v4217_v41 = vadd.f32 1.0, %v8472_v3 }
 0x563   : > { %16147 = vst [vmem:[#allocation56_spill] sm:$0xff] %v13726_v7  ;;  %16149 = vst [vmem:[#allocation18_spill] sm:$0xff] %v13730_v28  ;;  %v13739_v6 = vadd.f32 %v16153_v57, %v12125_v8  ;;  %v13743_v25 = vmul.f32 %v13353_v27, %v16155_v13  ;;  %8493 = vrcp.f32 %v4210_v0  ;;  %v16160_v33 = vld [vmem:[#allocation180_spill] sm:$0xff]  ;;  %v6202_v31 = vmul.f32 %v5565_v50, %v16161_v4  ;;  %v5567_v57 = vpop.f32.mrb[237].mxu1  ;;  %v16165_v28 = vld [vmem:[#allocation157_spill] sm:$0xff]  ;;  %v5378_v42 = vpop.f32.mrb[207].mxu0 }
 0x564   : > { %16152 = vst [vmem:[#allocation61_spill] sm:$0xff] %v13735_v63  ;;  %16159 = vst [vmem:[#allocation255_spill] sm:$0xff] %v13749_v46  ;;  %v6200_v38 = vmul.f32 %v5372_v48, %v16160_v33  ;;  %8495 = vrcp.f32 %v4215_v37  ;;  %v16162_v61 = vld [vmem:[#allocation184_spill] sm:$0xff]  ;;  %v5569_v0 = vpop.f32.mrb[238].mxu1  ;;  %v16166_v48 = vld [vmem:[#allocation185_spill] sm:$0xff]  ;;  %v4216_v7 = vadd.f32 1.0, %v8476_v60 }
 0x565   : > { %16154 = vst [vmem:[#allocation252_spill] sm:$0xff] %v13739_v6  ;;  %16156 = vst [vmem:[#allocation253_spill] sm:$0xff] %v13743_v25  ;;  %v6201_v27 = vmul.f32 %v5374_v40, %v16162_v61  ;;  %v16163_v13 = vld [vmem:[#allocation192_spill] sm:$0xff]  ;;  %v13756_v25 = vpop.eup %8477  ;;  %8497 = vpow2.f32 %v16165_v28  ;;  %v6208_v33 = vmul.f32 %v5376_v2, %v16166_v48  ;;  %v16167_v4 = vld [vmem:[#allocation187_spill] sm:$0xff]  ;;  %v5571_v18 = vpop.f32.mrb[239].mxu1  ;;  %v6209_v40 = vmul.f32 %v5378_v42, %v16168_v24 }
 0x566   : > { %v6203_v58 = vmul.f32 %v5567_v57, %v16163_v13  ;;  %16164 = vst [vmem:[#allocation281_spill] sm:$0xff] %v13756_v25  ;;  %v6210_v50 = vmul.f32 %v5569_v0, %v16167_v4  ;;  %v8480_v37 = vpop.eup %8479  ;;  %v16169_v61 = vld [vmem:[#allocation190_spill] sm:$0xff]  ;;  %v16170_v25 = vld [vmem:[#allocation160_spill] sm:$0xff]  ;;  %v16173_v2 = vld [vmem:[#allocation307_spill] sm:$0xff]  ;;  %v3530_v4 = vsub.f32 0.0, %v13749_v46 }
 0x567   : > { %v6246_v53 = vadd.f32 %v6201_v27, %v6200_v38  ;;  %v6211_v57 = vmul.f32 %v5571_v18, %v16169_v61  ;;  %v13763_v13 = vpop.eup %8481  ;;  %8499 = vpow2.f32 %v16170_v25  ;;  %v16171_v28 = vld [vmem:[#allocation306_spill] sm:$0xff]  ;;  %v13772_v0 = vadd.f32 %v16173_v2, %v12110_v44  ;;  %v16179_v27 = vld [vmem:[#allocation163_spill] sm:$0xff] }
 0x568   : > { %v6278_v22 = vadd.f32 %v6203_v58, %v6202_v31  ;;  %v13768_v3 = vadd.f32 %v16171_v28, %v12076_v15  ;;  %v13774_v48 = vpop.eup %8483  ;;  %v16176_v31 = vld [vmem:[#allocation155_spill] sm:$0xff]  ;;  %v6247_v18 = vadd.f32 %v6209_v40, %v6208_v33  ;;  %v4218_v60 = vadd.f32 1.0, %v8480_v37  ;;  %v16184_v40 = vld [vmem:[#allocation194_spill] sm:$0xff] }
 0x569   : > { %16174 = vst [vmem:[#allocation256_spill] sm:$0xff] %v13772_v0  ;;  %16175 = vst [vmem:[#allocation96_spill] sm:$0xff] %v13774_v48  ;;  %8501 = vpow2.f32 %v16176_v31  ;;  %v6279_v42 = vadd.f32 %v6211_v57, %v6210_v50  ;;  %v13779_v58 = vpop.eup %8485  ;;  %v3529_v25 = vsub.f32 0.0, %v13735_v63  ;;  %v3528_v15 = vsub.f32 0.0, %v13739_v6  ;;  %v16183_v50 = vld [vmem:[#allocation207_spill] sm:$0xff]  ;;  %v16192_v48 = vld [vmem:[#allocation165_spill] sm:$0xff] }
 0x56a   : > { %16172 = vst [vmem:[#allocation62_spill] sm:$0xff] %v13768_v3  ;;  %v13777_v24 = vadd.f32 %v6278_v22, %v6246_v53  ;;  %16178 = vst [vmem:[#allocation85_spill] sm:$0xff] %v13779_v58  ;;  %8503 = vrcp.f32 %v4217_v41  ;;  %v8488_v38 = vpop.eup %8487  ;;  %v13784_v44 = vmul.f32 1.442695, %v3527_v56  ;;  %v5608_v53 = vpop.f32.mrb[208].mxu0  ;;  %v3535_v41 = vsub.f32 0.0, %v13768_v3 }
 0x56b   : > { %8505 = vpow2.f32 %v16179_v27  ;;  %v13787_v61 = vadd.f32 %v6279_v42, %v6247_v18  ;;  %v5801_v22 = vpop.f32.mrb[240].mxu1  ;;  %v13789_v33 = vpop.eup %8489  ;;  %v5964_v37 = vmul.f32 %v5608_v53, %v16183_v50  ;;  %v16185_v56 = vld [vmem:[#allocation164_spill] sm:$0xff]  ;;  %v3537_v27 = vsub.f32 0.0, %v13772_v0  ;;  %v16186_v18 = vld [vmem:[#allocation201_spill] sm:$0xff] }
 0x56c   : > { %16177 = vst [vmem:[#allocation205_spill] sm:$0xff] %v13777_v24  ;;  %16180 = vst [vmem:[#allocation258_spill] sm:$0xff] %v13784_v44  ;;  %8507 = vrcp.f32 %v4216_v7  ;;  %v5966_v57 = vmul.f32 %v5801_v22, %v16184_v40  ;;  %v5610_v28 = vpop.f32.mrb[209].mxu0  ;;  %v5803_v2 = vpop.f32.mrb[241].mxu1  ;;  %v4223_v3 = vadd.f32 1.0, %v8488_v38  ;;  %v16188_v53 = vld [vmem:[#allocation208_spill] sm:$0xff] }
 0x56d   : > { %16181 = vst [vmem:[#allocation95_spill] sm:$0xff] %v13787_v61  ;;  %16182 = vst [vmem:[#allocation69_spill] sm:$0xff] %v13789_v33  ;;  %v8492_v31 = vpop.eup %8491  ;;  %8509 = vpow2.f32 %v16185_v56  ;;  %v5965_v42 = vmul.f32 %v5610_v28, %v16186_v18  ;;  %v16187_v61 = vld [vmem:[#allocation202_spill] sm:$0xff]  ;;  %v5612_v46 = vpop.f32.mrb[210].mxu0  ;;  %v16189_v22 = vld [vmem:[#allocation209_spill] sm:$0xff] }
 0x56e   : > { %v5967_v24 = vmul.f32 %v5803_v2, %v16187_v61  ;;  %v5805_v6 = vpop.f32.mrb[242].mxu1  ;;  %v13798_v7 = vpop.eup %8493  ;;  %8511 = vrcp.f32 %v4218_v60  ;;  %v5972_v50 = vmul.f32 %v5612_v46, %v16188_v53  ;;  %v16191_v18 = vld [vmem:[#allocation211_spill] sm:$0xff]  ;;  %v4225_v58 = vadd.f32 1.0, %v8492_v31  ;;  %v16195_v46 = vld [vmem:[#allocation166_spill] sm:$0xff] }
 0x56f   : > { %v5974_v40 = vmul.f32 %v5805_v6, %v16189_v22  ;;  %v5614_v63 = vpop.f32.mrb[211].mxu0  ;;  %v5807_v44 = vpop.f32.mrb[243].mxu1  ;;  %v6280_v56 = vadd.f32 %v5965_v42, %v5964_v37  ;;  %8513 = vpow2.f32 %v16192_v48  ;;  %v13807_v60 = vmul.f32 1.442695, %v3529_v25  ;;  %v16200_v25 = vld [vmem:[#allocation167_spill] sm:$0xff] }
 0x570   : > { %v13802_v33 = vpop.eup %8495  ;;  %v6312_v0 = vadd.f32 %v5967_v24, %v5966_v57  ;;  %v5973_v28 = vmul.f32 %v5614_v63, %v13306_v11  ;;  %v5975_v61 = vmul.f32 %v5807_v44, %v16191_v18  ;;  %v13809_v38 = vmul.f32 1.442695, %v3528_v15  ;;  %v16198_v63 = vld [vmem:[#allocation309_spill] sm:$0xff]  ;;  %v5618_v57 = vpop.f32.mrb[212].mxu0  ;;  %v16202_v31 = vld [vmem:[#allocation331_spill] sm:$0xff] }
 0x571   : > { %16190 = vst [vmem:[#allocation30_spill] sm:$0xff] %v13802_v33  ;;  %v8498_v2 = vpop.eup %8497  ;;  %16193 = vst [vmem:[#allocation101_spill] sm:$0xff] %v13807_v60  ;;  %8515 = vpow2.f32 %v16195_v46  ;;  %v13812_v24 = vmul.f32 1.442695, %v3530_v4  ;;  %v13814_v11 = vmul.f32 1.442695, %v3535_v41  ;;  %v13818_v44 = vadd.f32 %v16198_v63, %v12125_v8 }
 0x572   : > { %16194 = vst [vmem:[#allocation86_spill] sm:$0xff] %v13809_v38  ;;  %v6376_v6 = vadd.f32 %v6312_v0, %v6280_v56  ;;  %v6281_v53 = vadd.f32 %v5973_v28, %v5972_v50  ;;  %v6313_v22 = vadd.f32 %v5975_v61, %v5974_v40  ;;  %v8500_v33 = vpop.eup %8499  ;;  %8517 = vrcp.f32 %v4223_v3  ;;  %v5811_v0 = vpop.f32.mrb[244].mxu1  ;;  %v16203_v41 = vld [vmem:[#allocation222_spill] sm:$0xff]  ;;  %v16204_v61 = vld [vmem:[#allocation224_spill] sm:$0xff]  ;;  %v16205_v63 = vld [vmem:[#allocation233_spill] sm:$0xff] }
 0x573   : > { %16196 = vst [vmem:[#allocation31_spill] sm:$0xff] %v13812_v24  ;;  %16197 = vst [vmem:[#allocation102_spill] sm:$0xff] %v13814_v11  ;;  %v8502_v48 = vpop.eup %8501  ;;  %8519 = vpow2.f32 %v16200_v25  ;;  %v13821_v15 = vmul.f32 1.442695, %v3537_v27  ;;  %v4224_v3 = vadd.f32 1.0, %v8498_v2  ;;  %v5980_v4 = vmul.f32 %v5618_v57, %v13340_v14  ;;  %v5620_v8 = vpop.f32.mrb[213].mxu0 }
 0x574   : > { %16199 = vst [vmem:[#allocation290_spill] sm:$0xff] %v13818_v44  ;;  %v6377_v37 = vadd.f32 %v6313_v22, %v6281_v53  ;;  %v6408_v42 = vadd.f32 %v6376_v6, %v16202_v31  ;;  %v13824_v50 = vpop.eup %8503  ;;  %8521 = vrcp.f32 %v4225_v58  ;;  %v5982_v40 = vmul.f32 %v5811_v0, %v16203_v41  ;;  %v5813_v56 = vpop.f32.mrb[245].mxu1  ;;  %v16206_v2 = vld [vmem:[#allocation168_spill] sm:$0xff]  ;;  %v16207_v57 = vld [vmem:[#allocation237_spill] sm:$0xff] }
 0x575   : > { %16201 = vst [vmem:[#allocation243_spill] sm:$0xff] %v13821_v15  ;;  %v8506_v28 = vpop.eup %8505  ;;  %v4226_v18 = vadd.f32 1.0, %v8500_v33  ;;  %v5981_v27 = vmul.f32 %v5620_v8, %v16204_v61  ;;  %v5983_v46 = vmul.f32 %v5813_v56, %v13359_v29  ;;  %v5622_v53 = vpop.f32.mrb[214].mxu0  ;;  %v4231_v58 = vadd.f32 1.0, %v8502_v48  ;;  %v16208_v61 = vld [vmem:[#allocation239_spill] sm:$0xff]  ;;  %v16209_v56 = vld [vmem:[#allocation88_spill] sm:$0xff] }
 0x576   : > { %v5815_v22 = vpop.f32.mrb[246].mxu1  ;;  %v6409_v6 = vadd.f32 %v6377_v37, %v16205_v63  ;;  %v13831_v25 = vpop.eup %8507  ;;  %8523 = vpow2.f32 %v16206_v2  ;;  %v5988_v14 = vmul.f32 %v5622_v53, %v13378_v9  ;;  %v4233_v37 = vadd.f32 1.0, %v8506_v28  ;;  %v16210_v48 = vld [vmem:[#allocation310_spill] sm:$0xff] }
 0x577   : > { %v5990_v0 = vmul.f32 %v5815_v22, %v16207_v57  ;;  %v5624_v31 = vpop.f32.mrb[215].mxu0  ;;  %v5817_v41 = vpop.f32.mrb[247].mxu1  ;;  %v6282_v15 = vadd.f32 %v5981_v27, %v5980_v4  ;;  %v6314_v8 = vadd.f32 %v5983_v46, %v5982_v40  ;;  %8525 = vrcp.f32 %v4224_v3  ;;  %v16212_v40 = vld [vmem:[#allocation170_spill] sm:$0xff]  ;;  %v16213_v46 = vld [vmem:[#allocation72_spill] sm:$0xff] }
 0x578   : > { %v8510_v33 = vpop.eup %8509  ;;  %v5989_v29 = vmul.f32 %v5624_v31, %v16208_v61  ;;  %v5991_v11 = vmul.f32 %v5817_v41, %v16209_v56  ;;  %v13842_v63 = vadd.f32 %v16210_v48, %v12158_v49  ;;  %v6440_v9 = vpack.c.bf16 %v6409_v6, %v6408_v42  ;;  %v16214_v31 = vld [vmem:[#allocation225_spill] sm:$0xff]  ;;  %v16215_v49 = vld [vmem:[#allocation206_spill] sm:$0xff] }
 0x579   : > { %v13838_v24 = vpop.eup %8511  ;;  %8527 = vrcp.f32 %v4226_v18  ;;  %v6378_v53 = vadd.f32 %v6314_v8, %v6282_v15  ;;  %v4232_v4 = vadd.f32 1.0, %v8510_v33  ;;  %v3536_v27 = vsub.f32 0.0, %v13818_v44  ;;  %v5628_v18 = vpop.f32.mrb[216].mxu0  ;;  %v16216_v6 = vld [vmem:[#allocation73_spill] sm:$0xff] }
 0x57a   : > { %16211 = vst [vmem:[#allocation259_spill] sm:$0xff] %v13842_v63  ;;  %v6283_v22 = vadd.f32 %v5989_v29, %v5988_v14  ;;  %v6315_v2 = vadd.f32 %v5991_v11, %v5990_v0  ;;  %v8514_v57 = vpop.eup %8513  ;;  %8529 = vpow2.f32 %v16212_v40  ;;  %7266 = vmatprep.mubr.bf16.mxu0 %v6440_v9  ;;  %v13848_v3 = vmul.f32 %v16214_v31, %v16213_v46  ;;  %v5821_v15 = vpop.f32.mrb[248].mxu1  ;;  %v16217_v11 = vld [vmem:[#allocation226_spill] sm:$0xff]  ;;  %v16218_v8 = vld [vmem:[#allocation89_spill] sm:$0xff] }
 0x57b   : > { %v8516_v28 = vpop.eup %8515  ;;  %8531 = vrcp.f32 %v4231_v58  ;;  %v6410_v41 = vadd.f32 %v6378_v53, %v16215_v49  ;;  %v13853_v14 = vmul.f32 %v16217_v11, %v16216_v6  ;;  %v3538_v33 = vsub.f32 0.0, %v13842_v63  ;;  %v16219_v29 = vld [vmem:[#allocation325_spill] sm:$0xff]  ;;  %v5630_v48 = vpop.f32.mrb[217].mxu0 }
 0x57c   : > { %v6379_v42 = vadd.f32 %v6315_v2, %v6283_v22  ;;  %v13855_v0 = vpop.eup %8517  ;;  %8533 = vrcp.f32 %v4233_v37  ;;  %v5996_v61 = vmul.f32 %v5628_v18, %v16218_v8  ;;  %v5998_v56 = vmul.f32 %v5821_v15, %v16219_v29  ;;  %v5823_v58 = vpop.f32.mrb[249].mxu1  ;;  %v16220_v22 = vld [vmem:[#allocation238_spill] sm:$0xff] }
 0x57d   : > { %v8520_v9 = vpop.eup %8519  ;;  %v4234_v53 = vadd.f32 1.0, %v8514_v57  ;;  %v5997_v40 = vmul.f32 %v5630_v48, %v13486_v54  ;;  %v5999_v46 = vmul.f32 %v5823_v58, %v13493_v5  ;;  %v5632_v31 = vpop.f32.mrb[218].mxu0  ;;  %8535 = vrcp.f32 %v4232_v4  ;;  %v16221_v48 = vld [vmem:[#allocation214_spill] sm:$0xff] }
 0x57e   : > { %v6411_v2 = vadd.f32 %v6379_v42, %v16220_v22  ;;  %v5825_v49 = vpop.f32.mrb[250].mxu1  ;;  %v13863_v6 = vpop.eup %8521  ;;  %v4239_v37 = vadd.f32 1.0, %v8516_v28  ;;  %v6004_v18 = vmul.f32 %v5632_v31, %v13497_v45  ;;  %8537 = vpow2.f32 %v16221_v48  ;;  %v16223_v4 = vld [vmem:[#allocation74_spill] sm:$0xff]  ;;  %v16224_v28 = vld [vmem:[#allocation231_spill] sm:$0xff] }
 0x57f   : > { %v6006_v15 = vmul.f32 %v5825_v49, %v13512_v20  ;;  %v5634_v11 = vpop.f32.mrb[219].mxu0  ;;  %v5827_v8 = vpop.f32.mrb[251].mxu1  ;;  %v6284_v57 = vadd.f32 %v5997_v40, %v5996_v61  ;;  %v6316_v63 = vadd.f32 %v5999_v46, %v5998_v56  ;;  %v13869_v5 = vmul.f32 1.442695, %v3536_v27  ;;  %v16225_v20 = vld [vmem:[#allocation22_spill] sm:$0xff]  ;;  %v16226_v56 = vld [vmem:[#allocation75_spill] sm:$0xff] }
 0x580   : > { %v6441_v29 = vpack.c.bf16 %v6411_v2, %v6410_v41  ;;  %v6005_v42 = vmul.f32 %v5634_v11, %v13519_v30  ;;  %v8524_v54 = vpop.eup %8523  ;;  %v6007_v58 = vmul.f32 %v5827_v8, %v13523_v32  ;;  %v13874_v22 = vmul.f32 %v16224_v28, %v16223_v4  ;;  %v16227_v2 = vld [vmem:[#allocation322_spill] sm:$0xff]  ;;  %v16228_v40 = vld [vmem:[#allocation76_spill] sm:$0xff]  ;;  %v16231_v8 = vld [vmem:[#allocation213_spill] sm:$0xff] }
 0x581   : > { %16222 = vst [vmem:[#allocation124_spill] sm:$0xff] %v13869_v5  ;;  %v4241_v45 = vadd.f32 1.0, %v8520_v9  ;;  %8539 = vpow2.f32 %v16225_v20  ;;  %v6380_v31 = vadd.f32 %v6316_v63, %v6284_v57  ;;  %v13877_v61 = vpop.eup %8525  ;;  %v13881_v27 = vmul.f32 %v16227_v2, %v16226_v56  ;;  %v16229_v32 = vld [vmem:[#allocation90_spill] sm:$0xff]  ;;  %v5638_v63 = vpop.f32.mrb[220].mxu0 }
 0x582   : > { %v6285_v41 = vadd.f32 %v6005_v42, %v6004_v18  ;;  %7267 = vmatmul.mubr.bf16.vlgmr.msra.gmra.mrb[16].mxu0 %v6441_v29  ;;  %8541 = vrcp.f32 %v4234_v53  ;;  %v6317_v30 = vadd.f32 %v6007_v58, %v6006_v15  ;;  %v13885_v46 = vmul.f32 %v16229_v32, %v16228_v40  ;;  %v5831_v18 = vpop.f32.mrb[252].mxu1  ;;  %v16232_v15 = vld [vmem:[#allocation216_spill] sm:$0xff]  ;;  %v5640_v58 = vpop.f32.mrb[221].mxu0  ;;  %v16235_v40 = vld [vmem:[#allocation241_spill] sm:$0xff]  ;;  %v16259_v5 = vld [vmem:[#allocation82_spill] sm:$0xff] }
 0x583   : > { %v13887_v49 = vpop.eup %8527  ;;  %8543 = vrcp.f32 %v4239_v37  ;;  %v4240_v9 = vadd.f32 1.0, %v8524_v54  ;;  %v13889_v11 = vmul.f32 1.442695, %v3538_v33  ;;  %v6412_v29 = vadd.f32 %v6380_v31, %v16231_v8  ;;  %v5833_v4 = vpop.f32.mrb[253].mxu1  ;;  %v16233_v31 = vld [vmem:[#allocation109_spill] sm:$0xff] }
 0x584   : > { %v8530_v53 = vpop.eup %8529  ;;  %8545 = vpow2.f32 %v16232_v15  ;;  %v6381_v57 = vadd.f32 %v6317_v30, %v6285_v41  ;;  %v6012_v42 = vmul.f32 %v5638_v63, %v13527_v52  ;;  %v6014_v48 = vmul.f32 %v5831_v18, %v13531_v26  ;;  %v5642_v54 = vpop.f32.mrb[222].mxu0  ;;  %v16234_v52 = vld [vmem:[#allocation219_spill] sm:$0xff] }
 0x585   : > { %16230 = vst [vmem:[#allocation32_spill] sm:$0xff] %v13889_v11  ;;  %v13895_v28 = vpop.eup %8531  ;;  %8547 = vrcp.f32 %v4241_v45  ;;  %v6013_v33 = vmul.f32 %v5640_v58, %v13535_v59  ;;  %v6015_v37 = vmul.f32 %v5833_v4, %v13539_v47  ;;  %v5835_v20 = vpop.f32.mrb[254].mxu1  ;;  %v13901_v56 = vmul.f32 %v13454_v35, %v16233_v31  ;;  %v16236_v58 = vld [vmem:[#allocation329_spill] sm:$0xff]  ;;  %v16258_v11 = vld [vmem:[#allocation40_spill] sm:$0xff] }
 0x586   : > { %v13903_v41 = vpop.eup %8533  ;;  %8549 = vpow2.f32 %v16234_v52  ;;  %v6020_v26 = vmul.f32 %v5642_v54, %v13544_v43  ;;  %v6022_v30 = vmul.f32 %v5835_v20, %v13548_v21  ;;  %v5644_v2 = vpop.f32.mrb[223].mxu0  ;;  %v6413_v59 = vadd.f32 %v6381_v57, %v16235_v40  ;;  %v16237_v21 = vld [vmem:[#allocation7_spill] sm:$0xff] }
 0x587   : > { %v5837_v45 = vpop.f32.mrb[255].mxu1  ;;  %v6286_v32 = vadd.f32 %v6013_v33, %v6012_v42  ;;  %v6318_v47 = vadd.f32 %v6015_v37, %v6014_v48  ;;  %v6021_v63 = vmul.f32 %v5644_v2, %v13552_v34  ;;  %v13911_v35 = vpop.eup %8535  ;;  %8551 = vrcp.f32 %v4240_v9  ;;  %v16238_v48 = vld [vmem:[#allocation221_spill] sm:$0xff]  ;;  %v16239_v34 = vld [vmem:[#allocation248_spill] sm:$0xff]  ;;  %v16240_v9 = vld [vmem:[#allocation78_spill] sm:$0xff] }
 0x588   : > { %v6023_v18 = vmul.f32 %v5837_v45, %v13558_v51  ;;  %v4242_v8 = vadd.f32 1.0, %v8530_v53  ;;  %v6442_v15 = vpack.c.bf16 %v6413_v59, %v6412_v29  ;;  %v13915_v43 = vmul.f32 %v13458_v16, %v16236_v58  ;;  %v8538_v42 = vpop.eup %8537  ;;  %v16241_v53 = vld [vmem:[#allocation79_spill] sm:$0xff]  ;;  %v16244_v2 = vld [vmem:[#allocation81_spill] sm:$0xff] }
 0x589   : > { %8553 = vpow2.f32 %v16237_v21  ;;  %v6382_v4 = vadd.f32 %v6318_v47, %v6286_v32  ;;  %v6287_v54 = vadd.f32 %v6021_v63, %v6020_v26  ;;  %v13921_v51 = vmul.f32 %v13467_v17, %v16239_v34  ;;  %v16242_v37 = vld [vmem:[#allocation223_spill] sm:$0xff]  ;;  %v5648_v26 = vpop.f32.mrb[224].mxu0  ;;  %v16245_v45 = vld [vmem:[#allocation245_spill] sm:$0xff]  ;;  %v16247_v32 = vld [vmem:[#allocation296_spill] sm:$0xff] }
 0x58a   : > { %v6319_v57 = vadd.f32 %v6023_v18, %v6022_v30  ;;  %8555 = vpow2.f32 %v16238_v48  ;;  %7270 = vmatprep.mubr.bf16.mxu0 %v6442_v15  ;;  %v13925_v29 = vmul.f32 %v13475_v12, %v16240_v9  ;;  %v13929_v16 = vmul.f32 %v13488_v36, %v16241_v53  ;;  %v16243_v20 = vld [vmem:[#allocation91_spill] sm:$0xff]  ;;  %v5841_v30 = vpop.f32.mrb[0].mxu1  ;;  %v16246_v12 = vld [vmem:[#allocation34_spill] sm:$0xff]  ;;  %v5650_v47 = vpop.f32.mrb[225].mxu0  ;;  %v16248_v18 = vld [vmem:[#allocation217_spill] sm:$0xff] }
 0x58b   : > { %v8540_v33 = vpop.eup %8539  ;;  %8557 = vpow2.f32 %v16242_v37  ;;  %v6414_v31 = vadd.f32 %v6382_v4, %v16243_v20  ;;  %v13935_v17 = vmul.f32 %v16245_v45, %v16244_v2  ;;  %v6028_v59 = vmul.f32 %v5648_v26, %v16246_v12  ;;  %v5843_v63 = vpop.f32.mrb[1].mxu1  ;;  %v16249_v15 = vld [vmem:[#allocation33_spill] sm:$0xff]  ;;  %v16251_v48 = vld [vmem:[#allocation263_spill] sm:$0xff]  ;;  %v16252_v9 = vld [vmem:[#allocation268_spill] sm:$0xff] }
 0x58c   : > { %v6383_v52 = vadd.f32 %v6319_v57, %v6287_v54  ;;  %v13937_v40 = vpop.eup %8541  ;;  %8559 = vrcp.f32 %v4242_v8  ;;  %v6030_v36 = vmul.f32 %v5841_v30, %v16247_v32  ;;  %v13943_v58 = vmul.f32 %v16249_v15, %v16248_v18  ;;  %v16250_v54 = vld [vmem:[#allocation218_spill] sm:$0xff]  ;;  %v5652_v8 = vpop.f32.mrb[226].mxu0  ;;  %v16253_v30 = vld [vmem:[#allocation227_spill] sm:$0xff]  ;;  %v16254_v2 = vld [vmem:[#allocation37_spill] sm:$0xff] }
 0x58d   : > { %v13945_v21 = vpop.eup %8543  ;;  %v4247_v4 = vadd.f32 1.0, %v8538_v42  ;;  %v6029_v34 = vmul.f32 %v5650_v47, %v16251_v48  ;;  %v6031_v53 = vmul.f32 %v5843_v63, %v16252_v9  ;;  %v5845_v37 = vpop.f32.mrb[2].mxu1  ;;  %v4249_v26 = vadd.f32 1.0, %v8540_v33  ;;  %v16255_v12 = vld [vmem:[#allocation68_spill] sm:$0xff]  ;;  %v16256_v47 = vld [vmem:[#allocation27_spill] sm:$0xff] }
 0x58e   : > { %v6415_v57 = vadd.f32 %v6383_v52, %v16250_v54  ;;  %v8546_v20 = vpop.eup %8545  ;;  %8561 = vpow2.f32 %v16253_v30  ;;  %v6036_v45 = vmul.f32 %v5652_v8, %v16254_v2  ;;  %v6038_v32 = vmul.f32 %v5845_v37, %v16255_v12  ;;  %v5654_v18 = vpop.f32.mrb[227].mxu0  ;;  %v16257_v9 = vld [vmem:[#allocation240_spill] sm:$0xff]  ;;  %v16262_v37 = vld [vmem:[#allocation298_spill] sm:$0xff] }
 0x58f   : > { %v5847_v15 = vpop.f32.mrb[3].mxu1  ;;  %v13953_v44 = vpop.eup %8547  ;;  %v6288_v52 = vadd.f32 %v6029_v34, %v6028_v59  ;;  %v6320_v54 = vadd.f32 %v6031_v53, %v6030_v36  ;;  %v6037_v48 = vmul.f32 %v5654_v18, %v16256_v47  ;;  %8563 = vpow2.f32 %v16257_v9  ;;  %v16260_v30 = vld [vmem:[#allocation260_spill] sm:$0xff]  ;;  %v16264_v34 = vld [vmem:[#allocation87_spill] sm:$0xff]  ;;  %v16265_v53 = vld [vmem:[#allocation13_spill] sm:$0xff] }
 0x590   : > { %v6443_v42 = vpack.c.bf16 %v6415_v57, %v6414_v31  ;;  %v8550_v63 = vpop.eup %8549  ;;  %v6039_v33 = vmul.f32 %v5847_v15, %v16258_v11  ;;  %v13960_v38 = vmul.f32 %v16260_v30, %v16259_v5  ;;  %v16261_v8 = vld [vmem:[#allocation84_spill] sm:$0xff]  ;;  %8565 = vrcp.f32 %v4247_v4  ;;  %v5658_v4 = vpop.f32.mrb[228].mxu0 }
 0x591   : > { %v13964_v2 = vmul.f32 %v16262_v37, %v16261_v8  ;;  %v4248_v12 = vadd.f32 1.0, %v8546_v20  ;;  %v6384_v31 = vadd.f32 %v6320_v54, %v6288_v52  ;;  %v6289_v59 = vadd.f32 %v6037_v48, %v6036_v45  ;;  %v13966_v36 = vpop.eup %8551  ;;  %v16266_v18 = vld [vmem:[#allocation220_spill] sm:$0xff]  ;;  %v5851_v20 = vpop.f32.mrb[4].mxu1  ;;  %v16269_v45 = vld [vmem:[#allocation9_spill] sm:$0xff]  ;;  %v16270_v52 = vld [vmem:[#allocation103_spill] sm:$0xff] }
 0x592   : > { %7271 = vmatmul.mubr.bf16.gmra.mrb[20].mxu0 %v6443_v42  ;;  %16263 = vst [vmem:[#allocation107_spill] sm:$0xff] %v13966_v36  ;;  %8567 = vrcp.f32 %v4249_v26  ;;  %v6321_v57 = vadd.f32 %v6039_v33, %v6038_v32  ;;  %v13970_v11 = vmul.f32 %v16265_v53, %v16264_v34  ;;  %v16267_v5 = vld [vmem:[#allocation312_spill] sm:$0xff]  ;;  %v4250_v9 = vadd.f32 1.0, %v8550_v63  ;;  %v16271_v54 = vld [vmem:[#allocation14_spill] sm:$0xff]  ;;  %v5660_v53 = vpop.f32.mrb[229].mxu0  ;;  %v5853_v63 = vpop.f32.mrb[5].mxu1 }
 0x593   : > { %v13974_v15 = vmul.f32 %v16267_v5, %v16266_v18  ;;  %v8554_v47 = vpop.eup %8553  ;;  %v16268_v30 = vld [vmem:[#allocation280_spill] sm:$0xff]  ;;  %v6416_v42 = vadd.f32 %v6384_v31, %v16269_v45  ;;  %v13980_v26 = vmul.f32 %v16271_v54, %v16270_v52  ;;  %v16273_v8 = vld [vmem:[#allocation94_spill] sm:$0xff]  ;;  %v6046_v34 = vmul.f32 %v5851_v20, %v13666_v62  ;;  %v5855_v45 = vpop.f32.mrb[6].mxu1  ;;  %v16274_v52 = vld [vmem:[#allocation105_spill] sm:$0xff] }
 0x594   : > { %8569 = vpow2.f32 %v16268_v30  ;;  %v8556_v32 = vpop.eup %8555  ;;  %v16272_v48 = vld [vmem:[#allocation244_spill] sm:$0xff]  ;;  %v6385_v33 = vadd.f32 %v6321_v57, %v6289_v59  ;;  %v6044_v37 = vmul.f32 %v5658_v4, %v16273_v8  ;;  %v6045_v5 = vmul.f32 %v5660_v53, %v13689_v39  ;;  %v5662_v30 = vpop.f32.mrb[230].mxu0 }
 0x595   : > { %8571 = vpow2.f32 %v16272_v48  ;;  %v8558_v18 = vpop.eup %8557  ;;  %v6047_v31 = vmul.f32 %v5853_v63, %v13697_v23  ;;  %v13989_v54 = vmul.f32 %v13639_v19, %v16274_v52  ;;  %v4255_v59 = vadd.f32 1.0, %v8554_v47  ;;  %v5664_v4 = vpop.f32.mrb[231].mxu0  ;;  %v16277_v63 = vld [vmem:[#allocation56_spill] sm:$0xff]  ;;  %v16278_v47 = vld [vmem:[#allocation282_spill] sm:$0xff] }
 0x596   : > { %8573 = vrcp.f32 %v4248_v12  ;;  %v13991_v48 = vpop.eup %8559  ;;  %v6052_v57 = vmul.f32 %v5662_v30, %v13705_v1  ;;  %v6054_v62 = vmul.f32 %v5855_v45, %v13716_v55  ;;  %v5857_v20 = vpop.f32.mrb[7].mxu1  ;;  %v16276_v12 = vld [vmem:[#allocation246_spill] sm:$0xff]  ;;  %v6290_v39 = vadd.f32 %v6045_v5, %v6044_v37  ;;  %v16280_v37 = vld [vmem:[#allocation276_spill] sm:$0xff] }
 0x597   : > { %16275 = vst [vmem:[#allocation294_spill] sm:$0xff] %v13991_v48  ;;  %v6417_v8 = vadd.f32 %v6385_v33, %v16276_v12  ;;  %v6322_v53 = vadd.f32 %v6047_v31, %v6046_v34  ;;  %v6053_v23 = vmul.f32 %v5664_v4, %v13722_v10  ;;  %v6055_v60 = vmul.f32 %v5857_v20, %v16277_v63  ;;  %v16279_v33 = vld [vmem:[#allocation106_spill] sm:$0xff]  ;;  %v16285_v4 = vld [vmem:[#allocation324_spill] sm:$0xff]  ;;  %v16288_v12 = vld [vmem:[#allocation55_spill] sm:$0xff] }
 0x598   : > { %v8562_v36 = vpop.eup %8561  ;;  %8575 = vrcp.f32 %v4250_v9  ;;  %v4257_v19 = vadd.f32 1.0, %v8556_v32  ;;  %v4256_v52 = vadd.f32 1.0, %v8558_v18  ;;  %v14001_v34 = vmul.f32 %v16280_v37, %v16279_v33  ;;  %v16281_v10 = vld [vmem:[#allocation110_spill] sm:$0xff]  ;;  %v16283_v9 = vld [vmem:[#allocation111_spill] sm:$0xff]  ;;  %v16284_v32 = vld [vmem:[#allocation293_spill] sm:$0xff] }
 0x599   : > { %v6444_v48 = vpack.c.bf16 %v6417_v8, %v6416_v42  ;;  %8577 = vpow2.f32 %v16278_v47  ;;  %v6386_v1 = vadd.f32 %v6322_v53, %v6290_v39  ;;  %v6291_v30 = vadd.f32 %v6053_v23, %v6052_v57  ;;  %v8564_v45 = vpop.eup %8563  ;;  %v16282_v5 = vld [vmem:[#allocation318_spill] sm:$0xff]  ;;  %v16290_v47 = vld [vmem:[#allocation253_spill] sm:$0xff] }
 0x59a   : > { %v6323_v55 = vadd.f32 %v6055_v60, %v6054_v62  ;;  %8579 = vrcp.f32 %v4255_v59  ;;  %v14005_v31 = vmul.f32 %v16282_v5, %v16281_v10  ;;  %v14009_v18 = vmul.f32 %v16284_v32, %v16283_v9  ;;  %v14011_v42 = vpop.eup %8565  ;;  %v16286_v60 = vld [vmem:[#allocation247_spill] sm:$0xff]  ;;  %v5861_v62 = vpop.f32.mrb[8].mxu1  ;;  %v16287_v20 = vld [vmem:[#allocation114_spill] sm:$0xff] }
 0x59b   : > { %7274 = vmatprep.mubr.bf16.mxu0 %v6444_v48  ;;  %8581 = vpow2.f32 %v16285_v4  ;;  %v6418_v57 = vadd.f32 %v6386_v1, %v16286_v60  ;;  %v5668_v48 = vpop.f32.mrb[232].mxu0  ;;  %v14017_v8 = vmul.f32 %v16288_v12, %v16287_v20  ;;  %v4258_v53 = vadd.f32 1.0, %v8562_v36  ;;  %v16289_v23 = vld [vmem:[#allocation18_spill] sm:$0xff]  ;;  %v5863_v10 = vpop.f32.mrb[9].mxu1  ;;  %v16291_v1 = vld [vmem:[#allocation21_spill] sm:$0xff] }
 0x59c   : > { %v6387_v59 = vadd.f32 %v6323_v55, %v6291_v30  ;;  %v14019_v39 = vpop.eup %8567  ;;  %8583 = vrcp.f32 %v4257_v19  ;;  %v6060_v63 = vmul.f32 %v5668_v48, %v16289_v23  ;;  %v6062_v33 = vmul.f32 %v5861_v62, %v16290_v47  ;;  %v5670_v37 = vpop.f32.mrb[233].mxu0  ;;  %v16292_v19 = vld [vmem:[#allocation8_spill] sm:$0xff] }
 0x59d   : > { %8585 = vrcp.f32 %v4256_v52  ;;  %v6061_v55 = vmul.f32 %v5670_v37, %v13848_v3  ;;  %v6063_v9 = vmul.f32 %v5863_v10, %v13853_v14  ;;  %v5672_v32 = vpop.f32.mrb[234].mxu0  ;;  %v5865_v4 = vpop.f32.mrb[10].mxu1  ;;  %v4263_v20 = vadd.f32 1.0, %v8564_v45  ;;  %v16293_v37 = vld [vmem:[#allocation283_spill] sm:$0xff]  ;;  %v16294_v10 = vld [vmem:[#allocation116_spill] sm:$0xff] }
 0x59e   : > { %v8570_v5 = vpop.eup %8569  ;;  %v6419_v30 = vadd.f32 %v6387_v59, %v16291_v1  ;;  %8587 = vpow2.f32 %v16292_v19  ;;  %v6068_v36 = vmul.f32 %v5672_v32, %v13874_v22  ;;  %v6070_v48 = vmul.f32 %v5865_v4, %v13881_v27  ;;  %v5674_v62 = vpop.f32.mrb[235].mxu0  ;;  %v16295_v1 = vld [vmem:[#allocation277_spill] sm:$0xff]  ;;  %v16296_v27 = vld [vmem:[#allocation11_spill] sm:$0xff] }
 0x59f   : > { %v8572_v60 = vpop.eup %8571  ;;  %v5867_v12 = vpop.f32.mrb[11].mxu1  ;;  %v6292_v59 = vadd.f32 %v6061_v55, %v6060_v63  ;;  %v6324_v47 = vadd.f32 %v6063_v9, %v6062_v33  ;;  %v6069_v3 = vmul.f32 %v5674_v62, %v13885_v46  ;;  %v4265_v14 = vadd.f32 1.0, %v8570_v5  ;;  %v16297_v46 = vld [vmem:[#allocation70_spill] sm:$0xff] }
 0x5a0   : > { %v14029_v23 = vpop.eup %8573  ;;  %v6445_v52 = vpack.c.bf16 %v6419_v30, %v6418_v57  ;;  %8589 = vpow2.f32 %v16293_v37  ;;  %v6071_v45 = vmul.f32 %v5867_v12, %v13901_v56  ;;  %v14036_v19 = vmul.f32 %v16295_v1, %v16294_v10  ;;  %v16298_v33 = vld [vmem:[#allocation254_spill] sm:$0xff]  ;;  %v16299_v30 = vld [vmem:[#allocation125_spill] sm:$0xff]  ;;  %v5871_v62 = vpop.f32.mrb[12].mxu1 }
 0x5a1   : > { %v4264_v22 = vadd.f32 1.0, %v8572_v60  ;;  %8591 = vpow2.f32 %v16296_v27  ;;  %v6388_v32 = vadd.f32 %v6324_v47, %v6292_v59  ;;  %v6293_v4 = vadd.f32 %v6069_v3, %v6068_v36  ;;  %v16300_v56 = vld [vmem:[#allocation281_spill] sm:$0xff]  ;;  %v5678_v60 = vpop.f32.mrb[236].mxu0  ;;  %v16302_v36 = vld [vmem:[#allocation120_spill] sm:$0xff]  ;;  %v5873_v1 = vpop.f32.mrb[13].mxu1 }
 0x5a2   : > { %7275 = vmatmul.mubr.bf16.gmra.mrb[24].mxu0 %v6445_v52  ;;  %v14039_v57 = vpop.eup %8575  ;;  %8593 = vrcp.f32 %v4258_v53  ;;  %v6325_v63 = vadd.f32 %v6071_v45, %v6070_v48  ;;  %v14043_v5 = vmul.f32 %v16298_v33, %v16297_v46  ;;  %v14047_v55 = vmul.f32 %v16300_v56, %v16299_v30  ;;  %v16301_v12 = vld [vmem:[#allocation249_spill] sm:$0xff]  ;;  %v16303_v53 = vld [vmem:[#allocation122_spill] sm:$0xff]  ;;  %v16304_v48 = vld [vmem:[#allocation96_spill] sm:$0xff]  ;;  %v5680_v10 = vpop.f32.mrb[237].mxu0 }
 0x5a3   : > { %v8578_v9 = vpop.eup %8577  ;;  %8595 = vrcp.f32 %v4263_v20  ;;  %v6420_v59 = vadd.f32 %v6388_v32, %v16301_v12  ;;  %v14052_v52 = vmul.f32 %v13763_v13, %v16302_v36  ;;  %v14056_v47 = vmul.f32 %v16304_v48, %v16303_v53  ;;  %v5682_v46 = vpop.f32.mrb[238].mxu0  ;;  %v16305_v30 = vld [vmem:[#allocation128_spill] sm:$0xff]  ;;  %v16306_v56 = vld [vmem:[#allocation85_spill] sm:$0xff] }
 0x5a4   : > { %v14058_v3 = vpop.eup %8579  ;;  %8597 = vrcp.f32 %v4265_v14  ;;  %v6389_v37 = vadd.f32 %v6325_v63, %v6293_v4  ;;  %v6076_v45 = vmul.f32 %v5678_v60, %v13915_v43  ;;  %v6078_v20 = vmul.f32 %v5871_v62, %v13921_v51  ;;  %v5875_v33 = vpop.f32.mrb[14].mxu1 }
 0x5a5   : > { %v8582_v27 = vpop.eup %8581  ;;  %8599 = vrcp.f32 %v4264_v22  ;;  %v6077_v32 = vmul.f32 %v5680_v10, %v13925_v29  ;;  %v6079_v13 = vmul.f32 %v5873_v1, %v13929_v16  ;;  %v14066_v12 = vmul.f32 %v16306_v56, %v16305_v30  ;;  %v5684_v63 = vpop.f32.mrb[239].mxu0  ;;  %v16307_v22 = vld [vmem:[#allocation23_spill] sm:$0xff]  ;;  %v16308_v30 = vld [vmem:[#allocation28_spill] sm:$0xff] }
 0x5a6   : > { %v14068_v14 = vpop.eup %8583  ;;  %v4266_v4 = vadd.f32 1.0, %v8578_v9  ;;  %v6084_v43 = vmul.f32 %v5682_v46, %v13935_v17  ;;  %v6086_v51 = vmul.f32 %v5875_v33, %v13943_v58  ;;  %v5877_v60 = vpop.f32.mrb[15].mxu1  ;;  %v6421_v62 = vadd.f32 %v6389_v37, %v16307_v22  ;;  %v16309_v17 = vld [vmem:[#allocation131_spill] sm:$0xff]  ;;  %v16310_v46 = vld [vmem:[#allocation69_spill] sm:$0xff] }
 0x5a7   : > { %v14073_v29 = vpop.eup %8585  ;;  %v6294_v16 = vadd.f32 %v6077_v32, %v6076_v45  ;;  %v6326_v36 = vadd.f32 %v6079_v13, %v6078_v20  ;;  %v6085_v53 = vmul.f32 %v5684_v63, %v13960_v38  ;;  %v6087_v48 = vmul.f32 %v5877_v60, %v13964_v2  ;;  %v16311_v33 = vld [vmem:[#allocation319_spill] sm:$0xff]  ;;  %v16312_v20 = vld [vmem:[#allocation16_spill] sm:$0xff]  ;;  %v16315_v32 = vld [vmem:[#allocation30_spill] sm:$0xff] }
 0x5a8   : > { %v8588_v10 = vpop.eup %8587  ;;  %v4271_v1 = vadd.f32 1.0, %v8582_v27  ;;  %8601 = vpow2.f32 %v16308_v30  ;;  %v6446_v9 = vpack.c.bf16 %v6421_v62, %v6420_v59  ;;  %v14080_v58 = vmul.f32 %v16310_v46, %v16309_v17  ;;  %v16313_v38 = vld [vmem:[#allocation132_spill] sm:$0xff]  ;;  %v16314_v27 = vld [vmem:[#allocation133_spill] sm:$0xff]  ;;  %v16316_v13 = vld [vmem:[#allocation134_spill] sm:$0xff] }
 0x5a9   : > { %8603 = vpow2.f32 %v16311_v33  ;;  %v6390_v37 = vadd.f32 %v6326_v36, %v6294_v16  ;;  %v6295_v56 = vadd.f32 %v6085_v53, %v6084_v43  ;;  %v6327_v22 = vadd.f32 %v6087_v48, %v6086_v51  ;;  %v16317_v43 = vld [vmem:[#allocation250_spill] sm:$0xff]  ;;  %v5688_v16 = vpop.f32.mrb[240].mxu0  ;;  %v5881_v36 = vpop.f32.mrb[16].mxu1  ;;  %v16318_v53 = vld [vmem:[#allocation137_spill] sm:$0xff] }
 0x5aa   : > { %v8590_v45 = vpop.eup %8589  ;;  %8605 = vpow2.f32 %v16312_v20  ;;  %7278 = vmatprep.mubr.bf16.mxu0 %v6446_v9  ;;  %v14086_v2 = vmul.f32 %v13798_v7, %v16313_v38  ;;  %v14090_v59 = vmul.f32 %v16315_v32, %v16314_v27  ;;  %v14094_v63 = vmul.f32 %v13824_v50, %v16316_v13  ;;  %v5690_v17 = vpop.f32.mrb[241].mxu0 }
 0x5ab   : > { %v8592_v60 = vpop.eup %8591  ;;  %8607 = vrcp.f32 %v4266_v4  ;;  %v6422_v51 = vadd.f32 %v6390_v37, %v16317_v43  ;;  %v6391_v62 = vadd.f32 %v6327_v22, %v6295_v56  ;;  %v14099_v48 = vmul.f32 %v13831_v25, %v16318_v53  ;;  %v5883_v46 = vpop.f32.mrb[17].mxu1  ;;  %v16319_v37 = vld [vmem:[#allocation93_spill] sm:$0xff]  ;;  %v16322_v53 = vld [vmem:[#allocation118_spill] sm:$0xff] }
 0x5ac   : > { %v14101_v7 = vpop.eup %8593  ;;  %8609 = vrcp.f32 %v4271_v1  ;;  %v4273_v30 = vadd.f32 1.0, %v8588_v10  ;;  %v6092_v9 = vmul.f32 %v5688_v16, %v13970_v11  ;;  %v6094_v50 = vmul.f32 %v5881_v36, %v13974_v15  ;;  %v5692_v20 = vpop.f32.mrb[242].mxu0  ;;  %v16320_v1 = vld [vmem:[#allocation50_spill] sm:$0xff]  ;;  %v16321_v36 = vld [vmem:[#allocation139_spill] sm:$0xff] }
 0x5ad   : > { %v14105_v4 = vpop.eup %8595  ;;  %v4272_v33 = vadd.f32 1.0, %v8590_v45  ;;  %v6423_v56 = vadd.f32 %v6391_v62, %v16319_v37  ;;  %v6093_v22 = vmul.f32 %v5690_v17, %v13980_v26  ;;  %v6095_v25 = vmul.f32 %v5883_v46, %v13989_v54  ;;  %v5885_v38 = vpop.f32.mrb[18].mxu1  ;;  %v16326_v46 = vld [vmem:[#allocation147_spill] sm:$0xff] }
 0x5ae   : > { %v14110_v27 = vpop.eup %8597  ;;  %v4274_v10 = vadd.f32 1.0, %v8592_v60  ;;  %8611 = vpow2.f32 %v16320_v1  ;;  %v6100_v11 = vmul.f32 %v5692_v20, %v14001_v34  ;;  %v6102_v15 = vmul.f32 %v5885_v38, %v14005_v31  ;;  %v5694_v32 = vpop.f32.mrb[243].mxu0  ;;  %v16329_v38 = vld [vmem:[#allocation152_spill] sm:$0xff] }
 0x5af   : > { %v5887_v13 = vpop.f32.mrb[19].mxu1  ;;  %v14115_v45 = vpop.eup %8599  ;;  %v6447_v43 = vpack.c.bf16 %v6423_v56, %v6422_v51  ;;  %v6296_v62 = vadd.f32 %v6093_v22, %v6092_v9  ;;  %v6328_v26 = vadd.f32 %v6095_v25, %v6094_v50  ;;  %v6101_v54 = vmul.f32 %v5694_v32, %v14009_v18  ;;  %v16323_v51 = vld [vmem:[#allocation141_spill] sm:$0xff]  ;;  %v16325_v50 = vld [vmem:[#allocation144_spill] sm:$0xff]  ;;  %v16327_v22 = vld [vmem:[#allocation10_spill] sm:$0xff] }
 0x5b0   : > { %8613 = vrcp.f32 %v4273_v30  ;;  %v6103_v16 = vmul.f32 %v5887_v13, %v14017_v8  ;;  %v14121_v60 = vmul.f32 %v13838_v24, %v16321_v36  ;;  %v14125_v34 = vmul.f32 %v13855_v0, %v16322_v53  ;;  %v16324_v30 = vld [vmem:[#allocation278_spill] sm:$0xff]  ;;  %v5698_v37 = vpop.f32.mrb[244].mxu0  ;;  %v5891_v56 = vpop.f32.mrb[20].mxu1 }
 0x5b1   : > { %8615 = vrcp.f32 %v4272_v33  ;;  %v6392_v31 = vadd.f32 %v6328_v26, %v6296_v62  ;;  %v6297_v17 = vadd.f32 %v6101_v54, %v6100_v11  ;;  %7279 = vmatmul.mubr.bf16.gmra.mrb[28].mxu0 %v6447_v43  ;;  %v14129_v9 = vmul.f32 %v13863_v6, %v16323_v51  ;;  %v16328_v6 = vld [vmem:[#allocation150_spill] sm:$0xff]  ;;  %v16330_v11 = vld [vmem:[#allocation323_spill] sm:$0xff]  ;;  %v5700_v32 = vpop.f32.mrb[245].mxu0  ;;  %v5893_v13 = vpop.f32.mrb[21].mxu1  ;;  %v16332_v51 = vld [vmem:[#allocation257_spill] sm:$0xff] }
 0x5b2   : > { %v8602_v18 = vpop.eup %8601  ;;  %8617 = vpow2.f32 %v16324_v30  ;;  %v6329_v8 = vadd.f32 %v6103_v16, %v6102_v15  ;;  %v14134_v24 = vmul.f32 %v13877_v61, %v16325_v50  ;;  %v14138_v0 = vmul.f32 %v13887_v49, %v16326_v46  ;;  %v16331_v26 = vld [vmem:[#allocation279_spill] sm:$0xff]  ;;  %v5702_v54 = vpop.f32.mrb[246].mxu0 }
 0x5b3   : > { %v8604_v33 = vpop.eup %8603  ;;  %8619 = vrcp.f32 %v4274_v10  ;;  %v6424_v25 = vadd.f32 %v6392_v31, %v16327_v22  ;;  %v14143_v20 = vmul.f32 %v13895_v28, %v16328_v6  ;;  %v14147_v1 = vmul.f32 %v13903_v41, %v16329_v38  ;;  %v5895_v16 = vpop.f32.mrb[22].mxu1 }
 0x5b4   : > { %v8606_v61 = vpop.eup %8605  ;;  %8621 = vpow2.f32 %v16330_v11  ;;  %v6393_v15 = vadd.f32 %v6329_v8, %v6297_v17  ;;  %v6108_v49 = vmul.f32 %v5698_v37, %v14036_v19  ;;  %v6110_v10 = vmul.f32 %v5891_v56, %v14043_v5  ;;  %v5704_v31 = vpop.f32.mrb[247].mxu0  ;;  %v16333_v37 = vld [vmem:[#allocation19_spill] sm:$0xff] }
 0x5b5   : > { %v14152_v43 = vpop.eup %8607  ;;  %v4279_v62 = vadd.f32 1.0, %v8602_v18  ;;  %8623 = vpow2.f32 %v16331_v26  ;;  %v6109_v28 = vmul.f32 %v5700_v32, %v14047_v55  ;;  %v6111_v41 = vmul.f32 %v5893_v13, %v14052_v52  ;;  %v5897_v17 = vpop.f32.mrb[23].mxu1 }
 0x5b6   : > { %v14157_v36 = vpop.eup %8609  ;;  %v4281_v53 = vadd.f32 1.0, %v8604_v33  ;;  %v6116_v19 = vmul.f32 %v5702_v54, %v14056_v47  ;;  %v6118_v5 = vmul.f32 %v5895_v16, %v14066_v12  ;;  %v6425_v30 = vadd.f32 %v6393_v15, %v16332_v51  ;;  %v16334_v33 = vld [vmem:[#allocation153_spill] sm:$0xff]  ;;  %v5901_v26 = vpop.f32.mrb[24].mxu1 }
 0x5b7   : > { %v6298_v18 = vadd.f32 %v6109_v28, %v6108_v49  ;;  %v6330_v8 = vadd.f32 %v6111_v41, %v6110_v10  ;;  %v6117_v50 = vmul.f32 %v5704_v31, %v14080_v58  ;;  %v6119_v55 = vmul.f32 %v5897_v17, %v14086_v2  ;;  %v16335_v58 = vld [vmem:[#allocation140_spill] sm:$0xff]  ;;  %v16338_v49 = vld [vmem:[#allocation258_spill] sm:$0xff]  ;;  %v16339_v10 = vld [vmem:[#allocation261_spill] sm:$0xff] }
 0x5b8   : > { %v8612_v52 = vpop.eup %8611  ;;  %v4280_v46 = vadd.f32 1.0, %v8606_v61  ;;  %8625 = vpow2.f32 %v16333_v37  ;;  %v6448_v56 = vpack.c.bf16 %v6425_v30, %v6424_v25  ;;  %v14167_v47 = vmul.f32 %v13911_v35, %v16334_v33  ;;  %v16336_v61 = vld [vmem:[#allocation158_spill] sm:$0xff]  ;;  %v16337_v25 = vld [vmem:[#allocation159_spill] sm:$0xff]  ;;  %v16340_v28 = vld [vmem:[#allocation161_spill] sm:$0xff] }
 0x5b9   : > { %8627 = vrcp.f32 %v4279_v62  ;;  %v6394_v12 = vadd.f32 %v6330_v8, %v6298_v18  ;;  %v6299_v22 = vadd.f32 %v6117_v50, %v6116_v19  ;;  %v6331_v6 = vadd.f32 %v6119_v55, %v6118_v5  ;;  %v5708_v62 = vpop.f32.mrb[248].mxu0  ;;  %v16342_v19 = vld [vmem:[#allocation162_spill] sm:$0xff]  ;;  %v16344_v51 = vld [vmem:[#allocation101_spill] sm:$0xff] }
 0x5ba   : > { %v14169_v38 = vpop.eup %8613  ;;  %8629 = vrcp.f32 %v4281_v53  ;;  %7282 = vmatprep.mubr.bf16.mxu0 %v6448_v56  ;;  %v14173_v2 = vmul.f32 %v13937_v40, %v16335_v58  ;;  %v14177_v11 = vmul.f32 %v13945_v21, %v16336_v61  ;;  %v14181_v35 = vmul.f32 %v13953_v44, %v16337_v25  ;;  %v16341_v40 = vld [vmem:[#allocation107_spill] sm:$0xff]  ;;  %v5710_v16 = vpop.f32.mrb[249].mxu0  ;;  %v16343_v5 = vld [vmem:[#allocation294_spill] sm:$0xff]  ;;  %v16345_v30 = vld [vmem:[#allocation25_spill] sm:$0xff] }
 0x5bb   : > { %v14183_v15 = vpop.eup %8615  ;;  %8631 = vpow2.f32 %v16338_v49  ;;  %v6426_v32 = vadd.f32 %v6394_v12, %v16339_v10  ;;  %v6395_v13 = vadd.f32 %v6331_v6, %v6299_v22  ;;  %v14189_v41 = vmul.f32 %v16341_v40, %v16340_v28  ;;  %v5903_v53 = vpop.f32.mrb[25].mxu1  ;;  %v16346_v37 = vld [vmem:[#allocation86_spill] sm:$0xff]  ;;  %v16347_v49 = vld [vmem:[#allocation31_spill] sm:$0xff]  ;;  %v16348_v10 = vld [vmem:[#allocation193_spill] sm:$0xff] }
 0x5bc   : > { %v8618_v54 = vpop.eup %8617  ;;  %8633 = vrcp.f32 %v4280_v46  ;;  %v6124_v21 = vmul.f32 %v5708_v62, %v14090_v59  ;;  %v6126_v44 = vmul.f32 %v5901_v26, %v14094_v63  ;;  %v14195_v31 = vmul.f32 %v16343_v5, %v16342_v19  ;;  %v5712_v55 = vpop.f32.mrb[250].mxu0  ;;  %v16351_v26 = vld [vmem:[#allocation197_spill] sm:$0xff]  ;;  %v16352_v40 = vld [vmem:[#allocation199_spill] sm:$0xff] }
 0x5bd   : > { %v14197_v17 = vpop.eup %8619  ;;  %8635 = vpow2.f32 %v16344_v51  ;;  %v6427_v18 = vadd.f32 %v6395_v13, %v16345_v30  ;;  %v6125_v8 = vmul.f32 %v5710_v16, %v14099_v48  ;;  %v6127_v50 = vmul.f32 %v5903_v53, %v14121_v60  ;;  %v5905_v59 = vpop.f32.mrb[26].mxu1  ;;  %v16349_v13 = vld [vmem:[#allocation196_spill] sm:$0xff] }
 0x5be   : > { %v8622_v46 = vpop.eup %8621  ;;  %v4282_v63 = vadd.f32 1.0, %v8612_v52  ;;  %8637 = vpow2.f32 %v16346_v37  ;;  %v6132_v56 = vmul.f32 %v5712_v55, %v14125_v34  ;;  %v6134_v33 = vmul.f32 %v5905_v59, %v14129_v9  ;;  %v5714_v12 = vpop.f32.mrb[251].mxu0  ;;  %v16350_v9 = vld [vmem:[#allocation102_spill] sm:$0xff] }
 0x5bf   : > { %v5907_v22 = vpop.f32.mrb[27].mxu1  ;;  %v8624_v6 = vpop.eup %8623  ;;  %v6449_v58 = vpack.c.bf16 %v6427_v18, %v6426_v32  ;;  %v6300_v61 = vadd.f32 %v6125_v8, %v6124_v21  ;;  %v6332_v25 = vadd.f32 %v6127_v50, %v6126_v44  ;;  %v6133_v48 = vmul.f32 %v5714_v12, %v14134_v24  ;;  %v16353_v21 = vld [vmem:[#allocation200_spill] sm:$0xff]  ;;  %v16355_v8 = vld [vmem:[#allocation243_spill] sm:$0xff] }
 0x5c0   : > { %8639 = vpow2.f32 %v16347_v49  ;;  %v6135_v60 = vmul.f32 %v5907_v22, %v14138_v0  ;;  %v14211_v52 = vmul.f32 %v14011_v42, %v16348_v10  ;;  %v14215_v34 = vmul.f32 %v14019_v39, %v16349_v13  ;;  %v5718_v5 = vpop.f32.mrb[252].mxu0  ;;  %v5911_v51 = vpop.f32.mrb[28].mxu1 }
 0x5c1   : > { %8641 = vpow2.f32 %v16350_v9  ;;  %v6396_v62 = vadd.f32 %v6332_v25, %v6300_v61  ;;  %v6301_v32 = vadd.f32 %v6133_v48, %v6132_v56  ;;  %7283 = vmatmul.mubr.bf16.gmra.mrb[32].mxu0 %v6449_v58  ;;  %v14220_v24 = vmul.f32 %v14029_v23, %v16351_v26  ;;  %v16354_v23 = vld [vmem:[#allocation262_spill] sm:$0xff]  ;;  %v5913_v59 = vpop.f32.mrb[29].mxu1  ;;  %v16358_v25 = vld [vmem:[#allocation12_spill] sm:$0xff] }
 0x5c2   : > { %v8626_v28 = vpop.eup %8625  ;;  %8643 = vrcp.f32 %v4282_v63  ;;  %v6333_v0 = vadd.f32 %v6135_v60, %v6134_v33  ;;  %v14224_v42 = vmul.f32 %v14039_v57, %v16352_v40  ;;  %v14228_v39 = vmul.f32 %v14058_v3, %v16353_v21  ;;  %v5720_v3 = vpop.f32.mrb[253].mxu0  ;;  %v16360_v40 = vld [vmem:[#allocation204_spill] sm:$0xff] }
 0x5c3   : > { %v14230_v44 = vpop.eup %8627  ;;  %v4287_v16 = vadd.f32 1.0, %v8618_v54  ;;  %v4289_v53 = vadd.f32 1.0, %v8622_v46  ;;  %v4288_v19 = vadd.f32 1.0, %v8624_v6  ;;  %v6428_v30 = vadd.f32 %v6396_v62, %v16354_v23  ;;  %v16356_v54 = vld [vmem:[#allocation124_spill] sm:$0xff]  ;;  %v5722_v33 = vpop.f32.mrb[254].mxu0  ;;  %v16363_v23 = vld [vmem:[#allocation26_spill] sm:$0xff] }
 0x5c4   : > { %v14233_v18 = vpop.eup %8629  ;;  %8645 = vpow2.f32 %v16355_v8  ;;  %v6397_v50 = vadd.f32 %v6333_v0, %v6301_v32  ;;  %v6140_v57 = vmul.f32 %v5718_v5, %v14143_v20  ;;  %v6142_v55 = vmul.f32 %v5911_v51, %v14147_v1  ;;  %v5915_v12 = vpop.f32.mrb[30].mxu1  ;;  %v16357_v6 = vld [vmem:[#allocation32_spill] sm:$0xff]  ;;  %v16362_v5 = vld [vmem:[#allocation229_spill] sm:$0xff] }
 0x5c5   : > { %v8632_v63 = vpop.eup %8631  ;;  %v4290_v37 = vadd.f32 1.0, %v8626_v28  ;;  %8647 = vpow2.f32 %v16356_v54  ;;  %v6141_v46 = vmul.f32 %v5720_v3, %v14167_v47  ;;  %v6143_v56 = vmul.f32 %v5913_v59, %v14173_v2  ;;  %v5724_v58 = vpop.f32.mrb[255].mxu0  ;;  %v16359_v32 = vld [vmem:[#allocation20_spill] sm:$0xff] }
 0x5c6   : > { %v14241_v22 = vpop.eup %8633  ;;  %8649 = vpow2.f32 %v16357_v6  ;;  %v6148_v20 = vmul.f32 %v5722_v33, %v14177_v11  ;;  %v6150_v1 = vmul.f32 %v5915_v12, %v14181_v35  ;;  %v5917_v61 = vpop.f32.mrb[31].mxu1  ;;  %v6429_v48 = vadd.f32 %v6397_v50, %v16358_v25  ;;  %v16364_v50 = vld [vmem:[#allocation230_spill] sm:$0xff] }
 0x5c7   : > { %v8636_v49 = vpop.eup %8635  ;;  %v6302_v60 = vadd.f32 %v6141_v46, %v6140_v57  ;;  %v6334_v10 = vadd.f32 %v6143_v56, %v6142_v55  ;;  %v6149_v47 = vmul.f32 %v5724_v58, %v14189_v41  ;;  %v6151_v2 = vmul.f32 %v5917_v61, %v14195_v31  ;;  %v16361_v41 = vld [vmem:[#allocation212_spill] sm:$0xff]  ;;  %v5921_v8 = vpop.f32.mrb[32].mxu1 }
 0x5c8   : > { %v8638_v13 = vpop.eup %8637  ;;  %8651 = vrcp.f32 %v4287_v16  ;;  %v4295_v9 = vadd.f32 1.0, %v8632_v63  ;;  %v6450_v62 = vpack.c.bf16 %v6429_v48, %v6428_v30  ;;  %v5025_v11 = vmul.f32 %v14068_v14, %v16359_v32  ;;  %v5728_v30 = vpop.f32.mrb[0].mxu0  ;;  %v16365_v63 = vld [vmem:[#allocation269_spill] sm:$0xff] }
 0x5c9   : > { %8653 = vrcp.f32 %v4289_v53  ;;  %v6398_v35 = vadd.f32 %v6334_v10, %v6302_v60  ;;  %v6303_v26 = vadd.f32 %v6149_v47, %v6148_v20  ;;  %v6335_v28 = vadd.f32 %v6151_v2, %v6150_v1  ;;  %v5730_v3 = vpop.f32.mrb[1].mxu0  ;;  %v16366_v10 = vld [vmem:[#allocation232_spill] sm:$0xff]  ;;  %v16367_v47 = vld [vmem:[#allocation234_spill] sm:$0xff] }
 0x5ca   : > { %v8640_v0 = vpop.eup %8639  ;;  %8655 = vrcp.f32 %v4288_v19  ;;  %7286 = vmatprep.mubr.bf16.mxu0 %v6450_v62  ;;  %v5024_v21 = vmul.f32 %v14073_v29, %v16360_v40  ;;  %v5026_v31 = vmul.f32 %v14101_v7, %v16361_v41  ;;  %v5031_v16 = vmul.f32 %v14105_v4, %v16362_v5  ;;  %v5923_v4 = vpop.f32.mrb[33].mxu1 }
 0x5cb   : > { %v8642_v51 = vpop.eup %8641  ;;  %8657 = vrcp.f32 %v4290_v37  ;;  %v6430_v14 = vadd.f32 %v6398_v35, %v16363_v23  ;;  %v6399_v53 = vadd.f32 %v6335_v28, %v6303_v26  ;;  %v5033_v19 = vmul.f32 %v14110_v27, %v16364_v50  ;;  %v5732_v56 = vpop.f32.mrb[2].mxu0  ;;  %v16368_v35 = vld [vmem:[#allocation327_spill] sm:$0xff] }
 0x5cc   : > { %v14260_v57 = vpop.eup %8643  ;;  %8659 = vrcp.f32 %v4295_v9  ;;  %v4297_v29 = vadd.f32 1.0, %v8636_v49  ;;  %v6156_v55 = vmul.f32 %v5728_v30, %v14211_v52  ;;  %v6158_v7 = vmul.f32 %v5921_v8, %v14215_v34  ;;  %v5925_v33 = vpop.f32.mrb[34].mxu1 }
 0x5cd   : > { %v4296_v59 = vadd.f32 1.0, %v8638_v13  ;;  %v6431_v37 = vadd.f32 %v6399_v53, %v16365_v63  ;;  %v6157_v54 = vmul.f32 %v5730_v3, %v14220_v24  ;;  %v6159_v46 = vmul.f32 %v5923_v4, %v14224_v42  ;;  %v5734_v52 = vpop.f32.mrb[3].mxu0  ;;  %v5927_v58 = vpop.f32.mrb[35].mxu1  ;;  %v16372_v4 = vld [vmem:[#allocation17_spill] sm:$0xff] }
 0x5ce   : > { %v8646_v27 = vpop.eup %8645  ;;  %v4298_v12 = vadd.f32 1.0, %v8640_v0  ;;  %v4303_v6 = vadd.f32 1.0, %v8642_v51  ;;  %v6164_v20 = vmul.f32 %v5732_v56, %v14228_v39  ;;  %v6166_v1 = vmul.f32 %v5925_v33, %v5025_v11  ;;  %v5738_v0 = vpop.f32.mrb[4].mxu0 }
 0x5cf   : > { %v8648_v34 = vpop.eup %8647  ;;  %v6451_v61 = vpack.c.bf16 %v6431_v37, %v6430_v14  ;;  %v6304_v25 = vadd.f32 %v6157_v54, %v6156_v55  ;;  %v6336_v48 = vadd.f32 %v6159_v46, %v6158_v7  ;;  %v6165_v49 = vmul.f32 %v5734_v52, %v5024_v21  ;;  %v5931_v40 = vpop.f32.mrb[36].mxu1  ;;  %v16373_v46 = vld [vmem:[#allocation235_spill] sm:$0xff] }
 0x5d0   : > { %v8650_v60 = vpop.eup %8649  ;;  %8661 = vrcp.f32 %v4297_v29  ;;  %v6167_v24 = vmul.f32 %v5927_v58, %v5026_v31  ;;  %v5032_v42 = vmul.f32 %v14115_v45, %v16366_v10  ;;  %v5034_v2 = vmul.f32 %v14152_v43, %v16367_v47  ;;  %v16369_v45 = vld [vmem:[#allocation330_spill] sm:$0xff]  ;;  %v16370_v43 = vld [vmem:[#allocation236_spill] sm:$0xff]  ;;  %v5740_v8 = vpop.f32.mrb[5].mxu0 }
 0x5d1   : > { %8663 = vrcp.f32 %v4296_v59  ;;  %v4305_v13 = vadd.f32 1.0, %v8646_v27  ;;  %v6400_v39 = vadd.f32 %v6336_v48, %v6304_v25  ;;  %v6305_v9 = vadd.f32 %v6165_v49, %v6164_v20  ;;  %7287 = vmatmul.mubr.bf16.gmra.mrb[36].mxu0 %v6451_v61  ;;  %v16371_v31 = vld [vmem:[#allocation228_spill] sm:$0xff]  ;;  %v5933_v50 = vpop.f32.mrb[37].mxu1  ;;  %v5742_v7 = vpop.f32.mrb[6].mxu0  ;;  %v16376_v48 = vld [vmem:[#allocation242_spill] sm:$0xff] }
 0x5d2   : > { %v8652_v62 = vpop.eup %8651  ;;  %8665 = vrcp.f32 %v4298_v12  ;;  %v4304_v32 = vadd.f32 1.0, %v8648_v34  ;;  %v6337_v11 = vadd.f32 %v6167_v24, %v6166_v1  ;;  %v5039_v26 = vmul.f32 %v14157_v36, %v16368_v35  ;;  %v5935_v3 = vpop.f32.mrb[38].mxu1  ;;  %v16375_v34 = vld [vmem:[#allocation272_spill] sm:$0xff]  ;;  %v16379_v35 = vld [vmem:[#allocation321_spill] sm:$0xff] }
 0x5d3   : > { %v8654_v28 = vpop.eup %8653  ;;  %8667 = vrcp.f32 %v4303_v6  ;;  %v5041_v21 = vmul.f32 %v14169_v38, %v16369_v45  ;;  %v5040_v41 = vmul.f32 %v14183_v15, %v16370_v43  ;;  %v6432_v5 = vadd.f32 %v6400_v39, %v16371_v31  ;;  %v5744_v37 = vpop.f32.mrb[7].mxu0  ;;  %v16381_v45 = vld [vmem:[#allocation29_spill] sm:$0xff] }
 0x5d4   : > { %v8656_v51 = vpop.eup %8655  ;;  %v4306_v23 = vadd.f32 1.0, %v8650_v60  ;;  %v6401_v14 = vadd.f32 %v6337_v11, %v6305_v9  ;;  %v6172_v53 = vmul.f32 %v5738_v0, %v5031_v16  ;;  %v6174_v30 = vmul.f32 %v5931_v40, %v5033_v19  ;;  %v5937_v54 = vpop.f32.mrb[39].mxu1 }
 0x5d5   : > { %v8658_v36 = vpop.eup %8657  ;;  %8669 = vrcp.f32 %v4305_v13  ;;  %v6173_v29 = vmul.f32 %v5740_v8, %v5032_v42  ;;  %v6175_v55 = vmul.f32 %v5933_v50, %v5034_v2  ;;  %v5042_v38 = vmul.f32 %v14197_v17, %v16372_v4  ;;  %v16374_v17 = vld [vmem:[#allocation24_spill] sm:$0xff]  ;;  %v5748_v24 = vpop.f32.mrb[8].mxu0  ;;  %v16377_v42 = vld [vmem:[#allocation71_spill] sm:$0xff]  ;;  %v16378_v2 = vld [vmem:[#allocation41_spill] sm:$0xff] }
 0x5d6   : > { %v8660_v59 = vpop.eup %8659  ;;  %8671 = vrcp.f32 %v4304_v32  ;;  %v6180_v15 = vmul.f32 %v5742_v7, %v5039_v26  ;;  %v6182_v63 = vmul.f32 %v5935_v3, %v5041_v21  ;;  %v6433_v16 = vadd.f32 %v6401_v14, %v16373_v46  ;;  %v5941_v10 = vpop.f32.mrb[40].mxu1  ;;  %v16385_v46 = vld [vmem:[#allocation61_spill] sm:$0xff] }
 0x5d7   : > { %v6306_v19 = vadd.f32 %v6173_v29, %v6172_v53  ;;  %v6338_v56 = vadd.f32 %v6175_v55, %v6174_v30  ;;  %v6181_v33 = vmul.f32 %v5744_v37, %v5040_v41  ;;  %v6183_v27 = vmul.f32 %v5937_v54, %v5042_v38  ;;  %v5750_v11 = vpop.f32.mrb[9].mxu0  ;;  %v16383_v30 = vld [vmem:[#allocation15_spill] sm:$0xff] }
 0x5d8   : > { %8673 = vrcp.f32 %v4306_v23  ;;  %v6452_v12 = vpack.c.bf16 %v6433_v16, %v6432_v5  ;;  %v5047_v58 = vmul.f32 %v14230_v44, %v16374_v17  ;;  %v5049_v61 = vmul.f32 %v14233_v18, %v16375_v34  ;;  %v5943_v44 = vpop.f32.mrb[41].mxu1  ;;  %v16380_v18 = vld [vmem:[#allocation314_spill] sm:$0xff]  ;;  %v5752_v31 = vpop.f32.mrb[10].mxu0  ;;  %v16384_v54 = vld [vmem:[#allocation251_spill] sm:$0xff] }
 0x5d9   : > { %v6402_v6 = vadd.f32 %v6338_v56, %v6306_v19  ;;  %v6307_v20 = vadd.f32 %v6181_v33, %v6180_v15  ;;  %v6339_v1 = vadd.f32 %v6183_v27, %v6182_v63  ;;  %v5048_v47 = vmul.f32 %v14241_v22, %v16377_v42  ;;  %v5945_v5 = vpop.f32.mrb[42].mxu1  ;;  %v16382_v22 = vld [vmem:[#allocation273_spill] sm:$0xff]  ;;  %v5754_v53 = vpop.f32.mrb[11].mxu0  ;;  %v16387_v27 = vld [vmem:[#allocation255_spill] sm:$0xff] }
 0x5da   : > { %v8662_v52 = vpop.eup %8661  ;;  %7290 = vmatprep.mubr.bf16.mxu0 %v6452_v12  ;;  %v5050_v13 = vmul.f32 %v14260_v57, %v16378_v2  ;;  %v6188_v9 = vmul.f32 %v5748_v24, %v5047_v58  ;;  %v6190_v32 = vmul.f32 %v5941_v10, %v5049_v61  ;;  %v5055_v26 = vmul.f32 %v8652_v62, %v16379_v35  ;;  %v5947_v50 = vpop.f32.mrb[43].mxu1 }
 0x5db   : > { %v8664_v25 = vpop.eup %8663  ;;  %v6434_v49 = vadd.f32 %v6402_v6, %v16376_v48  ;;  %v6403_v60 = vadd.f32 %v6339_v1, %v6307_v20  ;;  %v5057_v0 = vmul.f32 %v8654_v28, %v16380_v18  ;;  %v6189_v43 = vmul.f32 %v5750_v11, %v5048_v47  ;;  %v5758_v19 = vpop.f32.mrb[12].mxu0  ;;  %v16388_v6 = vld [vmem:[#allocation62_spill] sm:$0xff]  ;;  %v16389_v1 = vld [vmem:[#allocation315_spill] sm:$0xff] }
 0x5dc   : > { %v8666_v39 = vpop.eup %8665  ;;  %v6191_v41 = vmul.f32 %v5943_v44, %v5050_v13  ;;  %v5056_v23 = vmul.f32 %v8656_v51, %v16382_v22  ;;  %v6196_v14 = vmul.f32 %v5752_v31, %v5055_v26  ;;  %v5058_v8 = vmul.f32 %v8658_v36, %v16383_v30  ;;  %v5951_v56 = vpop.f32.mrb[44].mxu1  ;;  %v16386_v36 = vld [vmem:[#allocation252_spill] sm:$0xff]  ;;  %v16391_v47 = vld [vmem:[#allocation290_spill] sm:$0xff]  ;;  %v16393_v44 = vld [vmem:[#allocation47_spill] sm:$0xff] }
 0x5dd   : > { %v8668_v40 = vpop.eup %8667  ;;  %v6435_v21 = vadd.f32 %v6403_v60, %v16381_v45  ;;  %v6198_v57 = vmul.f32 %v5945_v5, %v5057_v0  ;;  %v6308_v62 = vadd.f32 %v6189_v43, %v6188_v9  ;;  %v5063_v51 = vmul.f32 %v8660_v59, %v16384_v54  ;;  %v5760_v48 = vpop.f32.mrb[13].mxu0  ;;  %v16390_v60 = vld [vmem:[#allocation256_spill] sm:$0xff]  ;;  %v16394_v31 = vld [vmem:[#allocation205_spill] sm:$0xff] }
 0x5de   : > { %v6340_v7 = vadd.f32 %v6191_v41, %v6190_v32  ;;  %v6197_v28 = vmul.f32 %v5754_v53, %v5056_v23  ;;  %v6199_v4 = vmul.f32 %v5947_v50, %v5058_v8  ;;  %v5065_v16 = vmul.f32 %v8662_v52, %v16385_v46  ;;  %v5762_v52 = vpop.f32.mrb[14].mxu0  ;;  %v16395_v23 = vld [vmem:[#allocation95_spill] sm:$0xff] }
 0x5df   : > { %v8670_v29 = vpop.eup %8669  ;;  %v6453_v55 = vpack.c.bf16 %v6435_v21, %v6434_v49  ;;  %v5064_v33 = vmul.f32 %v8664_v25, %v16386_v36  ;;  %v5066_v12 = vmul.f32 %v8666_v39, %v16387_v27  ;;  %v5071_v20 = vmul.f32 %v8668_v40, %v16388_v6  ;;  %v5953_v49 = vpop.f32.mrb[45].mxu1  ;;  %v16392_v25 = vld [vmem:[#allocation259_spill] sm:$0xff] }
 0x5e0   : > { %v8672_v3 = vpop.eup %8671  ;;  %v6404_v38 = vadd.f32 %v6340_v7, %v6308_v62  ;;  %v6309_v15 = vadd.f32 %v6197_v28, %v6196_v14  ;;  %v6341_v37 = vadd.f32 %v6199_v4, %v6198_v57  ;;  %v6204_v34 = vmul.f32 %v5758_v19, %v5063_v51  ;;  %v5955_v42 = vpop.f32.mrb[46].mxu1  ;;  %v14314_v53 = vld [vmem:[%s14443_s9] ss:$0 sm:$0xff] }
 0x5e1   : > { %7291 = vmatmul.mubr.bf16.gmra.mrb[40].mxu0 %v6453_v55  ;;  %v6206_v61 = vmul.f32 %v5951_v56, %v5065_v16  ;;  %v5073_v24 = vmul.f32 %v8670_v29, %v16390_v60  ;;  %v6205_v59 = vmul.f32 %v5760_v48, %v5064_v33  ;;  %v6207_v10 = vmul.f32 %v5953_v49, %v5066_v12  ;;  %v5764_v32 = vpop.f32.mrb[15].mxu0  ;;  %v5957_v11 = vpop.f32.mrb[47].mxu1 }
 0x5e2   : > { %v8674_v63 = vpop.eup %8673  ;;  %v6436_v17 = vadd.f32 %v6404_v38, %v16389_v1  ;;  %v6405_v58 = vadd.f32 %v6341_v37, %v6309_v15  ;;  %v5072_v2 = vmul.f32 %v8672_v3, %v16391_v47  ;;  %v6212_v39 = vmul.f32 %v5762_v52, %v5071_v20 }
 0x5e3   : > { %v5074_v13 = vmul.f32 %v8674_v63, %v16392_v25  ;;  %v6214_v9 = vmul.f32 %v5955_v42, %v5073_v24  ;;  %v6310_v26 = vadd.f32 %v6205_v59, %v6204_v34  ;;  %v6342_v18 = vadd.f32 %v6207_v10, %v6206_v61 }
 0x5e4   : > { %v6437_v35 = vadd.f32 %v6405_v58, %v16393_v44  ;;  %v6213_v0 = vmul.f32 %v5764_v32, %v5072_v2 }
 0x5e5   : > { %v6215_v40 = vmul.f32 %v5957_v11, %v5074_v13  ;;  %v6406_v21 = vadd.f32 %v6342_v18, %v6310_v26 }
 0x5e6   : > { %v6454_v45 = vpack.c.bf16 %v6437_v35, %v6436_v17  ;;  %v6311_v43 = vadd.f32 %v6213_v0, %v6212_v39 }
 0x5e7   : > { %v6343_v41 = vadd.f32 %v6215_v40, %v6214_v9  ;;  %v6438_v5 = vadd.f32 %v6406_v21, %v16394_v31 }
 0x5e8   : > { %7294 = vmatprep.mubr.bf16.mxu0 %v6454_v45 }
 0x5e9   : > { %v6407_v22 = vadd.f32 %v6343_v41, %v6311_v43 }
 0x5eb   : > { %v6439_v14 = vadd.f32 %v6407_v22, %v16395_v23 }
 0x5ed   : > { %v6455_v57 = vpack.c.bf16 %v6439_v14, %v6438_v5 }
 0x5ef   : > { %7295 = vmatmul.mubr.bf16.gmra.mrb[44].mxu0 %v6455_v57 }
 0x655   : > { %v7268_v30 = vpop.f32.mrb[16].mxu0 }
 0x656   : > { %v6570_v8 = vadd.f32 %v7268_v30, %v14314_v53  ;;  %v6561_v50 = vpop.f32.mrb[17].mxu0 }
 0x657   : > { %v6562_v29 = vadd.f32 %v14314_v53, %v6561_v50  ;;  %v7269_v55 = vpop.f32.mrb[18].mxu0 }
 0x658   : > { %6690 = vst [vmem:[%s14318_s16 + $0x10] sm:$0xff] %v6570_v8  ;;  %v6573_v62 = vadd.f32 %v7269_v55, %v14314_v53  ;;  %v6564_v7 = vpop.f32.mrb[19].mxu0 }
 0x659   : > { %6688 = vst [vmem:[%s14318_s16] sm:$0xff] %v6562_v29  ;;  %v6565_v28 = vadd.f32 %v14314_v53, %v6564_v7 }
 0x65a   : > { %6691 = vst [vmem:[%s14318_s16 + $0x18] sm:$0xff] %v6573_v62 }
 0x65b   : > { %6689 = vst [vmem:[%s14318_s16 + $0x8] sm:$0xff] %v6565_v28 }
 0x665   : > { %v7272_v3 = vpop.f32.mrb[20].mxu0 }
 0x666   : > { %v6586_v4 = vadd.f32 %v7272_v3, %v14314_v53  ;;  %v6577_v38 = vpop.f32.mrb[21].mxu0 }
 0x667   : > { %v6578_v15 = vadd.f32 %v14314_v53, %v6577_v38  ;;  %v7273_v63 = vpop.f32.mrb[22].mxu0 }
 0x668   : > { %6694 = vst [vmem:[%s14318_s16 + $0x30] sm:$0xff] %v6586_v4  ;;  %v6589_v37 = vadd.f32 %v7273_v63, %v14314_v53  ;;  %v6580_v54 = vpop.f32.mrb[23].mxu0 }
 0x669   : > { %6692 = vst [vmem:[%s14318_s16 + $0x20] sm:$0xff] %v6578_v15  ;;  %v6581_v51 = vadd.f32 %v14314_v53, %v6580_v54 }
 0x66a   : > { %6695 = vst [vmem:[%s14318_s16 + $0x38] sm:$0xff] %v6589_v37 }
 0x66b   : > { %6693 = vst [vmem:[%s14318_s16 + $0x28] sm:$0xff] %v6581_v51 }
 0x675   : > { %v7276_v46 = vpop.f32.mrb[24].mxu0 }
 0x676   : > { %v6602_v16 = vadd.f32 %v7276_v46, %v14314_v53  ;;  %v6593_v19 = vpop.f32.mrb[25].mxu0 }
 0x677   : > { %v6594_v56 = vadd.f32 %v14314_v53, %v6593_v19  ;;  %v7277_v36 = vpop.f32.mrb[26].mxu0 }
 0x678   : > { %6698 = vst [vmem:[%s14318_s16 + $0x50] sm:$0xff] %v6602_v16  ;;  %v6605_v33 = vadd.f32 %v7277_v36, %v14314_v53  ;;  %v6596_v27 = vpop.f32.mrb[27].mxu0 }
 0x679   : > { %6696 = vst [vmem:[%s14318_s16 + $0x40] sm:$0xff] %v6594_v56  ;;  %v6597_v12 = vadd.f32 %v14314_v53, %v6596_v27 }
 0x67a   : > { %6699 = vst [vmem:[%s14318_s16 + $0x58] sm:$0xff] %v6605_v33 }
 0x67b   : > { %6697 = vst [vmem:[%s14318_s16 + $0x48] sm:$0xff] %v6597_v12 }
 0x684   : > { %v7280_v6 = vpop.f32.mrb[28].mxu0 }
 0x685   : > { %v6618_v20 = vadd.f32 %v7280_v6, %v14314_v53  ;;  %v6609_v1 = vpop.f32.mrb[29].mxu0 }
 0x686   : > { %v6610_v17 = vadd.f32 %v14314_v53, %v6609_v1  ;;  %v7281_v58 = vpop.f32.mrb[30].mxu0 }
 0x687   : > { %6702 = vst [vmem:[%s14318_s16 + $0x70] sm:$0xff] %v6618_v20  ;;  %v6621_v34 = vadd.f32 %v7281_v58, %v14314_v53  ;;  %v6612_v61 = vpop.f32.mrb[31].mxu0 }
 0x688   : > { %6700 = vst [vmem:[%s14318_s16 + $0x60] sm:$0xff] %v6610_v17  ;;  %v6613_v48 = vadd.f32 %v14314_v53, %v6612_v61 }
 0x689   : > { %6703 = vst [vmem:[%s14318_s16 + $0x78] sm:$0xff] %v6621_v34 }
 0x68a   : > { %6701 = vst [vmem:[%s14318_s16 + $0x68] sm:$0xff] %v6613_v48 }
 0x694   : > { %v7284_v49 = vpop.f32.mrb[32].mxu0 }
 0x695   : > { %v6634_v60 = vadd.f32 %v7284_v49, %v14314_v53  ;;  %v6625_v24 = vpop.f32.mrb[33].mxu0 }
 0x696   : > { %v6626_v59 = vadd.f32 %v14314_v53, %v6625_v24  ;;  %v7285_v10 = vpop.f32.mrb[34].mxu0 }
 0x697   : > { %6706 = vst [vmem:[%s14318_s16 + $0x90] sm:$0xff] %v6634_v60  ;;  %v6637_v52 = vadd.f32 %v7285_v10, %v14314_v53  ;;  %v6628_v42 = vpop.f32.mrb[35].mxu0 }
 0x698   : > { %6704 = vst [vmem:[%s14318_s16 + $0x80] sm:$0xff] %v6626_v59  ;;  %v6629_v47 = vadd.f32 %v14314_v53, %v6628_v42 }
 0x699   : > { %6707 = vst [vmem:[%s14318_s16 + $0x98] sm:$0xff] %v6637_v52 }
 0x69a   : > { %6705 = vst [vmem:[%s14318_s16 + $0x88] sm:$0xff] %v6629_v47 }
 0x6a4   : > { %v7288_v2 = vpop.f32.mrb[36].mxu0 }
 0x6a5   : > { %v6650_v25 = vadd.f32 %v7288_v2, %v14314_v53  ;;  %v6641_v13 = vpop.f32.mrb[37].mxu0 }
 0x6a6   : > { %v6642_v39 = vadd.f32 %v14314_v53, %v6641_v13  ;;  %v7289_v9 = vpop.f32.mrb[38].mxu0 }
 0x6a7   : > { %6710 = vst [vmem:[%s14318_s16 + $0xb0] sm:$0xff] %v6650_v25  ;;  %v6653_v32 = vadd.f32 %v7289_v9, %v14314_v53  ;;  %v6644_v11 = vpop.f32.mrb[39].mxu0 }
 0x6a8   : > { %6708 = vst [vmem:[%s14318_s16 + $0xa0] sm:$0xff] %v6642_v39  ;;  %v6645_v44 = vadd.f32 %v14314_v53, %v6644_v11 }
 0x6a9   : > { %6711 = vst [vmem:[%s14318_s16 + $0xb8] sm:$0xff] %v6653_v32 }
 0x6aa   : > { %6709 = vst [vmem:[%s14318_s16 + $0xa8] sm:$0xff] %v6645_v44 }
 0x6b4   : > { %v7292_v35 = vpop.f32.mrb[40].mxu0 }
 0x6b5   : > { %v6666_v26 = vadd.f32 %v7292_v35, %v14314_v53  ;;  %v6657_v18 = vpop.f32.mrb[41].mxu0 }
 0x6b6   : > { %v6658_v0 = vadd.f32 %v14314_v53, %v6657_v18  ;;  %v7293_v40 = vpop.f32.mrb[42].mxu0 }
 0x6b7   : > { %6714 = vst [vmem:[%s14318_s16 + $0xd0] sm:$0xff] %v6666_v26  ;;  %v6669_v45 = vadd.f32 %v7293_v40, %v14314_v53  ;;  %v6660_v21 = vpop.f32.mrb[43].mxu0 }
 0x6b8   : > { %6712 = vst [vmem:[%s14318_s16 + $0xc0] sm:$0xff] %v6658_v0  ;;  %v6661_v43 = vadd.f32 %v14314_v53, %v6660_v21 }
 0x6b9   : > { %6715 = vst [vmem:[%s14318_s16 + $0xd8] sm:$0xff] %v6669_v45 }
 0x6ba   : > { %6713 = vst [vmem:[%s14318_s16 + $0xc8] sm:$0xff] %v6661_v43 }
 0x6c2   : > { %v7296_v41 = vpop.f32.mrb[44].mxu0 }
 0x6c3   : > { %v6682_v31 = vadd.f32 %v7296_v41, %v14314_v53  ;;  %v6673_v5 = vpop.f32.mrb[45].mxu0 }
 0x6c4   : > { %v6674_v22 = vadd.f32 %v14314_v53, %v6673_v5  ;;  %v7297_v23 = vpop.f32.mrb[46].mxu0 }
 0x6c5   : > { %6718 = vst [vmem:[%s14318_s16 + $0xf0] sm:$0xff] %v6682_v31  ;;  %v6685_v14 = vadd.f32 %v7297_v23, %v14314_v53  ;;  %v6676_v57 = vpop.f32.mrb[47].mxu0 }
 0x6c6   : > { %6716 = vst [vmem:[%s14318_s16 + $0xe0] sm:$0xff] %v6674_v22  ;;  %v6677_v30 = vadd.f32 %v14314_v53, %v6676_v57 }
 0x6c7   : > { %6719 = vst [vmem:[%s14318_s16 + $0xf8] sm:$0xff] %v6685_v14 }
 0x6c8   : > { %6717 = vst [vmem:[%s14318_s16 + $0xe8] sm:$0xff] %v6677_v30 }
 0x6c9   : > { %8690 = shalt.err (!%p8687_p3)
}
 0x6ca   : > { %s8691_s19 = scalar_lea.hbm %s14383_s12, 4096  ;;  %s8695_s16 = scalar_lea.hbm %s14445_s11, 8192 }
 0x6cb   : > { %p8692_p4 = scmp.ne.s32.totalorder %s14383_s12, %s8691_s19  ;;  %p8696_p9 = scmp.lt.u32.totalorder %s14383_s12, %s14445_s11 }
 0x6cc   : > { %p8697_p10 = scmp.lt.u32.totalorder %s8695_s16, %s8691_s19  ;;  %p8699_p12 = scmp.lt.u32.totalorder %s8691_s19, %s14383_s12 }
 0x6cd   : > { %p8693_p7 = pnand %p8692_p4, %p8845_p5 }
 0x6ce   : > { %p8698_p11 = por %p8697_p10, %p8696_p9 }
 0x6cf   : > { %p8694_p8 = pneg %p8693_p7 }
 0x6d0   : > { %p8700_p13 = por %p8699_p12, %p8698_p11 }
 0x6d2   : > { %p8701_p0 = pnand %p8700_p13, %p8694_p8 }
 0x6d4   : > { %8704 = shalt.err (!%p8701_p0)
}
 0x6d5   : > { %s8745_s30 = smov 128   ;;  %s8746_s13 = smov 8  }
 0x6d6   : > { %7310 = dma.vmem_to_hbm [thread:$0]  (%p8845_p5), %s14385_s24, 4096, %s14383_s12, %s14393_s21, %s8745_s30, %s8745_s30, %s8746_s13  }
 0x6d7 PF: > { %p7316_p1 = scmp.ge.s32.totalorder %s8739_s20, 2  ;;  %s6749_s29 = sand.u32 1, %s8727_s17  }
 0x6d8   : > { %s6750_s1 = scalar_lea.sflag [#allocation3], %s6749_s29 }
 0x6d9   : > { %p7313_p2 = pnand %p7316_p1, %p8849_p6 }
 0x6db   : > { %8722 = dma.done.wait (!%p7313_p2), %s6750_s1, 4096  }
 0x6dc   : > { %8724 = vsyncadd (!%p7313_p2), %s6750_s1, 4294963200  ;;  %s16396_s26 = sld [smem:[#allocation5_spill]]  ;;  %s16397_s19 = sld [smem:[#allocation6_spill]] }
 0x6dd   : > { %p21_p3 = scmp.ge.s32.totalorder %s8832_s23, 4   ;;  %s16398_s17 = smov %s8731_s18 }
 0x6de   : > { %s16400_s20 = smov %s8832_s23 }
 0x6df   :  { %23 = sbr.rel (!%p21_p3) target bundleno = 5 (0x5), region = 102 }
 0x6e2   : > { %s16399_s18 = smov %s16396_s26 }
 0x6e6   :  { %6755 = vsyncpa [#allocation3], 1 }
 0x6e7   :  { %6757 = vsyncpa [#allocation3 + $0x1], 1 }

</bundles_post_ra>
